<compile_context>
chip_gen: v5e
topology: v5e:2x2
jax: 0.10.0
libtpu: 0.0.40
codegen_flags: <defaults>
</compile_context>

<pallas_src>
import functools

import jax
import jax.numpy as jnp
from jax import lax
from jax.experimental import pallas as pl
from jax.experimental.pallas import tpu as pltpu

EPS = 1e-5
_VMEM_LIMIT = 48 * 1024 * 1024   # safe on v5e/v6e (128 MiB) and v7x (64 MiB)


# ---------------------------------------------------------------------------
# small helpers
# ---------------------------------------------------------------------------
def _round_up(x, m):
    return ((x + m - 1) // m) * m


def _pick_row_tile(h, w, target_rows):
    """Row-tile height: ~target_rows output pixels per grid step (cdiv grid)."""
    cap = max(1, target_rows // max(w, 1))
    if cap >= h:
        return h
    return min(h, max(8, (cap // 8) * 8))


# ---------------------------------------------------------------------------
# Pallas kernels
# ---------------------------------------------------------------------------
def _matmul_bias_kernel(x_ref, w_ref, b_ref, o_ref):
    # (tile_m, K) @ (K, 4*Cout) bf16 on the MXU, f32 accumulate, + bias.
    acc = jnp.dot(x_ref[...], w_ref[...], preferred_element_type=jnp.float32)
    o_ref[...] = (acc + b_ref[...]).astype(o_ref.dtype)


def _conv3x3_mish_stats_kernel(xm_ref, xu_ref, xd_ref, w_ref, b_ref, sc_ref,
                               sh_ref, y_ref, st_ref, xs_ref, *, h_total):
    # xm_ref: (th, W, Cin)  bf16 main row block      (rows [i*th, i*th+th))
    # xu_ref: (1,  W, Cin)  bf16 1-row halo above    (row  i*th-1, clamped)
    # xd_ref: (1,  W, Cin)  bf16 1-row halo below    (row  i*th+th, clamped)
    # w_ref : (9*Cin, Cout) bf16 im2col weights (row = (kh*3+kw)*Cin + ci)
    # b_ref : (1, Cout) f32 bias;  sc/sh_ref: (1, Cin) f32 fused input affine
    # y_ref : (th, W, Cout) bf16 Mish(conv) output
    # st_ref: (1, 2, Cout)  f32 per-tile [sum, sumsq] partials for BN
    # xs_ref: (th+2, W+2, Cin) f32 VMEM scratch (padded input tile)
    th, win, cin = xm_ref.shape
    cout = y_ref.shape[-1]
    i = pl.program_id(1)

    sc = sc_ref[...].reshape(1, 1, cin)
    sh = sh_ref[...].reshape(1, 1, cin)

    def affine(v):
        return v.astype(jnp.float32) * sc + sh

    # ---- assemble the zero-bordered input tile in the scratch ----
    zero_col = jnp.zeros((th + 2, 1, cin), jnp.float32)
    xs_ref[:, 0:1, :] = zero_col                       # left zero border
    xs_ref[:, win + 1:win + 2, :] = zero_col           # right zero border

    top = affine(xu_ref[...])
    xs_ref[0:1, 1:win + 1, :] = jnp.where(i > 0, top, 0.0)

    bot = affine(xd_ref[...])
    has_below = (i * th + th) < h_total
    xs_ref[th + 1:th + 2, 1:win + 1, :] = jnp.where(has_below, bot, 0.0)

    main = affine(xm_ref[...])
    remainder = (h_total % th) != 0
    if remainder:                                      # mask rows past H
        valid = h_total - i * th
        rmask = lax.broadcasted_iota(jnp.int32, (th, 1, 1), 0) < valid
        main = jnp.where(rmask, main, 0.0)
    xs_ref[1:th + 1, 1:win + 1, :] = main

    # ---- im2col patch + single bf16 MXU dot (K = 9*Cin) ----
    cols = []
    for dh in range(3):
        for dw in range(3):
            cols.append(xs_ref[dh:dh + th, dw:dw + win, :])
    patch = jnp.concatenate(cols, axis=-1)             # (th, W, 9*Cin) f32
    patch = patch.reshape(th * win, 9 * cin).astype(jnp.bfloat16)

    acc = jnp.dot(patch, w_ref[...], preferred_element_type=jnp.float32)
    acc = acc + b_ref[...]

    # ---- Mish, single-exp algebraic form with large-x guard ----
    e = jnp.exp(jnp.minimum(acc, 20.0))
    t = e * (e + 2.0)
    y = acc * t / (t + 2.0)
    y = jnp.where(acc > 20.0, acc, y)

    if remainder:                                      # exclude pad rows
        fmask = lax.broadcasted_iota(jnp.int32, (th * win, 1), 0) < valid * win
        y = jnp.where(fmask, y, 0.0)

    st_ref[0, 0:1, :] = jnp.sum(y, axis=0, keepdims=True)
    st_ref[0, 1:2, :] = jnp.sum(y * y, axis=0, keepdims=True)
    y_ref[...] = y.reshape(th, win, cout).astype(jnp.bfloat16)


def _bn_apply_kernel(x_ref, sc_ref, sh_ref, o_ref):
    # y = x*scale + shift on a compact (tile_m, Cout) slab (final BN only).
    o_ref[...] = x_ref[...].astype(jnp.float32) * sc_ref[...] + sh_ref[...]


# ---------------------------------------------------------------------------
# Pallas wrappers
# ---------------------------------------------------------------------------
def matmul_bias(x2d, w2d, b_row, *, tile_m=1024, out_dtype=jnp.bfloat16):
    """(M, K) @ (K, N) + bias, bf16 operands, f32 accumulate, compact N."""
    m, k = x2d.shape
    nout = w2d.shape[1]
    tile_m = min(tile_m, _round_up(m, 8))
    mp = _round_up(m, tile_m)
    if mp != m:
        x2d = jnp.pad(x2d, ((0, mp - m), (0, 0)))
    out = pl.pallas_call(
        _matmul_bias_kernel,
        out_shape=jax.ShapeDtypeStruct((mp, nout), out_dtype),
        grid_spec=pltpu.PrefetchScalarGridSpec(
            num_scalar_prefetch=0,
            grid=(mp // tile_m,),
            in_specs=[
                pl.BlockSpec((tile_m, k), lambda i: (i, 0)),
                pl.BlockSpec((k, nout), lambda i: (0, 0)),
                pl.BlockSpec((1, nout), lambda i: (0, 0)),
            ],
            out_specs=pl.BlockSpec((tile_m, nout), lambda i: (i, 0)),
        ),
        compiler_params=pltpu.CompilerParams(
            dimension_semantics=("parallel",),
            vmem_limit_bytes=_VMEM_LIMIT),
    )(x2d, w2d, b_row)
    return out[:m]


def conv3x3_mish_stats(x, w, b, in_scale, in_shift, *, target_rows=8192):
    """Fused [input affine -> zero-pad -> 3x3 conv -> Mish -> BN partials].

    x: (N, H, W, Cin) bf16 un-padded NHWC activation.
    w: (Cout, Cin, 3, 3) f32 PyTorch OIHW weight.  b: (Cout,) f32 bias.
    in_scale/in_shift: (Cin,) f32 affine applied to x inside the kernel
    (previous stage's BatchNorm; identity for stage 1).
    Returns y (N, H, W, Cout) bf16 and stats (N*gh, 2, Cout) f32.
    """
    n, h, win, cin = x.shape
    cout = w.shape[0]
    assert w.shape[1] == cin

    th = _pick_row_tile(h, win, target_rows)
    gh = pl.cdiv(h, th)

    w9 = jnp.transpose(w, (2, 3, 1, 0)).reshape(9 * cin, cout)
    w9 = w9.astype(jnp.bfloat16)
    b_row = b.reshape(1, cout).astype(jnp.float32)
    sc_row = in_scale.reshape(1, cin).astype(jnp.float32)
    sh_row = in_shift.reshape(1, cin).astype(jnp.float32)

    kern = functools.partial(_conv3x3_mish_stats_kernel, h_total=h)

    y, stats = pl.pallas_call(
        kern,
        out_shape=(
            jax.ShapeDtypeStruct((n, h, win, cout), jnp.bfloat16),
            jax.ShapeDtypeStruct((n * gh, 2, cout), jnp.float32),
        ),
        grid_spec=pltpu.PrefetchScalarGridSpec(
            num_scalar_prefetch=0,
            grid=(n, gh),
            in_specs=[
                # main row block
                pl.BlockSpec((None, th, win, cin), lambda nb, i: (nb, i, 0, 0)),
                # 1-row halo above (clamped at the top, masked in-kernel)
                pl.BlockSpec((None, 1, win, cin),
                             lambda nb, i: (nb, jnp.maximum(i * th - 1, 0), 0, 0)),
                # 1-row halo below (clamped at the bottom, masked in-kernel)
                pl.BlockSpec((None, 1, win, cin),
                             lambda nb, i: (nb, jnp.minimum(i * th + th, h - 1), 0, 0)),
                pl.BlockSpec((9 * cin, cout), lambda nb, i: (0, 0)),
                pl.BlockSpec((1, cout), lambda nb, i: (0, 0)),
                pl.BlockSpec((1, cin), lambda nb, i: (0, 0)),
                pl.BlockSpec((1, cin), lambda nb, i: (0, 0)),
            ],
            out_specs=[
                pl.BlockSpec((None, th, win, cout), lambda nb, i: (nb, i, 0, 0)),
                pl.BlockSpec((1, 2, cout), lambda nb, i: (nb * gh + i, 0, 0)),
            ],
            scratch_shapes=[pltpu.VMEM((th + 2, win + 2, cin), jnp.float32)],
        ),
        compiler_params=pltpu.CompilerParams(
            dimension_semantics=("parallel", "parallel"),
            vmem_limit_bytes=_VMEM_LIMIT),
    )(x, x, x, w9, b_row, sc_row, sh_row)
    return y, stats


def batchnorm_apply(x2d, scale_row, shift_row, *, tile_m=4096):
    """Final-stage y = x*scale + shift on a compact (M, Cout) slab."""
    m, c = x2d.shape
    tile_m = min(tile_m, _round_up(m, 8))
    mp = _round_up(m, tile_m)
    if mp != m:
        x2d = jnp.pad(x2d, ((0, mp - m), (0, 0)))
    out = pl.pallas_call(
        _bn_apply_kernel,
        out_shape=jax.ShapeDtypeStruct((mp, c), jnp.float32),
        grid_spec=pltpu.PrefetchScalarGridSpec(
            num_scalar_prefetch=0,
            grid=(mp // tile_m,),
            in_specs=[
                pl.BlockSpec((tile_m, c), lambda i: (i, 0)),
                pl.BlockSpec((1, c), lambda i: (0, 0)),
                pl.BlockSpec((1, c), lambda i: (0, 0)),
            ],
            out_specs=pl.BlockSpec((tile_m, c), lambda i: (i, 0)),
        ),
        compiler_params=pltpu.CompilerParams(
            dimension_semantics=("parallel",),
            vmem_limit_bytes=_VMEM_LIMIT),
    )(x2d, scale_row, shift_row)
    return out[:m]


def upconv2x2(x_nhwc, wt, bt):
    """ConvTranspose2d(kernel=2, stride=2) as a compact Pallas matmul.

    x_nhwc: (N, H, W, Cin); wt: (Cin, Cout, 2, 2) PyTorch layout; bt: (Cout,).
    Returns (N, 2H, 2W, Cout) bf16.
    """
    n, h, w, cin = x_nhwc.shape
    cout = wt.shape[1]
    # (Cin, Cout, 2, 2) -> (Cin, 2, 2, Cout) -> (Cin, 4*Cout); cols = (kh,kw,co)
    wm = jnp.transpose(wt, (0, 2, 3, 1)).reshape(cin, 4 * cout)
    wm = wm.astype(jnp.bfloat16)
    b4 = jnp.tile(bt, 4).reshape(1, 4 * cout).astype(jnp.float32)

    x2d = x_nhwc.reshape(n * h * w, cin).astype(jnp.bfloat16)
    y = matmul_bias(x2d, wm, b4)                         # (M, 4*Cout) bf16
    y = y.reshape(n, h, w, 2, 2, cout)
    y = jnp.transpose(y, (0, 1, 3, 2, 4, 5)).reshape(n, 2 * h, 2 * w, cout)
    return y


# ---------------------------------------------------------------------------
# BN statistics from fused per-tile partials (tiny reduction, done in XLA)
# ---------------------------------------------------------------------------
def _bn_scale_shift(stats, count, gamma, beta, eps=EPS):
    tot = jnp.sum(stats, axis=0)                         # (2, Cout)
    mean = tot[0] / count
    var = jnp.maximum(tot[1] / count - mean * mean, 0.0)  # biased (training BN)
    scale = gamma * lax.rsqrt(var + eps)
    shift = beta - mean * scale
    return scale, shift                                  # each (Cout,)


# ---------------------------------------------------------------------------
# Full UNetUpBlock forward
# ---------------------------------------------------------------------------
def unet_up_block(x_nchw, feat_nchw, params, *, up_mode="upconv",
                  padding=True, batch_norm=True, eps=EPS):
    if up_mode != "upconv":
        # TODO(synk): up_mode='upsample' (bilinear Upsample + 1x1 conv) has no
        # Pallas path; only 'upconv' (ConvTranspose2d k=2 s=2) is implemented.
        raise NotImplementedError("only up_mode='upconv' is implemented")
    if not padding:
        # TODO(synk): padding=False is not wired through the fused in-kernel
        # zero-border path.
        raise NotImplementedError("only padding=True is implemented")

    x = jnp.transpose(x_nchw, (0, 2, 3, 1)).astype(jnp.float32)      # NCHW->NHWC
    feat = jnp.transpose(feat_nchw, (0, 2, 3, 1)).astype(jnp.float32)

    up = upconv2x2(x, params["wt"], params["bt"])        # (N, 2H, 2W, Cout) bf16
    n, hu, wu, cout = up.shape

    # center-crop the skip features and concatenate (compact-channel XLA glue).
    dy = (feat.shape[1] - hu) // 2
    dx = (feat.shape[2] - wu) // 2
    skip = feat[:, dy:dy + hu, dx:dx + wu, :].astype(jnp.bfloat16)
    z = jnp.concatenate([up, skip], axis=-1)             # (N, 2H, 2W, Cout+1)

    cin1 = z.shape[-1]
    ident_s = jnp.ones((cin1,), jnp.float32)
    ident_b = jnp.zeros((cin1,), jnp.float32)

    # ---- stage 1: conv + Mish (+ fused BN partial stats) ----
    y1, st1 = conv3x3_mish_stats(z, params["w1"], params["b1"], ident_s, ident_b)
    count = n * hu * wu

    if batch_norm:
        scale1, shift1 = _bn_scale_shift(st1, count, params["g1"],
                                         params["beta1"], eps)
    else:
        scale1 = jnp.ones((cout,), jnp.float32)
        shift1 = jnp.zeros((cout,), jnp.float32)

    # ---- stage 2: (stage-1 BN applied in-kernel) conv + Mish + stats ----
    y2, st2 = conv3x3_mish_stats(y1, params["w2"], params["b2"], scale1, shift1)

    if batch_norm:
        scale2, shift2 = _bn_scale_shift(st2, count, params["g2"],
                                         params["beta2"], eps)
        out_flat = batchnorm_apply(y2.reshape(count, cout),
                                   scale2.reshape(1, cout),
                                   shift2.reshape(1, cout))
        out = out_flat.reshape(n, hu, wu, cout)
    else:
        out = y2.astype(jnp.float32)

    return jnp.transpose(out, (0, 3, 1, 2))              # NHWC -> NCHW


# ---------------------------------------------------------------------------
# Pure-JAX reference (mirrors PyTorch semantics) for a sanity check
# ---------------------------------------------------------------------------
def reference_up_block(x, feat, p, padding=True, batch_norm=True, eps=EPS):
    pad = int(padding)
    # ConvTranspose2d(k=2, s=2) == lhs-dilated conv with flipped, IO-swapped kernel.
    w_conv = jnp.flip(jnp.transpose(p["wt"], (1, 0, 2, 3)), axis=(2, 3))
    up = lax.conv_general_dilated(
        x, w_conv, window_strides=(1, 1), padding=[(1, 1), (1, 1)],
        lhs_dilation=(2, 2), dimension_numbers=("NCHW", "OIHW", "NCHW"))
    up = up + p["bt"][None, :, None, None]
    hu, wu = up.shape[2], up.shape[3]
    dy = (feat.shape[2] - hu) // 2
    dx = (feat.shape[3] - wu) // 2
    z = jnp.concatenate([up, feat[:, :, dy:dy + hu, dx:dx + wu]], axis=1)

    def conv(v, w, b):
        y = lax.conv_general_dilated(
            v, w, window_strides=(1, 1), padding=[(pad, pad), (pad, pad)],
            dimension_numbers=("NCHW", "OIHW", "NCHW"))
        return y + b[None, :, None, None]

    def mish(v):
        return v * jnp.tanh(jnp.logaddexp(v, 0.0))

    def bn(v, g, bt):
        m = jnp.mean(v, axis=(0, 2, 3), keepdims=True)
        va = jnp.var(v, axis=(0, 2, 3), keepdims=True)
        return (v - m) / jnp.sqrt(va + eps) * g[None, :, None, None] \
            + bt[None, :, None, None]

    y = mish(conv(z, p["w1"], p["b1"]))
    if batch_norm:
        y = bn(y, p["g1"], p["beta1"])
    y = mish(conv(y, p["w2"], p["b2"]))
    if batch_norm:
        y = bn(y, p["g2"], p["beta2"])
    return y


# ---------------------------------------------------------------------------
if __name__ == "__main__":
    # UNetUpBlock(in_size=4, out_size=8, up_mode='upconv', padding=True,
    #             batch_norm=True).  x: (2, 4, 8, 8); skip features: (2, 1, 20, 20)
    # (1 channel, as required by conv_block's in_size = out_size + 1).
    N, Cin, H, W = 2, 4, 8, 8
    Cout = 8

    key = jax.random.PRNGKey(0)
    ks = jax.random.split(key, 12)
    x = jax.random.normal(ks[0], (N, Cin, H, W), jnp.float32)
    feat = jax.random.normal(ks[1], (N, 1, 20, 20), jnp.float32)

    params = {
        "wt": jax.random.normal(ks[2], (Cin, Cout, 2, 2), jnp.float32) * 0.3,
        "bt": jax.random.normal(ks[3], (Cout,), jnp.float32) * 0.1,
        "w1": jax.random.normal(ks[4], (Cout, Cout + 1, 3, 3), jnp.float32) * 0.2,
        "b1": jax.random.normal(ks[5], (Cout,), jnp.float32) * 0.1,
        "g1": 1.0 + 0.1 * jax.random.normal(ks[6], (Cout,), jnp.float32),
        "beta1": 0.1 * jax.random.normal(ks[7], (Cout,), jnp.float32),
        "w2": jax.random.normal(ks[8], (Cout, Cout, 3, 3), jnp.float32) * 0.2,
        "b2": jax.random.normal(ks[9], (Cout,), jnp.float32) * 0.1,
        "g2": 1.0 + 0.1 * jax.random.normal(ks[10], (Cout,), jnp.float32),
        "beta2": 0.1 * jax.random.normal(ks[11], (Cout,), jnp.float32),
    }

    fwd = jax.jit(functools.partial(unet_up_block, up_mode="upconv",
                                    padding=True, batch_norm=True))
    out = jax.block_until_ready(fwd(x, feat, params))

    ref = jax.block_until_ready(
        reference_up_block(x, feat, params, padding=True, batch_norm=True))

    assert out.shape == (N, Cout, 2 * H, 2 * W), out.shape
    # bf16 MXU operands / bf16 inter-stage hand-offs => looser tolerance than
    # a pure-f32 pipeline (accumulation is still f32).
    max_err = float(jnp.max(jnp.abs(out - ref)))
    assert jnp.allclose(out, ref, atol=1e-1, rtol=5e-2), max_err

    print("KERNEL_OK")
</pallas_src>

<mosaic_0001>
module attributes {stable_mosaic.version = 11 : i64} {
  func.func @_matmul_bias_kernel(%arg0: i32, %arg1: memref<128x4xbf16, #tpu.memory_space<vmem>>, %arg2: memref<4x32xbf16, #tpu.memory_space<vmem>>, %arg3: memref<1x32xf32, #tpu.memory_space<vmem>>, %arg4: memref<128x32xbf16, #tpu.memory_space<vmem>>) attributes {dimension_semantics = [#tpu.dimension_semantics<parallel>], iteration_bounds = array<i64: 1>, scalar_prefetch = 0 : i64, scratch_operands = 0 : i64, tpu.core_type = #tpu.core_type<tc>, window_params = [{transform_indices = @transform_0, window_bounds = array<i64: 128, 4>}, {pipeline_mode = #tpu.pipeline_mode<synchronous>, transform_indices = @transform_1, window_bounds = array<i64: 4, 32>}, {pipeline_mode = #tpu.pipeline_mode<synchronous>, transform_indices = @transform_2, window_bounds = array<i64: 1, 32>}, {transform_indices = @transform_3, window_bounds = array<i64: 128, 32>}]} {
    %c0 = arith.constant 0 : index
    %c0_0 = arith.constant 0 : index
    %0 = vector.load %arg1[%c0, %c0_0] : memref<128x4xbf16, #tpu.memory_space<vmem>>, vector<128x4xbf16>
    %c0_1 = arith.constant 0 : index
    %c0_2 = arith.constant 0 : index
    %1 = vector.load %arg2[%c0_1, %c0_2] : memref<4x32xbf16, #tpu.memory_space<vmem>>, vector<4x32xbf16>
    %cst = arith.constant dense<0.000000e+00> : vector<128x32xf32>
    %2 = tpu.matmul %0, %1, %cst {dimension_numbers = #tpu.dot_dimension_numbers<[1], [0], [0], [1], [0, 0, 1, 1], [], []>} : vector<128x4xbf16>, vector<4x32xbf16>, vector<128x32xf32> -> vector<128x32xf32>
    %c0_3 = arith.constant 0 : index
    %c0_4 = arith.constant 0 : index
    %3 = vector.load %arg3[%c0_3, %c0_4] : memref<1x32xf32, #tpu.memory_space<vmem>>, vector<1x32xf32>
    %4 = vector.broadcast %3 : vector<1x32xf32> to vector<128x32xf32>
    %5 = arith.addf %2, %4 : vector<128x32xf32>
    %6 = arith.truncf %5 : vector<128x32xf32> to vector<128x32xbf16>
    %c0_5 = arith.constant 0 : index
    %c0_6 = arith.constant 0 : index
    %7 = vector.load %arg4[%c0_5, %c0_6] : memref<128x32xbf16, #tpu.memory_space<vmem>>, vector<128x32xbf16>
    tpu.vector_store %arg4[%c0_5, %c0_6], %6 {strides = array<i32>} : memref<128x32xbf16, #tpu.memory_space<vmem>>, vector<128x32xbf16>,
    return
  }
  func.func @transform_0(%arg0: i32) -> (i32, i32) {
    %c0_i32 = arith.constant 0 : i32
    %c0_i32_0 = arith.constant 0 : i32
    return %arg0, %c0_i32 : i32, i32
  }
  func.func @transform_1(%arg0: i32) -> (i32, i32) {
    %c0_i32 = arith.constant 0 : i32
    %c0_i32_0 = arith.constant 0 : i32
    %c0_i32_1 = arith.constant 0 : i32
    return %c0_i32, %c0_i32_0 : i32, i32
  }
  func.func @transform_2(%arg0: i32) -> (i32, i32) {
    %c0_i32 = arith.constant 0 : i32
    %c0_i32_0 = arith.constant 0 : i32
    %c0_i32_1 = arith.constant 0 : i32
    return %c0_i32, %c0_i32_0 : i32, i32
  }
  func.func @transform_3(%arg0: i32) -> (i32, i32) {
    %c0_i32 = arith.constant 0 : i32
    %c0_i32_0 = arith.constant 0 : i32
    return %arg0, %c0_i32 : i32, i32
  }
}

module attributes {stable_mosaic.version = 11 : i64} {
  func.func @_conv3x3_mish_stats_kernel(%arg0: i32, %arg1: i32, %arg2: memref<1x16x16x9xbf16, #tpu.memory_space<vmem>>, %arg3: memref<1x1x16x9xbf16, #tpu.memory_space<vmem>>, %arg4: memref<1x1x16x9xbf16, #tpu.memory_space<vmem>>, %arg5: memref<81x8xbf16, #tpu.memory_space<vmem>>, %arg6: memref<1x8xf32, #tpu.memory_space<vmem>>, %arg7: memref<1x9xf32, #tpu.memory_space<vmem>>, %arg8: memref<1x9xf32, #tpu.memory_space<vmem>>, %arg9: memref<1x16x16x8xbf16, #tpu.memory_space<vmem>>, %arg10: memref<1x2x8xf32, #tpu.memory_space<vmem>>, %arg11: memref<18x18x9xf32, #tpu.memory_space<vmem>>) attributes {dimension_semantics = [#tpu.dimension_semantics<parallel>, #tpu.dimension_semantics<parallel>], iteration_bounds = array<i64: 2, 1>, scalar_prefetch = 0 : i64, scratch_operands = 1 : i64, tpu.core_type = #tpu.core_type<tc>, window_params = [{transform_indices = @transform_0, window_bounds = array<i64: 1, 16, 16, 9>}, {transform_indices = @transform_1, window_bounds = array<i64: 1, 1, 16, 9>}, {transform_indices = @transform_2, window_bounds = array<i64: 1, 1, 16, 9>}, {pipeline_mode = #tpu.pipeline_mode<synchronous>, transform_indices = @transform_3, window_bounds = array<i64: 81, 8>}, {pipeline_mode = #tpu.pipeline_mode<synchronous>, transform_indices = @transform_4, window_bounds = array<i64: 1, 8>}, {pipeline_mode = #tpu.pipeline_mode<synchronous>, transform_indices = @transform_5, window_bounds = array<i64: 1, 9>}, {pipeline_mode = #tpu.pipeline_mode<synchronous>, transform_indices = @transform_6, window_bounds = array<i64: 1, 9>}, {transform_indices = @transform_7, window_bounds = array<i64: 1, 16, 16, 8>}, {transform_indices = @transform_8, window_bounds = array<i64: 1, 2, 8>}]} {
    %c0 = arith.constant 0 : index
    %c0_0 = arith.constant 0 : index
    %0 = vector.load %arg7[%c0, %c0_0] : memref<1x9xf32, #tpu.memory_space<vmem>>, vector<1x9xf32>
    %1 = vector.shape_cast %0 : vector<1x9xf32> to vector<1x1x9xf32>
    %c0_1 = arith.constant 0 : index
    %c0_2 = arith.constant 0 : index
    %2 = vector.load %arg8[%c0_1, %c0_2] : memref<1x9xf32, #tpu.memory_space<vmem>>, vector<1x9xf32>
    %3 = vector.shape_cast %2 : vector<1x9xf32> to vector<1x1x9xf32>
    %cst = arith.constant 0.000000e+00 : f32
    %4 = vector.broadcast %cst : f32 to vector<18x1x9xf32>
    %c0_3 = arith.constant 0 : index
    %c0_4 = arith.constant 0 : index
    %c0_5 = arith.constant 0 : index
    %5 = vector.load %arg11[%c0_3, %c0_4, %c0_5] : memref<18x18x9xf32, #tpu.memory_space<vmem>>, vector<18x1x9xf32>
    tpu.vector_store %arg11[%c0_3, %c0_4, %c0_5], %4 {strides = array<i32>} : memref<18x18x9xf32, #tpu.memory_space<vmem>>, vector<18x1x9xf32>,
    %c0_6 = arith.constant 0 : index
    %c17 = arith.constant 17 : index
    %c0_7 = arith.constant 0 : index
    %6 = vector.load %arg11[%c0_6, %c17, %c0_7] : memref<18x18x9xf32, #tpu.memory_space<vmem>>, vector<18x1x9xf32>
    tpu.vector_store %arg11[%c0_6, %c17, %c0_7], %4 {strides = array<i32>} : memref<18x18x9xf32, #tpu.memory_space<vmem>>, vector<18x1x9xf32>,
    %c0_8 = arith.constant 0 : index
    %c0_9 = arith.constant 0 : index
    %c0_10 = arith.constant 0 : index
    %c0_11 = arith.constant 0 : index
    %7 = vector.load %arg3[%c0_8, %c0_9, %c0_10, %c0_11] : memref<1x1x16x9xbf16, #tpu.memory_space<vmem>>, vector<1x1x16x9xbf16>
    %8 = vector.shape_cast %7 : vector<1x1x16x9xbf16> to vector<1x16x9xbf16>
    %9 = arith.extf %8 : vector<1x16x9xbf16> to vector<1x16x9xf32>
    %10 = vector.broadcast %1 : vector<1x1x9xf32> to vector<1x16x9xf32>
    %11 = arith.mulf %9, %10 : vector<1x16x9xf32>
    %12 = vector.broadcast %3 : vector<1x1x9xf32> to vector<1x16x9xf32>
    %13 = arith.addf %11, %12 : vector<1x16x9xf32>
    %c0_i32 = arith.constant 0 : i32
    %14 = arith.cmpi sgt, %arg1, %c0_i32 : i32
    %cst_12 = arith.constant 0.000000e+00 : f32
    %15 = vector.broadcast %cst_12 : f32 to vector<1x16x9xf32>
    %16 = arith.select %14, %13, %15 : vector<1x16x9xf32>
    %c0_13 = arith.constant 0 : index
    %c1 = arith.constant 1 : index
    %c0_14 = arith.constant 0 : index
    %17 = vector.load %arg11[%c0_13, %c1, %c0_14] : memref<18x18x9xf32, #tpu.memory_space<vmem>>, vector<1x16x9xf32>
    tpu.vector_store %arg11[%c0_13, %c1, %c0_14], %16 {strides = array<i32>} : memref<18x18x9xf32, #tpu.memory_space<vmem>>, vector<1x16x9xf32>,
    %c0_15 = arith.constant 0 : index
    %c0_16 = arith.constant 0 : index
    %c0_17 = arith.constant 0 : index
    %c0_18 = arith.constant 0 : index
    %18 = vector.load %arg4[%c0_15, %c0_16, %c0_17, %c0_18] : memref<1x1x16x9xbf16, #tpu.memory_space<vmem>>, vector<1x1x16x9xbf16>
    %19 = vector.shape_cast %18 : vector<1x1x16x9xbf16> to vector<1x16x9xbf16>
    %20 = arith.extf %19 : vector<1x16x9xbf16> to vector<1x16x9xf32>
    %21 = vector.broadcast %1 : vector<1x1x9xf32> to vector<1x16x9xf32>
    %22 = arith.mulf %20, %21 : vector<1x16x9xf32>
    %23 = vector.broadcast %3 : vector<1x1x9xf32> to vector<1x16x9xf32>
    %24 = arith.addf %22, %23 : vector<1x16x9xf32>
    %c16_i32 = arith.constant 16 : i32
    %25 = arith.muli %arg1, %c16_i32 : i32
    %c16_i32_19 = arith.constant 16 : i32
    %26 = arith.addi %25, %c16_i32_19 : i32
    %c16_i32_20 = arith.constant 16 : i32
    %27 = arith.cmpi slt, %26, %c16_i32_20 : i32
    %cst_21 = arith.constant 0.000000e+00 : f32
    %28 = vector.broadcast %cst_21 : f32 to vector<1x16x9xf32>
    %29 = arith.select %27, %24, %28 : vector<1x16x9xf32>
    %c17_22 = arith.constant 17 : index
    %c1_23 = arith.constant 1 : index
    %c0_24 = arith.constant 0 : index
    %30 = vector.load %arg11[%c17_22, %c1_23, %c0_24] : memref<18x18x9xf32, #tpu.memory_space<vmem>>, vector<1x16x9xf32>
    tpu.vector_store %arg11[%c17_22, %c1_23, %c0_24], %29 {strides = array<i32>} : memref<18x18x9xf32, #tpu.memory_space<vmem>>, vector<1x16x9xf32>,
    %c0_25 = arith.constant 0 : index
    %c0_26 = arith.constant 0 : index
    %c0_27 = arith.constant 0 : index
    %c0_28 = arith.constant 0 : index
    %31 = vector.load %arg2[%c0_25, %c0_26, %c0_27, %c0_28] : memref<1x16x16x9xbf16, #tpu.memory_space<vmem>>, vector<1x16x16x9xbf16>
    %32 = vector.shape_cast %31 : vector<1x16x16x9xbf16> to vector<16x16x9xbf16>
    %33 = arith.extf %32 : vector<16x16x9xbf16> to vector<16x16x9xf32>
    %34 = vector.broadcast %1 : vector<1x1x9xf32> to vector<16x16x9xf32>
    %35 = arith.mulf %33, %34 : vector<16x16x9xf32>
    %36 = vector.broadcast %3 : vector<1x1x9xf32> to vector<16x16x9xf32>
    %37 = arith.addf %35, %36 : vector<16x16x9xf32>
    %c1_29 = arith.constant 1 : index
    %c1_30 = arith.constant 1 : index
    %c0_31 = arith.constant 0 : index
    %38 = vector.load %arg11[%c1_29, %c1_30, %c0_31] : memref<18x18x9xf32, #tpu.memory_space<vmem>>, vector<16x16x9xf32>
    tpu.vector_store %arg11[%c1_29, %c1_30, %c0_31], %37 {strides = array<i32>} : memref<18x18x9xf32, #tpu.memory_space<vmem>>, vector<16x16x9xf32>,
    %c0_32 = arith.constant 0 : index
    %c0_33 = arith.constant 0 : index
    %c0_34 = arith.constant 0 : index
    %39 = vector.load %arg11[%c0_32, %c0_33, %c0_34] : memref<18x18x9xf32, #tpu.memory_space<vmem>>, vector<16x16x9xf32>
    %c0_35 = arith.constant 0 : index
    %c1_36 = arith.constant 1 : index
    %c0_37 = arith.constant 0 : index
    %40 = vector.load %arg11[%c0_35, %c1_36, %c0_37] : memref<18x18x9xf32, #tpu.memory_space<vmem>>, vector<16x16x9xf32>
    %c0_38 = arith.constant 0 : index
    %c2 = arith.constant 2 : index
    %c0_39 = arith.constant 0 : index
    %41 = vector.load %arg11[%c0_38, %c2, %c0_39] : memref<18x18x9xf32, #tpu.memory_space<vmem>>, vector<16x16x9xf32>
    %c1_40 = arith.constant 1 : index
    %c0_41 = arith.constant 0 : index
    %c0_42 = arith.constant 0 : index
    %42 = vector.load %arg11[%c1_40, %c0_41, %c0_42] : memref<18x18x9xf32, #tpu.memory_space<vmem>>, vector<16x16x9xf32>
    %c1_43 = arith.constant 1 : index
    %c1_44 = arith.constant 1 : index
    %c0_45 = arith.constant 0 : index
    %43 = vector.load %arg11[%c1_43, %c1_44, %c0_45] : memref<18x18x9xf32, #tpu.memory_space<vmem>>, vector<16x16x9xf32>
    %c1_46 = arith.constant 1 : index
    %c2_47 = arith.constant 2 : index
    %c0_48 = arith.constant 0 : index
    %44 = vector.load %arg11[%c1_46, %c2_47, %c0_48] : memref<18x18x9xf32, #tpu.memory_space<vmem>>, vector<16x16x9xf32>
    %c2_49 = arith.constant 2 : index
    %c0_50 = arith.constant 0 : index
    %c0_51 = arith.constant 0 : index
    %45 = vector.load %arg11[%c2_49, %c0_50, %c0_51] : memref<18x18x9xf32, #tpu.memory_space<vmem>>, vector<16x16x9xf32>
    %c2_52 = arith.constant 2 : index
    %c1_53 = arith.constant 1 : index
    %c0_54 = arith.constant 0 : index
    %46 = vector.load %arg11[%c2_52, %c1_53, %c0_54] : memref<18x18x9xf32, #tpu.memory_space<vmem>>, vector<16x16x9xf32>
    %c2_55 = arith.constant 2 : index
    %c2_56 = arith.constant 2 : index
    %c0_57 = arith.constant 0 : index
    %47 = vector.load %arg11[%c2_55, %c2_56, %c0_57] : memref<18x18x9xf32, #tpu.memory_space<vmem>>, vector<16x16x9xf32>
    %48 = tpu.concatenate %39, %40, %41, %42, %43, %44, %45, %46, %47 in 2 : vector<16x16x9xf32>, vector<16x16x9xf32>, vector<16x16x9xf32>, vector<16x16x9xf32>, vector<16x16x9xf32>, vector<16x16x9xf32>, vector<16x16x9xf32>, vector<16x16x9xf32>, vector<16x16x9xf32> -> vector<16x16x81xf32>
    %49 = vector.shape_cast %48 : vector<16x16x81xf32> to vector<256x81xf32>
    %50 = arith.truncf %49 : vector<256x81xf32> to vector<256x81xbf16>
    %c0_58 = arith.constant 0 : index
    %c0_59 = arith.constant 0 : index
    %51 = vector.load %arg5[%c0_58, %c0_59] : memref<81x8xbf16, #tpu.memory_space<vmem>>, vector<81x8xbf16>
    %cst_60 = arith.constant dense<0.000000e+00> : vector<256x8xf32>
    %52 = tpu.matmul %50, %51, %cst_60 {dimension_numbers = #tpu.dot_dimension_numbers<[1], [0], [0], [1], [0, 0, 1, 1], [], []>} : vector<256x81xbf16>, vector<81x8xbf16>, vector<256x8xf32> -> vector<256x8xf32>
    %c0_61 = arith.constant 0 : index
    %c0_62 = arith.constant 0 : index
    %53 = vector.load %arg6[%c0_61, %c0_62] : memref<1x8xf32, #tpu.memory_space<vmem>>, vector<1x8xf32>
    %54 = vector.broadcast %53 : vector<1x8xf32> to vector<256x8xf32>
    %55 = arith.addf %52, %54 : vector<256x8xf32>
    %cst_63 = arith.constant 2.000000e+01 : f32
    %56 = vector.broadcast %cst_63 : f32 to vector<256x8xf32>
    %57 = arith.minimumf %55, %56 : vector<256x8xf32>
    %58 = math.exp %57 : vector<256x8xf32>
    %cst_64 = arith.constant 2.000000e+00 : f32
    %59 = vector.broadcast %cst_64 : f32 to vector<256x8xf32>
    %60 = arith.addf %58, %59 : vector<256x8xf32>
    %61 = arith.mulf %58, %60 : vector<256x8xf32>
    %62 = arith.mulf %55, %61 : vector<256x8xf32>
    %cst_65 = arith.constant 2.000000e+00 : f32
    %63 = vector.broadcast %cst_65 : f32 to vector<256x8xf32>
    %64 = arith.addf %61, %63 : vector<256x8xf32>
    %65 = arith.divf %62, %64 : vector<256x8xf32>
    %cst_66 = arith.constant 2.000000e+01 : f32
    %66 = vector.broadcast %cst_66 : f32 to vector<256x8xf32>
    %67 = arith.cmpf ogt, %55, %66 : vector<256x8xf32>
    %68 = arith.select %67, %55, %65 : vector<256x8xi1>, vector<256x8xf32>
    %cst_67 = arith.constant dense<0.000000e+00> : vector<8xf32>
    %69 = vector.multi_reduction <add>, %68, %cst_67 [0] : vector<256x8xf32> to vector<8xf32>
    %70 = vector.shape_cast %69 : vector<8xf32> to vector<1x8xf32>
    %c0_68 = arith.constant 0 : index
    %c0_69 = arith.constant 0 : index
    %c0_70 = arith.constant 0 : index
    %71 = vector.load %arg10[%c0_68, %c0_69, %c0_70] : memref<1x2x8xf32, #tpu.memory_space<vmem>>, vector<1x1x8xf32>
    %72 = vector.shape_cast %71 : vector<1x1x8xf32> to vector<1x8xf32>
    %73 = vector.shape_cast %70 : vector<1x8xf32> to vector<1x1x8xf32>
    tpu.vector_store %arg10[%c0_68, %c0_69, %c0_70], %73 {strides = array<i32>} : memref<1x2x8xf32, #tpu.memory_space<vmem>>, vector<1x1x8xf32>,
    %74 = arith.mulf %68, %68 : vector<256x8xf32>
    %cst_71 = arith.constant dense<0.000000e+00> : vector<8xf32>
    %75 = vector.multi_reduction <add>, %74, %cst_71 [0] : vector<256x8xf32> to vector<8xf32>
    %76 = vector.shape_cast %75 : vector<8xf32> to vector<1x8xf32>
    %c0_72 = arith.constant 0 : index
    %c1_73 = arith.constant 1 : index
    %c0_74 = arith.constant 0 : index
    %77 = vector.load %arg10[%c0_72, %c1_73, %c0_74] : memref<1x2x8xf32, #tpu.memory_space<vmem>>, vector<1x1x8xf32>
    %78 = vector.shape_cast %77 : vector<1x1x8xf32> to vector<1x8xf32>
    %79 = vector.shape_cast %76 : vector<1x8xf32> to vector<1x1x8xf32>
    tpu.vector_store %arg10[%c0_72, %c1_73, %c0_74], %79 {strides = array<i32>} : memref<1x2x8xf32, #tpu.memory_space<vmem>>, vector<1x1x8xf32>,
    %80 = vector.shape_cast %68 : vector<256x8xf32> to vector<16x16x8xf32>
    %81 = arith.truncf %80 : vector<16x16x8xf32> to vector<16x16x8xbf16>
    %c0_75 = arith.constant 0 : index
    %c0_76 = arith.constant 0 : index
    %c0_77 = arith.constant 0 : index
    %c0_78 = arith.constant 0 : index
    %82 = vector.load %arg9[%c0_75, %c0_76, %c0_77, %c0_78] : memref<1x16x16x8xbf16, #tpu.memory_space<vmem>>, vector<1x16x16x8xbf16>
    %83 = vector.shape_cast %82 : vector<1x16x16x8xbf16> to vector<16x16x8xbf16>
    %84 = vector.shape_cast %81 : vector<16x16x8xbf16> to vector<1x16x16x8xbf16>
    tpu.vector_store %arg9[%c0_75, %c0_76, %c0_77, %c0_78], %84 {strides = array<i32>} : memref<1x16x16x8xbf16, #tpu.memory_space<vmem>>, vector<1x16x16x8xbf16>,
    return
  }
  func.func @transform_0(%arg0: i32, %arg1: i32) -> (i32, i32, i32, i32) {
    %c0_i32 = arith.constant 0 : i32
    %c0_i32_0 = arith.constant 0 : i32
    %c0_i32_1 = arith.constant 0 : i32
    return %arg0, %arg1, %c0_i32, %c0_i32_0 : i32, i32, i32, i32
  }
  func.func @transform_1(%arg0: i32, %arg1: i32) -> (i32, i32, i32, i32) {
    %c16_i32 = arith.constant 16 : i32
    %0 = arith.muli %arg1, %c16_i32 : i32
    %c1_i32 = arith.constant 1 : i32
    %1 = arith.subi %0, %c1_i32 : i32
    %c0_i32 = arith.constant 0 : i32
    %2 = arith.maxsi %1, %c0_i32 : i32
    %c0_i32_0 = arith.constant 0 : i32
    %c0_i32_1 = arith.constant 0 : i32
    %c0_i32_2 = arith.constant 0 : i32
    return %arg0, %2, %c0_i32_0, %c0_i32_1 : i32, i32, i32, i32
  }
  func.func @transform_2(%arg0: i32, %arg1: i32) -> (i32, i32, i32, i32) {
    %c16_i32 = arith.constant 16 : i32
    %0 = arith.muli %arg1, %c16_i32 : i32
    %c16_i32_0 = arith.constant 16 : i32
    %1 = arith.addi %0, %c16_i32_0 : i32
    %c15_i32 = arith.constant 15 : i32
    %2 = arith.minsi %1, %c15_i32 : i32
    %c0_i32 = arith.constant 0 : i32
    %c0_i32_1 = arith.constant 0 : i32
    %c0_i32_2 = arith.constant 0 : i32
    return %arg0, %2, %c0_i32, %c0_i32_1 : i32, i32, i32, i32
  }
  func.func @transform_3(%arg0: i32, %arg1: i32) -> (i32, i32) {
    %c0_i32 = arith.constant 0 : i32
    %c0_i32_0 = arith.constant 0 : i32
    %c0_i32_1 = arith.constant 0 : i32
    return %c0_i32, %c0_i32_0 : i32, i32
  }
  func.func @transform_4(%arg0: i32, %arg1: i32) -> (i32, i32) {
    %c0_i32 = arith.constant 0 : i32
    %c0_i32_0 = arith.constant 0 : i32
    %c0_i32_1 = arith.constant 0 : i32
    return %c0_i32, %c0_i32_0 : i32, i32
  }
  func.func @transform_5(%arg0: i32, %arg1: i32) -> (i32, i32) {
    %c0_i32 = arith.constant 0 : i32
    %c0_i32_0 = arith.constant 0 : i32
    %c0_i32_1 = arith.constant 0 : i32
    return %c0_i32, %c0_i32_0 : i32, i32
  }
  func.func @transform_6(%arg0: i32, %arg1: i32) -> (i32, i32) {
    %c0_i32 = arith.constant 0 : i32
    %c0_i32_0 = arith.constant 0 : i32
    %c0_i32_1 = arith.constant 0 : i32
    return %c0_i32, %c0_i32_0 : i32, i32
  }
  func.func @transform_7(%arg0: i32, %arg1: i32) -> (i32, i32, i32, i32) {
    %c0_i32 = arith.constant 0 : i32
    %c0_i32_0 = arith.constant 0 : i32
    %c0_i32_1 = arith.constant 0 : i32
    return %arg0, %arg1, %c0_i32, %c0_i32_0 : i32, i32, i32, i32
  }
  func.func @transform_8(%arg0: i32, %arg1: i32) -> (i32, i32, i32) {
    %c1_i32 = arith.constant 1 : i32
    %0 = arith.muli %arg0, %c1_i32 : i32
    %1 = arith.addi %0, %arg1 : i32
    %c0_i32 = arith.constant 0 : i32
    %c0_i32_0 = arith.constant 0 : i32
    %c0_i32_1 = arith.constant 0 : i32
    return %1, %c0_i32, %c0_i32_0 : i32, i32, i32
  }
}

module attributes {stable_mosaic.version = 11 : i64} {
  func.func @_conv3x3_mish_stats_kernel(%arg0: i32, %arg1: i32, %arg2: memref<1x16x16x8xbf16, #tpu.memory_space<vmem>>, %arg3: memref<1x1x16x8xbf16, #tpu.memory_space<vmem>>, %arg4: memref<1x1x16x8xbf16, #tpu.memory_space<vmem>>, %arg5: memref<72x8xbf16, #tpu.memory_space<vmem>>, %arg6: memref<1x8xf32, #tpu.memory_space<vmem>>, %arg7: memref<1x8xf32, #tpu.memory_space<vmem>>, %arg8: memref<1x8xf32, #tpu.memory_space<vmem>>, %arg9: memref<1x16x16x8xbf16, #tpu.memory_space<vmem>>, %arg10: memref<1x2x8xf32, #tpu.memory_space<vmem>>, %arg11: memref<18x18x8xf32, #tpu.memory_space<vmem>>) attributes {dimension_semantics = [#tpu.dimension_semantics<parallel>, #tpu.dimension_semantics<parallel>], iteration_bounds = array<i64: 2, 1>, scalar_prefetch = 0 : i64, scratch_operands = 1 : i64, tpu.core_type = #tpu.core_type<tc>, window_params = [{transform_indices = @transform_0, window_bounds = array<i64: 1, 16, 16, 8>}, {transform_indices = @transform_1, window_bounds = array<i64: 1, 1, 16, 8>}, {transform_indices = @transform_2, window_bounds = array<i64: 1, 1, 16, 8>}, {pipeline_mode = #tpu.pipeline_mode<synchronous>, transform_indices = @transform_3, window_bounds = array<i64: 72, 8>}, {pipeline_mode = #tpu.pipeline_mode<synchronous>, transform_indices = @transform_4, window_bounds = array<i64: 1, 8>}, {pipeline_mode = #tpu.pipeline_mode<synchronous>, transform_indices = @transform_5, window_bounds = array<i64: 1, 8>}, {pipeline_mode = #tpu.pipeline_mode<synchronous>, transform_indices = @transform_6, window_bounds = array<i64: 1, 8>}, {transform_indices = @transform_7, window_bounds = array<i64: 1, 16, 16, 8>}, {transform_indices = @transform_8, window_bounds = array<i64: 1, 2, 8>}]} {
    %c0 = arith.constant 0 : index
    %c0_0 = arith.constant 0 : index
    %0 = vector.load %arg7[%c0, %c0_0] : memref<1x8xf32, #tpu.memory_space<vmem>>, vector<1x8xf32>
    %1 = vector.shape_cast %0 : vector<1x8xf32> to vector<1x1x8xf32>
    %c0_1 = arith.constant 0 : index
    %c0_2 = arith.constant 0 : index
    %2 = vector.load %arg8[%c0_1, %c0_2] : memref<1x8xf32, #tpu.memory_space<vmem>>, vector<1x8xf32>
    %3 = vector.shape_cast %2 : vector<1x8xf32> to vector<1x1x8xf32>
    %cst = arith.constant 0.000000e+00 : f32
    %4 = vector.broadcast %cst : f32 to vector<18x1x8xf32>
    %c0_3 = arith.constant 0 : index
    %c0_4 = arith.constant 0 : index
    %c0_5 = arith.constant 0 : index
    %5 = vector.load %arg11[%c0_3, %c0_4, %c0_5] : memref<18x18x8xf32, #tpu.memory_space<vmem>>, vector<18x1x8xf32>
    tpu.vector_store %arg11[%c0_3, %c0_4, %c0_5], %4 {strides = array<i32>} : memref<18x18x8xf32, #tpu.memory_space<vmem>>, vector<18x1x8xf32>,
    %c0_6 = arith.constant 0 : index
    %c17 = arith.constant 17 : index
    %c0_7 = arith.constant 0 : index
    %6 = vector.load %arg11[%c0_6, %c17, %c0_7] : memref<18x18x8xf32, #tpu.memory_space<vmem>>, vector<18x1x8xf32>
    tpu.vector_store %arg11[%c0_6, %c17, %c0_7], %4 {strides = array<i32>} : memref<18x18x8xf32, #tpu.memory_space<vmem>>, vector<18x1x8xf32>,
    %c0_8 = arith.constant 0 : index
    %c0_9 = arith.constant 0 : index
    %c0_10 = arith.constant 0 : index
    %c0_11 = arith.constant 0 : index
    %7 = vector.load %arg3[%c0_8, %c0_9, %c0_10, %c0_11] : memref<1x1x16x8xbf16, #tpu.memory_space<vmem>>, vector<1x1x16x8xbf16>
    %8 = vector.shape_cast %7 : vector<1x1x16x8xbf16> to vector<1x16x8xbf16>
    %9 = arith.extf %8 : vector<1x16x8xbf16> to vector<1x16x8xf32>
    %10 = vector.broadcast %1 : vector<1x1x8xf32> to vector<1x16x8xf32>
    %11 = arith.mulf %9, %10 : vector<1x16x8xf32>
    %12 = vector.broadcast %3 : vector<1x1x8xf32> to vector<1x16x8xf32>
    %13 = arith.addf %11, %12 : vector<1x16x8xf32>
    %c0_i32 = arith.constant 0 : i32
    %14 = arith.cmpi sgt, %arg1, %c0_i32 : i32
    %cst_12 = arith.constant 0.000000e+00 : f32
    %15 = vector.broadcast %cst_12 : f32 to vector<1x16x8xf32>
    %16 = arith.select %14, %13, %15 : vector<1x16x8xf32>
    %c0_13 = arith.constant 0 : index
    %c1 = arith.constant 1 : index
    %c0_14 = arith.constant 0 : index
    %17 = vector.load %arg11[%c0_13, %c1, %c0_14] : memref<18x18x8xf32, #tpu.memory_space<vmem>>, vector<1x16x8xf32>
    tpu.vector_store %arg11[%c0_13, %c1, %c0_14], %16 {strides = array<i32>} : memref<18x18x8xf32, #tpu.memory_space<vmem>>, vector<1x16x8xf32>,
    %c0_15 = arith.constant 0 : index
    %c0_16 = arith.constant 0 : index
    %c0_17 = arith.constant 0 : index
    %c0_18 = arith.constant 0 : index
    %18 = vector.load %arg4[%c0_15, %c0_16, %c0_17, %c0_18] : memref<1x1x16x8xbf16, #tpu.memory_space<vmem>>, vector<1x1x16x8xbf16>
    %19 = vector.shape_cast %18 : vector<1x1x16x8xbf16> to vector<1x16x8xbf16>
    %20 = arith.extf %19 : vector<1x16x8xbf16> to vector<1x16x8xf32>
    %21 = vector.broadcast %1 : vector<1x1x8xf32> to vector<1x16x8xf32>
    %22 = arith.mulf %20, %21 : vector<1x16x8xf32>
    %23 = vector.broadcast %3 : vector<1x1x8xf32> to vector<1x16x8xf32>
    %24 = arith.addf %22, %23 : vector<1x16x8xf32>
    %c16_i32 = arith.constant 16 : i32
    %25 = arith.muli %arg1, %c16_i32 : i32
    %c16_i32_19 = arith.constant 16 : i32
    %26 = arith.addi %25, %c16_i32_19 : i32
    %c16_i32_20 = arith.constant 16 : i32
    %27 = arith.cmpi slt, %26, %c16_i32_20 : i32
    %cst_21 = arith.constant 0.000000e+00 : f32
    %28 = vector.broadcast %cst_21 : f32 to vector<1x16x8xf32>
    %29 = arith.select %27, %24, %28 : vector<1x16x8xf32>
    %c17_22 = arith.constant 17 : index
    %c1_23 = arith.constant 1 : index
    %c0_24 = arith.constant 0 : index
    %30 = vector.load %arg11[%c17_22, %c1_23, %c0_24] : memref<18x18x8xf32, #tpu.memory_space<vmem>>, vector<1x16x8xf32>
    tpu.vector_store %arg11[%c17_22, %c1_23, %c0_24], %29 {strides = array<i32>} : memref<18x18x8xf32, #tpu.memory_space<vmem>>, vector<1x16x8xf32>,
    %c0_25 = arith.constant 0 : index
    %c0_26 = arith.constant 0 : index
    %c0_27 = arith.constant 0 : index
    %c0_28 = arith.constant 0 : index
    %31 = vector.load %arg2[%c0_25, %c0_26, %c0_27, %c0_28] : memref<1x16x16x8xbf16, #tpu.memory_space<vmem>>, vector<1x16x16x8xbf16>
    %32 = vector.shape_cast %31 : vector<1x16x16x8xbf16> to vector<16x16x8xbf16>
    %33 = arith.extf %32 : vector<16x16x8xbf16> to vector<16x16x8xf32>
    %34 = vector.broadcast %1 : vector<1x1x8xf32> to vector<16x16x8xf32>
    %35 = arith.mulf %33, %34 : vector<16x16x8xf32>
    %36 = vector.broadcast %3 : vector<1x1x8xf32> to vector<16x16x8xf32>
    %37 = arith.addf %35, %36 : vector<16x16x8xf32>
    %c1_29 = arith.constant 1 : index
    %c1_30 = arith.constant 1 : index
    %c0_31 = arith.constant 0 : index
    %38 = vector.load %arg11[%c1_29, %c1_30, %c0_31] : memref<18x18x8xf32, #tpu.memory_space<vmem>>, vector<16x16x8xf32>
    tpu.vector_store %arg11[%c1_29, %c1_30, %c0_31], %37 {strides = array<i32>} : memref<18x18x8xf32, #tpu.memory_space<vmem>>, vector<16x16x8xf32>,
    %c0_32 = arith.constant 0 : index
    %c0_33 = arith.constant 0 : index
    %c0_34 = arith.constant 0 : index
    %39 = vector.load %arg11[%c0_32, %c0_33, %c0_34] : memref<18x18x8xf32, #tpu.memory_space<vmem>>, vector<16x16x8xf32>
    %c0_35 = arith.constant 0 : index
    %c1_36 = arith.constant 1 : index
    %c0_37 = arith.constant 0 : index
    %40 = vector.load %arg11[%c0_35, %c1_36, %c0_37] : memref<18x18x8xf32, #tpu.memory_space<vmem>>, vector<16x16x8xf32>
    %c0_38 = arith.constant 0 : index
    %c2 = arith.constant 2 : index
    %c0_39 = arith.constant 0 : index
    %41 = vector.load %arg11[%c0_38, %c2, %c0_39] : memref<18x18x8xf32, #tpu.memory_space<vmem>>, vector<16x16x8xf32>
    %c1_40 = arith.constant 1 : index
    %c0_41 = arith.constant 0 : index
    %c0_42 = arith.constant 0 : index
    %42 = vector.load %arg11[%c1_40, %c0_41, %c0_42] : memref<18x18x8xf32, #tpu.memory_space<vmem>>, vector<16x16x8xf32>
    %c1_43 = arith.constant 1 : index
    %c1_44 = arith.constant 1 : index
    %c0_45 = arith.constant 0 : index
    %43 = vector.load %arg11[%c1_43, %c1_44, %c0_45] : memref<18x18x8xf32, #tpu.memory_space<vmem>>, vector<16x16x8xf32>
    %c1_46 = arith.constant 1 : index
    %c2_47 = arith.constant 2 : index
    %c0_48 = arith.constant 0 : index
    %44 = vector.load %arg11[%c1_46, %c2_47, %c0_48] : memref<18x18x8xf32, #tpu.memory_space<vmem>>, vector<16x16x8xf32>
    %c2_49 = arith.constant 2 : index
    %c0_50 = arith.constant 0 : index
    %c0_51 = arith.constant 0 : index
    %45 = vector.load %arg11[%c2_49, %c0_50, %c0_51] : memref<18x18x8xf32, #tpu.memory_space<vmem>>, vector<16x16x8xf32>
    %c2_52 = arith.constant 2 : index
    %c1_53 = arith.constant 1 : index
    %c0_54 = arith.constant 0 : index
    %46 = vector.load %arg11[%c2_52, %c1_53, %c0_54] : memref<18x18x8xf32, #tpu.memory_space<vmem>>, vector<16x16x8xf32>
    %c2_55 = arith.constant 2 : index
    %c2_56 = arith.constant 2 : index
    %c0_57 = arith.constant 0 : index
    %47 = vector.load %arg11[%c2_55, %c2_56, %c0_57] : memref<18x18x8xf32, #tpu.memory_space<vmem>>, vector<16x16x8xf32>
    %48 = tpu.concatenate %39, %40, %41, %42, %43, %44, %45, %46, %47 in 2 : vector<16x16x8xf32>, vector<16x16x8xf32>, vector<16x16x8xf32>, vector<16x16x8xf32>, vector<16x16x8xf32>, vector<16x16x8xf32>, vector<16x16x8xf32>, vector<16x16x8xf32>, vector<16x16x8xf32> -> vector<16x16x72xf32>
    %49 = vector.shape_cast %48 : vector<16x16x72xf32> to vector<256x72xf32>
    %50 = arith.truncf %49 : vector<256x72xf32> to vector<256x72xbf16>
    %c0_58 = arith.constant 0 : index
    %c0_59 = arith.constant 0 : index
    %51 = vector.load %arg5[%c0_58, %c0_59] : memref<72x8xbf16, #tpu.memory_space<vmem>>, vector<72x8xbf16>
    %cst_60 = arith.constant dense<0.000000e+00> : vector<256x8xf32>
    %52 = tpu.matmul %50, %51, %cst_60 {dimension_numbers = #tpu.dot_dimension_numbers<[1], [0], [0], [1], [0, 0, 1, 1], [], []>} : vector<256x72xbf16>, vector<72x8xbf16>, vector<256x8xf32> -> vector<256x8xf32>
    %c0_61 = arith.constant 0 : index
    %c0_62 = arith.constant 0 : index
    %53 = vector.load %arg6[%c0_61, %c0_62] : memref<1x8xf32, #tpu.memory_space<vmem>>, vector<1x8xf32>
    %54 = vector.broadcast %53 : vector<1x8xf32> to vector<256x8xf32>
    %55 = arith.addf %52, %54 : vector<256x8xf32>
    %cst_63 = arith.constant 2.000000e+01 : f32
    %56 = vector.broadcast %cst_63 : f32 to vector<256x8xf32>
    %57 = arith.minimumf %55, %56 : vector<256x8xf32>
    %58 = math.exp %57 : vector<256x8xf32>
    %cst_64 = arith.constant 2.000000e+00 : f32
    %59 = vector.broadcast %cst_64 : f32 to vector<256x8xf32>
    %60 = arith.addf %58, %59 : vector<256x8xf32>
    %61 = arith.mulf %58, %60 : vector<256x8xf32>
    %62 = arith.mulf %55, %61 : vector<256x8xf32>
    %cst_65 = arith.constant 2.000000e+00 : f32
    %63 = vector.broadcast %cst_65 : f32 to vector<256x8xf32>
    %64 = arith.addf %61, %63 : vector<256x8xf32>
    %65 = arith.divf %62, %64 : vector<256x8xf32>
    %cst_66 = arith.constant 2.000000e+01 : f32
    %66 = vector.broadcast %cst_66 : f32 to vector<256x8xf32>
    %67 = arith.cmpf ogt, %55, %66 : vector<256x8xf32>
    %68 = arith.select %67, %55, %65 : vector<256x8xi1>, vector<256x8xf32>
    %cst_67 = arith.constant dense<0.000000e+00> : vector<8xf32>
    %69 = vector.multi_reduction <add>, %68, %cst_67 [0] : vector<256x8xf32> to vector<8xf32>
    %70 = vector.shape_cast %69 : vector<8xf32> to vector<1x8xf32>
    %c0_68 = arith.constant 0 : index
    %c0_69 = arith.constant 0 : index
    %c0_70 = arith.constant 0 : index
    %71 = vector.load %arg10[%c0_68, %c0_69, %c0_70] : memref<1x2x8xf32, #tpu.memory_space<vmem>>, vector<1x1x8xf32>
    %72 = vector.shape_cast %71 : vector<1x1x8xf32> to vector<1x8xf32>
    %73 = vector.shape_cast %70 : vector<1x8xf32> to vector<1x1x8xf32>
    tpu.vector_store %arg10[%c0_68, %c0_69, %c0_70], %73 {strides = array<i32>} : memref<1x2x8xf32, #tpu.memory_space<vmem>>, vector<1x1x8xf32>,
    %74 = arith.mulf %68, %68 : vector<256x8xf32>
    %cst_71 = arith.constant dense<0.000000e+00> : vector<8xf32>
    %75 = vector.multi_reduction <add>, %74, %cst_71 [0] : vector<256x8xf32> to vector<8xf32>
    %76 = vector.shape_cast %75 : vector<8xf32> to vector<1x8xf32>
    %c0_72 = arith.constant 0 : index
    %c1_73 = arith.constant 1 : index
    %c0_74 = arith.constant 0 : index
    %77 = vector.load %arg10[%c0_72, %c1_73, %c0_74] : memref<1x2x8xf32, #tpu.memory_space<vmem>>, vector<1x1x8xf32>
    %78 = vector.shape_cast %77 : vector<1x1x8xf32> to vector<1x8xf32>
    %79 = vector.shape_cast %76 : vector<1x8xf32> to vector<1x1x8xf32>
    tpu.vector_store %arg10[%c0_72, %c1_73, %c0_74], %79 {strides = array<i32>} : memref<1x2x8xf32, #tpu.memory_space<vmem>>, vector<1x1x8xf32>,
    %80 = vector.shape_cast %68 : vector<256x8xf32> to vector<16x16x8xf32>
    %81 = arith.truncf %80 : vector<16x16x8xf32> to vector<16x16x8xbf16>
    %c0_75 = arith.constant 0 : index
    %c0_76 = arith.constant 0 : index
    %c0_77 = arith.constant 0 : index
    %c0_78 = arith.constant 0 : index
    %82 = vector.load %arg9[%c0_75, %c0_76, %c0_77, %c0_78] : memref<1x16x16x8xbf16, #tpu.memory_space<vmem>>, vector<1x16x16x8xbf16>
    %83 = vector.shape_cast %82 : vector<1x16x16x8xbf16> to vector<16x16x8xbf16>
    %84 = vector.shape_cast %81 : vector<16x16x8xbf16> to vector<1x16x16x8xbf16>
    tpu.vector_store %arg9[%c0_75, %c0_76, %c0_77, %c0_78], %84 {strides = array<i32>} : memref<1x16x16x8xbf16, #tpu.memory_space<vmem>>, vector<1x16x16x8xbf16>,
    return
  }
  func.func @transform_0(%arg0: i32, %arg1: i32) -> (i32, i32, i32, i32) {
    %c0_i32 = arith.constant 0 : i32
    %c0_i32_0 = arith.constant 0 : i32
    %c0_i32_1 = arith.constant 0 : i32
    return %arg0, %arg1, %c0_i32, %c0_i32_0 : i32, i32, i32, i32
  }
  func.func @transform_1(%arg0: i32, %arg1: i32) -> (i32, i32, i32, i32) {
    %c16_i32 = arith.constant 16 : i32
    %0 = arith.muli %arg1, %c16_i32 : i32
    %c1_i32 = arith.constant 1 : i32
    %1 = arith.subi %0, %c1_i32 : i32
    %c0_i32 = arith.constant 0 : i32
    %2 = arith.maxsi %1, %c0_i32 : i32
    %c0_i32_0 = arith.constant 0 : i32
    %c0_i32_1 = arith.constant 0 : i32
    %c0_i32_2 = arith.constant 0 : i32
    return %arg0, %2, %c0_i32_0, %c0_i32_1 : i32, i32, i32, i32
  }
  func.func @transform_2(%arg0: i32, %arg1: i32) -> (i32, i32, i32, i32) {
    %c16_i32 = arith.constant 16 : i32
    %0 = arith.muli %arg1, %c16_i32 : i32
    %c16_i32_0 = arith.constant 16 : i32
    %1 = arith.addi %0, %c16_i32_0 : i32
    %c15_i32 = arith.constant 15 : i32
    %2 = arith.minsi %1, %c15_i32 : i32
    %c0_i32 = arith.constant 0 : i32
    %c0_i32_1 = arith.constant 0 : i32
    %c0_i32_2 = arith.constant 0 : i32
    return %arg0, %2, %c0_i32, %c0_i32_1 : i32, i32, i32, i32
  }
  func.func @transform_3(%arg0: i32, %arg1: i32) -> (i32, i32) {
    %c0_i32 = arith.constant 0 : i32
    %c0_i32_0 = arith.constant 0 : i32
    %c0_i32_1 = arith.constant 0 : i32
    return %c0_i32, %c0_i32_0 : i32, i32
  }
  func.func @transform_4(%arg0: i32, %arg1: i32) -> (i32, i32) {
    %c0_i32 = arith.constant 0 : i32
    %c0_i32_0 = arith.constant 0 : i32
    %c0_i32_1 = arith.constant 0 : i32
    return %c0_i32, %c0_i32_0 : i32, i32
  }
  func.func @transform_5(%arg0: i32, %arg1: i32) -> (i32, i32) {
    %c0_i32 = arith.constant 0 : i32
    %c0_i32_0 = arith.constant 0 : i32
    %c0_i32_1 = arith.constant 0 : i32
    return %c0_i32, %c0_i32_0 : i32, i32
  }
  func.func @transform_6(%arg0: i32, %arg1: i32) -> (i32, i32) {
    %c0_i32 = arith.constant 0 : i32
    %c0_i32_0 = arith.constant 0 : i32
    %c0_i32_1 = arith.constant 0 : i32
    return %c0_i32, %c0_i32_0 : i32, i32
  }
  func.func @transform_7(%arg0: i32, %arg1: i32) -> (i32, i32, i32, i32) {
    %c0_i32 = arith.constant 0 : i32
    %c0_i32_0 = arith.constant 0 : i32
    %c0_i32_1 = arith.constant 0 : i32
    return %arg0, %arg1, %c0_i32, %c0_i32_0 : i32, i32, i32, i32
  }
  func.func @transform_8(%arg0: i32, %arg1: i32) -> (i32, i32, i32) {
    %c1_i32 = arith.constant 1 : i32
    %0 = arith.muli %arg0, %c1_i32 : i32
    %1 = arith.addi %0, %arg1 : i32
    %c0_i32 = arith.constant 0 : i32
    %c0_i32_0 = arith.constant 0 : i32
    %c0_i32_1 = arith.constant 0 : i32
    return %1, %c0_i32, %c0_i32_0 : i32, i32, i32
  }
}

module attributes {stable_mosaic.version = 11 : i64} {
  func.func @_bn_apply_kernel(%arg0: i32, %arg1: memref<512x8xbf16, #tpu.memory_space<vmem>>, %arg2: memref<1x8xf32, #tpu.memory_space<vmem>>, %arg3: memref<1x8xf32, #tpu.memory_space<vmem>>, %arg4: memref<512x8xf32, #tpu.memory_space<vmem>>) attributes {dimension_semantics = [#tpu.dimension_semantics<parallel>], iteration_bounds = array<i64: 1>, scalar_prefetch = 0 : i64, scratch_operands = 0 : i64, tpu.core_type = #tpu.core_type<tc>, window_params = [{transform_indices = @transform_0, window_bounds = array<i64: 512, 8>}, {pipeline_mode = #tpu.pipeline_mode<synchronous>, transform_indices = @transform_1, window_bounds = array<i64: 1, 8>}, {pipeline_mode = #tpu.pipeline_mode<synchronous>, transform_indices = @transform_2, window_bounds = array<i64: 1, 8>}, {transform_indices = @transform_3, window_bounds = array<i64: 512, 8>}]} {
    %c0 = arith.constant 0 : index
    %c0_0 = arith.constant 0 : index
    %0 = vector.load %arg1[%c0, %c0_0] : memref<512x8xbf16, #tpu.memory_space<vmem>>, vector<512x8xbf16>
    %1 = arith.extf %0 : vector<512x8xbf16> to vector<512x8xf32>
    %c0_1 = arith.constant 0 : index
    %c0_2 = arith.constant 0 : index
    %2 = vector.load %arg2[%c0_1, %c0_2] : memref<1x8xf32, #tpu.memory_space<vmem>>, vector<1x8xf32>
    %3 = vector.broadcast %2 : vector<1x8xf32> to vector<512x8xf32>
    %4 = arith.mulf %1, %3 : vector<512x8xf32>
    %c0_3 = arith.constant 0 : index
    %c0_4 = arith.constant 0 : index
    %5 = vector.load %arg3[%c0_3, %c0_4] : memref<1x8xf32, #tpu.memory_space<vmem>>, vector<1x8xf32>
    %6 = vector.broadcast %5 : vector<1x8xf32> to vector<512x8xf32>
    %7 = arith.addf %4, %6 : vector<512x8xf32>
    %c0_5 = arith.constant 0 : index
    %c0_6 = arith.constant 0 : index
    %8 = vector.load %arg4[%c0_5, %c0_6] : memref<512x8xf32, #tpu.memory_space<vmem>>, vector<512x8xf32>
    tpu.vector_store %arg4[%c0_5, %c0_6], %7 {strides = array<i32>} : memref<512x8xf32, #tpu.memory_space<vmem>>, vector<512x8xf32>,
    return
  }
  func.func @transform_0(%arg0: i32) -> (i32, i32) {
    %c0_i32 = arith.constant 0 : i32
    %c0_i32_0 = arith.constant 0 : i32
    return %arg0, %c0_i32 : i32, i32
  }
  func.func @transform_1(%arg0: i32) -> (i32, i32) {
    %c0_i32 = arith.constant 0 : i32
    %c0_i32_0 = arith.constant 0 : i32
    %c0_i32_1 = arith.constant 0 : i32
    return %c0_i32, %c0_i32_0 : i32, i32
  }
  func.func @transform_2(%arg0: i32) -> (i32, i32) {
    %c0_i32 = arith.constant 0 : i32
    %c0_i32_0 = arith.constant 0 : i32
    %c0_i32_1 = arith.constant 0 : i32
    return %c0_i32, %c0_i32_0 : i32, i32
  }
  func.func @transform_3(%arg0: i32) -> (i32, i32) {
    %c0_i32 = arith.constant 0 : i32
    %c0_i32_0 = arith.constant 0 : i32
    return %arg0, %c0_i32 : i32, i32
  }
}

</mosaic_0001>

<bundles_post_ra>
// kernel: tile.9
= control target key start
LH: loop header
LB: loop body
LE: loop exit
PB: predicated region body
PF: predicated region fallthrough
CT: control target
= control target key end

     0   :  { %s37_s8 = smov 8   ;;  %s38_s9 = smov 16   ;;  %vm7_vm0 = vcmask 64512   ;;  %vm13_vm1 = vcmask 261312   ;;  %vm19_vm2 = vcmask 195712   ;;  %vm25_vm3 = vcmask 130112   ;;  %s55_s0 = inlined_call_operand.vmem [shape: f32[4,8], index: 0, kind: input, shape index: {}]   ;;  %s56_s1 = inlined_call_operand.vmem [shape: f32[1,32], index: 1, kind: output, shape index: {}]  }
   0x1   :  { %v4_v0 = vld [vmem:[%s55_s0] sm:$0xf]  ;;  %s36_s0 = smov 24  }
   0x2   :  { %5 = vst [vmem:[#allocation1] sm:$0xf] %v4_v0 }
   0x9   :  { %v10_v1 = vld [vmem:[#allocation1 + $0x3] sm:$0x1]   ;;  %v22_v2 = vld [vmem:[#allocation1 + $0x1] sm:$0x1]   ;;  %v16_v3 = vld [vmem:[#allocation1 + $0x2] sm:$0x1]  }
   0xa   :  { %11 = vrot.lane.b32.xlu0 %v10_v1, %s36_s0  ;;  %23 = vrot.lane.b32.xlu1 %v22_v2, %s37_s8  ;;  %v6_v4 = vld [vmem:[#allocation1] sm:$0x1]  }
   0xb   :  { %8 = vst.msk [vmem:[#allocation0] sm:$0x1] %vm7_vm0, %v6_v4  }
  0x12   :  { %17 = vrot.lane.b32.xlu0 %v16_v3, %s38_s9 }
  0x7c   :  { %v12_v5 = vpop.permute.xlu0 %11   ;;  %v24_v6 = vpop.permute.xlu1 %23  }
  0x7d   :  { %14 = vst.msk [vmem:[#allocation0] sm:$0x1] %vm13_vm1, %v12_v5  }
  0x84   :  { %v18_v7 = vpop.permute.xlu0 %17  }
  0x85   :  { %20 = vst.msk [vmem:[#allocation0] sm:$0x1] %vm19_vm2, %v18_v7  }
  0x86   :  { %26 = vst.msk [vmem:[#allocation0] sm:$0x1] %vm25_vm3, %v24_v6  }
  0x8d   :  { %v29_v8 = vld [vmem:[#allocation0] sm:$0x1] }
  0x8e   :  { %32 = vst [vmem:[%s56_s1] sm:$0x1] %v29_v8 }

// kernel: tile.8
= control target key start
LH: loop header
LB: loop body
LE: loop exit
PB: predicated region body
PF: predicated region fallthrough
CT: control target
= control target key end

     0   :  { %s22_s0 = inlined_call_operand.vmem [shape: f32[8], index: 0, kind: input, shape index: {}]   ;;  %s23_s1 = inlined_call_operand.vmem [shape: f32[4,8], index: 1, kind: output, shape index: {}]  }
   0x1   :  { %v4_v0 = vld [vmem:[%s22_s0] ss:$0 sm:$0xff] }
   0x2   :  { %5 = vst [vmem:[%s23_s1] sm:$0xf] %v4_v0 }

// kernel: unet_up_block.4
= control target key start
LH: loop header
LB: loop body
LE: loop exit
PB: predicated region body
PF: predicated region fallthrough
CT: control target
= control target key end

     0   :  { %vm101_vm0 = vcmask 1041408   ;;  %vm76_vm1 = vcmask 31744   ;;  %vm170_vm2 = vcmask 257024   ;;  %s365_s1 = inlined_call_operand.vmem [shape: bf16[4,32], index: 1, kind: input, shape index: {}]   ;;  %s366_s0 = inlined_call_operand.vmem [shape: bf16[128,4], index: 0, kind: input, shape index: {}]   ;;  %s367_s2 = inlined_call_operand.vmem [shape: f32[1,32], index: 2, kind: input, shape index: {}]   ;;  %s368_s3 = inlined_call_operand.vmem [shape: bf16[128,32], index: 3, kind: output, shape index: {}]  }
   0x1   :  { %v31_v0 = vld [vmem:[%s365_s1] sm:$0x3]  ;;  %v233_v3 = vld [vmem:[%s366_s0 + $0x10] sm:$0xff]  ;;  %v232_v6 = vld [vmem:[%s366_s0 + $0x8] sm:$0xff] }
   0x2   :  { %v103_v1 = vsel %vm101_vm0, %v31_v0, 0  ;;  %v231_v2 = vld [vmem:[%s366_s0] sm:$0xff]  ;;  %v237_v5 = vld [vmem:[%s366_s0 + $0x30] sm:$0xff]  ;;  %v234_v7 = vld [vmem:[%s366_s0 + $0x18] sm:$0xff] }
   0x3   :  { %112 = vmatpush.bf16.msra.mxu0 %v103_v1  ;;  %239 = vmatpush.bf16.msra.mxu1 %v103_v1  ;;  %v235_v4 = vld [vmem:[%s366_s0 + $0x20] sm:$0xff]  ;;  %v236_v8 = vld [vmem:[%s366_s0 + $0x28] sm:$0xff]  ;;  %v238_v9 = vld [vmem:[%s366_s0 + $0x38] sm:$0xff] }
   0x4   :  { %240 = vmatpush.bf16.msra.mxu2 %v103_v1  ;;  %241 = vmatpush.bf16.msra.mxu3 %v103_v1  ;;  %v242_v10 = vld [vmem:[%s367_s2] ss:$0 sm:$0xff] }
   0x6   :  { %223 = vmatmul.msk.bf16.vlgmr.msra.gmra.mxu0 %vm76_vm1, %v231_v2  ;;  %225 = vmatmul.msk.bf16.vlgmr.msra.gmra.mxu1 %vm76_vm1, %v233_v3 }
   0x7   :  { %227 = vmatmul.msk.bf16.vlgmr.msra.gmra.mxu2 %vm76_vm1, %v235_v4  ;;  %229 = vmatmul.msk.bf16.vlgmr.msra.gmra.mxu3 %vm76_vm1, %v237_v5 }
  0x16   :  { %224 = vmatmul.msk.bf16.gmra.mxu0 %vm76_vm1, %v232_v6  ;;  %226 = vmatmul.msk.bf16.gmra.mxu1 %vm76_vm1, %v234_v7 }
  0x17   :  { %228 = vmatmul.msk.bf16.gmra.mxu2 %vm76_vm1, %v236_v8  ;;  %230 = vmatmul.msk.bf16.gmra.mxu3 %vm76_vm1, %v238_v9 }
  0x83   :  { %v114_v11 = vpop.f32.mrf.mxu0  ;;  %v124_v12 = vpop.f32.mrf.mxu1 }
  0x84   :  { %v115_v13 = vadd.f32 %v242_v10, %v114_v11  ;;  %v125_v14 = vadd.f32 %v242_v10, %v124_v12 }
  0x86   :  { %v154_v15 = vpack.c.bf16 %v115_v13, %v115_v13  ;;  %v158_v16 = vpack.c.bf16 %v125_v14, %v125_v14 }
  0x88   :  { %171 = vst.msk [vmem:[%s368_s3] sm:$0xf] %vm170_vm2, %v154_v15 }
  0x89   :  { %175 = vst.msk [vmem:[%s368_s3 + $0x10] sm:$0xf] %vm170_vm2, %v158_v16 }
  0x8a   :  { %v134_v17 = vpop.f32.mrf.mxu2  ;;  %v144_v18 = vpop.f32.mrf.mxu3 }
  0x8b   :  { %v135_v19 = vadd.f32 %v242_v10, %v134_v17  ;;  %v145_v20 = vadd.f32 %v242_v10, %v144_v18  ;;  %v116_v21 = vpop.f32.mrf.mxu0  ;;  %v126_v22 = vpop.f32.mrf.mxu1 }
  0x8c   :  { %v117_v23 = vadd.f32 %v242_v10, %v116_v21  ;;  %v127_v24 = vadd.f32 %v242_v10, %v126_v22 }
  0x8d   :  { %v162_v25 = vpack.c.bf16 %v135_v19, %v135_v19  ;;  %v166_v26 = vpack.c.bf16 %v145_v20, %v145_v20 }
  0x8e   :  { %v155_v27 = vpack.c.bf16 %v117_v23, %v117_v23  ;;  %v159_v28 = vpack.c.bf16 %v127_v24, %v127_v24 }
  0x8f   :  { %179 = vst.msk [vmem:[%s368_s3 + $0x20] sm:$0xf] %vm170_vm2, %v162_v25 }
  0x90   :  { %183 = vst.msk [vmem:[%s368_s3 + $0x30] sm:$0xf] %vm170_vm2, %v166_v26 }
  0x91   :  { %172 = vst.msk [vmem:[%s368_s3 + $0x4] sm:$0xf] %vm170_vm2, %v155_v27 }
  0x92   :  { %176 = vst.msk [vmem:[%s368_s3 + $0x14] sm:$0xf] %vm170_vm2, %v159_v28  ;;  %v136_v29 = vpop.f32.mrf.mxu2  ;;  %v146_v30 = vpop.f32.mrf.mxu3 }
  0x93   :  { %v137_v31 = vadd.f32 %v242_v10, %v136_v29  ;;  %v147_v32 = vadd.f32 %v242_v10, %v146_v30  ;;  %v119_v33 = vpop.f32.mrf.mxu0  ;;  %v129_v34 = vpop.f32.mrf.mxu1 }
  0x94   :  { %v120_v35 = vadd.f32 %v242_v10, %v119_v33  ;;  %v130_v36 = vadd.f32 %v242_v10, %v129_v34 }
  0x95   :  { %v163_v37 = vpack.c.bf16 %v137_v31, %v137_v31  ;;  %v167_v38 = vpack.c.bf16 %v147_v32, %v147_v32 }
  0x96   :  { %v156_v39 = vpack.c.bf16 %v120_v35, %v120_v35  ;;  %v160_v40 = vpack.c.bf16 %v130_v36, %v130_v36 }
  0x97   :  { %180 = vst.msk [vmem:[%s368_s3 + $0x24] sm:$0xf] %vm170_vm2, %v163_v37 }
  0x98   :  { %184 = vst.msk [vmem:[%s368_s3 + $0x34] sm:$0xf] %vm170_vm2, %v167_v38 }
  0x99   :  { %173 = vst.msk [vmem:[%s368_s3 + $0x8] sm:$0xf] %vm170_vm2, %v156_v39 }
  0x9a   :  { %177 = vst.msk [vmem:[%s368_s3 + $0x18] sm:$0xf] %vm170_vm2, %v160_v40  ;;  %v139_v41 = vpop.f32.mrf.mxu2  ;;  %v149_v42 = vpop.f32.mrf.mxu3 }
  0x9b   :  { %v140_v43 = vadd.f32 %v242_v10, %v139_v41  ;;  %v150_v44 = vadd.f32 %v242_v10, %v149_v42  ;;  %v121_v45 = vpop.f32.mrf.mxu0  ;;  %v131_v46 = vpop.f32.mrf.mxu1 }
  0x9c   :  { %v122_v47 = vadd.f32 %v242_v10, %v121_v45  ;;  %v132_v48 = vadd.f32 %v242_v10, %v131_v46 }
  0x9d   :  { %v164_v49 = vpack.c.bf16 %v140_v43, %v140_v43  ;;  %v168_v50 = vpack.c.bf16 %v150_v44, %v150_v44 }
  0x9e   :  { %v157_v51 = vpack.c.bf16 %v122_v47, %v122_v47  ;;  %v161_v52 = vpack.c.bf16 %v132_v48, %v132_v48 }
  0x9f   :  { %181 = vst.msk [vmem:[%s368_s3 + $0x28] sm:$0xf] %vm170_vm2, %v164_v49 }
  0xa0   :  { %185 = vst.msk [vmem:[%s368_s3 + $0x38] sm:$0xf] %vm170_vm2, %v168_v50 }
  0xa1   :  { %174 = vst.msk [vmem:[%s368_s3 + $0xc] sm:$0xf] %vm170_vm2, %v157_v51 }
  0xa2   :  { %178 = vst.msk [vmem:[%s368_s3 + $0x1c] sm:$0xf] %vm170_vm2, %v161_v52  ;;  %v141_v53 = vpop.f32.mrf.mxu2  ;;  %v151_v54 = vpop.f32.mrf.mxu3 }
  0xa3   :  { %v142_v55 = vadd.f32 %v242_v10, %v141_v53  ;;  %v152_v56 = vadd.f32 %v242_v10, %v151_v54 }
  0xa5   :  { %v165_v57 = vpack.c.bf16 %v142_v55, %v142_v55  ;;  %v169_v58 = vpack.c.bf16 %v152_v56, %v152_v56 }
  0xa7   :  { %182 = vst.msk [vmem:[%s368_s3 + $0x2c] sm:$0xf] %vm170_vm2, %v165_v57 }
  0xa8   :  { %186 = vst.msk [vmem:[%s368_s3 + $0x3c] sm:$0xf] %vm170_vm2, %v169_v58 }

// kernel: unet_up_block.7
= control target key start
LH: loop header
LB: loop body
LE: loop exit
PB: predicated region body
PF: predicated region fallthrough
CT: control target
= control target key end

     0   :  { %vm278_vm0 = vcmask 64512   ;;  %s1022_s0 = inlined_call_operand.vmem [shape: bf16[512,8], index: 0, kind: input, shape index: {}]   ;;  %s1023_s1 = inlined_call_operand.vmem [shape: f32[1,8], index: 1, kind: input, shape index: {}]   ;;  %s1024_s2 = inlined_call_operand.vmem [shape: f32[1,8], index: 2, kind: input, shape index: {}]   ;;  %s1025_s3 = inlined_call_operand.vmem [shape: f32[512,8], index: 3, kind: output, shape index: {}]  }
   0x1   :  { %v348_v0 = vld [vmem:[%s1022_s0] sm:$0xff]   ;;  %v475_v5 = vld [vmem:[%s1022_s0 + $0x8] sm:$0xff]   ;;  %v476_v8 = vld [vmem:[%s1022_s0 + $0x10] sm:$0xff]  }
   0x2   :  { %v534_v1 = vld [vmem:[%s1023_s1] ss:$0 sm:$0xff]  ;;  %v349_v2 = vunpack.c.l.bf16 %v348_v0  ;;  %v350_v4 = vunpack.c.h.bf16 %v348_v0  ;;  %v353_v6 = vunpack.c.l.bf16 %v475_v5  ;;  %v354_v7 = vunpack.c.h.bf16 %v475_v5  ;;  %v477_v9 = vld [vmem:[%s1022_s0 + $0x18] sm:$0xff]   ;;  %v479_v23 = vld [vmem:[%s1022_s0 + $0x28] sm:$0xff]  }
   0x3   :  { %v539_v3 = vld [vmem:[%s1024_s2] ss:$0 sm:$0xff]  ;;  %v357_v12 = vunpack.c.l.bf16 %v476_v8  ;;  %v358_v13 = vunpack.c.h.bf16 %v476_v8  ;;  %v361_v16 = vunpack.c.l.bf16 %v477_v9  ;;  %v362_v17 = vunpack.c.h.bf16 %v477_v9  ;;  %v480_v28 = vld [vmem:[%s1022_s0 + $0x30] sm:$0xff]   ;;  %v481_v33 = vld [vmem:[%s1022_s0 + $0x38] sm:$0xff]  }
   0x4   :  { %v146_v10 = vmul.f32 %v534_v1, %v349_v2  ;;  %v147_v11 = vmul.f32 %v534_v1, %v350_v4  ;;  %v148_v14 = vmul.f32 %v534_v1, %v353_v6  ;;  %v149_v15 = vmul.f32 %v534_v1, %v354_v7  ;;  %v478_v18 = vld [vmem:[%s1022_s0 + $0x20] sm:$0xff]   ;;  %v483_v49 = vld [vmem:[%s1022_s0 + $0x48] sm:$0xff]   ;;  %v484_v52 = vld [vmem:[%s1022_s0 + $0x50] sm:$0xff]  }
   0x5   :  { %v150_v21 = vmul.f32 %v534_v1, %v357_v12  ;;  %v151_v22 = vmul.f32 %v534_v1, %v358_v13  ;;  %v152_v26 = vmul.f32 %v534_v1, %v361_v16  ;;  %v153_v27 = vmul.f32 %v534_v1, %v362_v17  ;;  %v482_v46 = vld [vmem:[%s1022_s0 + $0x40] sm:$0xff]   ;;  %v485_v61 = vld [vmem:[%s1022_s0 + $0x58] sm:$0xff]   ;;  %v487_v13 = vld [vmem:[%s1022_s0 + $0x68] sm:$0xff]  }
   0x6   :  { %v214_v19 = vadd.f32 %v539_v3, %v146_v10  ;;  %v215_v20 = vadd.f32 %v539_v3, %v147_v11  ;;  %v216_v24 = vadd.f32 %v539_v3, %v148_v14  ;;  %v217_v25 = vadd.f32 %v539_v3, %v149_v15  ;;  %v486_v6 = vld [vmem:[%s1022_s0 + $0x60] sm:$0xff]  }
   0x7   :  { %v218_v29 = vadd.f32 %v539_v3, %v150_v21  ;;  %v219_v30 = vadd.f32 %v539_v3, %v151_v22  ;;  %v365_v31 = vunpack.c.l.bf16 %v478_v18  ;;  %v366_v32 = vunpack.c.h.bf16 %v478_v18 }
   0x8   :  { %279 = vst.msk [vmem:[%s1025_s3] sm:$0xff] %vm278_vm0, %v214_v19  ;;  %v220_v34 = vadd.f32 %v539_v3, %v152_v26  ;;  %v221_v35 = vadd.f32 %v539_v3, %v153_v27  ;;  %v369_v36 = vunpack.c.l.bf16 %v479_v23  ;;  %v370_v37 = vunpack.c.h.bf16 %v479_v23  ;;  %v489_v27 = vld [vmem:[%s1022_s0 + $0x78] sm:$0xff]  }
   0x9   :  { %280 = vst.msk [vmem:[%s1025_s3 + $0x8] sm:$0xff] %vm278_vm0, %v215_v20  ;;  %v154_v38 = vmul.f32 %v534_v1, %v365_v31  ;;  %v155_v39 = vmul.f32 %v534_v1, %v366_v32  ;;  %v373_v40 = vunpack.c.l.bf16 %v480_v28  ;;  %v374_v41 = vunpack.c.h.bf16 %v480_v28  ;;  %v488_v20 = vld [vmem:[%s1022_s0 + $0x70] sm:$0xff]  }
   0xa   :  { %281 = vst.msk [vmem:[%s1025_s3 + $0x10] sm:$0xff] %vm278_vm0, %v216_v24  ;;  %v156_v42 = vmul.f32 %v534_v1, %v369_v36  ;;  %v157_v43 = vmul.f32 %v534_v1, %v370_v37  ;;  %v377_v44 = vunpack.c.l.bf16 %v481_v33  ;;  %v378_v45 = vunpack.c.h.bf16 %v481_v33 }
   0xb   :  { %282 = vst.msk [vmem:[%s1025_s3 + $0x18] sm:$0xff] %vm278_vm0, %v217_v25  ;;  %v222_v47 = vadd.f32 %v539_v3, %v154_v38  ;;  %v158_v48 = vmul.f32 %v534_v1, %v373_v40  ;;  %v223_v50 = vadd.f32 %v539_v3, %v155_v39  ;;  %v159_v51 = vmul.f32 %v534_v1, %v374_v41  ;;  %v491_v41 = vld [vmem:[%s1022_s0 + $0x88] sm:$0xff]  }
   0xc   :  { %283 = vst.msk [vmem:[%s1025_s3 + $0x20] sm:$0xff] %vm278_vm0, %v218_v29  ;;  %v224_v53 = vadd.f32 %v539_v3, %v156_v42  ;;  %v160_v54 = vmul.f32 %v534_v1, %v377_v44  ;;  %v381_v55 = vunpack.c.l.bf16 %v482_v46  ;;  %v382_v56 = vunpack.c.h.bf16 %v482_v46 }
   0xd   :  { %284 = vst.msk [vmem:[%s1025_s3 + $0x28] sm:$0xff] %vm278_vm0, %v219_v30  ;;  %v225_v57 = vadd.f32 %v539_v3, %v157_v43  ;;  %v161_v58 = vmul.f32 %v534_v1, %v378_v45  ;;  %v385_v59 = vunpack.c.l.bf16 %v483_v49  ;;  %v386_v60 = vunpack.c.h.bf16 %v483_v49 }
   0xe   :  { %285 = vst.msk [vmem:[%s1025_s3 + $0x30] sm:$0xff] %vm278_vm0, %v220_v34  ;;  %v226_v62 = vadd.f32 %v539_v3, %v158_v48  ;;  %v162_v63 = vmul.f32 %v534_v1, %v381_v55  ;;  %v389_v0 = vunpack.c.l.bf16 %v484_v52  ;;  %v227_v2 = vadd.f32 %v539_v3, %v159_v51  ;;  %v490_v34 = vld [vmem:[%s1022_s0 + $0x80] sm:$0xff]   ;;  %v492_v48 = vld [vmem:[%s1022_s0 + $0x90] sm:$0xff]   ;;  %v493_v55 = vld [vmem:[%s1022_s0 + $0x98] sm:$0xff]  }
   0xf   :  { %286 = vst.msk [vmem:[%s1025_s3 + $0x38] sm:$0xff] %vm278_vm0, %v221_v35  ;;  %v163_v4 = vmul.f32 %v534_v1, %v382_v56  ;;  %v390_v5 = vunpack.c.h.bf16 %v484_v52  ;;  %v228_v7 = vadd.f32 %v539_v3, %v160_v54  ;;  %v164_v8 = vmul.f32 %v534_v1, %v385_v59 }
  0x10   :  { %287 = vst.msk [vmem:[%s1025_s3 + $0x40] sm:$0xff] %vm278_vm0, %v222_v47  ;;  %v393_v9 = vunpack.c.l.bf16 %v485_v61  ;;  %v229_v10 = vadd.f32 %v539_v3, %v161_v58  ;;  %v165_v11 = vmul.f32 %v534_v1, %v386_v60  ;;  %v394_v12 = vunpack.c.h.bf16 %v485_v61 }
  0x11   :  { %288 = vst.msk [vmem:[%s1025_s3 + $0x48] sm:$0xff] %vm278_vm0, %v223_v50  ;;  %v230_v14 = vadd.f32 %v539_v3, %v162_v63  ;;  %v166_v15 = vmul.f32 %v534_v1, %v389_v0  ;;  %v397_v16 = vunpack.c.l.bf16 %v486_v6  ;;  %v231_v17 = vadd.f32 %v539_v3, %v163_v4 }
  0x12   :  { %289 = vst.msk [vmem:[%s1025_s3 + $0x50] sm:$0xff] %vm278_vm0, %v224_v53  ;;  %v167_v18 = vmul.f32 %v534_v1, %v390_v5  ;;  %v398_v19 = vunpack.c.h.bf16 %v486_v6  ;;  %v232_v21 = vadd.f32 %v539_v3, %v164_v8  ;;  %v168_v22 = vmul.f32 %v534_v1, %v393_v9 }
  0x13   :  { %290 = vst.msk [vmem:[%s1025_s3 + $0x58] sm:$0xff] %vm278_vm0, %v225_v57  ;;  %v401_v23 = vunpack.c.l.bf16 %v487_v13  ;;  %v233_v24 = vadd.f32 %v539_v3, %v165_v11  ;;  %v169_v25 = vmul.f32 %v534_v1, %v394_v12  ;;  %v402_v26 = vunpack.c.h.bf16 %v487_v13 }
  0x14   :  { %291 = vst.msk [vmem:[%s1025_s3 + $0x60] sm:$0xff] %vm278_vm0, %v226_v62  ;;  %v234_v28 = vadd.f32 %v539_v3, %v166_v15  ;;  %v170_v29 = vmul.f32 %v534_v1, %v397_v16  ;;  %v405_v30 = vunpack.c.l.bf16 %v488_v20  ;;  %v235_v31 = vadd.f32 %v539_v3, %v167_v18  ;;  %v494_v62 = vld [vmem:[%s1022_s0 + $0xa0] sm:$0xff]  }
  0x15   :  { %292 = vst.msk [vmem:[%s1025_s3 + $0x68] sm:$0xff] %vm278_vm0, %v227_v2  ;;  %v171_v32 = vmul.f32 %v534_v1, %v398_v19  ;;  %v406_v33 = vunpack.c.h.bf16 %v488_v20  ;;  %v236_v35 = vadd.f32 %v539_v3, %v168_v22  ;;  %v172_v36 = vmul.f32 %v534_v1, %v401_v23 }
  0x16   :  { %293 = vst.msk [vmem:[%s1025_s3 + $0x70] sm:$0xff] %vm278_vm0, %v228_v7  ;;  %v409_v37 = vunpack.c.l.bf16 %v489_v27  ;;  %v237_v38 = vadd.f32 %v539_v3, %v169_v25  ;;  %v173_v39 = vmul.f32 %v534_v1, %v402_v26  ;;  %v410_v40 = vunpack.c.h.bf16 %v489_v27  ;;  %v495_v7 = vld [vmem:[%s1022_s0 + $0xa8] sm:$0xff]  }
  0x17   :  { %294 = vst.msk [vmem:[%s1025_s3 + $0x78] sm:$0xff] %vm278_vm0, %v229_v10  ;;  %v238_v42 = vadd.f32 %v539_v3, %v170_v29  ;;  %v174_v43 = vmul.f32 %v534_v1, %v405_v30  ;;  %v413_v44 = vunpack.c.l.bf16 %v490_v34  ;;  %v239_v45 = vadd.f32 %v539_v3, %v171_v32 }
  0x18   :  { %295 = vst.msk [vmem:[%s1025_s3 + $0x80] sm:$0xff] %vm278_vm0, %v230_v14  ;;  %v175_v46 = vmul.f32 %v534_v1, %v406_v33  ;;  %v414_v47 = vunpack.c.h.bf16 %v490_v34  ;;  %v240_v49 = vadd.f32 %v539_v3, %v172_v36  ;;  %v176_v50 = vmul.f32 %v534_v1, %v409_v37  ;;  %v496_v14 = vld [vmem:[%s1022_s0 + $0xb0] sm:$0xff]  }
  0x19   :  { %296 = vst.msk [vmem:[%s1025_s3 + $0x88] sm:$0xff] %vm278_vm0, %v231_v17  ;;  %v417_v51 = vunpack.c.l.bf16 %v491_v41  ;;  %v241_v52 = vadd.f32 %v539_v3, %v173_v39  ;;  %v177_v53 = vmul.f32 %v534_v1, %v410_v40  ;;  %v418_v54 = vunpack.c.h.bf16 %v491_v41  ;;  %v853_v39 = vld [vmem:[%s1022_s0 + $0xf8] sm:$0xff]  }
  0x1a   :  { %297 = vst.msk [vmem:[%s1025_s3 + $0x90] sm:$0xff] %vm278_vm0, %v232_v21  ;;  %v242_v56 = vadd.f32 %v539_v3, %v174_v43  ;;  %v178_v57 = vmul.f32 %v534_v1, %v413_v44  ;;  %v421_v58 = vunpack.c.l.bf16 %v492_v48  ;;  %v243_v59 = vadd.f32 %v539_v3, %v175_v46  ;;  %v497_v21 = vld [vmem:[%s1022_s0 + $0xb8] sm:$0xff]   ;;  %v500_v43 = vld [vmem:[%s1022_s0 + $0xd0] sm:$0xff]  }
  0x1b   :  { %298 = vst.msk [vmem:[%s1025_s3 + $0x98] sm:$0xff] %vm278_vm0, %v233_v24  ;;  %v179_v60 = vmul.f32 %v534_v1, %v414_v47  ;;  %v422_v61 = vunpack.c.h.bf16 %v492_v48  ;;  %v244_v63 = vadd.f32 %v539_v3, %v176_v50  ;;  %v180_v0 = vmul.f32 %v534_v1, %v417_v51  ;;  %v501_v50 = vld [vmem:[%s1022_s0 + $0xd8] sm:$0xff]  }
  0x1c   :  { %299 = vst.msk [vmem:[%s1025_s3 + $0xa0] sm:$0xff] %vm278_vm0, %v234_v28  ;;  %v425_v2 = vunpack.c.l.bf16 %v493_v55  ;;  %v245_v4 = vadd.f32 %v539_v3, %v177_v53  ;;  %v181_v5 = vmul.f32 %v534_v1, %v418_v54  ;;  %v426_v6 = vunpack.c.h.bf16 %v493_v55  ;;  %v498_v28 = vld [vmem:[%s1022_s0 + $0xc0] sm:$0xff]  }
  0x1d   :  { %300 = vst.msk [vmem:[%s1025_s3 + $0xa8] sm:$0xff] %vm278_vm0, %v235_v31  ;;  %v246_v8 = vadd.f32 %v539_v3, %v178_v57  ;;  %v182_v9 = vmul.f32 %v534_v1, %v421_v58  ;;  %v429_v10 = vunpack.c.l.bf16 %v494_v62  ;;  %v247_v11 = vadd.f32 %v539_v3, %v179_v60  ;;  %v502_v58 = vld [vmem:[%s1022_s0 + $0xe0] sm:$0xff]  }
  0x1e   :  { %301 = vst.msk [vmem:[%s1025_s3 + $0xb0] sm:$0xff] %vm278_vm0, %v236_v35  ;;  %v183_v12 = vmul.f32 %v534_v1, %v422_v61  ;;  %v430_v13 = vunpack.c.h.bf16 %v494_v62  ;;  %v248_v15 = vadd.f32 %v539_v3, %v180_v0  ;;  %v184_v16 = vmul.f32 %v534_v1, %v425_v2  ;;  %v499_v35 = vld [vmem:[%s1022_s0 + $0xc8] sm:$0xff]  }
  0x1f   :  { %302 = vst.msk [vmem:[%s1025_s3 + $0xb8] sm:$0xff] %vm278_vm0, %v237_v38  ;;  %v433_v17 = vunpack.c.l.bf16 %v495_v7  ;;  %v249_v18 = vadd.f32 %v539_v3, %v181_v5  ;;  %v185_v19 = vmul.f32 %v534_v1, %v426_v6  ;;  %v434_v20 = vunpack.c.h.bf16 %v495_v7 }
  0x20   :  { %303 = vst.msk [vmem:[%s1025_s3 + $0xc0] sm:$0xff] %vm278_vm0, %v238_v42  ;;  %v250_v22 = vadd.f32 %v539_v3, %v182_v9  ;;  %v186_v23 = vmul.f32 %v534_v1, %v429_v10  ;;  %v437_v24 = vunpack.c.l.bf16 %v496_v14  ;;  %v251_v25 = vadd.f32 %v539_v3, %v183_v12  ;;  %v504_v12 = vld [vmem:[%s1022_s0 + $0xf0] sm:$0xff]  }
  0x21   :  { %304 = vst.msk [vmem:[%s1025_s3 + $0xc8] sm:$0xff] %vm278_vm0, %v239_v45  ;;  %v187_v26 = vmul.f32 %v534_v1, %v430_v13  ;;  %v438_v27 = vunpack.c.h.bf16 %v496_v14  ;;  %v252_v29 = vadd.f32 %v539_v3, %v184_v16  ;;  %v188_v30 = vmul.f32 %v534_v1, %v433_v17 }
  0x22   :  { %305 = vst.msk [vmem:[%s1025_s3 + $0xd0] sm:$0xff] %vm278_vm0, %v240_v49  ;;  %v441_v31 = vunpack.c.l.bf16 %v497_v21  ;;  %v253_v32 = vadd.f32 %v539_v3, %v185_v19  ;;  %v189_v33 = vmul.f32 %v534_v1, %v434_v20  ;;  %v442_v34 = vunpack.c.h.bf16 %v497_v21 }
  0x23   :  { %306 = vst.msk [vmem:[%s1025_s3 + $0xd8] sm:$0xff] %vm278_vm0, %v241_v52  ;;  %v254_v36 = vadd.f32 %v539_v3, %v186_v23  ;;  %v190_v37 = vmul.f32 %v534_v1, %v437_v24  ;;  %v445_v38 = vunpack.c.l.bf16 %v498_v28  ;;  %v255_v40 = vadd.f32 %v539_v3, %v187_v26 }
  0x24   :  { %307 = vst.msk [vmem:[%s1025_s3 + $0xe0] sm:$0xff] %vm278_vm0, %v242_v56  ;;  %v191_v41 = vmul.f32 %v534_v1, %v438_v27  ;;  %v446_v42 = vunpack.c.h.bf16 %v498_v28  ;;  %v256_v44 = vadd.f32 %v539_v3, %v188_v30  ;;  %v192_v45 = vmul.f32 %v534_v1, %v441_v31 }
  0x25   :  { %308 = vst.msk [vmem:[%s1025_s3 + $0xe8] sm:$0xff] %vm278_vm0, %v243_v59  ;;  %v449_v46 = vunpack.c.l.bf16 %v499_v35  ;;  %v257_v47 = vadd.f32 %v539_v3, %v189_v33  ;;  %v193_v48 = vmul.f32 %v534_v1, %v442_v34  ;;  %v450_v49 = vunpack.c.h.bf16 %v499_v35 }
  0x26   :  { %309 = vst.msk [vmem:[%s1025_s3 + $0xf0] sm:$0xff] %vm278_vm0, %v244_v63  ;;  %v474_v51 = vunpack.c.h.bf16 %v853_v39  ;;  %v258_v52 = vadd.f32 %v539_v3, %v190_v37  ;;  %v194_v53 = vmul.f32 %v534_v1, %v445_v38  ;;  %v453_v54 = vunpack.c.l.bf16 %v500_v43 }
  0x27   :  { %310 = vst.msk [vmem:[%s1025_s3 + $0xf8] sm:$0xff] %vm278_vm0, %v245_v4  ;;  %v259_v55 = vadd.f32 %v539_v3, %v191_v41  ;;  %v195_v56 = vmul.f32 %v534_v1, %v446_v42  ;;  %v454_v57 = vunpack.c.h.bf16 %v500_v43  ;;  %v260_v60 = vadd.f32 %v539_v3, %v192_v45  ;;  %v503_v4 = vld [vmem:[%s1022_s0 + $0xe8] sm:$0xff]  }
  0x28   :  { %311 = vst.msk [vmem:[%s1025_s3 + $0x100] sm:$0xff] %vm278_vm0, %v246_v8  ;;  %v209_v59 = vmul.f32 %v534_v1, %v474_v51  ;;  %v196_v61 = vmul.f32 %v534_v1, %v449_v46  ;;  %v457_v62 = vunpack.c.l.bf16 %v501_v50  ;;  %v261_v63 = vadd.f32 %v539_v3, %v193_v48 }
  0x29   :  { %312 = vst.msk [vmem:[%s1025_s3 + $0x108] sm:$0xff] %vm278_vm0, %v247_v11  ;;  %v197_v0 = vmul.f32 %v534_v1, %v450_v49  ;;  %v458_v2 = vunpack.c.h.bf16 %v501_v50  ;;  %v262_v6 = vadd.f32 %v539_v3, %v194_v53  ;;  %v198_v7 = vmul.f32 %v534_v1, %v453_v54 }
  0x2a   :  { %313 = vst.msk [vmem:[%s1025_s3 + $0x110] sm:$0xff] %vm278_vm0, %v248_v15  ;;  %v277_v5 = vadd.f32 %v539_v3, %v209_v59  ;;  %v461_v8 = vunpack.c.l.bf16 %v502_v58  ;;  %v263_v9 = vadd.f32 %v539_v3, %v195_v56  ;;  %v199_v10 = vmul.f32 %v534_v1, %v454_v57 }
  0x2b   :  { %314 = vst.msk [vmem:[%s1025_s3 + $0x118] sm:$0xff] %vm278_vm0, %v249_v18  ;;  %v462_v11 = vunpack.c.h.bf16 %v502_v58  ;;  %v264_v13 = vadd.f32 %v539_v3, %v196_v61  ;;  %v200_v14 = vmul.f32 %v534_v1, %v457_v62  ;;  %v465_v15 = vunpack.c.l.bf16 %v503_v4 }
  0x2c   :  { %315 = vst.msk [vmem:[%s1025_s3 + $0x120] sm:$0xff] %vm278_vm0, %v250_v22  ;;  %v265_v16 = vadd.f32 %v539_v3, %v197_v0  ;;  %v201_v17 = vmul.f32 %v534_v1, %v458_v2  ;;  %v466_v18 = vunpack.c.h.bf16 %v503_v4  ;;  %v266_v19 = vadd.f32 %v539_v3, %v198_v7 }
  0x2d   :  { %316 = vst.msk [vmem:[%s1025_s3 + $0x128] sm:$0xff] %vm278_vm0, %v251_v25  ;;  %v202_v20 = vmul.f32 %v534_v1, %v461_v8  ;;  %v469_v21 = vunpack.c.l.bf16 %v504_v12  ;;  %v267_v22 = vadd.f32 %v539_v3, %v199_v10  ;;  %v203_v23 = vmul.f32 %v534_v1, %v462_v11 }
  0x2e   :  { %317 = vst.msk [vmem:[%s1025_s3 + $0x130] sm:$0xff] %vm278_vm0, %v252_v29  ;;  %v470_v24 = vunpack.c.h.bf16 %v504_v12  ;;  %v268_v25 = vadd.f32 %v539_v3, %v200_v14  ;;  %v204_v26 = vmul.f32 %v534_v1, %v465_v15  ;;  %v473_v27 = vunpack.c.l.bf16 %v853_v39 }
  0x2f   :  { %318 = vst.msk [vmem:[%s1025_s3 + $0x138] sm:$0xff] %vm278_vm0, %v253_v32  ;;  %v269_v28 = vadd.f32 %v539_v3, %v201_v17  ;;  %v205_v29 = vmul.f32 %v534_v1, %v466_v18  ;;  %v270_v30 = vadd.f32 %v539_v3, %v202_v20  ;;  %v206_v31 = vmul.f32 %v534_v1, %v469_v21 }
  0x30   :  { %319 = vst.msk [vmem:[%s1025_s3 + $0x140] sm:$0xff] %vm278_vm0, %v254_v36  ;;  %v271_v32 = vadd.f32 %v539_v3, %v203_v23  ;;  %v207_v33 = vmul.f32 %v534_v1, %v470_v24  ;;  %v272_v34 = vadd.f32 %v539_v3, %v204_v26  ;;  %v208_v35 = vmul.f32 %v534_v1, %v473_v27 }
  0x31   :  { %320 = vst.msk [vmem:[%s1025_s3 + $0x148] sm:$0xff] %vm278_vm0, %v255_v40  ;;  %v273_v36 = vadd.f32 %v539_v3, %v205_v29  ;;  %v274_v37 = vadd.f32 %v539_v3, %v206_v31 }
  0x32   :  { %321 = vst.msk [vmem:[%s1025_s3 + $0x150] sm:$0xff] %vm278_vm0, %v256_v44  ;;  %v275_v1 = vadd.f32 %v539_v3, %v207_v33  ;;  %v276_v38 = vadd.f32 %v539_v3, %v208_v35 }
  0x33   :  { %322 = vst.msk [vmem:[%s1025_s3 + $0x158] sm:$0xff] %vm278_vm0, %v257_v47 }
  0x34   :  { %323 = vst.msk [vmem:[%s1025_s3 + $0x160] sm:$0xff] %vm278_vm0, %v258_v52 }
  0x35   :  { %324 = vst.msk [vmem:[%s1025_s3 + $0x168] sm:$0xff] %vm278_vm0, %v259_v55 }
  0x36   :  { %325 = vst.msk [vmem:[%s1025_s3 + $0x170] sm:$0xff] %vm278_vm0, %v260_v60 }
  0x37   :  { %326 = vst.msk [vmem:[%s1025_s3 + $0x178] sm:$0xff] %vm278_vm0, %v261_v63 }
  0x38   :  { %327 = vst.msk [vmem:[%s1025_s3 + $0x180] sm:$0xff] %vm278_vm0, %v262_v6 }
  0x39   :  { %328 = vst.msk [vmem:[%s1025_s3 + $0x188] sm:$0xff] %vm278_vm0, %v263_v9 }
  0x3a   :  { %329 = vst.msk [vmem:[%s1025_s3 + $0x190] sm:$0xff] %vm278_vm0, %v264_v13 }
  0x3b   :  { %330 = vst.msk [vmem:[%s1025_s3 + $0x198] sm:$0xff] %vm278_vm0, %v265_v16 }
  0x3c   :  { %331 = vst.msk [vmem:[%s1025_s3 + $0x1a0] sm:$0xff] %vm278_vm0, %v266_v19 }
  0x3d   :  { %332 = vst.msk [vmem:[%s1025_s3 + $0x1a8] sm:$0xff] %vm278_vm0, %v267_v22 }
  0x3e   :  { %333 = vst.msk [vmem:[%s1025_s3 + $0x1b0] sm:$0xff] %vm278_vm0, %v268_v25 }
  0x3f   :  { %334 = vst.msk [vmem:[%s1025_s3 + $0x1b8] sm:$0xff] %vm278_vm0, %v269_v28 }
  0x40   :  { %335 = vst.msk [vmem:[%s1025_s3 + $0x1c0] sm:$0xff] %vm278_vm0, %v270_v30 }
  0x41   :  { %336 = vst.msk [vmem:[%s1025_s3 + $0x1c8] sm:$0xff] %vm278_vm0, %v271_v32 }
  0x42   :  { %337 = vst.msk [vmem:[%s1025_s3 + $0x1d0] sm:$0xff] %vm278_vm0, %v272_v34 }
  0x43   :  { %338 = vst.msk [vmem:[%s1025_s3 + $0x1d8] sm:$0xff] %vm278_vm0, %v273_v36 }
  0x44   :  { %339 = vst.msk [vmem:[%s1025_s3 + $0x1e0] sm:$0xff] %vm278_vm0, %v274_v37 }
  0x45   :  { %340 = vst.msk [vmem:[%s1025_s3 + $0x1e8] sm:$0xff] %vm278_vm0, %v275_v1 }
  0x46   :  { %341 = vst.msk [vmem:[%s1025_s3 + $0x1f0] sm:$0xff] %vm278_vm0, %v276_v38 }
  0x47   :  { %342 = vst.msk [vmem:[%s1025_s3 + $0x1f8] sm:$0xff] %vm278_vm0, %v277_v5 }

// kernel: unet_up_block.5
= control target key start
LH: loop header
LB: loop body
LE: loop exit
PB: predicated region body
PF: predicated region fallthrough
CT: control target
= control target key end

     0   :  { %s4740_s26 = smov 0   ;;  %s4742_s2 = smov 0   ;;  %s6992_s0 = inlined_call_operand.vmem [shape: bf16[2,16,16,9], index: 0, kind: input, shape index: {}, may-alias: {0,1,2}]   ;;  %s6993_s1 = inlined_call_operand.vmem [shape: bf16[2,16,16,9], index: 1, kind: input, shape index: {}, may-alias: {0,1,2}]   ;;  %s6994_s2 = inlined_call_operand.vmem [shape: bf16[2,16,16,9], index: 2, kind: input, shape index: {}, may-alias: {0,1,2}]   ;;  %s6995_s3 = inlined_call_operand.vmem [shape: bf16[81,8], index: 3, kind: input, shape index: {}]   ;;  %s6996_s4 = inlined_call_operand.vmem [shape: f32[1,8], index: 4, kind: input, shape index: {}]   ;;  %s6997_s5 = inlined_call_operand.vmem [shape: f32[1,9], index: 5, kind: input, shape index: {}]   ;;  %s6998_s6 = inlined_call_operand.vmem [shape: f32[1,9], index: 6, kind: input, shape index: {}]   ;;  %s6999_s7 = inlined_call_operand.vmem [shape: bf16[2,16,16,8], index: 7, kind: output, shape index: {0}]   ;;  %s7000_s8 = inlined_call_operand.vmem [shape: f32[2,2,8], index: 8, kind: output, shape index: {1}]  }
   0x1   :  { %s4744_s27 = smov 0  }
   0x2 LB: > { %s31_s28 = sadd.s32 1, %s4679_s2  ;;  %p3700_p0 = scmp.ge.s32.totalorder %s4683_s27, 1  ;;  %s4683_s27 = sphi %s4744_s27, %s19_s27   ;;  %s4679_s2 = sphi %s4742_s2, %s7051_s2   ;;  %s4675_s26 = sphi %s4740_s26, %s7050_s26  }
   0x3   : > { %p33_p1 = scmp.ge.s32.totalorder %s31_s28, 2  ;;  %p353_p2 = scmp.lt.s32.totalorder %s4683_s27, 3 }
   0x5   : > { %s7053_s28 = smov (%p33_p1, %s31_s28), 0  ;;  %p354_p3 = pnand %p3700_p0, %p353_p2 }
   0x7   : > { %357 = sbr.rel (%p354_p3) target bundleno = 755 (0x2f3), region = 48 }
   0xc   : > { %vm550_vm0 = vcmask 72704   ;;  %p429_p4 = scmp.lt.s32.totalorder %s4675_s26, 1  ;;  %v4685_v0 = vmov 0.0   ;;  %v4779_v1 = vld [vmem:[%s6997_s5] ss:$0 sm:$0xff]  ;;  %s4686_s15 = smov 9  }
   0xd   : > { %551 = vst.msk [vmem:[#allocation2 + $0x1] sm:$0xff] %vm550_vm0, %v4685_v0  ;;  %v4787_v5 = vld [vmem:[%s6998_s6] ss:$0 sm:$0xff]  ;;  %vm493_vm1 = vcmask 65536   ;;  %s4687_s16 = smov 18   ;;  %s4688_s17 = smov 27  }
   0xe   : > { %552 = vst.msk [vmem:[#allocation2 + $0x9] sm:$0xff] %vm550_vm0, %v4685_v0  ;;  %s7055_s26 = smov (!%p429_p4, %s4675_s26), 1  ;;  %s4689_s18 = smov 36   ;;  %vm2078_vm2 = vcmask 146432   ;;  %vm2111_vm3 = vcmask 220160   ;;  %vm2144_vm4 = vcmask 293888  }
   0xf   : > { %570 = vst.msk [vmem:[#allocation2 + $0x199] sm:$0xff] %vm550_vm0, %v4685_v0  ;;  %s3748_s29 = sshll.u32 %s7055_s26, 7  ;;  %s4690_s19 = smov 45   ;;  %vm2422_vm5 = vcmask 1040384   ;;  %vm2177_vm6 = vcmask 367616   ;;  %vm2210_vm7 = vcmask 441344  }
  0x10   : > { %571 = vst.msk [vmem:[#allocation2 + $0x1a1] sm:$0xff] %vm550_vm0, %v4685_v0  ;;  %s4774_s10 = scalar_lea.vmem %s6992_s0, %s3748_s29  ;;  %s4691_s20 = smov 54   ;;  %vm2243_vm8 = vcmask 515072   ;;  %vm2276_vm9 = vcmask 588800   ;;  %vm2373_vm10 = vcmask 662528  }
  0x11   : > { %v3824_v2 = vld [vmem:[%s4774_s10 + $0x18] sm:$0xff]   ;;  %v3822_v3 = vld [vmem:[%s4774_s10 + $0x8] sm:$0xff]   ;;  %v3759_v4 = vld [vmem:[%s4774_s10] sm:$0xff]   ;;  %512 = vst.msk [vmem:[#allocation2 + $0x11] sm:$0x1] %vm493_vm1, %v4685_v0  ;;  %s4692_s21 = smov 63  }
  0x12   : > { %v3772_v6 = vunpack.c.l.bf16 %v3824_v2  ;;  %v3773_v7 = vunpack.c.h.bf16 %v3824_v2  ;;  %v3764_v8 = vunpack.c.l.bf16 %v3822_v3  ;;  %v3765_v9 = vunpack.c.h.bf16 %v3822_v3  ;;  %v3825_v10 = vld [vmem:[%s4774_s10 + $0x20] sm:$0xff]   ;;  %v3823_v24 = vld [vmem:[%s4774_s10 + $0x10] sm:$0xff]   ;;  %v3826_v25 = vld [vmem:[%s4774_s10 + $0x28] sm:$0xff]   ;;  %494 = vst.msk [vmem:[#allocation2] sm:$0x1] %vm493_vm1, %v4685_v0  ;;  %s4693_s22 = smov 72  }
  0x13   : > { %v3760_v12 = vunpack.c.l.bf16 %v3759_v4  ;;  %v3761_v13 = vunpack.c.h.bf16 %v3759_v4  ;;  %v3776_v14 = vunpack.c.l.bf16 %v3825_v10  ;;  %v3777_v15 = vunpack.c.h.bf16 %v3825_v10  ;;  %v3828_v30 = vld [vmem:[%s4774_s10 + $0x38] sm:$0xff]   ;;  %v3827_v31 = vld [vmem:[%s4774_s10 + $0x30] sm:$0xff]   ;;  %v3829_v50 = vld [vmem:[%s4774_s10 + $0x40] sm:$0xff]   ;;  %495 = vst.msk [vmem:[#allocation2 + $0x18] sm:$0x1] %vm493_vm1, %v4685_v0 }
  0x14   : > { %v765_v11 = vld [vmem:[#allocation2 + $0x1] sm:$0xff]  ;;  %v642_v17 = vmul.f32 %v4779_v1, %v3772_v6  ;;  %v643_v18 = vmul.f32 %v4779_v1, %v3773_v7  ;;  %v638_v19 = vmul.f32 %v4779_v1, %v3764_v8  ;;  %v639_v20 = vmul.f32 %v4779_v1, %v3765_v9  ;;  %v3831_v51 = vld [vmem:[%s4774_s10 + $0x50] sm:$0xff]   ;;  %v3832_v4 = vld [vmem:[%s4774_s10 + $0x58] sm:$0xff]   ;;  %496 = vst.msk [vmem:[#allocation2 + $0x30] sm:$0x1] %vm493_vm1, %v4685_v0 }
  0x15   : > { %v766_v16 = vld [vmem:[#allocation2 + $0x9] sm:$0xff]  ;;  %v636_v22 = vmul.f32 %v4779_v1, %v3760_v12  ;;  %v637_v23 = vmul.f32 %v4779_v1, %v3761_v13  ;;  %v644_v29 = vmul.f32 %v4779_v1, %v3776_v14  ;;  %v645_v34 = vmul.f32 %v4779_v1, %v3777_v15  ;;  %497 = vst.msk [vmem:[#allocation2 + $0x48] sm:$0x1] %vm493_vm1, %v4685_v0 }
  0x16   : > { %v3889_v21 = vpack.i.bf16 %v766_v16, %v765_v11  ;;  %v674_v26 = vadd.f32 %v4787_v5, %v642_v17  ;;  %v675_v27 = vadd.f32 %v4787_v5, %v643_v18  ;;  %v670_v28 = vadd.f32 %v4787_v5, %v638_v19  ;;  %v3830_v57 = vld [vmem:[%s4774_s10 + $0x48] sm:$0xff]   ;;  %498 = vst.msk [vmem:[#allocation2 + $0x60] sm:$0x1] %vm493_vm1, %v4685_v0 }
  0x17   : > { %v671_v32 = vadd.f32 %v4787_v5, %v639_v20  ;;  %v668_v33 = vadd.f32 %v4787_v5, %v636_v22  ;;  %v3768_v35 = vunpack.c.l.bf16 %v3823_v24  ;;  %v3769_v36 = vunpack.c.h.bf16 %v3823_v24  ;;  %v3834_v15 = vld [vmem:[%s4774_s10 + $0x68] sm:$0xff]   ;;  %499 = vst.msk [vmem:[#allocation2 + $0x78] sm:$0x1] %vm493_vm1, %v4685_v0 }
  0x18   : > { %3890 = vrot.lane.b32.xlu0 %v3889_v21, %s4686_s15  ;;  %707 = vst.msk [vmem:[#allocation2 + $0x61] sm:$0xff] %vm550_vm0, %v674_v26  ;;  %v3780_v37 = vunpack.c.l.bf16 %v3826_v25  ;;  %v3781_v38 = vunpack.c.h.bf16 %v3826_v25  ;;  %v669_v39 = vadd.f32 %v4787_v5, %v637_v23  ;;  %v3788_v40 = vunpack.c.l.bf16 %v3828_v30  ;;  %v3833_v25 = vld [vmem:[%s4774_s10 + $0x60] sm:$0xff]  }
  0x19   : > { %708 = vst.msk [vmem:[#allocation2 + $0x69] sm:$0xff] %vm550_vm0, %v675_v27  ;;  %v3789_v41 = vunpack.c.h.bf16 %v3828_v30  ;;  %v3784_v42 = vunpack.c.l.bf16 %v3827_v31  ;;  %v676_v43 = vadd.f32 %v4787_v5, %v644_v29  ;;  %v640_v44 = vmul.f32 %v4779_v1, %v3768_v35  ;;  %v3835_v35 = vld [vmem:[%s4774_s10 + $0x70] sm:$0xff]  }
  0x1a   : > { %703 = vst.msk [vmem:[#allocation2 + $0x31] sm:$0xff] %vm550_vm0, %v670_v28  ;;  %v641_v45 = vmul.f32 %v4779_v1, %v3769_v36  ;;  %v646_v46 = vmul.f32 %v4779_v1, %v3780_v37  ;;  %v677_v47 = vadd.f32 %v4787_v5, %v645_v34  ;;  %v647_v48 = vmul.f32 %v4779_v1, %v3781_v38 }
  0x1b   : > { %704 = vst.msk [vmem:[#allocation2 + $0x39] sm:$0xff] %vm550_vm0, %v671_v32  ;;  %v3785_v49 = vunpack.c.h.bf16 %v3827_v31  ;;  %v672_v52 = vadd.f32 %v4787_v5, %v640_v44  ;;  %v650_v53 = vmul.f32 %v4779_v1, %v3788_v40  ;;  %v651_v55 = vmul.f32 %v4779_v1, %v3789_v41 }
  0x1c   : > { %701 = vst.msk [vmem:[#allocation2 + $0x19] sm:$0xff] %vm550_vm0, %v668_v33  ;;  %v673_v54 = vadd.f32 %v4787_v5, %v641_v45  ;;  %v648_v56 = vmul.f32 %v4779_v1, %v3784_v42  ;;  %v678_v58 = vadd.f32 %v4787_v5, %v646_v46  ;;  %v3792_v59 = vunpack.c.l.bf16 %v3829_v50 }
  0x1d   : > { %702 = vst.msk [vmem:[#allocation2 + $0x21] sm:$0xff] %vm550_vm0, %v669_v39  ;;  %v3793_v60 = vunpack.c.h.bf16 %v3829_v50  ;;  %v3800_v61 = vunpack.c.l.bf16 %v3831_v51  ;;  %v679_v63 = vadd.f32 %v4787_v5, %v647_v48  ;;  %v649_v2 = vmul.f32 %v4779_v1, %v3785_v49 }
  0x1e   : > { %709 = vst.msk [vmem:[#allocation2 + $0x79] sm:$0xff] %vm550_vm0, %v676_v43  ;;  %v3801_v3 = vunpack.c.h.bf16 %v3831_v51  ;;  %v682_v7 = vadd.f32 %v4787_v5, %v650_v53  ;;  %v652_v8 = vmul.f32 %v4779_v1, %v3792_v59  ;;  %v3796_v9 = vunpack.c.l.bf16 %v3830_v57 }
  0x1f   : > { %v773_v62 = vld [vmem:[#allocation2 + $0x61] sm:$0xff]  ;;  %710 = vst.msk [vmem:[#allocation2 + $0x81] sm:$0xff] %vm550_vm0, %v677_v47  ;;  %v683_v12 = vadd.f32 %v4787_v5, %v651_v55  ;;  %v653_v13 = vmul.f32 %v4779_v1, %v3793_v60  ;;  %v3797_v14 = vunpack.c.h.bf16 %v3830_v57  ;;  %v680_v17 = vadd.f32 %v4787_v5, %v648_v56 }
  0x20   : > { %v774_v6 = vld [vmem:[#allocation2 + $0x69] sm:$0xff]  ;;  %705 = vst.msk [vmem:[#allocation2 + $0x49] sm:$0xff] %vm550_vm0, %v672_v52  ;;  %v656_v18 = vmul.f32 %v4779_v1, %v3800_v61  ;;  %v3804_v19 = vunpack.c.l.bf16 %v3832_v4  ;;  %v681_v22 = vadd.f32 %v4787_v5, %v649_v2  ;;  %v657_v23 = vmul.f32 %v4779_v1, %v3801_v3 }
  0x21   : > { %v4838_v10 = vpack.i.bf16 %v774_v6, %v773_v62  ;;  %v769_v11 = vld [vmem:[#allocation2 + $0x31] sm:$0xff]  ;;  %706 = vst.msk [vmem:[#allocation2 + $0x51] sm:$0xff] %vm550_vm0, %v673_v54  ;;  %v3805_v24 = vunpack.c.h.bf16 %v3832_v4  ;;  %v684_v27 = vadd.f32 %v4787_v5, %v652_v8  ;;  %v654_v28 = vmul.f32 %v4779_v1, %v3796_v9 }
  0x22   : > { %v770_v16 = vld [vmem:[#allocation2 + $0x39] sm:$0xff]  ;;  %711 = vst.msk [vmem:[#allocation2 + $0x91] sm:$0xff] %vm550_vm0, %v678_v58  ;;  %v3812_v29 = vunpack.c.l.bf16 %v3834_v15  ;;  %v685_v32 = vadd.f32 %v4787_v5, %v653_v13  ;;  %v655_v33 = vmul.f32 %v4779_v1, %v3797_v14  ;;  %v3813_v34 = vunpack.c.h.bf16 %v3834_v15 }
  0x23   : > { %3910 = vrot.lane.b32.xlu2 %v4838_v10, %s4686_s15  ;;  %v4849_v20 = vpack.i.bf16 %v770_v16, %v769_v11  ;;  %v767_v21 = vld [vmem:[#allocation2 + $0x19] sm:$0xff]  ;;  %712 = vst.msk [vmem:[#allocation2 + $0x99] sm:$0xff] %vm550_vm0, %v679_v63  ;;  %v688_v37 = vadd.f32 %v4787_v5, %v656_v18  ;;  %v658_v38 = vmul.f32 %v4779_v1, %v3804_v19  ;;  %v3808_v39 = vunpack.c.l.bf16 %v3833_v25 }
  0x24   : > { %v768_v26 = vld [vmem:[#allocation2 + $0x21] sm:$0xff]  ;;  %715 = vst.msk [vmem:[#allocation2 + $0xc1] sm:$0xff] %vm550_vm0, %v682_v7  ;;  %v689_v42 = vadd.f32 %v4787_v5, %v657_v23  ;;  %v659_v43 = vmul.f32 %v4779_v1, %v3805_v24  ;;  %v3809_v44 = vunpack.c.h.bf16 %v3833_v25  ;;  %v686_v46 = vadd.f32 %v4787_v5, %v654_v28 }
  0x25   : > { %3900 = vrot.lane.b32.xlu1 %v4849_v20, %s4686_s15  ;;  %v4860_v30 = vpack.i.bf16 %v768_v26, %v767_v21  ;;  %v775_v31 = vld [vmem:[#allocation2 + $0x79] sm:$0xff]  ;;  %716 = vst.msk [vmem:[#allocation2 + $0xc9] sm:$0xff] %vm550_vm0, %v683_v12  ;;  %v662_v47 = vmul.f32 %v4779_v1, %v3812_v29  ;;  %v3816_v48 = vunpack.c.l.bf16 %v3835_v35  ;;  %v687_v51 = vadd.f32 %v4787_v5, %v655_v33 }
  0x26   : > { %v776_v36 = vld [vmem:[#allocation2 + $0x81] sm:$0xff]  ;;  %713 = vst.msk [vmem:[#allocation2 + $0xa9] sm:$0xff] %vm550_vm0, %v680_v17  ;;  %v663_v52 = vmul.f32 %v4779_v1, %v3813_v34  ;;  %v3817_v53 = vunpack.c.h.bf16 %v3835_v35  ;;  %v690_v55 = vadd.f32 %v4787_v5, %v658_v38  ;;  %v660_v56 = vmul.f32 %v4779_v1, %v3808_v39  ;;  %v798_v38 = vld [vmem:[#allocation2 + $0xa] sm:$0xff] }
  0x27   : > { %3895 = vrot.lane.b32.xlu0 %v4860_v30, %s4686_s15  ;;  %v4871_v40 = vpack.i.bf16 %v776_v36, %v775_v31  ;;  %v771_v41 = vld [vmem:[#allocation2 + $0x49] sm:$0xff]  ;;  %714 = vst.msk [vmem:[#allocation2 + $0xb1] sm:$0xff] %vm550_vm0, %v681_v22  ;;  %v691_v58 = vadd.f32 %v4787_v5, %v659_v43  ;;  %v661_v59 = vmul.f32 %v4779_v1, %v3809_v44 }
  0x28   : > { %v772_v45 = vld [vmem:[#allocation2 + $0x51] sm:$0xff]  ;;  %717 = vst.msk [vmem:[#allocation2 + $0xd9] sm:$0xff] %vm550_vm0, %v684_v27  ;;  %v694_v62 = vadd.f32 %v4787_v5, %v662_v47  ;;  %v664_v63 = vmul.f32 %v4779_v1, %v3816_v48  ;;  %v695_v2 = vadd.f32 %v4787_v5, %v663_v52  ;;  %v665_v3 = vmul.f32 %v4779_v1, %v3817_v53  ;;  %v807_v53 = vld [vmem:[#allocation2 + $0x7a] sm:$0xff] }
  0x29   : > { %v4879_v49 = vpack.i.bf16 %v772_v45, %v771_v41  ;;  %v777_v50 = vld [vmem:[#allocation2 + $0x91] sm:$0xff]  ;;  %718 = vst.msk [vmem:[#allocation2 + $0xe1] sm:$0xff] %vm550_vm0, %v685_v32  ;;  %v692_v7 = vadd.f32 %v4787_v5, %v660_v56  ;;  %v693_v9 = vadd.f32 %v4787_v5, %v661_v59  ;;  %v799_v41 = vld [vmem:[#allocation2 + $0x1a] sm:$0xff] }
  0x2a   : > { %v778_v54 = vld [vmem:[#allocation2 + $0x99] sm:$0xff]  ;;  %721 = vst.msk [vmem:[#allocation2 + $0x109] sm:$0xff] %vm550_vm0, %v688_v37  ;;  %v696_v13 = vadd.f32 %v4787_v5, %v664_v63  ;;  %v697_v15 = vadd.f32 %v4787_v5, %v665_v3  ;;  %v797_v37 = vld [vmem:[#allocation2 + $0x2] sm:$0xff]  ;;  %v803_v44 = vld [vmem:[#allocation2 + $0x4a] sm:$0xff] }
  0x2b   : > { %3915 = vrot.lane.b32.xlu2 %v4871_v40, %s4686_s15  ;;  %v4889_v57 = vpack.i.bf16 %v778_v54, %v777_v50  ;;  %722 = vst.msk [vmem:[#allocation2 + $0x111] sm:$0xff] %vm550_vm0, %v689_v42  ;;  %v781_v60 = vld [vmem:[#allocation2 + $0xc1] sm:$0xff]  ;;  %v3969_v39 = vpack.i.bf16 %v798_v38, %v797_v37  ;;  %v801_v42 = vld [vmem:[#allocation2 + $0x32] sm:$0xff] }
  0x2c   : > { %v782_v61 = vld [vmem:[#allocation2 + $0xc9] sm:$0xff]  ;;  %719 = vst.msk [vmem:[#allocation2 + $0xf1] sm:$0xff] %vm550_vm0, %v686_v46  ;;  %v3836_v38 = vld [vmem:[%s4774_s10 + $0x78] sm:$0xff]  }
  0x2d   : > { %3905 = vrot.lane.b32.xlu1 %v4879_v49, %s4686_s15  ;;  %720 = vst.msk [vmem:[#allocation2 + $0xf9] sm:$0xff] %vm550_vm0, %v687_v51  ;;  %v779_v4 = vld [vmem:[#allocation2 + $0xa9] sm:$0xff]  ;;  %v4906_v8 = vpack.i.bf16 %v782_v61, %v781_v60 }
  0x2e   : > { %v780_v6 = vld [vmem:[#allocation2 + $0xb1] sm:$0xff]  ;;  %723 = vst.msk [vmem:[#allocation2 + $0x121] sm:$0xff] %vm550_vm0, %v690_v55  ;;  %v805_v51 = vld [vmem:[#allocation2 + $0x62] sm:$0xff] }
  0x2f   : > { %3920 = vrot.lane.b32.xlu0 %v4889_v57, %s4686_s15  ;;  %724 = vst.msk [vmem:[#allocation2 + $0x129] sm:$0xff] %vm550_vm0, %v691_v58  ;;  %v783_v11 = vld [vmem:[#allocation2 + $0xd9] sm:$0xff]  ;;  %v4912_v14 = vpack.i.bf16 %v780_v6, %v779_v4  ;;  %v811_v61 = vld [vmem:[#allocation2 + $0xaa] sm:$0xff]  ;;  %v813_v63 = vld [vmem:[#allocation2 + $0xc2] sm:$0xff] }
  0x30   : > { %v784_v12 = vld [vmem:[#allocation2 + $0xe1] sm:$0xff]  ;;  %727 = vst.msk [vmem:[#allocation2 + $0x151] sm:$0xff] %vm550_vm0, %v694_v62  ;;  %v809_v55 = vld [vmem:[#allocation2 + $0x92] sm:$0xff] }
  0x31   : > { %728 = vst.msk [vmem:[#allocation2 + $0x159] sm:$0xff] %vm550_vm0, %v695_v2  ;;  %v4919_v16 = vpack.i.bf16 %v784_v12, %v783_v11  ;;  %v787_v17 = vld [vmem:[#allocation2 + $0x109] sm:$0xff]  ;;  %v815_v3 = vld [vmem:[#allocation2 + $0xda] sm:$0xff] }
  0x32   : > { %725 = vst.msk [vmem:[#allocation2 + $0x139] sm:$0xff] %vm550_vm0, %v692_v7  ;;  %v788_v18 = vld [vmem:[#allocation2 + $0x111] sm:$0xff] }
  0x33   : > { %3930 = vrot.lane.b32.xlu2 %v4906_v8, %s4686_s15  ;;  %726 = vst.msk [vmem:[#allocation2 + $0x141] sm:$0xff] %vm550_vm0, %v693_v9  ;;  %v785_v19 = vld [vmem:[#allocation2 + $0xf1] sm:$0xff]  ;;  %v4930_v22 = vpack.i.bf16 %v788_v18, %v787_v17 }
  0x34   : > { %729 = vst.msk [vmem:[#allocation2 + $0x169] sm:$0xff] %vm550_vm0, %v696_v13  ;;  %v786_v21 = vld [vmem:[#allocation2 + $0xf9] sm:$0xff]  ;;  %v819_v12 = vld [vmem:[#allocation2 + $0x10a] sm:$0xff] }
  0x35   : > { %3925 = vrot.lane.b32.xlu1 %v4912_v14, %s4686_s15  ;;  %730 = vst.msk [vmem:[#allocation2 + $0x171] sm:$0xff] %vm550_vm0, %v697_v15  ;;  %v789_v23 = vld [vmem:[#allocation2 + $0x121] sm:$0xff]  ;;  %v4936_v25 = vpack.i.bf16 %v786_v21, %v785_v19  ;;  %v817_v9 = vld [vmem:[#allocation2 + $0xf2] sm:$0xff] }
  0x36   : > { %v790_v24 = vld [vmem:[#allocation2 + $0x129] sm:$0xff]  ;;  %500 = vst.msk [vmem:[#allocation2 + $0x90] sm:$0x1] %vm493_vm1, %v4685_v0 }
  0x37   : > { %3935 = vrot.lane.b32.xlu0 %v4919_v16, %s4686_s15  ;;  %v4944_v26 = vpack.i.bf16 %v790_v24, %v789_v23  ;;  %v793_v27 = vld [vmem:[#allocation2 + $0x151] sm:$0xff]  ;;  %501 = vst.msk [vmem:[#allocation2 + $0xa8] sm:$0x1] %vm493_vm1, %v4685_v0  ;;  %v821_v15 = vld [vmem:[#allocation2 + $0x122] sm:$0xff] }
  0x38   : > { %v794_v28 = vld [vmem:[#allocation2 + $0x159] sm:$0xff]  ;;  %502 = vst.msk [vmem:[#allocation2 + $0xc0] sm:$0x1] %vm493_vm1, %v4685_v0 }
  0x39   : > { %v791_v29 = vld [vmem:[#allocation2 + $0x139] sm:$0xff]  ;;  %v4958_v32 = vpack.i.bf16 %v794_v28, %v793_v27  ;;  %503 = vst.msk [vmem:[#allocation2 + $0xd8] sm:$0x1] %vm493_vm1, %v4685_v0 }
  0x3a   : > { %v792_v31 = vld [vmem:[#allocation2 + $0x141] sm:$0xff]  ;;  %504 = vst.msk [vmem:[#allocation2 + $0xf0] sm:$0x1] %vm493_vm1, %v4685_v0  ;;  %v825_v27 = vld [vmem:[#allocation2 + $0x152] sm:$0xff] }
  0x3b   : > { %3945 = vrot.lane.b32.xlu2 %v4930_v22, %s4686_s15  ;;  %v795_v33 = vld [vmem:[#allocation2 + $0x169] sm:$0xff]  ;;  %v4964_v35 = vpack.i.bf16 %v792_v31, %v791_v29  ;;  %505 = vst.msk [vmem:[#allocation2 + $0x108] sm:$0x1] %vm493_vm1, %v4685_v0  ;;  %v823_v23 = vld [vmem:[#allocation2 + $0x13a] sm:$0xff] }
  0x3c   : > { %v796_v34 = vld [vmem:[#allocation2 + $0x171] sm:$0xff]  ;;  %506 = vst.msk [vmem:[#allocation2 + $0x120] sm:$0x1] %vm493_vm1, %v4685_v0 }
  0x3d   : > { %3940 = vrot.lane.b32.xlu1 %v4936_v25, %s4686_s15  ;;  %v4972_v36 = vpack.i.bf16 %v796_v34, %v795_v33  ;;  %507 = vst.msk [vmem:[#allocation2 + $0x138] sm:$0x1] %vm493_vm1, %v4685_v0  ;;  %v827_v29 = vld [vmem:[#allocation2 + $0x16a] sm:$0xff] }
  0x3e   : > { %508 = vst.msk [vmem:[#allocation2 + $0x150] sm:$0x1] %vm493_vm1, %v4685_v0 }
  0x3f   : > { %3950 = vrot.lane.b32.xlu0 %v4944_v26, %s4686_s15  ;;  %509 = vst.msk [vmem:[#allocation2 + $0x168] sm:$0x1] %vm493_vm1, %v4685_v0 }
  0x40   : > { %510 = vst.msk [vmem:[#allocation2 + $0x180] sm:$0x1] %vm493_vm1, %v4685_v0 }
  0x41   : > { %511 = vst.msk [vmem:[#allocation2 + $0x198] sm:$0x1] %vm493_vm1, %v4685_v0 }
  0x42   : > { %513 = vst.msk [vmem:[#allocation2 + $0x29] sm:$0x1] %vm493_vm1, %v4685_v0 }
  0x43   : > { %3960 = vrot.lane.b32.xlu2 %v4958_v32, %s4686_s15  ;;  %514 = vst.msk [vmem:[#allocation2 + $0x41] sm:$0x1] %vm493_vm1, %v4685_v0 }
  0x44   : > { %515 = vst.msk [vmem:[#allocation2 + $0x59] sm:$0x1] %vm493_vm1, %v4685_v0 }
  0x45   : > { %3955 = vrot.lane.b32.xlu1 %v4964_v35, %s4686_s15  ;;  %516 = vst.msk [vmem:[#allocation2 + $0x71] sm:$0x1] %vm493_vm1, %v4685_v0 }
  0x46   : > { %517 = vst.msk [vmem:[#allocation2 + $0x89] sm:$0x1] %vm493_vm1, %v4685_v0 }
  0x47   : > { %3965 = vrot.lane.b32.xlu0 %v4972_v36, %s4686_s15  ;;  %518 = vst.msk [vmem:[#allocation2 + $0xa1] sm:$0x1] %vm493_vm1, %v4685_v0 }
  0x48   : > { %519 = vst.msk [vmem:[#allocation2 + $0xb9] sm:$0x1] %vm493_vm1, %v4685_v0 }
  0x49   : > { %520 = vst.msk [vmem:[#allocation2 + $0xd1] sm:$0x1] %vm493_vm1, %v4685_v0  ;;  %v800_v43 = vld [vmem:[#allocation2 + $0x22] sm:$0xff] }
  0x4a   : > { %521 = vst.msk [vmem:[#allocation2 + $0xe9] sm:$0x1] %vm493_vm1, %v4685_v0  ;;  %v5009_v45 = vpack.i.bf16 %v800_v43, %v799_v41  ;;  %v802_v46 = vld [vmem:[#allocation2 + $0x3a] sm:$0xff]  ;;  %v3821_v43 = vunpack.c.h.bf16 %v3836_v38 }
  0x4b   : > { %522 = vst.msk [vmem:[#allocation2 + $0x101] sm:$0x1] %vm493_vm1, %v4685_v0  ;;  %v5013_v47 = vpack.i.bf16 %v802_v46, %v801_v42  ;;  %v804_v48 = vld [vmem:[#allocation2 + $0x52] sm:$0xff]  ;;  %v5072_v41 = vld [vmem:[#allocation2 + $0x20] sm:$0xff]  ;;  %v3820_v42 = vunpack.c.l.bf16 %v3836_v38 }
  0x4c   : > { %523 = vst.msk [vmem:[#allocation2 + $0x119] sm:$0x1] %vm493_vm1, %v4685_v0  ;;  %3975 = vrot.lane.b32.xlu2 %v5009_v45, %s4687_s16  ;;  %v5019_v50 = vpack.i.bf16 %v804_v48, %v803_v44  ;;  %v806_v52 = vld [vmem:[#allocation2 + $0x6a] sm:$0xff]  ;;  %v5077_v46 = vld [vmem:[#allocation2 + $0x38] sm:$0xff] }
  0x4d   : > { %3970 = vrot.lane.b32.xlu1 %v3969_v39, %s4687_s16  ;;  %524 = vst.msk [vmem:[#allocation2 + $0x131] sm:$0x1] %vm493_vm1, %v4685_v0  ;;  %v808_v54 = vld [vmem:[#allocation2 + $0x82] sm:$0xff]  ;;  %v5033_v58 = vpack.i.bf16 %v806_v52, %v805_v51  ;;  %v5070_v39 = vld [vmem:[#allocation2 + $0x18] sm:$0xff]  ;;  %v5075_v44 = vld [vmem:[#allocation2 + $0x30] sm:$0xff]  ;;  %v666_v52 = vmul.f32 %v4779_v1, %v3820_v42 }
  0x4e   : > { %525 = vst.msk [vmem:[#allocation2 + $0x149] sm:$0x1] %vm493_vm1, %v4685_v0  ;;  %v810_v56 = vld [vmem:[#allocation2 + $0x9a] sm:$0xff]  ;;  %v5037_v59 = vpack.i.bf16 %v808_v54, %v807_v53  ;;  %v5079_v48 = vld [vmem:[#allocation2 + $0x48] sm:$0xff]  ;;  %v5081_v51 = vld [vmem:[#allocation2 + $0x50] sm:$0xff]  ;;  %v667_v53 = vmul.f32 %v4779_v1, %v3821_v43  ;;  %v4049_v54 = vpack.i.bf16 %v5072_v41, %v5070_v39 }
  0x4f   : > { %3980 = vrot.lane.b32.xlu0 %v5013_v47, %s4687_s16  ;;  %526 = vst.msk [vmem:[#allocation2 + $0x161] sm:$0x1] %vm493_vm1, %v4685_v0  ;;  %v5041_v60 = vpack.i.bf16 %v810_v56, %v809_v55  ;;  %v812_v62 = vld [vmem:[#allocation2 + $0xb2] sm:$0xff]  ;;  %v5089_v55 = vpack.i.bf16 %v5077_v46, %v5075_v44  ;;  %v698_v56 = vadd.f32 %v4787_v5, %v666_v52  ;;  %v835_v1 = vld [vmem:[#allocation2 + $0x60] sm:$0xff] }
  0x50   : > { %527 = vst.msk [vmem:[#allocation2 + $0x179] sm:$0x1] %vm493_vm1, %v4685_v0  ;;  %v814_v2 = vld [vmem:[#allocation2 + $0xca] sm:$0xff]  ;;  %v5049_v6 = vpack.i.bf16 %v812_v62, %v811_v61  ;;  %v699_v61 = vadd.f32 %v4787_v5, %v667_v53  ;;  %v5095_v62 = vpack.i.bf16 %v5081_v51, %v5079_v48  ;;  %v837_v5 = vld [vmem:[#allocation2 + $0x78] sm:$0xff] }
  0x51   : > { %528 = vst.msk [vmem:[#allocation2 + $0x191] sm:$0x1] %vm493_vm1, %v4685_v0  ;;  %v816_v4 = vld [vmem:[#allocation2 + $0xe2] sm:$0xff] }
  0x52   : > { %529 = vst.msk [vmem:[#allocation2 + $0x1a9] sm:$0x1] %vm493_vm1, %v4685_v0  ;;  %v5051_v0 = vpack.i.bf16 %v814_v2, %v813_v63  ;;  %v5053_v7 = vpack.i.bf16 %v816_v4, %v815_v3  ;;  %v818_v11 = vld [vmem:[#allocation2 + $0xfa] sm:$0xff]  ;;  %v836_v63 = vld [vmem:[#allocation2 + $0x68] sm:$0xff]  ;;  %vm3491_vm1 = vcmask 60416  }
  0x53   : > { %7014 = vst [vmem:[#allocation3_spill] sm:$0xff] %v5041_v60  ;;  %v820_v13 = vld [vmem:[#allocation2 + $0x112] sm:$0xff]  ;;  %v5061_v18 = vpack.i.bf16 %v818_v11, %v817_v9  ;;  %v838_v2 = vld [vmem:[#allocation2 + $0x80] sm:$0xff] }
  0x54   : > { %3990 = vrot.lane.b32.xlu2 %v5033_v58, %s4687_s16  ;;  %7015 = vst [vmem:[#allocation4_spill] sm:$0xff] %v5049_v6  ;;  %v822_v17 = vld [vmem:[#allocation2 + $0x12a] sm:$0xff]  ;;  %v4024_v19 = vpack.i.bf16 %v820_v13, %v819_v12  ;;  %v5106_v12 = vld [vmem:[#allocation2 + $0x98] sm:$0xff]  ;;  %v5108_v13 = vpack.i.bf16 %v836_v63, %v835_v1 }
  0x55   : > { %3985 = vrot.lane.b32.xlu1 %v5019_v50, %s4687_s16  ;;  %7016 = vst [vmem:[#allocation5_spill] sm:$0xff] %v5051_v0  ;;  %v4029_v21 = vpack.i.bf16 %v822_v17, %v821_v15  ;;  %v824_v24 = vld [vmem:[#allocation2 + $0x142] sm:$0xff]  ;;  %v5104_v11 = vld [vmem:[#allocation2 + $0x90] sm:$0xff]  ;;  %v4069_v15 = vpack.i.bf16 %v838_v2, %v837_v5 }
  0x56   : > { %7017 = vst [vmem:[#allocation6_spill] sm:$0xff] %v5053_v7  ;;  %v826_v28 = vld [vmem:[#allocation2 + $0x15a] sm:$0xff]  ;;  %v4034_v33 = vpack.i.bf16 %v824_v24, %v823_v23  ;;  %v5123_v23 = vld [vmem:[#allocation2 + $0xa8] sm:$0xff]  ;;  %v5125_v24 = vld [vmem:[#allocation2 + $0xb0] sm:$0xff] }
  0x57   : > { %3995 = vrot.lane.b32.xlu0 %v5037_v59, %s4687_s16  ;;  %7018 = vst [vmem:[#allocation7_spill] sm:$0xff] %v5061_v18  ;;  %v828_v31 = vld [vmem:[#allocation2 + $0x172] sm:$0xff]  ;;  %v4039_v34 = vpack.i.bf16 %v826_v28, %v825_v27  ;;  %v843_v27 = vld [vmem:[#allocation2 + $0xc0] sm:$0xff]  ;;  %v844_v28 = vld [vmem:[#allocation2 + $0xc8] sm:$0xff]  ;;  %v5135_v38 = vpack.i.bf16 %v5125_v24, %v5123_v23 }
  0x58   : > { %v4044_v37 = vpack.i.bf16 %v828_v31, %v827_v29  ;;  %7019 = vst [vmem:[#allocation8_spill] sm:$0xff] %v5089_v55  ;;  %v4084_v42 = vpack.i.bf16 %v844_v28, %v843_v27 }
  0x59   : > { %7020 = vst [vmem:[#allocation9_spill] sm:$0xff] %v5095_v62 }
  0x5a   : > { %731 = vst.msk [vmem:[#allocation2 + $0x181] sm:$0xff] %vm550_vm0, %v698_v56  ;;  %v5150_v56 = vld [vmem:[#allocation2 + $0xf8] sm:$0xff] }
  0x5b   : > { %732 = vst.msk [vmem:[#allocation2 + $0x189] sm:$0xff] %vm550_vm0, %v699_v61  ;;  %v849_v61 = vld [vmem:[#allocation2 + $0x108] sm:$0xff] }
  0x5c   : > { %4005 = vrot.lane.b32.xlu2 %v5049_v6, %s4687_s16  ;;  %7021 = vst [vmem:[#allocation10_spill] sm:$0xff] %v5108_v13 }
  0x5d   : > { %4000 = vrot.lane.b32.xlu1 %v5041_v60, %s4687_s16  ;;  %7023 = vst [vmem:[#allocation12_spill] sm:$0xff] %v5135_v38 }
  0x5f   : > { %4010 = vrot.lane.b32.xlu0 %v5051_v0, %s4687_s16 }
  0x64   : > { %4020 = vrot.lane.b32.xlu2 %v5061_v18, %s4687_s16  ;;  %v5184_v18 = vld [vmem:[#allocation2 + $0x170] sm:$0xff] }
  0x65   : > { %4015 = vrot.lane.b32.xlu1 %v5053_v7, %s4687_s16 }
  0x67   : > { %4025 = vrot.lane.b32.xlu0 %v4024_v19, %s4687_s16 }
  0x6c   : > { %4035 = vrot.lane.b32.xlu2 %v4034_v33, %s4687_s16 }
  0x6d   : > { %4030 = vrot.lane.b32.xlu1 %v4029_v21, %s4687_s16  ;;  %v5118_v21 = vpack.i.bf16 %v5106_v12, %v5104_v11 }
  0x6f   : > { %4040 = vrot.lane.b32.xlu0 %v4039_v34, %s4687_s16  ;;  %7022 = vst [vmem:[#allocation11_spill] sm:$0xff] %v5118_v21  ;;  %v5129_v34 = vld [vmem:[#allocation2 + $0xd8] sm:$0xff] }
  0x74   : > { %4050 = vrot.lane.b32.xlu2 %v4049_v54, %s4688_s17  ;;  %v5148_v54 = vld [vmem:[#allocation2 + $0xf0] sm:$0xff] }
  0x75   : > { %4045 = vrot.lane.b32.xlu1 %v4044_v37, %s4687_s16  ;;  %v5131_v37 = vld [vmem:[#allocation2 + $0xe0] sm:$0xff] }
  0x76   : > { %v4089_v53 = vpack.i.bf16 %v5131_v37, %v5129_v34 }
  0x77   : > { %4055 = vrot.lane.b32.xlu0 %v5089_v55, %s4688_s17 }
  0x7c   : > { %4065 = vrot.lane.b32.xlu2 %v5108_v13, %s4688_s17  ;;  %v856_v13 = vld [vmem:[#allocation2 + $0x158] sm:$0xff] }
  0x7d   : > { %4060 = vrot.lane.b32.xlu1 %v5095_v62, %s4688_s17  ;;  %v3911_v3 = vpop.permute.xlu2 %3910 }
  0x7e   : > { %v3913_v4 = vunpack.i.h.bf16 %v3911_v3  ;;  %v3912_v9 = vunpack.i.l.bf16 %v3911_v3  ;;  %v5153_v3 = vld [vmem:[#allocation2 + $0x120] sm:$0xff] }
  0x7f   : > { %4070 = vrot.lane.b32.xlu0 %v4069_v15, %s4688_s17 }
  0x80   : > { %v5111_v17 = vsel %vm550_vm0, %v835_v1, %v3912_v9  ;;  %v5114_v19 = vsel %vm550_vm0, %v836_v63, %v3913_v4  ;;  %v850_v1 = vld [vmem:[#allocation2 + $0x110] sm:$0xff]  ;;  %v5155_v4 = vld [vmem:[#allocation2 + $0x128] sm:$0xff]  ;;  %v5159_v9 = vpack.i.bf16 %v5150_v56, %v5148_v54 }
  0x82   : > { %7024 = vst [vmem:[#allocation13_spill] sm:$0xff] %v5159_v9 }
  0x84   : > { %4080 = vrot.lane.b32.xlu2 %v5135_v38, %s4688_s17  ;;  %v855_v38 = vld [vmem:[#allocation2 + $0x150] sm:$0xff] }
  0x85   : > { %4075 = vrot.lane.b32.xlu1 %v5118_v21, %s4688_s17  ;;  %v3916_v29 = vpop.permute.xlu2 %3915  ;;  %v5188_v21 = vpack.i.bf16 %v856_v13, %v855_v38 }
  0x86   : > { %v3918_v31 = vunpack.i.h.bf16 %v3916_v29  ;;  %v3917_v33 = vunpack.i.l.bf16 %v3916_v29  ;;  %v5163_v29 = vpack.i.bf16 %v850_v1, %v849_v61 }
  0x87   : > { %4085 = vrot.lane.b32.xlu0 %v4084_v42, %s4688_s17  ;;  %v4104_v42 = vpack.i.bf16 %v5155_v4, %v5153_v3 }
  0x88   : > { %v5138_v43 = vsel %vm550_vm0, %v838_v2, %v3918_v31  ;;  %v5141_v52 = vsel %vm550_vm0, %v837_v5, %v3917_v33  ;;  %7025 = vst [vmem:[#allocation14_spill] sm:$0xff] %v5163_v29 }
  0x8a   : > { %v5161_v15 = vpop.permute.xlu0 %3890 }
  0x8c   : > { %4095 = vrot.lane.b32.xlu2 %v5159_v9, %s4688_s17 }
  0x8d   : > { %4090 = vrot.lane.b32.xlu1 %v4089_v53, %s4688_s17  ;;  %v3931_v63 = vpop.permute.xlu2 %3930  ;;  %v5175_v53 = vld [vmem:[#allocation2 + $0x138] sm:$0xff] }
  0x8e   : > { %v3933_v2 = vunpack.i.h.bf16 %v3931_v63  ;;  %v3932_v5 = vunpack.i.l.bf16 %v3931_v63  ;;  %v5179_v63 = vld [vmem:[#allocation2 + $0x140] sm:$0xff] }
  0x8f   : > { %4100 = vrot.lane.b32.xlu0 %v5163_v29, %s4688_s17  ;;  %v4109_v9 = vpack.i.bf16 %v5179_v63, %v5175_v53 }
  0x90   : > { %v5166_v31 = vsel %vm550_vm0, %v844_v28, %v3933_v2  ;;  %v5169_v33 = vsel %vm550_vm0, %v843_v27, %v3932_v5  ;;  %v5182_v5 = vld [vmem:[#allocation2 + $0x168] sm:$0xff] }
  0x94   : > { %4110 = vrot.lane.b32.xlu2 %v4109_v9, %s4688_s17 }
  0x95   : > { %4105 = vrot.lane.b32.xlu1 %v4104_v42, %s4688_s17  ;;  %v3946_v28 = vpop.permute.xlu2 %3945 }
  0x96   : > { %v3948_v27 = vunpack.i.h.bf16 %v3946_v28  ;;  %v3947_v2 = vunpack.i.l.bf16 %v3946_v28  ;;  %v4119_v28 = vpack.i.bf16 %v5184_v18, %v5182_v5 }
  0x97   : > { %v3901_v62 = vpop.permute.xlu1 %3900  ;;  %4115 = vrot.lane.b32.xlu0 %v5188_v21, %s4688_s17 }
  0x98   : > { %v5191_v29 = vsel %vm550_vm0, %v850_v1, %v3948_v27  ;;  %v5194_v55 = vsel %vm550_vm0, %v849_v61, %v3947_v2  ;;  %v3903_v42 = vunpack.i.h.bf16 %v3901_v62  ;;  %v3902_v7 = vunpack.i.l.bf16 %v3901_v62  ;;  %v859_v61 = vld [vmem:[#allocation2 + $0x180] sm:$0xff]  ;;  %v860_v1 = vld [vmem:[#allocation2 + $0x188] sm:$0xff] }
  0x99   : > { %7026 = vst [vmem:[#allocation15_spill] sm:$0xff] %v5191_v29  ;;  %v3896_v0 = vpop.permute.xlu0 %3895 }
  0x9a   : > { %7027 = vst [vmem:[#allocation16_spill] sm:$0xff] %v5194_v55  ;;  %v5200_v6 = vsel %vm550_vm0, %v5075_v44, %v3902_v7  ;;  %v5204_v60 = vsel %vm550_vm0, %v5077_v46, %v3903_v42  ;;  %v4124_v55 = vpack.i.bf16 %v860_v1, %v859_v61 }
  0x9c   : > { %4125 = vrot.lane.b32.xlu2 %v4124_v55, %s4688_s17  ;;  %v3898_v55 = vunpack.i.h.bf16 %v3896_v0 }
  0x9d   : > { %4120 = vrot.lane.b32.xlu1 %v4119_v28, %s4688_s17  ;;  %v3961_v62 = vpop.permute.xlu2 %3960 }
  0x9e   : > { %v3963_v27 = vunpack.i.h.bf16 %v3961_v62  ;;  %v3962_v2 = vunpack.i.l.bf16 %v3961_v62 }
  0x9f   : > { %v5210_v29 = vpop.permute.xlu1 %3905  ;;  %4130 = vrot.lane.b32.xlu0 %v4860_v30, %s4689_s18 }
  0xa0   : > { %v5213_v7 = vsel %vm550_vm0, %v856_v13, %v3963_v27  ;;  %v5216_v44 = vsel %vm550_vm0, %v855_v38, %v3962_v2  ;;  %v3897_v27 = vunpack.i.l.bf16 %v3896_v0 }
  0xa1   : > { %v3921_v46 = vpop.permute.xlu0 %3920 }
  0xa2   : > { %v3923_v9 = vunpack.i.h.bf16 %v3921_v46  ;;  %v3922_v42 = vunpack.i.l.bf16 %v3921_v46 }
  0xa4   : > { %v5223_v28 = vsel %vm550_vm0, %v5106_v12, %v3923_v9  ;;  %v5227_v13 = vsel %vm550_vm0, %v5104_v11, %v3922_v42  ;;  %4140 = vrot.lane.b32.xlu2 %v4879_v49, %s4689_s18  ;;  %v2048_v49 = vsel %vm550_vm0, %v5070_v39, %v3897_v27 }
  0xa5   : > { %4135 = vrot.lane.b32.xlu1 %v4849_v20, %s4689_s18 }
  0xa6   : > { %v3976_v20 = vpop.permute.xlu2 %3975 }
  0xa7   : > { %v3926_v38 = vpop.permute.xlu1 %3925  ;;  %4145 = vrot.lane.b32.xlu0 %v4838_v10, %s4689_s18  ;;  %v3978_v0 = vunpack.i.h.bf16 %v3976_v20  ;;  %v3977_v12 = vunpack.i.l.bf16 %v3976_v20  ;;  %v2049_v10 = vsel %vm550_vm0, %v5072_v41, %v3898_v55 }
  0xa8   : > { %v3928_v27 = vunpack.i.h.bf16 %v3926_v38  ;;  %v3927_v20 = vunpack.i.l.bf16 %v3926_v38  ;;  %v734_v38 = vld [vmem:[#allocation2 + $0x8] sm:$0xff] }
  0xa9   : > { %v3936_v61 = vpop.permute.xlu0 %3935 }
  0xaa   : > { %v3938_v1 = vunpack.i.h.bf16 %v3936_v61  ;;  %v3937_v62 = vunpack.i.l.bf16 %v3936_v61 }
  0xac   : > { %v5237_v30 = vsel %vm550_vm0, %v5131_v37, %v3938_v1  ;;  %v5241_v11 = vsel %vm550_vm0, %v5129_v34, %v3937_v62  ;;  %v5250_v37 = vsel %vm2078_vm2, %v2048_v49, %v3977_v12  ;;  %v5253_v34 = vsel %vm2078_vm2, %v2049_v10, %v3978_v0  ;;  %4155 = vrot.lane.b32.xlu2 %v4889_v57, %s4689_s18 }
  0xad   : > { %4150 = vrot.lane.b32.xlu1 %v4871_v40, %s4689_s18  ;;  %v3892_v0 = vunpack.i.l.bf16 %v5161_v15  ;;  %v2060_v10 = vsel %vm550_vm0, %v5123_v23, %v3927_v20 }
  0xae   : > { %v3991_v41 = vpop.permute.xlu2 %3990 }
  0xaf   : > { %v3941_v2 = vpop.permute.xlu1 %3940  ;;  %4160 = vrot.lane.b32.xlu0 %v4912_v14, %s4689_s18  ;;  %v3993_v61 = vunpack.i.h.bf16 %v3991_v41  ;;  %v3992_v1 = vunpack.i.l.bf16 %v3991_v41 }
  0xb0   : > { %v3943_v23 = vunpack.i.h.bf16 %v3941_v2 }
  0xb1   : > { %v3951_v46 = vpop.permute.xlu0 %3950  ;;  %v5273_v57 = vsel %vm2078_vm2, %v5114_v19, %v3993_v61  ;;  %v5277_v14 = vsel %vm2078_vm2, %v5111_v17, %v3992_v1  ;;  %v3893_v17 = vunpack.i.h.bf16 %v5161_v15  ;;  %v3942_v1 = vunpack.i.l.bf16 %v3941_v2 }
  0xb2   : > { %v3953_v9 = vunpack.i.h.bf16 %v3951_v46  ;;  %v3952_v42 = vunpack.i.l.bf16 %v3951_v46 }
  0xb3   : > { %v2047_v41 = vsel %vm550_vm0, %v734_v38, %v3893_v17 }
  0xb4   : > { %v5261_v40 = vsel %vm550_vm0, %v5155_v4, %v3953_v9  ;;  %v5265_v39 = vsel %vm550_vm0, %v5153_v3, %v3952_v42  ;;  %4170 = vrot.lane.b32.xlu2 %v4919_v16, %s4689_s18  ;;  %v733_v16 = vld [vmem:[#allocation2] sm:$0xff] }
  0xb5   : > { %4165 = vrot.lane.b32.xlu1 %v4906_v8, %s4689_s18 }
  0xb6   : > { %v4006_v12 = vpop.permute.xlu2 %4005 }
  0xb7   : > { %v5269_v62 = vpop.permute.xlu1 %3955  ;;  %4175 = vrot.lane.b32.xlu0 %v4936_v25, %s4689_s18  ;;  %v4008_v49 = vunpack.i.h.bf16 %v4006_v12  ;;  %v4007_v25 = vunpack.i.l.bf16 %v4006_v12 }
  0xb9   : > { %v3966_v4 = vpop.permute.xlu0 %3965  ;;  %v5303_v15 = vsel %vm2078_vm2, %v2060_v10, %v4007_v25 }
  0xba   : > { %v3968_v55 = vunpack.i.h.bf16 %v3966_v4  ;;  %v3967_v3 = vunpack.i.l.bf16 %v3966_v4  ;;  %v891_v4 = vld [vmem:[#allocation2 + $0x181] sm:$0xff] }
  0xbc   : > { %v5285_v8 = vsel %vm550_vm0, %v5184_v18, %v3968_v55  ;;  %v5289_v19 = vsel %vm550_vm0, %v5182_v5, %v3967_v3  ;;  %v2061_v18 = vsel %vm550_vm0, %v5125_v24, %v3928_v27  ;;  %4185 = vrot.lane.b32.xlu2 %v4944_v26, %s4689_s18  ;;  %v892_v55 = vld [vmem:[#allocation2 + $0x189] sm:$0xff]  ;;  %v3908_v3 = vunpack.i.h.bf16 %v5210_v29 }
  0xbd   : > { %4180 = vrot.lane.b32.xlu1 %v4930_v22, %s4689_s18  ;;  %v5300_v46 = vsel %vm2078_vm2, %v2061_v18, %v4008_v49  ;;  %v2046_v22 = vsel %vm550_vm0, %v733_v16, %v3892_v0  ;;  %v3907_v27 = vunpack.i.l.bf16 %v5210_v29  ;;  %v4204_v2 = vpack.i.bf16 %v892_v55, %v891_v4 }
  0xbe   : > { %v4021_v20 = vpop.permute.xlu2 %4020  ;;  %v2067_v26 = vsel %vm550_vm0, %v5150_v56, %v3943_v23  ;;  %v2066_v16 = vsel %vm550_vm0, %v5148_v54, %v3942_v1  ;;  %v2053_v10 = vsel %vm550_vm0, %v5081_v51, %v3908_v3 }
  0xbf   : > { %v3971_v5 = vpop.permute.xlu1 %3970  ;;  %4190 = vrot.lane.b32.xlu0 %v4964_v35, %s4689_s18  ;;  %v4023_v17 = vunpack.i.h.bf16 %v4021_v20  ;;  %v4022_v0 = vunpack.i.l.bf16 %v4021_v20  ;;  %v2052_v56 = vsel %vm550_vm0, %v5079_v48, %v3907_v27 }
  0xc0   : > { %v3973_v9 = vunpack.i.h.bf16 %v3971_v5  ;;  %v3972_v42 = vunpack.i.l.bf16 %v3971_v5 }
  0xc1   : > { %v3981_v12 = vpop.permute.xlu0 %3980  ;;  %v5326_v25 = vsel %vm2078_vm2, %v2067_v26, %v4023_v17  ;;  %v5329_v29 = vsel %vm2078_vm2, %v2066_v16, %v4022_v0 }
  0xc2   : > { %v5308_v61 = vsel %vm2078_vm2, %v2047_v41, %v3973_v9  ;;  %v5311_v24 = vsel %vm2078_vm2, %v2046_v22, %v3972_v42  ;;  %v3983_v38 = vunpack.i.h.bf16 %v3981_v12  ;;  %v3982_v35 = vunpack.i.l.bf16 %v3981_v12 }
  0xc3   : > { %v3958_v22 = vunpack.i.h.bf16 %v5269_v62  ;;  %v3957_v41 = vunpack.i.l.bf16 %v5269_v62 }
  0xc4   : > { %v5337_v54 = vsel %vm2078_vm2, %v5204_v60, %v3983_v38  ;;  %v5341_v5 = vsel %vm2078_vm2, %v5200_v6, %v3982_v35  ;;  %4200 = vrot.lane.b32.xlu2 %v4972_v36, %s4689_s18 }
  0xc5   : > { %4195 = vrot.lane.b32.xlu1 %v4958_v32, %s4689_s18  ;;  %v2073_v23 = vsel %vm550_vm0, %v5179_v63, %v3958_v22  ;;  %v2072_v1 = vsel %vm550_vm0, %v5175_v53, %v3957_v41  ;;  %vm3285_vm0 = vcmask 64512  }
  0xc6   : > { %v4036_v48 = vpop.permute.xlu2 %4035 }
  0xc7   : > { %v3986_v49 = vpop.permute.xlu1 %3985  ;;  %4205 = vrot.lane.b32.xlu0 %v4204_v2, %s4689_s18  ;;  %v4038_v60 = vunpack.i.h.bf16 %v4036_v48  ;;  %v4037_v6 = vunpack.i.l.bf16 %v4036_v48 }
  0xc8   : > { %v3988_v32 = vunpack.i.h.bf16 %v3986_v49  ;;  %v3987_v18 = vunpack.i.l.bf16 %v3986_v49 }
  0xc9   : > { %v3996_v51 = vpop.permute.xlu0 %3995  ;;  %v5357_v36 = vsel %vm2078_vm2, %v2073_v23, %v4038_v60  ;;  %v5360_v3 = vsel %vm2078_vm2, %v2072_v1, %v4037_v6  ;;  %v7030_v6 = vld [vmem:[#allocation15_spill] sm:$0xff]  ;;  %v7031_v23 = vld [vmem:[#allocation16_spill] sm:$0xff] }
  0xca   : > { %v2085_v9 = vsel %vm2078_vm2, %v2052_v56, %v3987_v18  ;;  %v2086_v42 = vsel %vm2078_vm2, %v2053_v10, %v3988_v32  ;;  %v3998_v62 = vunpack.i.h.bf16 %v3996_v51  ;;  %v3997_v4 = vunpack.i.l.bf16 %v3996_v51 }
  0xcc   : > { %v5364_v20 = vsel %vm2078_vm2, %v5138_v43, %v3998_v62  ;;  %v5368_v63 = vsel %vm2078_vm2, %v5141_v52, %v3997_v4  ;;  %4215 = vrot.lane.b32.xlu2 %v5013_v47, %s4690_s19  ;;  %v7032_v4 = vld [vmem:[#allocation5_spill] sm:$0xff] }
  0xcd   : > { %4210 = vrot.lane.b32.xlu1 %v5009_v45, %s4690_s19 }
  0xce   : > { %v4051_v0 = vpop.permute.xlu2 %4050 }
  0xcf   : > { %v4001_v55 = vpop.permute.xlu1 %4000  ;;  %4220 = vrot.lane.b32.xlu0 %v5019_v50, %s4690_s19  ;;  %v4053_v43 = vunpack.i.h.bf16 %v4051_v0  ;;  %v4052_v52 = vunpack.i.l.bf16 %v4051_v0  ;;  %v7034_v0 = vld [vmem:[#allocation8_spill] sm:$0xff] }
  0xd0   : > { %v4003_v27 = vunpack.i.h.bf16 %v4001_v55  ;;  %v4002_v45 = vunpack.i.l.bf16 %v4001_v55  ;;  %v958_v55 = vld [vmem:[#allocation2 + $0x31] sm:$0xff] }
  0xd1   : > { %v4011_v12 = vpop.permute.xlu0 %4010  ;;  %v5386_v16 = vsel %vm2111_vm3, %v5311_v24, %v4052_v52  ;;  %v7028_v24 = vld [vmem:[#allocation3_spill] sm:$0xff] }
  0xd2   : > { %v2091_v53 = vsel %vm2078_vm2, %v5227_v13, %v4002_v45  ;;  %v2092_v17 = vsel %vm2078_vm2, %v5223_v28, %v4003_v27  ;;  %v4013_v2 = vunpack.i.h.bf16 %v4011_v12  ;;  %v4012_v26 = vunpack.i.l.bf16 %v4011_v12  ;;  %v959_v27 = vld [vmem:[#allocation2 + $0x39] sm:$0xff] }
  0xd3   : > { %v5382_v28 = vsel %vm2111_vm3, %v5308_v61, %v4053_v43 }
  0xd4   : > { %v5390_v49 = vsel %vm2078_vm2, %v5166_v31, %v4013_v2  ;;  %4230 = vrot.lane.b32.xlu2 %v5037_v59, %s4690_s19  ;;  %v7029_v31 = vld [vmem:[#allocation4_spill] sm:$0xff] }
  0xd5   : > { %4225 = vrot.lane.b32.xlu1 %v5033_v58, %s4690_s19  ;;  %v5394_v58 = vsel %vm2078_vm2, %v5169_v33, %v4012_v26  ;;  %v4259_v26 = vpack.i.bf16 %v959_v27, %v958_v55 }
  0xd6   : > { %v4066_v18 = vpop.permute.xlu2 %4065 }
  0xd7   : > { %v4016_v13 = vpop.permute.xlu1 %4015  ;;  %4235 = vrot.lane.b32.xlu0 %v7028_v24, %s4690_s19  ;;  %v4068_v10 = vunpack.i.h.bf16 %v4066_v18  ;;  %v4067_v56 = vunpack.i.l.bf16 %v4066_v18 }
  0xd8   : > { %v4018_v38 = vunpack.i.h.bf16 %v4016_v13  ;;  %v4017_v35 = vunpack.i.l.bf16 %v4016_v13 }
  0xd9   : > { %v4026_v33 = vpop.permute.xlu0 %4025 }
  0xda   : > { %v2097_v32 = vsel %vm2078_vm2, %v5241_v11, %v4017_v35  ;;  %v2098_v61 = vsel %vm2078_vm2, %v5237_v30, %v4018_v38  ;;  %v4028_v22 = vunpack.i.h.bf16 %v4026_v33  ;;  %v4027_v41 = vunpack.i.l.bf16 %v4026_v33 }
  0xdb   : > { %v5407_v11 = vsel %vm2111_vm3, %v2086_v42, %v4068_v10  ;;  %v5410_v30 = vsel %vm2111_vm3, %v2085_v9, %v4067_v56  ;;  %v7033_v9 = vld [vmem:[#allocation6_spill] sm:$0xff] }
  0xdc   : > { %v5414_v51 = vsel %vm2078_vm2, %v7030_v6, %v4028_v22  ;;  %v5418_v1 = vsel %vm2078_vm2, %v7031_v23, %v4027_v41  ;;  %4245 = vrot.lane.b32.xlu2 %v7032_v4, %s4690_s19  ;;  %v7035_v22 = vld [vmem:[#allocation9_spill] sm:$0xff] }
  0xdd   : > { %4240 = vrot.lane.b32.xlu1 %v7029_v31, %s4690_s19 }
  0xde   : > { %v4081_v45 = vpop.permute.xlu2 %4080 }
  0xdf   : > { %v4031_v48 = vpop.permute.xlu1 %4030  ;;  %4250 = vrot.lane.b32.xlu0 %v7033_v9, %s4690_s19  ;;  %v4083_v43 = vunpack.i.h.bf16 %v4081_v45  ;;  %v4082_v52 = vunpack.i.l.bf16 %v4081_v45 }
  0xe0   : > { %v4033_v59 = vunpack.i.h.bf16 %v4031_v48  ;;  %v4032_v60 = vunpack.i.l.bf16 %v4031_v48 }
  0xe1   : > { %v4041_v12 = vpop.permute.xlu0 %4040  ;;  %v5431_v13 = vsel %vm2111_vm3, %v2091_v53, %v4082_v52  ;;  %v5434_v38 = vsel %vm2111_vm3, %v2092_v17, %v4083_v43  ;;  %v960_v17 = vld [vmem:[#allocation2 + $0x49] sm:$0xff] }
  0xe2   : > { %v2103_v62 = vsel %vm2078_vm2, %v5265_v39, %v4032_v60  ;;  %v2104_v42 = vsel %vm2078_vm2, %v5261_v40, %v4033_v59  ;;  %v4043_v39 = vunpack.i.h.bf16 %v4041_v12  ;;  %v4042_v2 = vunpack.i.l.bf16 %v4041_v12  ;;  %v967_v59 = vld [vmem:[#allocation2 + $0x99] sm:$0xff] }
  0xe4   : > { %v5438_v31 = vsel %vm2078_vm2, %v5213_v7, %v4043_v39  ;;  %v5442_v10 = vsel %vm2078_vm2, %v5216_v44, %v4042_v2  ;;  %4260 = vrot.lane.b32.xlu2 %v4259_v26, %s4692_s21  ;;  %v961_v7 = vld [vmem:[#allocation2 + $0x51] sm:$0xff] }
  0xe5   : > { %4255 = vrot.lane.b32.xlu1 %v7034_v0, %s4691_s20  ;;  %v4279_v6 = vpack.i.bf16 %v961_v7, %v960_v17 }
  0xe6   : > { %v4096_v33 = vpop.permute.xlu2 %4095 }
  0xe7   : > { %v4046_v40 = vpop.permute.xlu1 %4045  ;;  %4265 = vrot.lane.b32.xlu0 %v5013_v47, %s4693_s22  ;;  %v4098_v44 = vunpack.i.h.bf16 %v4096_v33  ;;  %v4097_v41 = vunpack.i.l.bf16 %v4096_v33 }
  0xe8   : > { %v4048_v35 = vunpack.i.h.bf16 %v4046_v40  ;;  %v4047_v18 = vunpack.i.l.bf16 %v4046_v40 }
  0xe9   : > { %v4056_v48 = vpop.permute.xlu0 %4055  ;;  %v5454_v4 = vsel %vm2111_vm3, %v2097_v32, %v4097_v41  ;;  %v5457_v47 = vsel %vm2111_vm3, %v2098_v61, %v4098_v44  ;;  %v7036_v61 = vld [vmem:[#allocation11_spill] sm:$0xff] }
  0xea   : > { %v2109_v56 = vsel %vm2078_vm2, %v5289_v19, %v4047_v18  ;;  %v2110_v53 = vsel %vm2078_vm2, %v5285_v8, %v4048_v35  ;;  %v966_v19 = vld [vmem:[#allocation2 + $0x91] sm:$0xff]  ;;  %v4058_v60 = vunpack.i.h.bf16 %v4056_v48  ;;  %v4057_v8 = vunpack.i.l.bf16 %v4056_v48 }
  0xeb   : > { %v4284_v0 = vpack.i.bf16 %v967_v59, %v966_v19 }
  0xec   : > { %v5461_v27 = vsel %vm2111_vm3, %v5250_v37, %v4057_v8  ;;  %v5465_v45 = vsel %vm2111_vm3, %v5253_v34, %v4058_v60  ;;  %4275 = vrot.lane.b32.xlu2 %v7036_v61, %s4691_s20 }
  0xed   : > { %4270 = vrot.lane.b32.xlu1 %v7035_v22, %s4691_s20 }
  0xee   : > { %v4111_v52 = vpop.permute.xlu2 %4110 }
  0xef   : > { %v4061_v23 = vpop.permute.xlu1 %4060  ;;  %4280 = vrot.lane.b32.xlu0 %v4279_v6, %s4692_s21  ;;  %v4113_v37 = vunpack.i.h.bf16 %v4111_v52  ;;  %v4112_v12 = vunpack.i.l.bf16 %v4111_v52  ;;  %v968_v52 = vld [vmem:[#allocation2 + $0xa9] sm:$0xff] }
  0xf0   : > { %v4063_v9 = vunpack.i.h.bf16 %v4061_v23  ;;  %v4062_v55 = vunpack.i.l.bf16 %v4061_v23 }
  0xf1   : > { %v4071_v39 = vpop.permute.xlu0 %4070  ;;  %v5476_v40 = vsel %vm2111_vm3, %v2103_v62, %v4112_v12 }
  0xf2   : > { %v2116_v43 = vsel %vm2111_vm3, %v5341_v5, %v4062_v55  ;;  %v2117_v32 = vsel %vm2111_vm3, %v5337_v54, %v4063_v9  ;;  %v4073_v34 = vunpack.i.h.bf16 %v4071_v39  ;;  %v4072_v2 = vunpack.i.l.bf16 %v4071_v39  ;;  %v962_v9 = vld [vmem:[#allocation2 + $0x61] sm:$0xff] }
  0xf3   : > { %v5479_v5 = vsel %vm2111_vm3, %v2104_v42, %v4113_v37  ;;  %v975_v42 = vld [vmem:[#allocation2 + $0xf9] sm:$0xff]  ;;  %v969_v37 = vld [vmem:[#allocation2 + $0xb1] sm:$0xff] }
  0xf4   : > { %v5483_v18 = vsel %vm2111_vm3, %v5273_v57, %v4073_v34  ;;  %v5487_v17 = vsel %vm2111_vm3, %v5277_v14, %v4072_v2  ;;  %4290 = vrot.lane.b32.xlu2 %v5019_v50, %s4693_s22  ;;  %v974_v57 = vld [vmem:[#allocation2 + $0xf1] sm:$0xff]  ;;  %v7037_v14 = vld [vmem:[#allocation13_spill] sm:$0xff] }
  0xf5   : > { %4285 = vrot.lane.b32.xlu1 %v4284_v0, %s4692_s21  ;;  %v4304_v19 = vpack.i.bf16 %v975_v42, %v974_v57 }
  0xf6   : > { %v4126_v33 = vpop.permute.xlu2 %4125 }
  0xf7   : > { %v4076_v26 = vpop.permute.xlu1 %4075  ;;  %4295 = vrot.lane.b32.xlu0 %v7028_v24, %s4693_s22  ;;  %v4128_v22 = vunpack.i.h.bf16 %v4126_v33  ;;  %v4127_v44 = vunpack.i.l.bf16 %v4126_v33  ;;  %v4329_v33 = vpack.i.bf16 %v969_v37, %v968_v52 }
  0xf8   : > { %v4078_v54 = vunpack.i.h.bf16 %v4076_v26  ;;  %v4077_v35 = vunpack.i.l.bf16 %v4076_v26 }
  0xf9   : > { %v5504_v59 = vsel %vm2111_vm3, %v2109_v56, %v4127_v44  ;;  %v5507_v50 = vsel %vm2111_vm3, %v2110_v53, %v4128_v22  ;;  %v7038_v53 = vld [vmem:[#allocation7_spill] sm:$0xff]  ;;  %v994_v22 = vld [vmem:[#allocation2 + $0x62] sm:$0xff] }
  0xfa   : > { %v5491_v7 = vsel %vm2111_vm3, %v5368_v63, %v4077_v35  ;;  %v5495_v62 = vsel %vm2111_vm3, %v5364_v20, %v4078_v54  ;;  %v4086_v63 = vpop.permute.xlu0 %4085  ;;  %v1000_v44 = vld [vmem:[#allocation2 + $0xaa] sm:$0xff] }
  0xfb   : > { %v4088_v41 = vunpack.i.h.bf16 %v4086_v63  ;;  %v4087_v48 = vunpack.i.l.bf16 %v4086_v63  ;;  %v1001_v63 = vld [vmem:[#allocation2 + $0xb2] sm:$0xff] }
  0xfc   : > { %4305 = vrot.lane.b32.xlu2 %v4304_v19, %s4692_s21  ;;  %v911_v19 = vld [vmem:[#allocation2 + $0xf2] sm:$0xff] }
  0xfd   : > { %4300 = vrot.lane.b32.xlu1 %v7037_v14, %s4691_s20  ;;  %v5511_v8 = vsel %vm2111_vm3, %v5300_v46, %v4088_v41  ;;  %v5515_v6 = vsel %vm2111_vm3, %v5303_v15, %v4087_v48  ;;  %v963_v46 = vld [vmem:[#allocation2 + $0x69] sm:$0xff] }
  0xfe   : > { %v4141_v55 = vpop.permute.xlu2 %4140  ;;  %v7039_v15 = vld [vmem:[#allocation10_spill] sm:$0xff]  ;;  %v4324_v39 = vpack.i.bf16 %v963_v46, %v962_v9 }
  0xff   : > { %v4091_v20 = vpop.permute.xlu1 %4090  ;;  %4310 = vrot.lane.b32.xlu0 %v7038_v53, %s4693_s22  ;;  %v4143_v0 = vunpack.i.h.bf16 %v4141_v55  ;;  %v4142_v61 = vunpack.i.l.bf16 %v4141_v55  ;;  %v4339_v53 = vpack.i.bf16 %v1001_v63, %v1000_v44 }
 0x100   : > { %v4093_v24 = vunpack.i.h.bf16 %v4091_v20  ;;  %v4092_v60 = vunpack.i.l.bf16 %v4091_v20  ;;  %v912_v20 = vld [vmem:[#allocation2 + $0xfa] sm:$0xff] }
 0x101   : > { %v5531_v2 = vsel %vm2144_vm4, %v2116_v43, %v4142_v61  ;;  %v5534_v26 = vsel %vm2144_vm4, %v2117_v32, %v4143_v0  ;;  %v7040_v32 = vld [vmem:[#allocation12_spill] sm:$0xff]  ;;  %v4344_v52 = vpack.i.bf16 %v912_v20, %v911_v19  ;;  %v1008_v20 = vld [vmem:[#allocation2 + $0x10a] sm:$0xff] }
 0x102   : > { %v5519_v23 = vsel %vm2111_vm3, %v5394_v58, %v4092_v60  ;;  %v5523_v56 = vsel %vm2111_vm3, %v5390_v49, %v4093_v24  ;;  %v4101_v58 = vpop.permute.xlu0 %4100 }
 0x103   : > { %v4103_v12 = vunpack.i.h.bf16 %v4101_v58  ;;  %v4102_v49 = vunpack.i.l.bf16 %v4101_v58 }
 0x104   : > { %4320 = vrot.lane.b32.xlu2 %v7040_v32, %s4691_s20 }
 0x105   : > { %4315 = vrot.lane.b32.xlu1 %v7039_v15, %s4691_s20  ;;  %v5538_v57 = vsel %vm2111_vm3, %v5326_v25, %v4103_v12  ;;  %v5542_v42 = vsel %vm2111_vm3, %v5329_v29, %v4102_v49  ;;  %v995_v25 = vld [vmem:[#allocation2 + $0x6a] sm:$0xff] }
 0x106   : > { %v4156_v29 = vpop.permute.xlu2 %4155  ;;  %v4334_v60 = vpack.i.bf16 %v995_v25, %v994_v22 }
 0x107   : > { %v4106_v34 = vpop.permute.xlu1 %4105  ;;  %4325 = vrot.lane.b32.xlu0 %v4324_v39, %s4692_s21  ;;  %v4158_v41 = vunpack.i.h.bf16 %v4156_v29  ;;  %v4157_v48 = vunpack.i.l.bf16 %v4156_v29  ;;  %v7041_v29 = vld [vmem:[#allocation14_spill] sm:$0xff] }
 0x108   : > { %v4108_v54 = vunpack.i.h.bf16 %v4106_v34  ;;  %v4107_v35 = vunpack.i.l.bf16 %v4106_v34 }
 0x109   : > { %v5558_v46 = vsel %vm2144_vm4, %v5491_v7, %v4157_v48  ;;  %v5562_v55 = vsel %vm2144_vm4, %v5495_v62, %v4158_v41  ;;  %v917_v62 = vld [vmem:[#allocation2 + $0x13a] sm:$0xff]  ;;  %v982_v41 = vld [vmem:[#allocation2 + $0x151] sm:$0xff] }
 0x10a   : > { %v5546_v14 = vsel %vm2111_vm3, %v5418_v1, %v4107_v35  ;;  %v5550_v43 = vsel %vm2111_vm3, %v5414_v51, %v4108_v54  ;;  %v4116_v1 = vpop.permute.xlu0 %4115  ;;  %v983_v48 = vld [vmem:[#allocation2 + $0x159] sm:$0xff] }
 0x10b   : > { %v4118_v24 = vunpack.i.h.bf16 %v4116_v1  ;;  %v4117_v51 = vunpack.i.l.bf16 %v4116_v1 }
 0x10c   : > { %4335 = vrot.lane.b32.xlu2 %v4334_v60, %s4693_s22 }
 0x10d   : > { %4330 = vrot.lane.b32.xlu1 %v4329_v33, %s4692_s21  ;;  %v5566_v61 = vsel %vm2111_vm3, %v5357_v36, %v4118_v24  ;;  %v5570_v58 = vsel %vm2111_vm3, %v5360_v3, %v4117_v51  ;;  %v918_v36 = vld [vmem:[#allocation2 + $0x142] sm:$0xff] }
 0x10e   : > { %v4171_v12 = vpop.permute.xlu2 %4170 }
 0x10f   : > { %v4121_v9 = vpop.permute.xlu1 %4120  ;;  %4340 = vrot.lane.b32.xlu0 %v4339_v53, %s4693_s22  ;;  %v4173_v3 = vunpack.i.h.bf16 %v4171_v12  ;;  %v4172_v49 = vunpack.i.l.bf16 %v4171_v12  ;;  %v4369_v53 = vpack.i.bf16 %v983_v48, %v982_v41 }
 0x110   : > { %v4123_v15 = vunpack.i.h.bf16 %v4121_v9  ;;  %v4122_v0 = vunpack.i.l.bf16 %v4121_v9 }
 0x111   : > { %v5591_v33 = vsel %vm2144_vm4, %v5523_v56, %v4173_v3  ;;  %v976_v56 = vld [vmem:[#allocation2 + $0x109] sm:$0xff]  ;;  %v1014_v3 = vld [vmem:[#allocation2 + $0x152] sm:$0xff] }
 0x112   : > { %v5574_v37 = vsel %vm2111_vm3, %v5442_v10, %v4122_v0  ;;  %v5578_v7 = vsel %vm2111_vm3, %v5438_v31, %v4123_v15  ;;  %v4131_v39 = vpop.permute.xlu0 %4130  ;;  %v5583_v10 = vpack.i.bf16 %v918_v36, %v917_v62  ;;  %v5587_v31 = vsel %vm2144_vm4, %v5519_v23, %v4172_v49  ;;  %v932_v49 = vld [vmem:[#allocation2 + $0x78] sm:$0xff] }
 0x113   : > { %v4133_v34 = vunpack.i.h.bf16 %v4131_v39  ;;  %v4132_v54 = vunpack.i.l.bf16 %v4131_v39  ;;  %v933_v39 = vld [vmem:[#allocation2 + $0x80] sm:$0xff] }
 0x114   : > { %4350 = vrot.lane.b32.xlu2 %v5583_v10, %s4690_s19 }
 0x115   : > { %4345 = vrot.lane.b32.xlu1 %v4344_v52, %s4690_s19  ;;  %v5595_v25 = vsel %vm2144_vm4, %v5382_v28, %v4133_v34  ;;  %v5599_v44 = vsel %vm2144_vm4, %v5386_v16, %v4132_v54  ;;  %v977_v28 = vld [vmem:[#allocation2 + $0x111] sm:$0xff] }
 0x116   : > { %v4186_v16 = vpop.permute.xlu2 %4185  ;;  %v4364_v60 = vpack.i.bf16 %v977_v28, %v976_v56 }
 0x117   : > { %v4136_v35 = vpop.permute.xlu1 %4135  ;;  %4355 = vrot.lane.b32.xlu0 %v7041_v29, %s4691_s20  ;;  %v4187_v1 = vunpack.i.l.bf16 %v4186_v16  ;;  %v4384_v29 = vpack.i.bf16 %v933_v39, %v932_v49 }
 0x118   : > { %v4138_v32 = vunpack.i.h.bf16 %v4136_v35  ;;  %v4137_v22 = vunpack.i.l.bf16 %v4136_v35  ;;  %v938_v35 = vld [vmem:[#allocation2 + $0xc0] sm:$0xff] }
 0x119   : > { %v5617_v15 = vsel %vm2144_vm4, %v5546_v14, %v4187_v1  ;;  %v2335_v1 = vld [vmem:[%s6995_s3 + $0x28] sm:$0x1] }
 0x11a   : > { %v5603_v63 = vsel %vm2144_vm4, %v5461_v27, %v4137_v22  ;;  %v5607_v23 = vsel %vm2144_vm4, %v5465_v45, %v4138_v32  ;;  %v4188_v27 = vunpack.i.h.bf16 %v4186_v16  ;;  %v4146_v19 = vpop.permute.xlu0 %4145  ;;  %v1009_v45 = vld [vmem:[#allocation2 + $0x112] sm:$0xff]  ;;  %v939_v32 = vld [vmem:[#allocation2 + $0xc8] sm:$0xff] }
 0x11b   : > { %v4148_v24 = vunpack.i.h.bf16 %v4146_v19  ;;  %v4147_v51 = vunpack.i.l.bf16 %v4146_v19  ;;  %v5631_v12 = vpack.i.bf16 %v1009_v45, %v1008_v20  ;;  %v2361_v45 = vunpack.c.l.b16 %v2335_v1 }
 0x11c   : > { %v5621_v0 = vsel %vm2144_vm4, %v5550_v43, %v4188_v27  ;;  %4365 = vrot.lane.b32.xlu2 %v4364_v60, %s4692_s21 }
 0x11d   : > { %4360 = vrot.lane.b32.xlu1 %v5188_v21, %s4691_s20  ;;  %v5625_v62 = vsel %vm2144_vm4, %v5407_v11, %v4148_v24  ;;  %v5629_v36 = vsel %vm2144_vm4, %v5410_v30, %v4147_v51  ;;  %v1015_v11 = vld [vmem:[#allocation2 + $0x15a] sm:$0xff]  ;;  %v2367_v51 = vpack.c.b16 %v2361_v45, %v2361_v45 }
 0x11e   : > { %v4201_v30 = vpop.permute.xlu2 %4200  ;;  %v5645_v56 = vpack.i.bf16 %v1015_v11, %v1014_v3  ;;  %v997_v3 = vld [vmem:[#allocation2 + $0x82] sm:$0xff] }
 0x11f   : > { %v4151_v9 = vpop.permute.xlu1 %4150  ;;  %4370 = vrot.lane.b32.xlu0 %v4369_v53, %s4692_s21  ;;  %v4203_v34 = vunpack.i.h.bf16 %v4201_v30  ;;  %v4202_v54 = vunpack.i.l.bf16 %v4201_v30  ;;  %v970_v53 = vld [vmem:[#allocation2 + $0xc1] sm:$0xff] }
 0x120   : > { %v4153_v52 = vunpack.i.h.bf16 %v4151_v9  ;;  %v4152_v21 = vunpack.i.l.bf16 %v4151_v9  ;;  %v4694_v9 = vmov 0  }
 0x121   : > { %v5649_v41 = vsel %vm2144_vm4, %v5574_v37, %v4202_v54  ;;  %v5653_v48 = vsel %vm2144_vm4, %v5578_v7, %v4203_v34  ;;  %v4389_v37 = vpack.i.bf16 %v939_v32, %v938_v35 }
 0x122   : > { %v5635_v14 = vsel %vm2144_vm4, %v5487_v17, %v4152_v21  ;;  %v5639_v43 = vsel %vm2144_vm4, %v5483_v18, %v4153_v52  ;;  %v4161_v17 = vpop.permute.xlu0 %4160  ;;  %v2424_v52 = vsel %vm2422_vm5, 65535, %v4694_v9  ;;  %v3755_v9 = vld [vmem:[%s6995_s3 + $0x10] sm:$0xff] }
 0x123   : > { %v4163_v22 = vunpack.i.h.bf16 %v4161_v17  ;;  %v4162_v18 = vunpack.i.l.bf16 %v4161_v17  ;;  %v2426_v11 = vand.u32 %v2424_v52, %v2367_v51 }
 0x124   : > { %4380 = vrot.lane.b32.xlu2 %v5645_v56, %s4693_s22 }
 0x125   : > { %4375 = vrot.lane.b32.xlu1 %v5631_v12, %s4693_s22  ;;  %v5660_v19 = vsel %vm2144_vm4, %v5431_v13, %v4162_v18  ;;  %v5664_v20 = vsel %vm2144_vm4, %v5434_v38, %v4163_v22  ;;  %v964_v13 = vld [vmem:[#allocation2 + $0x79] sm:$0xff]  ;;  %v965_v38 = vld [vmem:[#allocation2 + $0x81] sm:$0xff]  ;;  %2430 = vmatpush.bf16.msra.mxu0 %v2426_v11 }
 0x126   : > { %v5677_v60 = vpop.permute.xlu2 %4215  ;;  %v4394_v30 = vpack.i.bf16 %v965_v38, %v964_v13  ;;  %3837 = vmatpush.bf16.msra.mxu1 %v2426_v11  ;;  %3838 = vmatpush.bf16.msra.mxu2 %v2426_v11 }
 0x127   : > { %v4166_v28 = vpop.permute.xlu1 %4165  ;;  %4385 = vrot.lane.b32.xlu0 %v4384_v29, %s4691_s20  ;;  %v3757_v29 = vld [vmem:[%s6995_s3 + $0x20] sm:$0xff]  ;;  %3839 = vmatpush.bf16.msra.mxu3 %v2426_v11 }
 0x128   : > { %v4168_v16 = vunpack.i.h.bf16 %v4166_v28  ;;  %v4167_v27 = vunpack.i.l.bf16 %v4166_v28 }
 0x129   : > { %2431 = vmatpush.bf16.msra.mxu0 %v3757_v29 }
 0x12a   : > { %v5668_v7 = vsel %vm2144_vm4, %v5515_v6, %v4167_v27  ;;  %v5672_v24 = vsel %vm2144_vm4, %v5511_v8, %v4168_v16  ;;  %v971_v6 = vld [vmem:[#allocation2 + $0xc9] sm:$0xff]  ;;  %v4176_v21 = vpop.permute.xlu0 %4175  ;;  %v996_v8 = vld [vmem:[#allocation2 + $0x7a] sm:$0xff]  ;;  %3840 = vmatpush.bf16.msra.mxu1 %v3757_v29  ;;  %3841 = vmatpush.bf16.msra.mxu2 %v3757_v29 }
 0x12b   : > { %v4178_v49 = vunpack.i.h.bf16 %v4176_v21  ;;  %v4177_v39 = vunpack.i.l.bf16 %v4176_v21  ;;  %v4399_v54 = vpack.i.bf16 %v971_v6, %v970_v53  ;;  %v4404_v18 = vpack.i.bf16 %v997_v3, %v996_v8  ;;  %3842 = vmatpush.bf16.msra.mxu3 %v3757_v29  ;;  %v953_v3 = vld [vmem:[#allocation2 + $0x170] sm:$0xff] }
 0x12c   : > { %4395 = vrot.lane.b32.xlu2 %v4394_v30, %s4692_s21  ;;  %v978_v30 = vld [vmem:[#allocation2 + $0x121] sm:$0xff] }
 0x12d   : > { %4390 = vrot.lane.b32.xlu1 %v4389_v37, %s4691_s20  ;;  %v5682_v32 = vsel %vm2144_vm4, %v5454_v4, %v4177_v39  ;;  %v5686_v22 = vsel %vm2144_vm4, %v5457_v47, %v4178_v49  ;;  %v1002_v4 = vld [vmem:[#allocation2 + $0xc2] sm:$0xff]  ;;  %v1003_v47 = vld [vmem:[#allocation2 + $0xca] sm:$0xff] }
 0x12e   : > { %v5701_v27 = vpop.permute.xlu2 %4230  ;;  %v4409_v45 = vpack.i.bf16 %v1003_v47, %v1002_v4  ;;  %v3753_v4 = vld [vmem:[%s6995_s3] sm:$0xff] }
 0x12f   : > { %v4181_v34 = vpop.permute.xlu1 %4180  ;;  %4400 = vrot.lane.b32.xlu0 %v4399_v54, %s4692_s21 }
 0x130   : > { %v4183_v17 = vunpack.i.h.bf16 %v4181_v34  ;;  %v4182_v35 = vunpack.i.l.bf16 %v4181_v34  ;;  %v979_v34 = vld [vmem:[#allocation2 + $0x129] sm:$0xff] }
 0x132   : > { %v5693_v28 = vsel %vm2144_vm4, %v5542_v42, %v4182_v35  ;;  %v5697_v16 = vsel %vm2144_vm4, %v5538_v57, %v4183_v17  ;;  %v3756_v42 = vld [vmem:[%s6995_s3 + $0x18] sm:$0xff]  ;;  %v4191_v1 = vpop.permute.xlu0 %4190 }
 0x133   : > { %v4193_v57 = vunpack.i.h.bf16 %v4191_v1  ;;  %v4192_v37 = vunpack.i.l.bf16 %v4191_v1  ;;  %2432 = vmatpush.bf16.msra.mxu0 %v3756_v42  ;;  %3843 = vmatpush.bf16.msra.mxu1 %v3756_v42  ;;  %v985_v1 = vld [vmem:[#allocation2 + $0x171] sm:$0xff] }
 0x134   : > { %3844 = vmatpush.bf16.msra.mxu2 %v3756_v42  ;;  %3845 = vmatpush.bf16.msra.mxu3 %v3756_v42 }
 0x135   : > { %4405 = vrot.lane.b32.xlu1 %v4404_v18, %s4693_s22  ;;  %v5709_v53 = vsel %vm2144_vm4, %v5476_v40, %v4192_v37  ;;  %v5713_v6 = vsel %vm2144_vm4, %v5479_v5, %v4193_v57  ;;  %4410 = vrot.lane.b32.xlu2 %v4409_v45, %s4693_s22  ;;  %v946_v40 = vld [vmem:[#allocation2 + $0x120] sm:$0xff]  ;;  %v947_v5 = vld [vmem:[#allocation2 + $0x128] sm:$0xff] }
 0x136   : > { %v4246_v8 = vpop.permute.xlu2 %4245  ;;  %v4424_v17 = vpack.i.bf16 %v947_v5, %v946_v40  ;;  %v1011_v37 = vld [vmem:[#allocation2 + $0x12a] sm:$0xff] }
 0x137   : > { %v4196_v51 = vpop.permute.xlu1 %4195  ;;  %4415 = vrot.lane.b32.xlu0 %v5631_v12, %s4690_s19  ;;  %2433 = vmatpush.bf16.msra.mxu0 %v3755_v9  ;;  %v4248_v11 = vunpack.i.h.bf16 %v4246_v8  ;;  %v4247_v49 = vunpack.i.l.bf16 %v4246_v8  ;;  %v1016_v45 = vld [vmem:[#allocation2 + $0x16a] sm:$0xff] }
 0x138   : > { %v4198_v13 = vunpack.i.h.bf16 %v4196_v51  ;;  %v4197_v38 = vunpack.i.l.bf16 %v4196_v51  ;;  %3846 = vmatpush.bf16.msra.mxu1 %v3755_v9  ;;  %3847 = vmatpush.bf16.msra.mxu2 %v3755_v9  ;;  %v1017_v51 = vld [vmem:[#allocation2 + $0x172] sm:$0xff] }
 0x139   : > { %3848 = vmatpush.bf16.msra.mxu3 %v3755_v9  ;;  %v5742_v18 = vsel %vm2177_vm6, %v5672_v24, %v4248_v11  ;;  %v984_v24 = vld [vmem:[#allocation2 + $0x169] sm:$0xff]  ;;  %v4449_v8 = vpack.i.bf16 %v1017_v51, %v1016_v45  ;;  %v941_v11 = vld [vmem:[#allocation2 + $0xe0] sm:$0xff] }
 0x13a   : > { %v5720_v52 = vsel %vm2144_vm4, %v5570_v58, %v4197_v38  ;;  %v5724_v21 = vsel %vm2144_vm4, %v5566_v61, %v4198_v13  ;;  %v952_v58 = vld [vmem:[#allocation2 + $0x168] sm:$0xff]  ;;  %v4206_v39 = vpop.permute.xlu0 %4205  ;;  %v4439_v13 = vpack.i.bf16 %v985_v1, %v984_v24 }
 0x13b   : > { %v3754_v61 = vld [vmem:[%s6995_s3 + $0x8] sm:$0xff]  ;;  %v4208_v12 = vunpack.i.h.bf16 %v4206_v39  ;;  %v4207_v54 = vunpack.i.l.bf16 %v4206_v39  ;;  %v4429_v29 = vpack.i.bf16 %v953_v3, %v952_v58  ;;  %v972_v39 = vld [vmem:[#allocation2 + $0xd9] sm:$0xff] }
 0x13c   : > { %2434 = vmatpush.bf16.msra.mxu0 %v3754_v61  ;;  %3849 = vmatpush.bf16.msra.mxu1 %v3754_v61 }
 0x13d   : > { %4420 = vrot.lane.b32.xlu1 %v5645_v56, %s4690_s19  ;;  %v5738_v56 = vsel %vm2177_vm6, %v5668_v7, %v4247_v49  ;;  %v5749_v47 = vsel %vm2144_vm4, %v5504_v59, %v4207_v54  ;;  %v5753_v42 = vsel %vm2144_vm4, %v5507_v50, %v4208_v12  ;;  %v4434_v7 = vpack.i.bf16 %v979_v34, %v978_v30  ;;  %v1010_v59 = vld [vmem:[#allocation2 + $0x122] sm:$0xff] }
 0x13e   : > { %3850 = vmatpush.bf16.msra.mxu2 %v3754_v61  ;;  %3851 = vmatpush.bf16.msra.mxu3 %v3754_v61  ;;  %v5757_v57 = vpop.permute.xlu2 %4260  ;;  %v4444_v9 = vpack.i.bf16 %v1011_v37, %v1010_v59  ;;  %v940_v61 = vld [vmem:[#allocation2 + $0xd8] sm:$0xff]  ;;  %v973_v30 = vld [vmem:[#allocation2 + $0xe1] sm:$0xff] }
 0x13f   : > { %v5734_v35 = vpop.permute.xlu1 %4210  ;;  %4425 = vrot.lane.b32.xlu2 %v4424_v17, %s4691_s20  ;;  %4430 = vrot.lane.b32.xlu0 %v4429_v29, %s4691_s20  ;;  %v1005_v12 = vld [vmem:[#allocation2 + $0xe2] sm:$0xff]  ;;  %v4454_v54 = vpack.i.bf16 %v941_v11, %v940_v61 }
 0x140   : > { %2435 = vmatpush.bf16.msra.mxu0 %v3753_v4  ;;  %3852 = vmatpush.bf16.msra.mxu1 %v3753_v4  ;;  %v4213_v37 = vunpack.i.h.bf16 %v5734_v35  ;;  %v4212_v45 = vunpack.i.l.bf16 %v5734_v35 }
 0x142   : > { %v5760_v50 = vpop.permute.xlu0 %4220  ;;  %3853 = vmatpush.bf16.msra.mxu2 %v3753_v4  ;;  %3854 = vmatpush.bf16.msra.mxu3 %v3753_v4  ;;  %v2178_v61 = vsel %vm2177_vm6, %v5599_v44, %v4212_v45  ;;  %v2179_v11 = vsel %vm2177_vm6, %v5595_v25, %v4213_v37  ;;  %v980_v25 = vld [vmem:[#allocation2 + $0x139] sm:$0xff]  ;;  %v981_v44 = vld [vmem:[#allocation2 + $0x141] sm:$0xff] }
 0x145   : > { %4435 = vrot.lane.b32.xlu1 %v4434_v7, %s4692_s21 }
 0x146   : > { %v5772_v49 = vpop.permute.xlu2 %4275 }
 0x147   : > { %v4226_v38 = vpop.permute.xlu1 %4225  ;;  %4440 = vrot.lane.b32.xlu2 %v4439_v13, %s4692_s21  ;;  %4445 = vrot.lane.b32.xlu0 %v4444_v9, %s4693_s22  ;;  %v949_v13 = vld [vmem:[#allocation2 + $0x140] sm:$0xff] }
 0x148   : > { %v4228_v40 = vunpack.i.h.bf16 %v4226_v38  ;;  %v4227_v5 = vunpack.i.l.bf16 %v4226_v38 }
 0x14a   : > { %v5764_v58 = vsel %vm2177_vm6, %v5629_v36, %v4227_v5  ;;  %v5768_v3 = vsel %vm2177_vm6, %v5625_v62, %v4228_v40  ;;  %v5775_v34 = vpop.permute.xlu0 %4235  ;;  %v1004_v36 = vld [vmem:[#allocation2 + $0xda] sm:$0xff]  ;;  %v4459_v62 = vpack.i.bf16 %v973_v30, %v972_v39  ;;  %v4263_v39 = vunpack.i.h.bf16 %v5757_v57 }
 0x14b   : > { %v4464_v7 = vpack.i.bf16 %v1005_v12, %v1004_v36  ;;  %v4262_v30 = vunpack.i.l.bf16 %v5757_v57  ;;  %v954_v12 = vld [vmem:[#allocation2 + $0x180] sm:$0xff] }
 0x14d   : > { %4450 = vrot.lane.b32.xlu1 %v4449_v8, %s4693_s22 }
 0x14e   : > { %v5787_v59 = vpop.permute.xlu2 %4290 }
 0x14f   : > { %v4241_v17 = vpop.permute.xlu1 %4240  ;;  %4455 = vrot.lane.b32.xlu2 %v4454_v54, %s4691_s20  ;;  %4460 = vrot.lane.b32.xlu0 %v4459_v62, %s4692_s21  ;;  %v955_v54 = vld [vmem:[#allocation2 + $0x188] sm:$0xff] }
 0x150   : > { %v4243_v29 = vunpack.i.h.bf16 %v4241_v17  ;;  %v4242_v4 = vunpack.i.l.bf16 %v4241_v17 }
 0x152   : > { %v5779_v24 = vsel %vm2177_vm6, %v5660_v19, %v4242_v4  ;;  %v5783_v1 = vsel %vm2177_vm6, %v5664_v20, %v4243_v29  ;;  %v5792_v51 = vpop.permute.xlu0 %4250  ;;  %v948_v19 = vld [vmem:[#allocation2 + $0x138] sm:$0xff]  ;;  %v986_v29 = vld [vmem:[#allocation2 + $0x181] sm:$0xff]  ;;  %v987_v4 = vld [vmem:[#allocation2 + $0x189] sm:$0xff] }
 0x153   : > { %v4479_v5 = vpack.i.bf16 %v949_v13, %v948_v19  ;;  %v4218_v19 = vunpack.i.h.bf16 %v5677_v60  ;;  %v4217_v13 = vunpack.i.l.bf16 %v5677_v60 }
 0x155   : > { %4465 = vrot.lane.b32.xlu1 %v4464_v7, %s4693_s22  ;;  %v2181_v60 = vsel %vm2177_vm6, %v5607_v23, %v4218_v19  ;;  %v4233_v23 = vunpack.i.h.bf16 %v5701_v27 }
 0x156   : > { %v5804_v17 = vpop.permute.xlu2 %4305 }
 0x157   : > { %v4256_v38 = vpop.permute.xlu1 %4255  ;;  %4470 = vrot.lane.b32.xlu2 %v4444_v9, %s4690_s19  ;;  %4475 = vrot.lane.b32.xlu0 %v4449_v8, %s4690_s19  ;;  %v4484_v8 = vpack.i.bf16 %v955_v54, %v954_v12  ;;  %v1019_v12 = vld [vmem:[#allocation2 + $0x18a] sm:$0xff]  ;;  %v4293_v54 = vunpack.i.h.bf16 %v5787_v59 }
 0x158   : > { %v4258_v40 = vunpack.i.h.bf16 %v4256_v38  ;;  %v4257_v20 = vunpack.i.l.bf16 %v4256_v38  ;;  %v4489_v38 = vpack.i.bf16 %v981_v44, %v980_v25  ;;  %v4292_v25 = vunpack.i.l.bf16 %v5787_v59 }
 0x15a   : > { %v2211_v35 = vsel %vm2210_vm7, %v2178_v61, %v4257_v20  ;;  %v2212_v36 = vsel %vm2210_vm7, %v2179_v11, %v4258_v40  ;;  %v4266_v62 = vpop.permute.xlu0 %4265 }
 0x15b   : > { %v2244_v57 = vsel %vm2243_vm8, %v2211_v35, %v4262_v30  ;;  %v2245_v9 = vsel %vm2243_vm8, %v2212_v36, %v4263_v39  ;;  %v4268_v7 = vunpack.i.h.bf16 %v4266_v62  ;;  %v4267_v37 = vunpack.i.l.bf16 %v4266_v62  ;;  %v1018_v36 = vld [vmem:[#allocation2 + $0x182] sm:$0xff] }
 0x15c   : > { %v2180_v30 = vsel %vm2177_vm6, %v5603_v63, %v4217_v13 }
 0x15d   : > { %4480 = vrot.lane.b32.xlu1 %v4479_v5, %s4691_s20  ;;  %v2277_v40 = vsel %vm2276_vm9, %v2244_v57, %v4267_v37  ;;  %v2278_v20 = vsel %vm2276_vm9, %v2245_v9, %v4268_v7  ;;  %v4494_v5 = vpack.i.bf16 %v987_v4, %v986_v29  ;;  %v4232_v4 = vunpack.i.l.bf16 %v5701_v27 }
 0x15e   : > { %v2309_v39 = vpack.c.bf16 %v2278_v20, %v2277_v40  ;;  %v5820_v35 = vpop.permute.xlu2 %4320  ;;  %v4504_v7 = vpack.i.bf16 %v1019_v12, %v1018_v36  ;;  %v4278_v37 = vunpack.i.h.bf16 %v5772_v49  ;;  %v989_v36 = vld [vmem:[#allocation2 + $0x1a1] sm:$0xff] }
 0x15f   : > { %v4271_v45 = vpop.permute.xlu1 %4270  ;;  %4485 = vrot.lane.b32.xlu2 %v4484_v8, %s4691_s20  ;;  %4490 = vrot.lane.b32.xlu0 %v4489_v38, %s4692_s21  ;;  %v2186_v27 = vsel %vm2177_vm6, %v5635_v14, %v4232_v4  ;;  %v4253_v14 = vunpack.i.h.bf16 %v5792_v51 }
 0x160   : > { %v4273_v61 = vunpack.i.h.bf16 %v4271_v45  ;;  %v4272_v11 = vunpack.i.l.bf16 %v4271_v45  ;;  %3730 = vmatmul.msk.bf16.vlgmr.msra.gmra.mxu0 %vm2373_vm10, %v2309_v39  ;;  %v4277_v45 = vunpack.i.l.bf16 %v5772_v49  ;;  %v2187_v49 = vsel %vm2177_vm6, %v5639_v43, %v4233_v23 }
 0x161   : > { %v2220_v39 = vsel %vm2210_vm7, %v2187_v49, %v4278_v37 }
 0x162   : > { %v2213_v44 = vsel %vm2210_vm7, %v2180_v30, %v4272_v11  ;;  %v2214_v62 = vsel %vm2210_vm7, %v2181_v60, %v4273_v61  ;;  %v4281_v57 = vpop.permute.xlu0 %4280  ;;  %v957_v61 = vld [vmem:[#allocation2 + $0x1a0] sm:$0xff]  ;;  %v2219_v11 = vsel %vm2210_vm7, %v2186_v27, %v4277_v45  ;;  %v4252_v30 = vunpack.i.l.bf16 %v5792_v51 }
 0x163   : > { %v4283_v9 = vunpack.i.h.bf16 %v4281_v57  ;;  %v4282_v63 = vunpack.i.l.bf16 %v4281_v57 }
 0x165   : > { %4495 = vrot.lane.b32.xlu1 %v4494_v5, %s4692_s21  ;;  %v2246_v8 = vsel %vm2243_vm8, %v2213_v44, %v4282_v63  ;;  %v2247_v59 = vsel %vm2243_vm8, %v2214_v62, %v4283_v9  ;;  %v956_v5 = vld [vmem:[#allocation2 + $0x198] sm:$0xff]  ;;  %v1021_v44 = vld [vmem:[#allocation2 + $0x1a2] sm:$0xff] }
 0x166   : > { %v2279_v38 = vsel %vm2276_vm9, %v2246_v8, %v4292_v25  ;;  %v2280_v40 = vsel %vm2276_vm9, %v2247_v59, %v4293_v54  ;;  %v5845_v60 = vpop.permute.xlu2 %4335  ;;  %v1020_v25 = vld [vmem:[#allocation2 + $0x19a] sm:$0xff]  ;;  %v4514_v63 = vpack.i.bf16 %v957_v61, %v956_v5  ;;  %v2195_v8 = vsel %vm2177_vm6, %v5591_v33, %v4253_v14 }
 0x167   : > { %v4286_v29 = vpop.permute.xlu1 %4285  ;;  %v2310_v20 = vpack.c.bf16 %v2280_v40, %v2279_v38  ;;  %4500 = vrot.lane.b32.xlu2 %v5583_v10, %s4693_s22  ;;  %4505 = vrot.lane.b32.xlu0 %v4504_v7, %s4693_s22  ;;  %v988_v10 = vld [vmem:[#allocation2 + $0x199] sm:$0xff]  ;;  %v4524_v45 = vpack.i.bf16 %v1021_v44, %v1020_v25  ;;  %v4308_v59 = vunpack.i.h.bf16 %v5804_v17  ;;  %v4338_v25 = vunpack.i.h.bf16 %v5845_v60 }
 0x168   : > { %v4288_v19 = vunpack.i.h.bf16 %v4286_v29  ;;  %v4287_v13 = vunpack.i.l.bf16 %v4286_v29  ;;  %v4519_v4 = vpack.i.bf16 %v989_v36, %v988_v10 }
 0x16a   : > { %v2252_v43 = vsel %vm2243_vm8, %v2219_v11, %v4287_v13  ;;  %v2253_v12 = vsel %vm2243_vm8, %v2220_v39, %v4288_v19  ;;  %v4296_v54 = vpop.permute.xlu0 %4295  ;;  %v4307_v19 = vunpack.i.l.bf16 %v5804_v17  ;;  %v4223_v11 = vunpack.i.h.bf16 %v5760_v50 }
 0x16b   : > { %v4298_v62 = vunpack.i.h.bf16 %v4296_v54  ;;  %v4297_v57 = vunpack.i.l.bf16 %v4296_v54  ;;  %v4222_v39 = vunpack.i.l.bf16 %v5760_v50  ;;  %v4337_v50 = vunpack.i.l.bf16 %v5845_v60 }
 0x16d   : > { %4510 = vrot.lane.b32.xlu1 %v4504_v7, %s4690_s19  ;;  %v2194_v7 = vsel %vm2177_vm6, %v5587_v31, %v4252_v30  ;;  %v2285_v37 = vsel %vm2276_vm9, %v2252_v43, %v4297_v57  ;;  %v2286_v51 = vsel %vm2276_vm9, %v2253_v12, %v4298_v62  ;;  %v2182_v43 = vsel %vm2177_vm6, %v5531_v2, %v4222_v39 }
 0x16e   : > { %v2313_v13 = vpack.c.bf16 %v2286_v51, %v2285_v37  ;;  %v5864_v31 = vpop.permute.xlu2 %4350  ;;  %v2183_v12 = vsel %vm2177_vm6, %v5534_v26, %v4223_v11  ;;  %v4237_v2 = vunpack.i.l.bf16 %v5775_v34  ;;  %v4323_v26 = vunpack.i.h.bf16 %v5820_v35 }
 0x16f   : > { %v4301_v9 = vpop.permute.xlu1 %4300  ;;  %4515 = vrot.lane.b32.xlu2 %v4514_v63, %s4691_s20  ;;  %4520 = vrot.lane.b32.xlu0 %v4519_v4, %s4692_s21  ;;  %v4322_v4 = vunpack.i.l.bf16 %v5820_v35  ;;  %s6076_s20 = scalar_lea.vmem %s6999_s7, %s3748_s29 }
 0x170   : > { %v4303_v29 = vunpack.i.h.bf16 %v4301_v9  ;;  %v4302_v23 = vunpack.i.l.bf16 %v4301_v9  ;;  %3734 = vmatmul.msk.bf16.vlgmr.msra.gmra.mxu1 %vm2373_vm10, %v2313_v13  ;;  %3731 = vmatmul.msk.bf16.gmra.mxu0 %vm2373_vm10, %v2310_v20 }
 0x172   : > { %v2227_v38 = vsel %vm2210_vm7, %v2194_v7, %v4302_v23  ;;  %v2228_v40 = vsel %vm2210_vm7, %v2195_v8, %v4303_v29  ;;  %v4311_v33 = vpop.permute.xlu0 %4310  ;;  %v4238_v23 = vunpack.i.h.bf16 %v5775_v34 }
 0x173   : > { %v2260_v17 = vsel %vm2243_vm8, %v2227_v38, %v4307_v19  ;;  %v2261_v27 = vsel %vm2243_vm8, %v2228_v40, %v4308_v59  ;;  %v4313_v49 = vunpack.i.h.bf16 %v4311_v33  ;;  %v4312_v5 = vunpack.i.l.bf16 %v4311_v33 }
 0x174   : > { %v2188_v19 = vsel %vm2177_vm6, %v5558_v46, %v4237_v2  ;;  %v2189_v34 = vsel %vm2177_vm6, %v5562_v55, %v4238_v23 }
 0x175   : > { %4525 = vrot.lane.b32.xlu1 %v4524_v45, %s4693_s22  ;;  %v2293_v30 = vsel %vm2276_vm9, %v2260_v17, %v4312_v5  ;;  %v2294_v10 = vsel %vm2276_vm9, %v2261_v27, %v4313_v49  ;;  %v2221_v13 = vsel %vm2210_vm7, %v2188_v19, %v4322_v4  ;;  %v2222_v35 = vsel %vm2210_vm7, %v2189_v34, %v4323_v26  ;;  %s3709_s22 = sshll.u32 %s7055_s26, 1 }
 0x176   : > { %v2317_v14 = vpack.c.bf16 %v2294_v10, %v2293_v30  ;;  %v5879_v54 = vpop.permute.xlu2 %4365  ;;  %s488_s25 = scalar_lea.vmem %s7000_s8, %s3709_s22 }
 0x177   : > { %v4316_v61 = vpop.permute.xlu1 %4315 }
 0x178   : > { %v4318_v36 = vunpack.i.h.bf16 %v4316_v61  ;;  %v4317_v20 = vunpack.i.l.bf16 %v4316_v61  ;;  %3738 = vmatmul.msk.bf16.vlgmr.msra.gmra.mxu2 %vm2373_vm10, %v2317_v14  ;;  %v4352_v14 = vunpack.i.l.bf16 %v5864_v31 }
 0x17a   : > { %v2215_v44 = vsel %vm2210_vm7, %v2182_v43, %v4317_v20  ;;  %v2216_v62 = vsel %vm2210_vm7, %v2183_v12, %v4318_v36  ;;  %v4326_v57 = vpop.permute.xlu0 %4325  ;;  %v4353_v20 = vunpack.i.h.bf16 %v5864_v31  ;;  %v4367_v31 = vunpack.i.l.bf16 %v5879_v54 }
 0x17b   : > { %v4328_v9 = vunpack.i.h.bf16 %v4326_v57  ;;  %v4327_v63 = vunpack.i.l.bf16 %v4326_v57  ;;  %v2202_v57 = vsel %vm2177_vm6, %v5709_v53, %v4352_v14 }
 0x17d   : > { %v2248_v7 = vsel %vm2243_vm8, %v2215_v44, %v4327_v63  ;;  %v2249_v60 = vsel %vm2243_vm8, %v2216_v62, %v4328_v9  ;;  %v2203_v9 = vsel %vm2177_vm6, %v5713_v6, %v4353_v20  ;;  %v4368_v63 = vunpack.i.h.bf16 %v5879_v54 }
 0x17e   : > { %v2281_v45 = vsel %vm2276_vm9, %v2248_v7, %v4337_v50  ;;  %v2282_v8 = vsel %vm2276_vm9, %v2249_v60, %v4338_v25  ;;  %v4381_v38 = vpop.permute.xlu2 %4380 }
 0x17f   : > { %v4331_v29 = vpop.permute.xlu1 %4330  ;;  %v2311_v59 = vpack.c.bf16 %v2282_v8, %v2281_v45  ;;  %v4382_v23 = vunpack.i.l.bf16 %v4381_v38 }
 0x180   : > { %v4333_v37 = vunpack.i.h.bf16 %v4331_v29  ;;  %v4332_v51 = vunpack.i.l.bf16 %v4331_v29  ;;  %v4383_v29 = vunpack.i.h.bf16 %v4381_v38 }
 0x181   : > { %3732 = vmatmul.msk.bf16.gmra.mxu0 %vm2373_vm10, %v2311_v59 }
 0x182   : > { %v2254_v40 = vsel %vm2243_vm8, %v2221_v13, %v4332_v51  ;;  %v2255_v33 = vsel %vm2243_vm8, %v2222_v35, %v4333_v37  ;;  %v4341_v17 = vpop.permute.xlu0 %4340 }
 0x183   : > { %v4343_v27 = vunpack.i.h.bf16 %v4341_v17  ;;  %v4342_v49 = vunpack.i.l.bf16 %v4341_v17 }
 0x185   : > { %v2287_v46 = vsel %vm2276_vm9, %v2254_v40, %v4342_v49  ;;  %v2288_v61 = vsel %vm2276_vm9, %v2255_v33, %v4343_v27 }
 0x186   : > { %v2314_v55 = vpack.c.bf16 %v2288_v61, %v2287_v46  ;;  %v5905_v10 = vpop.permute.xlu2 %4395 }
 0x187   : > { %v4346_v5 = vpop.permute.xlu1 %4345 }
 0x188   : > { %3735 = vmatmul.msk.bf16.gmra.mxu1 %vm2373_vm10, %v2314_v55  ;;  %v4348_v39 = vunpack.i.h.bf16 %v4346_v5  ;;  %v4347_v30 = vunpack.i.l.bf16 %v4346_v5  ;;  %v4398_v55 = vunpack.i.h.bf16 %v5905_v10 }
 0x18a   : > { %v4356_v11 = vpop.permute.xlu0 %4355  ;;  %v2196_v44 = vsel %vm2177_vm6, %v5682_v32, %v4347_v30  ;;  %v2197_v62 = vsel %vm2177_vm6, %v5686_v22, %v4348_v39 }
 0x18b   : > { %v4358_v43 = vunpack.i.h.bf16 %v4356_v11  ;;  %v4357_v12 = vunpack.i.l.bf16 %v4356_v11  ;;  %v4397_v11 = vunpack.i.l.bf16 %v5905_v10 }
 0x18d   : > { %v2229_v2 = vsel %vm2210_vm7, %v2196_v44, %v4357_v12  ;;  %v2230_v26 = vsel %vm2210_vm7, %v2197_v62, %v4358_v43 }
 0x18e   : > { %v2262_v8 = vsel %vm2243_vm8, %v2229_v2, %v4367_v31  ;;  %v2263_v59 = vsel %vm2243_vm8, %v2230_v26, %v4368_v63 }
 0x18f   : > { %v4361_v36 = vpop.permute.xlu1 %4360  ;;  %v4411_v51 = vpop.permute.xlu2 %4410 }
 0x190   : > { %v4363_v25 = vunpack.i.h.bf16 %v4361_v36  ;;  %v4362_v50 = vunpack.i.l.bf16 %v4361_v36  ;;  %v4413_v39 = vunpack.i.h.bf16 %v4411_v51  ;;  %v4412_v30 = vunpack.i.l.bf16 %v4411_v51 }
 0x192   : > { %v2235_v32 = vsel %vm2210_vm7, %v2202_v57, %v4362_v50  ;;  %v2236_v22 = vsel %vm2210_vm7, %v2203_v9, %v4363_v25  ;;  %v4371_v4 = vpop.permute.xlu0 %4370 }
 0x193   : > { %v4373_v7 = vunpack.i.h.bf16 %v4371_v4  ;;  %v4372_v53 = vunpack.i.l.bf16 %v4371_v4 }
 0x195   : > { %v2268_v45 = vsel %vm2243_vm8, %v2235_v32, %v4372_v53  ;;  %v2269_v54 = vsel %vm2243_vm8, %v2236_v22, %v4373_v7 }
 0x196   : > { %v2301_v19 = vsel %vm2276_vm9, %v2268_v45, %v4382_v23  ;;  %v2302_v34 = vsel %vm2276_vm9, %v2269_v54, %v4383_v29 }
 0x197   : > { %v4376_v60 = vpop.permute.xlu1 %4375  ;;  %v2321_v38 = vpack.c.bf16 %v2302_v34, %v2301_v19 }
 0x198   : > { %v4378_v37 = vunpack.i.h.bf16 %v4376_v60  ;;  %v4377_v6 = vunpack.i.l.bf16 %v4376_v60 }
 0x199   : > { %3742 = vmatmul.msk.bf16.vlgmr.msra.gmra.mxu3 %vm2373_vm10, %v2321_v38  ;;  %v4426_v61 = vpop.permute.xlu2 %4425 }
 0x19a   : > { %v2295_v13 = vsel %vm2276_vm9, %v2262_v8, %v4377_v6  ;;  %v2296_v35 = vsel %vm2276_vm9, %v2263_v59, %v4378_v37  ;;  %v4386_v33 = vpop.permute.xlu0 %4385  ;;  %v4428_v51 = vunpack.i.h.bf16 %v4426_v61  ;;  %v4427_v45 = vunpack.i.l.bf16 %v4426_v61 }
 0x19b   : > { %v2318_v40 = vpack.c.bf16 %v2296_v35, %v2295_v13  ;;  %v4388_v27 = vunpack.i.h.bf16 %v4386_v33  ;;  %v4387_v49 = vunpack.i.l.bf16 %v4386_v33 }
 0x19d   : > { %3739 = vmatmul.msk.bf16.gmra.mxu2 %vm2373_vm10, %v2318_v40  ;;  %v2217_v36 = vsel %vm2210_vm7, %v5764_v58, %v4387_v49  ;;  %v2218_v20 = vsel %vm2210_vm7, %v5768_v3, %v4388_v27 }
 0x19e   : > { %v2250_v58 = vsel %vm2243_vm8, %v2217_v36, %v4397_v11  ;;  %v2251_v3 = vsel %vm2243_vm8, %v2218_v20, %v4398_v55 }
 0x19f   : > { %v4391_v17 = vpop.permute.xlu1 %4390 }
 0x1a0   : > { %v4393_v5 = vunpack.i.h.bf16 %v4391_v17  ;;  %v4392_v46 = vunpack.i.l.bf16 %v4391_v17 }
 0x1a1   : > { %v4441_v2 = vpop.permute.xlu2 %4440 }
 0x1a2   : > { %v2223_v14 = vsel %vm2210_vm7, %v5779_v24, %v4392_v46  ;;  %v2224_v43 = vsel %vm2210_vm7, %v5783_v1, %v4393_v5  ;;  %v4401_v12 = vpop.permute.xlu0 %4400  ;;  %v4443_v40 = vunpack.i.h.bf16 %v4441_v2  ;;  %v4442_v33 = vunpack.i.l.bf16 %v4441_v2 }
 0x1a3   : > { %v4403_v25 = vunpack.i.h.bf16 %v4401_v12  ;;  %v4402_v50 = vunpack.i.l.bf16 %v4401_v12 }
 0x1a5   : > { %v2256_v57 = vsel %vm2243_vm8, %v2223_v14, %v4402_v50  ;;  %v2257_v9 = vsel %vm2243_vm8, %v2224_v43, %v4403_v25 }
 0x1a6   : > { %v2289_v63 = vsel %vm2276_vm9, %v2256_v57, %v4412_v30  ;;  %v2290_v24 = vsel %vm2276_vm9, %v2257_v9, %v4413_v39 }
 0x1a7   : > { %v4406_v44 = vpop.permute.xlu1 %4405  ;;  %v2315_v29 = vpack.c.bf16 %v2290_v24, %v2289_v63 }
 0x1a8   : > { %v4408_v62 = vunpack.i.h.bf16 %v4406_v44  ;;  %v4407_v10 = vunpack.i.l.bf16 %v4406_v44 }
 0x1a9   : > { %3736 = vmatmul.msk.bf16.gmra.mxu1 %vm2373_vm10, %v2315_v29  ;;  %v4456_v53 = vpop.permute.xlu2 %4455 }
 0x1aa   : > { %v2283_v1 = vsel %vm2276_vm9, %v2250_v58, %v4407_v10  ;;  %v2284_v31 = vsel %vm2276_vm9, %v2251_v3, %v4408_v62  ;;  %v4416_v26 = vpop.permute.xlu0 %4415  ;;  %v4458_v44 = vunpack.i.h.bf16 %v4456_v53  ;;  %v4457_v62 = vunpack.i.l.bf16 %v4456_v53 }
 0x1ab   : > { %v2312_v23 = vpack.c.bf16 %v2284_v31, %v2283_v1  ;;  %v4418_v22 = vunpack.i.h.bf16 %v4416_v26  ;;  %v4417_v4 = vunpack.i.l.bf16 %v4416_v26 }
 0x1ac   : > { %v2225_v3 = vsel %vm2210_vm7, %v5738_v56, %v4457_v62  ;;  %v2226_v63 = vsel %vm2210_vm7, %v5742_v18, %v4458_v44 }
 0x1ad   : > { %3733 = vmatmul.msk.bf16.gmra.mxu0 %vm2373_vm10, %v2312_v23  ;;  %v2198_v54 = vsel %vm2177_vm6, %v5693_v28, %v4417_v4  ;;  %v2199_v8 = vsel %vm2177_vm6, %v5697_v16, %v4418_v22 }
 0x1ae   : > { %v2231_v17 = vsel %vm2210_vm7, %v2198_v54, %v4427_v45  ;;  %v2232_v27 = vsel %vm2210_vm7, %v2199_v8, %v4428_v51 }
 0x1af   : > { %v4421_v32 = vpop.permute.xlu1 %4420 }
 0x1b0   : > { %v4423_v60 = vunpack.i.h.bf16 %v4421_v32  ;;  %v4422_v37 = vunpack.i.l.bf16 %v4421_v32 }
 0x1b1   : > { %v4471_v39 = vpop.permute.xlu2 %4470 }
 0x1b2   : > { %v4431_v7 = vpop.permute.xlu0 %4430  ;;  %v2204_v35 = vsel %vm2177_vm6, %v5720_v52, %v4422_v37  ;;  %v2205_v38 = vsel %vm2177_vm6, %v5724_v21, %v4423_v60  ;;  %v4473_v56 = vunpack.i.h.bf16 %v4471_v39 }
 0x1b3   : > { %v4433_v59 = vunpack.i.h.bf16 %v4431_v7  ;;  %v4432_v19 = vunpack.i.l.bf16 %v4431_v7  ;;  %v4472_v7 = vunpack.i.l.bf16 %v4471_v39 }
 0x1b5   : > { %v2237_v28 = vsel %vm2210_vm7, %v2204_v35, %v4432_v19  ;;  %v2238_v16 = vsel %vm2210_vm7, %v2205_v38, %v4433_v59  ;;  %v2200_v37 = vsel %vm2177_vm6, %v5617_v15, %v4472_v7 }
 0x1b6   : > { %v2270_v20 = vsel %vm2243_vm8, %v2237_v28, %v4442_v33  ;;  %v2271_v14 = vsel %vm2243_vm8, %v2238_v16, %v4443_v40 }
 0x1b7   : > { %v4436_v6 = vpop.permute.xlu1 %4435 }
 0x1b8   : > { %v4438_v34 = vunpack.i.h.bf16 %v4436_v6  ;;  %v4437_v13 = vunpack.i.l.bf16 %v4436_v6  ;;  %v2201_v6 = vsel %vm2177_vm6, %v5621_v0, %v4473_v56 }
 0x1b9   : > { %v4486_v23 = vpop.permute.xlu2 %4485 }
 0x1ba   : > { %v2264_v49 = vsel %vm2243_vm8, %v2231_v17, %v4437_v13  ;;  %v2265_v5 = vsel %vm2243_vm8, %v2232_v27, %v4438_v34  ;;  %v4446_v46 = vpop.permute.xlu0 %4445  ;;  %v4488_v40 = vunpack.i.h.bf16 %v4486_v23  ;;  %v4487_v33 = vunpack.i.l.bf16 %v4486_v23 }
 0x1bb   : > { %v4448_v61 = vunpack.i.h.bf16 %v4446_v46  ;;  %v4447_v52 = vunpack.i.l.bf16 %v4446_v46 }
 0x1bd   : > { %v2297_v30 = vsel %vm2276_vm9, %v2264_v49, %v4447_v52  ;;  %v2298_v36 = vsel %vm2276_vm9, %v2265_v5, %v4448_v61 }
 0x1be   : > { %v2319_v43 = vpack.c.bf16 %v2298_v36, %v2297_v30 }
 0x1bf   : > { %v4451_v55 = vpop.permute.xlu1 %4450 }
 0x1c0   : > { %v4453_v11 = vunpack.i.h.bf16 %v4451_v55  ;;  %v4452_v21 = vunpack.i.l.bf16 %v4451_v55  ;;  %3740 = vmatmul.msk.bf16.gmra.mxu2 %vm2373_vm10, %v2319_v43 }
 0x1c1   : > { %v4501_v60 = vpop.permute.xlu2 %4500 }
 0x1c2   : > { %v2303_v12 = vsel %vm2276_vm9, %v2270_v20, %v4452_v21  ;;  %v2304_v25 = vsel %vm2276_vm9, %v2271_v14, %v4453_v11  ;;  %v4461_v10 = vpop.permute.xlu0 %4460  ;;  %v4503_v19 = vunpack.i.h.bf16 %v4501_v60  ;;  %v4502_v34 = vunpack.i.l.bf16 %v4501_v60  ;;  %v6006_v11 = vld [vmem:[%s6996_s4] ss:$0 sm:$0xff] }
 0x1c3   : > { %v2322_v50 = vpack.c.bf16 %v2304_v25, %v2303_v12  ;;  %v4463_v57 = vunpack.i.h.bf16 %v4461_v10  ;;  %v4462_v9 = vunpack.i.l.bf16 %v4461_v10 }
 0x1c5   : > { %3743 = vmatmul.msk.bf16.gmra.mxu3 %vm2373_vm10, %v2322_v50  ;;  %v2258_v31 = vsel %vm2243_vm8, %v2225_v3, %v4462_v9  ;;  %v2259_v29 = vsel %vm2243_vm8, %v2226_v63, %v4463_v57 }
 0x1c7   : > { %v4466_v58 = vpop.permute.xlu1 %4465 }
 0x1c8   : > { %v4468_v24 = vunpack.i.h.bf16 %v4466_v58  ;;  %v4467_v1 = vunpack.i.l.bf16 %v4466_v58 }
 0x1c9   : > { %v4516_v36 = vpop.permute.xlu2 %4515 }
 0x1ca   : > { %v2291_v2 = vsel %vm2276_vm9, %v2258_v31, %v4467_v1  ;;  %v2292_v26 = vsel %vm2276_vm9, %v2259_v29, %v4468_v24  ;;  %v4476_v22 = vpop.permute.xlu0 %4475  ;;  %v4518_v62 = vunpack.i.h.bf16 %v4516_v36  ;;  %v4517_v10 = vunpack.i.l.bf16 %v4516_v36 }
 0x1cb   : > { %v2316_v32 = vpack.c.bf16 %v2292_v26, %v2291_v2  ;;  %v4478_v51 = vunpack.i.h.bf16 %v4476_v22  ;;  %v4477_v45 = vunpack.i.l.bf16 %v4476_v22 }
 0x1cd   : > { %3737 = vmatmul.msk.bf16.gmra.mxu1 %vm2373_vm10, %v2316_v32  ;;  %v2206_v15 = vsel %vm2177_vm6, %v5649_v41, %v4477_v45  ;;  %v2207_v0 = vsel %vm2177_vm6, %v5653_v48, %v4478_v51 }
 0x1ce   : > { %v2239_v61 = vsel %vm2210_vm7, %v2206_v15, %v4487_v33  ;;  %v2240_v52 = vsel %vm2210_vm7, %v2207_v0, %v4488_v40 }
 0x1cf   : > { %v4481_v4 = vpop.permute.xlu1 %4480 }
 0x1d0   : > { %v4483_v53 = vunpack.i.h.bf16 %v4481_v4  ;;  %v4482_v18 = vunpack.i.l.bf16 %v4481_v4 }
 0x1d2   : > { %v2233_v54 = vsel %vm2210_vm7, %v2200_v37, %v4482_v18  ;;  %v2234_v8 = vsel %vm2210_vm7, %v2201_v6, %v4483_v53  ;;  %v4491_v59 = vpop.permute.xlu0 %4490 }
 0x1d3   : > { %v4493_v13 = vunpack.i.h.bf16 %v4491_v59  ;;  %v4492_v35 = vunpack.i.l.bf16 %v4491_v59 }
 0x1d5   : > { %v2266_v17 = vsel %vm2243_vm8, %v2233_v54, %v4492_v35  ;;  %v2267_v27 = vsel %vm2243_vm8, %v2234_v8, %v4493_v13 }
 0x1d6   : > { %v2299_v49 = vsel %vm2276_vm9, %v2266_v17, %v4502_v34  ;;  %v2300_v5 = vsel %vm2276_vm9, %v2267_v27, %v4503_v19 }
 0x1d7   : > { %v4496_v38 = vpop.permute.xlu1 %4495  ;;  %v2320_v46 = vpack.c.bf16 %v2300_v5, %v2299_v49 }
 0x1d8   : > { %v4498_v28 = vunpack.i.h.bf16 %v4496_v38  ;;  %v4497_v16 = vunpack.i.l.bf16 %v4496_v38 }
 0x1d9   : > { %3741 = vmatmul.msk.bf16.gmra.mxu2 %vm2373_vm10, %v2320_v46 }
 0x1da   : > { %v2272_v41 = vsel %vm2243_vm8, %v2239_v61, %v4497_v16  ;;  %v2273_v48 = vsel %vm2243_vm8, %v2240_v52, %v4498_v28  ;;  %v4506_v55 = vpop.permute.xlu0 %4505 }
 0x1db   : > { %v4508_v21 = vunpack.i.h.bf16 %v4506_v55  ;;  %v4507_v39 = vunpack.i.l.bf16 %v4506_v55 }
 0x1dd   : > { %v2437_v43 = vpop.f32.mrf.mxu0  ;;  %v2305_v12 = vsel %vm2276_vm9, %v2272_v41, %v4507_v39  ;;  %v2306_v25 = vsel %vm2276_vm9, %v2273_v48, %v4508_v21 }
 0x1de   : > { %v6011_v50 = vadd.f32 %v6006_v11, %v2437_v43  ;;  %v2323_v44 = vpack.c.bf16 %v2306_v25, %v2305_v12 }
 0x1df   : > { %v4511_v30 = vpop.permute.xlu1 %4510 }
 0x1e0   : > { %v4513_v20 = vunpack.i.h.bf16 %v4511_v30  ;;  %v4512_v14 = vunpack.i.l.bf16 %v4511_v30  ;;  %v2517_v58 = vmin.f32 %v6011_v50, 20.0  ;;  %3744 = vmatmul.msk.bf16.gmra.mxu3 %vm2373_vm10, %v2323_v44  ;;  %vm3221_vm15 = vcmp.gt.f32.partialorder %v6011_v50, 20.0 }
 0x1e2   : > { %v2208_v57 = vsel %vm2177_vm6, %v5749_v47, %v4512_v14  ;;  %v2209_v9 = vsel %vm2177_vm6, %v5753_v42, %v4513_v20  ;;  %v2549_v3 = vmul.f32 1.442695, %v2517_v58  ;;  %v4521_v1 = vpop.permute.xlu0 %4520 }
 0x1e3   : > { %v2241_v63 = vsel %vm2210_vm7, %v2208_v57, %v4517_v10  ;;  %v2242_v24 = vsel %vm2210_vm7, %v2209_v9, %v4518_v62  ;;  %v4523_v31 = vunpack.i.h.bf16 %v4521_v1  ;;  %v4522_v29 = vunpack.i.l.bf16 %v4521_v1 }
 0x1e4   : > { %4532 = vpow2.f32 %v2549_v3 }
 0x1e5   : > { %v2274_v47 = vsel %vm2243_vm8, %v2241_v63, %v4522_v29  ;;  %v2275_v42 = vsel %vm2243_vm8, %v2242_v24, %v4523_v31  ;;  %v2439_v32 = vpop.f32.mrf.mxu0 }
 0x1e6   : > { %v6024_v22 = vadd.f32 %v6006_v11, %v2439_v32 }
 0x1e7   : > { %v4526_v23 = vpop.permute.xlu1 %4525 }
 0x1e8   : > { %v4528_v2 = vunpack.i.h.bf16 %v4526_v23  ;;  %v4527_v26 = vunpack.i.l.bf16 %v4526_v23  ;;  %v2518_v53 = vmin.f32 %v6024_v22, 20.0  ;;  %vm3222_vm2 = vcmp.gt.f32.partialorder %v6024_v22, 20.0 }
 0x1ea   : > { %v2307_v4 = vsel %vm2276_vm9, %v2274_v47, %v4527_v26  ;;  %v2308_v56 = vsel %vm2276_vm9, %v2275_v42, %v4528_v2  ;;  %v4533_v18 = vpop.eup %4532  ;;  %v2551_v60 = vmul.f32 1.442695, %v2518_v53 }
 0x1eb   : > { %v2324_v7 = vpack.c.bf16 %v2308_v56, %v2307_v4  ;;  %v2613_v37 = vadd.f32 2.0, %v4533_v18 }
 0x1ec   : > { %4534 = vpow2.f32 %v2551_v60 }
 0x1ed   : > { %v2645_v6 = vmul.f32 %v4533_v18, %v2613_v37  ;;  %v2457_v51 = vpop.f32.mrf.mxu1  ;;  %v2442_v54 = vpop.f32.mrf.mxu0 }
 0x1ee   : > { %v6030_v45 = vadd.f32 %v6006_v11, %v2457_v51  ;;  %v6033_v59 = vadd.f32 %v6006_v11, %v2442_v54 }
 0x1ef   : > { %v2709_v8 = vadd.f32 2.0, %v2645_v6  ;;  %v2677_v10 = vmul.f32 %v2645_v6, %v6011_v50 }
 0x1f0   : > { %v2525_v19 = vmin.f32 %v6030_v45, 20.0  ;;  %3745 = vmatmul.msk.bf16.gmra.mxu3 %vm2373_vm10, %v2324_v7  ;;  %v2519_v35 = vmin.f32 %v6033_v59, 20.0  ;;  %vm3229_vm9 = vcmp.gt.f32.partialorder %v6030_v45, 20.0 }
 0x1f1   : > { %4536 = vrcp.f32 %v2709_v8  ;;  %v2750_v48 = vand.u32 2147483647, %v2709_v8  ;;  %v2752_v55 = vand.u32 2147483648, %v2709_v8  ;;  %vm2746_vm12 = vweird.f32 %v2709_v8 }
 0x1f2   : > { %v4535_v34 = vpop.eup %4534  ;;  %v2565_v13 = vmul.f32 1.442695, %v2525_v19  ;;  %v2553_v40 = vmul.f32 1.442695, %v2519_v35 }
 0x1f3   : > { %v2614_v38 = vadd.f32 2.0, %v4535_v34  ;;  %v2753_v57 = vor.u32 1.1754944e-38, %v2752_v55  ;;  %vm2751_vm14 = vcmp.eq.f32.partialorder %v2750_v48, 8.507059e+37 }
 0x1f4   : > { %4538 = vpow2.f32 %v2565_v13 }
 0x1f5   : > { %v6038_v33 = vmul.f32 %v4535_v34, %v2614_v38  ;;  %v2459_v15 = vpop.f32.mrf.mxu1  ;;  %4540 = vpow2.f32 %v2553_v40  ;;  %v2444_v17 = vpop.f32.mrf.mxu0 }
 0x1f6   : > { %v6041_v0 = vadd.f32 %v6006_v11, %v2459_v15  ;;  %v6047_v16 = vadd.f32 %v6006_v11, %v2444_v17 }
 0x1f7   : > { %v4537_v27 = vpop.eup %4536  ;;  %v6044_v28 = vadd.f32 2.0, %v6038_v33  ;;  %v2678_v6 = vmul.f32 %v6038_v33, %v6024_v22 }
 0x1f8   : > { %v2742_v49 = vmul.f32 %v4537_v27, %v2709_v8  ;;  %v2526_v5 = vmin.f32 %v6041_v0, 20.0  ;;  %v2520_v41 = vmin.f32 %v6047_v16, 20.0  ;;  %vm2747_vm11 = vweird.f32 %v4537_v27 }
 0x1f9   : > { %4542 = vrcp.f32 %v6044_v28  ;;  %vm2748_vm13 = vmor %vm2746_vm12, %vm2747_vm11  ;;  %v2765_v2 = vand.u32 2147483647, %v6044_v28  ;;  %v2767_v47 = vand.u32 2147483648, %v6044_v28  ;;  %vm2761_vm4 = vweird.f32 %v6044_v28 }
 0x1fa   : > { %v4539_v46 = vpop.eup %4538  ;;  %v2743_v61 = vsub.f32 1.0, %v2742_v49  ;;  %v2567_v52 = vmul.f32 1.442695, %v2526_v5  ;;  %v2555_v20 = vmul.f32 1.442695, %v2520_v41  ;;  %vm3223_vm12 = vcmp.gt.f32.partialorder %v6033_v59, 20.0 }
 0x1fb   : > { %v2621_v21 = vadd.f32 2.0, %v4539_v46  ;;  %v2477_v39 = vpop.f32.mrf.mxu2  ;;  %v4541_v30 = vpop.eup %4540  ;;  %vm2766_vm5 = vcmp.eq.f32.partialorder %v2765_v2, 8.507059e+37  ;;  %v2768_v54 = vor.u32 1.1754944e-38, %v2767_v47 }
 0x1fc   : > { %v2744_v36 = vmul.f32 %v4537_v27, %v2743_v61  ;;  %4544 = vpow2.f32 %v2567_v52  ;;  %v6053_v14 = vadd.f32 %v6006_v11, %v2477_v39  ;;  %v2615_v12 = vadd.f32 2.0, %v4541_v30 }
 0x1fd   : > { %v2653_v43 = vmul.f32 %v4539_v46, %v2621_v21  ;;  %4546 = vpow2.f32 %v2555_v20 }
 0x1fe   : > { %v2745_v25 = vadd.f32 %v4537_v27, %v2744_v36  ;;  %v2533_v44 = vmin.f32 %v6053_v14, 20.0  ;;  %v6060_v58 = vmul.f32 %v4541_v30, %v2615_v12  ;;  %v2447_v26 = vpop.f32.mrf.mxu0 }
 0x1ff   : > { %v4543_v62 = vpop.eup %4542  ;;  %v6058_v9 = vadd.f32 2.0, %v2653_v43  ;;  %v6085_v37 = vadd.f32 %v6006_v11, %v2447_v26  ;;  %v2685_v8 = vmul.f32 %v2653_v43, %v6030_v45 }
 0x200   : > { %v2749_v3 = vsel %vm2748_vm13, %v4537_v27, %v2745_v25  ;;  %v2757_v63 = vmul.f32 %v4543_v62, %v6044_v28  ;;  %v2581_v24 = vmul.f32 1.442695, %v2533_v44  ;;  %v6069_v42 = vadd.f32 2.0, %v6060_v58 }
 0x201   : > { %v2754_v1 = vsel %vm2751_vm14, %v2753_v57, %v2749_v3  ;;  %4548 = vrcp.f32 %v6058_v9  ;;  %vm2762_vm3 = vweird.f32 %v4543_v62  ;;  %v2870_v53 = vand.u32 2147483647, %v6058_v9 }
 0x202   : > { %v4545_v31 = vpop.eup %4544  ;;  %v2755_v29 = vmul.f32 %v2754_v1, %v2677_v10  ;;  %v2758_v23 = vsub.f32 1.0, %v2757_v63  ;;  %4550 = vpow2.f32 %v2581_v24  ;;  %v2872_v60 = vand.u32 2147483648, %v6058_v9  ;;  %vm2763_vm6 = vmor %vm2761_vm4, %vm2762_vm3 }
 0x203   : > { %v2622_v32 = vadd.f32 2.0, %v4545_v31  ;;  %v4547_v4 = vpop.eup %4546  ;;  %4552 = vrcp.f32 %v6069_v42  ;;  %vm2866_vm7 = vweird.f32 %v6058_v9  ;;  %vm6097_vm8 = vcmp.eq.f32.partialorder %v2870_v53, 8.507059e+37 }
 0x204   : > { %v3253_v56 = vsel %vm3221_vm15, %v6011_v50, %v2755_v29  ;;  %v2759_v7 = vmul.f32 %v4543_v62, %v2758_v23  ;;  %v2616_v34 = vadd.f32 2.0, %v4547_v4  ;;  %v2873_v15 = vor.u32 1.1754944e-38, %v2872_v60 }
 0x205   : > { %v3459_v18 = vpack.c.bf16 %v3253_v56, %v3253_v56  ;;  %v6093_v19 = vmul.f32 %v4545_v31, %v2622_v32  ;;  %v2521_v27 = vmin.f32 %v6085_v37, 20.0  ;;  %v3286_v28 = vsel %vm3285_vm0, %v3253_v56, 0.0 }
 0x206   : > { %v2760_v51 = vadd.f32 %v4543_v62, %v2759_v7  ;;  %v3357_v49 = vmul.f32 %v3253_v56, %v3253_v56  ;;  %v2780_v52 = vand.u32 2147483647, %v6069_v42  ;;  %v2648_v41 = vmul.f32 %v4547_v4, %v2616_v34 }
 0x207   : > { %v4549_v50 = vpop.eup %4548  ;;  %3492 = vst.msk [vmem:[%s6076_s20] sm:$0xf] %vm3491_vm1, %v3459_v18  ;;  %v6102_v17 = vadd.f32 2.0, %v6093_v19  ;;  %v2782_v43 = vand.u32 2147483648, %v6069_v42  ;;  %v2679_v23 = vmul.f32 %v6060_v58, %v6033_v59  ;;  %vm2776_vm14 = vweird.f32 %v6069_v42 }
 0x208   : > { %v2764_v13 = vsel %vm2763_vm6, %v4543_v62, %v2760_v51  ;;  %v2862_v35 = vmul.f32 %v4549_v50, %v6058_v9  ;;  %v4551_v40 = vpop.eup %4550  ;;  %vm2867_vm10 = vweird.f32 %v4549_v50  ;;  %v2557_v62 = vmul.f32 1.442695, %v2521_v27 }
 0x209   : > { %v2769_v33 = vsel %vm2766_vm5, %v2768_v54, %v2764_v13  ;;  %v4553_v61 = vpop.eup %4552  ;;  %4554 = vrcp.f32 %v6102_v17  ;;  %v2629_v48 = vadd.f32 2.0, %v4551_v40  ;;  %v3389_v10 = vsel %vm3285_vm0, %v3357_v49, 0.0  ;;  %vm2868_vm11 = vmor %vm2866_vm7, %vm2867_vm10 }
 0x20a   : > { %v2770_v5 = vmul.f32 %v2769_v33, %v2678_v6  ;;  %v2863_v46 = vsub.f32 1.0, %v2862_v35  ;;  %v2772_v39 = vmul.f32 %v4553_v61, %v6069_v42  ;;  %vm2777_vm13 = vweird.f32 %v4553_v61 }
 0x20b   : > { %v6124_v3 = vmul.f32 %v4551_v40, %v2629_v48  ;;  %vm2778_vm15 = vmor %vm2776_vm14, %vm2777_vm13  ;;  %v2783_v47 = vor.u32 1.1754944e-38, %v2782_v43  ;;  %v2885_v32 = vand.u32 2147483647, %v6102_v17  ;;  %v2887_v4 = vand.u32 2147483648, %v6102_v17  ;;  %v2479_v40 = vpop.f32.mrf.mxu2 }
 0x20c   : > { %v3254_v55 = vsel %vm3222_vm2, %v6024_v22, %v2770_v5  ;;  %v2864_v21 = vmul.f32 %v4549_v50, %v2863_v46  ;;  %v2773_v44 = vsub.f32 1.0, %v2772_v39  ;;  %v6122_v22 = vadd.f32 2.0, %v2648_v41 }
 0x20d   : > { %v3287_v30 = vsel %vm3285_vm0, %v3254_v55, 0.0  ;;  %v3358_v36 = vmul.f32 %v3254_v55, %v3254_v55  ;;  %v3460_v20 = vpack.c.bf16 %v3254_v55, %v3254_v55  ;;  %v6136_v56 = vadd.f32 2.0, %v6124_v3 }
 0x20e   : > { %v3288_v12 = vadd.f32 %v3287_v30, %v3286_v28  ;;  %v2865_v25 = vadd.f32 %v4549_v50, %v2864_v21  ;;  %v2774_v1 = vmul.f32 %v4553_v61, %v2773_v44  ;;  %4556 = vrcp.f32 %v6122_v22  ;;  %v2462_v28 = vpop.f32.mrf.mxu1 }
 0x20f   : > { %v3390_v57 = vsel %vm3285_vm0, %v3358_v36, 0.0  ;;  %3493 = vst.msk [vmem:[%s6076_s20 + $0x4] sm:$0xf] %vm3491_vm1, %v3460_v20  ;;  %v4555_v31 = vpop.eup %4554  ;;  %4558 = vpow2.f32 %v2557_v62  ;;  %vm2781_vm2 = vcmp.eq.f32.partialorder %v2780_v52, 8.507059e+37  ;;  %v2686_v60 = vmul.f32 %v6093_v19, %v6041_v0 }
 0x210   : > { %v3391_v63 = vadd.f32 %v3390_v57, %v3389_v10  ;;  %v2869_v24 = vsel %vm2868_vm11, %v4549_v50, %v2865_v25  ;;  %v2775_v2 = vadd.f32 %v4553_v61, %v2774_v1  ;;  %v2877_v26 = vmul.f32 %v4555_v31, %v6102_v17 }
 0x211   : > { %v2874_v29 = vsel %vm6097_vm8, %v2873_v15, %v2869_v24  ;;  %vm3230_vm3 = vcmp.gt.f32.partialorder %v6041_v0, 20.0  ;;  %vm2882_vm4 = vweird.f32 %v4555_v31  ;;  %4560 = vrcp.f32 %v6136_v56 }
 0x212   : > { %v2875_v9 = vmul.f32 %v2874_v29, %v2685_v8  ;;  %v2779_v42 = vsel %vm2778_vm15, %v4553_v61, %v2775_v2  ;;  %v2878_v7 = vsub.f32 1.0, %v2877_v26  ;;  %vm2881_vm5 = vweird.f32 %v6102_v17 }
 0x213   : > { %v2784_v18 = vsel %vm2781_vm2, %v2783_v47, %v2779_v42  ;;  %vm6152_vm6 = vcmp.eq.f32.partialorder %v2885_v32, 8.507059e+37  ;;  %v2888_v54 = vor.u32 1.1754944e-38, %v2887_v4  ;;  %v2680_v8 = vmul.f32 %v2648_v41, %v6047_v16  ;;  %vm2883_vm7 = vmor %vm2881_vm5, %vm2882_vm4 }
 0x214   : > { %v6141_v58 = vsel %vm3229_vm9, %v6030_v45, %v2875_v9  ;;  %v2785_v6 = vmul.f32 %v2784_v18, %v2679_v23  ;;  %v2879_v51 = vmul.f32 %v4555_v31, %v2878_v7  ;;  %v4557_v50 = vpop.eup %4556  ;;  %v2795_v38 = vand.u32 2147483647, %v6122_v22  ;;  %v2449_v9 = vpop.f32.mrf.mxu0 }
 0x215   : > { %v3467_v53 = vpack.c.bf16 %v6141_v58, %v6141_v58  ;;  %v4559_v19 = vpop.eup %4558  ;;  %v2787_v35 = vmul.f32 %v4557_v50, %v6122_v22  ;;  %v2797_v27 = vand.u32 2147483648, %v6122_v22  ;;  %vm2792_vm8 = vweird.f32 %v4557_v50 }
 0x216   : > { %v3255_v34 = vsel %vm3223_vm12, %v6033_v59, %v2785_v6  ;;  %v2880_v13 = vadd.f32 %v4555_v31, %v2879_v51  ;;  %v2617_v52 = vadd.f32 2.0, %v4559_v19  ;;  %v6171_v41 = vadd.f32 %v6006_v11, %v2479_v40  ;;  %v2464_v7 = vpop.f32.mrf.mxu1 }
 0x217   : > { %3500 = vst.msk [vmem:[%s6076_s20 + $0x20] sm:$0xf] %vm3491_vm1, %v3467_v53  ;;  %v3289_v33 = vsel %vm3285_vm0, %v3255_v34, 0.0  ;;  %v3359_v15 = vmul.f32 %v3255_v34, %v3255_v34  ;;  %v3461_v17 = vpack.c.bf16 %v3255_v34, %v3255_v34  ;;  %v2788_v46 = vsub.f32 1.0, %v2787_v35  ;;  %v4561_v48 = vpop.eup %4560 }
 0x218   : > { %v3290_v49 = vadd.f32 %v3289_v33, %v3288_v12  ;;  %v2884_v5 = vsel %vm2883_vm7, %v4555_v31, %v2880_v13  ;;  %v6174_v30 = vadd.f32 %v6006_v11, %v2462_v28  ;;  %vm2791_vm9 = vweird.f32 %v6122_v22 }
 0x219   : > { %v3392_v59 = vsel %vm3285_vm0, %v3359_v15, 0.0  ;;  %3494 = vst.msk [vmem:[%s6076_s20 + $0x8] sm:$0xf] %vm3491_vm1, %v3461_v17  ;;  %v2889_v61 = vsel %vm6152_vm6, %v2888_v54, %v2884_v5  ;;  %v2789_v39 = vmul.f32 %v4557_v50, %v2788_v46  ;;  %v2982_v36 = vmul.f32 %v4561_v48, %v6136_v56  ;;  %vm2793_vm11 = vmor %vm2791_vm9, %vm2792_vm8 }
 0x21a   : > { %v3393_v55 = vadd.f32 %v3392_v59, %v3391_v63  ;;  %v2890_v21 = vmul.f32 %v2889_v61, %v2686_v60  ;;  %v6178_v20 = vmul.f32 %v4559_v19, %v2617_v52  ;;  %v2534_v43 = vmin.f32 %v6171_v41, 20.0 }
 0x21b   : > { %v2790_v25 = vadd.f32 %v4557_v50, %v2789_v39  ;;  %vm2796_vm10 = vcmp.eq.f32.partialorder %v2795_v38, 8.507059e+37  ;;  %v2527_v44 = vmin.f32 %v6174_v30, 20.0  ;;  %v2798_v10 = vor.u32 1.1754944e-38, %v2797_v27 }
 0x21c   : > { %v6184_v12 = vsel %vm3230_vm3, %v6041_v0, %v2890_v21  ;;  %v2983_v57 = vsub.f32 1.0, %v2982_v36  ;;  %v2990_v22 = vand.u32 2147483647, %v6136_v56  ;;  %v2992_v24 = vand.u32 2147483648, %v6136_v56  ;;  %v2497_v6 = vpop.f32.mrf.mxu3 }
 0x21d   : > { %v3468_v62 = vpack.c.bf16 %v6184_v12, %v6184_v12  ;;  %v2794_v63 = vsel %vm2793_vm11, %v4557_v50, %v2790_v25  ;;  %v6193_v1 = vadd.f32 2.0, %v6178_v20  ;;  %v2583_v0 = vmul.f32 1.442695, %v2534_v43 }
 0x21e   : > { %v2799_v31 = vsel %vm2796_vm10, %v2798_v10, %v2794_v63  ;;  %v2984_v29 = vmul.f32 %v4561_v48, %v2983_v57  ;;  %vm2987_vm12 = vweird.f32 %v4561_v48  ;;  %v2569_v23 = vmul.f32 1.442695, %v2527_v44 }
 0x21f   : > { %3501 = vst.msk [vmem:[%s6076_s20 + $0x24] sm:$0xf] %vm3491_vm1, %v3468_v62  ;;  %v2800_v2 = vmul.f32 %v2799_v31, %v2680_v8  ;;  %vm3224_vm13 = vcmp.gt.f32.partialorder %v6047_v16, 20.0  ;;  %v2693_v26 = vmul.f32 %v6124_v3, %v6053_v14  ;;  %4562 = vrcp.f32 %v6193_v1 }
 0x220   : > { %v2985_v47 = vadd.f32 %v4561_v48, %v2984_v29  ;;  %vm2986_vm14 = vweird.f32 %v6136_v56  ;;  %vm2991_vm15 = vcmp.eq.f32.partialorder %v2990_v22, 8.507059e+37  ;;  %4564 = vpow2.f32 %v2583_v0  ;;  %v2482_v25 = vpop.f32.mrf.mxu2 }
 0x221   : > { %v3256_v32 = vsel %vm3224_vm13, %v6047_v16, %v2800_v2  ;;  %vm2988_vm2 = vmor %vm2986_vm14, %vm2987_vm12  ;;  %v2993_v4 = vor.u32 1.1754944e-38, %v2992_v24  ;;  %4566 = vpow2.f32 %v2569_v23  ;;  %v6204_v42 = vadd.f32 %v6006_v11, %v2449_v9 }
 0x222   : > { %v3291_v53 = vsel %vm3285_vm0, %v3256_v32, 0.0  ;;  %v3360_v3 = vmul.f32 %v3256_v32, %v3256_v32  ;;  %v3462_v18 = vpack.c.bf16 %v3256_v32, %v3256_v32  ;;  %v2989_v60 = vsel %vm2988_vm2, %v4561_v48, %v2985_v47 }
 0x223   : > { %v6207_v51 = vadd.f32 %v3291_v53, %v3290_v49  ;;  %v2994_v56 = vsel %vm2991_vm15, %v2993_v4, %v2989_v60  ;;  %v2522_v50 = vmin.f32 %v6204_v42, 20.0  ;;  %v6214_v54 = vadd.f32 %v6006_v11, %v2464_v7 }
 0x224   : > { %v3394_v16 = vsel %vm3285_vm0, %v3360_v3, 0.0  ;;  %3495 = vst.msk [vmem:[%s6076_s20 + $0xc] sm:$0xf] %vm3491_vm1, %v3462_v18  ;;  %v2995_v45 = vmul.f32 %v2994_v56, %v2693_v26  ;;  %vm3237_vm3 = vcmp.gt.f32.partialorder %v6053_v14, 20.0  ;;  %v6220_v13 = vadd.f32 %v6006_v11, %v2497_v6  ;;  %v2499_v3 = vpop.f32.mrf.mxu3 }
 0x225   : > { %v4563_v8 = vpop.eup %4562  ;;  %v6216_v19 = vadd.f32 %v3394_v16, %v3393_v55  ;;  %v2559_v34 = vmul.f32 1.442695, %v2522_v50  ;;  %v2528_v33 = vmin.f32 %v6214_v54, 20.0  ;;  %v2810_v46 = vand.u32 2147483647, %v6193_v1 }
 0x226   : > { %v4565_v35 = vpop.eup %4564  ;;  %v6223_v38 = vsel %vm3237_vm3, %v6053_v14, %v2995_v45  ;;  %v2802_v40 = vmul.f32 %v4563_v8, %v6193_v1  ;;  %v2812_v14 = vand.u32 2147483648, %v6193_v1  ;;  %v2541_v61 = vmin.f32 %v6220_v13, 20.0 }
 0x227   : > { %v4567_v15 = vpop.eup %4566  ;;  %v3475_v17 = vpack.c.bf16 %v6223_v38, %v6223_v38  ;;  %v2630_v27 = vadd.f32 2.0, %v4565_v35  ;;  %4568 = vpow2.f32 %v2559_v34  ;;  %v2571_v5 = vmul.f32 1.442695, %v2528_v33 }
 0x228   : > { %v2803_v28 = vsub.f32 1.0, %v2802_v40  ;;  %v2623_v49 = vadd.f32 2.0, %v4567_v15  ;;  %vm2807_vm4 = vweird.f32 %v4563_v8  ;;  %vm2806_vm5 = vweird.f32 %v6193_v1 }
 0x229   : > { %3508 = vst.msk [vmem:[%s6076_s20 + $0x40] sm:$0xf] %vm3491_vm1, %v3475_v17  ;;  %v2662_v59 = vmul.f32 %v4565_v35, %v2630_v27  ;;  %4570 = vpow2.f32 %v2571_v5  ;;  %vm2808_vm6 = vmor %vm2806_vm5, %vm2807_vm4  ;;  %v2813_v36 = vor.u32 1.1754944e-38, %v2812_v14  ;;  %v2597_v43 = vmul.f32 1.442695, %v2541_v61 }
 0x22a   : > { %v2804_v52 = vmul.f32 %v4563_v8, %v2803_v28  ;;  %v2655_v48 = vmul.f32 %v4567_v15, %v2623_v49  ;;  %v2681_v62 = vmul.f32 %v6178_v20, %v6085_v37  ;;  %vm2811_vm7 = vcmp.eq.f32.partialorder %v2810_v46, 8.507059e+37  ;;  %v2467_v49 = vpop.f32.mrf.mxu1 }
 0x22b   : > { %v6234_v55 = vadd.f32 2.0, %v2662_v59  ;;  %v6244_v1 = vadd.f32 %v6006_v11, %v2482_v25  ;;  %vm3225_vm8 = vcmp.gt.f32.partialorder %v6085_v37, 20.0  ;;  %v2694_v20 = vmul.f32 %v2662_v59, %v6171_v41 }
 0x22c   : > { %v2805_v21 = vadd.f32 %v4563_v8, %v2804_v52  ;;  %v6237_v39 = vadd.f32 2.0, %v2655_v48  ;;  %v6278_v40 = vadd.f32 %v6006_v11, %v2499_v3  ;;  %v2687_v15 = vmul.f32 %v2655_v48, %v6174_v30 }
 0x22d   : > { %4572 = vrcp.f32 %v6234_v55  ;;  %v4569_v44 = vpop.eup %4568  ;;  %v3005_v53 = vand.u32 2147483647, %v6234_v55  ;;  %v3007_v60 = vand.u32 2147483648, %v6234_v55  ;;  %vm3001_vm10 = vweird.f32 %v6234_v55 }
 0x22e   : > { %v2809_v10 = vsel %vm2808_vm6, %v4563_v8, %v2805_v21  ;;  %4574 = vrcp.f32 %v6237_v39  ;;  %v2618_v24 = vadd.f32 2.0, %v4569_v44  ;;  %v2900_v16 = vand.u32 2147483647, %v6237_v39 }
 0x22f   : > { %v2814_v57 = vsel %vm2811_vm7, %v2813_v36, %v2809_v10  ;;  %v4571_v22 = vpop.eup %4570  ;;  %4576 = vpow2.f32 %v2597_v43  ;;  %v2902_v35 = vand.u32 2147483648, %v6237_v39  ;;  %vm3006_vm12 = vcmp.eq.f32.partialorder %v3005_v53, 8.507059e+37 }
 0x230   : > { %v2815_v63 = vmul.f32 %v2814_v57, %v2681_v62  ;;  %v2624_v0 = vadd.f32 2.0, %v4571_v22  ;;  %v6249_v29 = vmul.f32 %v4569_v44, %v2618_v24  ;;  %vm2896_vm13 = vweird.f32 %v6237_v39 }
 0x231   : > { %v3008_v5 = vor.u32 1.1754944e-38, %v3007_v60  ;;  %vm2901_vm15 = vcmp.eq.f32.partialorder %v2900_v16, 8.507059e+37  ;;  %v2542_v14 = vmin.f32 %v6278_v40, 20.0  ;;  %v2903_v61 = vor.u32 1.1754944e-38, %v2902_v35 }
 0x232   : > { %v3257_v31 = vsel %vm3225_vm8, %v6085_v37, %v2815_v63  ;;  %v6252_v47 = vmul.f32 %v4571_v22, %v2624_v0  ;;  %v2535_v37 = vmin.f32 %v6244_v1, 20.0  ;;  %v6266_v56 = vadd.f32 2.0, %v6249_v29 }
 0x233   : > { %v4573_v23 = vpop.eup %4572  ;;  %v3293_v9 = vsel %vm3285_vm0, %v3257_v31, 0.0  ;;  %v3361_v2 = vmul.f32 %v3257_v31, %v3257_v31  ;;  %v3463_v26 = vpack.c.bf16 %v3257_v31, %v3257_v31  ;;  %v2599_v36 = vmul.f32 1.442695, %v2542_v14  ;;  %v2484_v31 = vpop.f32.mrf.mxu2 }
 0x234   : > { %v4575_v32 = vpop.eup %4574  ;;  %v6255_v4 = vadd.f32 %v3293_v9, %v6207_v51  ;;  %v2997_v7 = vmul.f32 %v4573_v23, %v6234_v55  ;;  %v6273_v45 = vadd.f32 2.0, %v6252_v47  ;;  %4578 = vrcp.f32 %v6266_v56 }
 0x235   : > { %v3396_v18 = vsel %vm3285_vm0, %v3361_v2, 0.0  ;;  %3496 = vst.msk [vmem:[%s6076_s20 + $0x10] sm:$0xf] %vm3491_vm1, %v3463_v26  ;;  %v2892_v6 = vmul.f32 %v4575_v32, %v6237_v39  ;;  %v4577_v8 = vpop.eup %4576  ;;  %vm3002_vm9 = vweird.f32 %v4573_v23  ;;  %vm2897_vm11 = vweird.f32 %v4575_v32 }
 0x236   : > { %v6269_v51 = vadd.f32 %v3396_v18, %v6216_v19  ;;  %v2998_v50 = vsub.f32 1.0, %v2997_v7  ;;  %4580 = vrcp.f32 %v6273_v45  ;;  %v2585_v19 = vmul.f32 1.442695, %v2535_v37  ;;  %vm3003_vm14 = vmor %vm3001_vm10, %vm3002_vm9 }
 0x237   : > { %v2893_v34 = vsub.f32 1.0, %v2892_v6  ;;  %v2637_v28 = vadd.f32 2.0, %v4577_v8  ;;  %vm2898_vm2 = vmor %vm2896_vm13, %vm2897_vm11  ;;  %v6288_v39 = vadd.f32 %v6006_v11, %v2467_v49  ;;  %vm3238_vm3 = vcmp.gt.f32.partialorder %v6171_v41, 20.0 }
 0x238   : > { %v2999_v33 = vmul.f32 %v4573_v23, %v2998_v50  ;;  %4582 = vpow2.f32 %v2585_v19  ;;  %vm3231_vm4 = vcmp.gt.f32.partialorder %v6174_v30, 20.0  ;;  %v2827_v57 = vand.u32 2147483648, %v6266_v56 }
 0x239   : > { %v2894_v17 = vmul.f32 %v4575_v32, %v2893_v34  ;;  %v6285_v52 = vmul.f32 %v4577_v8, %v2637_v28  ;;  %4584 = vpow2.f32 %v2599_v36  ;;  %vm3226_vm5 = vcmp.gt.f32.partialorder %v6204_v42, 20.0 }
 0x23a   : > { %v3000_v27 = vadd.f32 %v4573_v23, %v2999_v33  ;;  %v4579_v48 = vpop.eup %4578  ;;  %v2529_v9 = vmin.f32 %v6288_v39, 20.0  ;;  %vm2821_vm7 = vweird.f32 %v6266_v56  ;;  %v2828_v37 = vor.u32 1.1754944e-38, %v2827_v57 }
 0x23b   : > { %v2895_v46 = vadd.f32 %v4575_v32, %v2894_v17  ;;  %v2817_v62 = vmul.f32 %v4579_v48, %v6266_v56  ;;  %v6299_v0 = vadd.f32 2.0, %v6285_v52  ;;  %vm2822_vm6 = vweird.f32 %v4579_v48 }
 0x23c   : > { %v3004_v59 = vsel %vm3003_vm14, %v4573_v23, %v3000_v27  ;;  %v4581_v43 = vpop.eup %4580  ;;  %v2915_v3 = vand.u32 2147483647, %v6273_v45  ;;  %v2917_v18 = vand.u32 2147483648, %v6273_v45  ;;  %vm2823_vm8 = vmor %vm2821_vm7, %vm2822_vm6  ;;  %v2573_v50 = vmul.f32 1.442695, %v2529_v9 }
 0x23d   : > { %v3009_v55 = vsel %vm3006_vm12, %v3008_v5, %v3004_v59  ;;  %v2899_v21 = vsel %vm2898_vm2, %v4575_v32, %v2895_v46  ;;  %v2907_v22 = vmul.f32 %v4581_v43, %v6273_v45  ;;  %v2818_v24 = vsub.f32 1.0, %v2817_v62  ;;  %v2452_v5 = vpop.f32.mrf.mxu0 }
 0x23e   : > { %v3010_v25 = vmul.f32 %v3009_v55, %v2694_v20  ;;  %v2904_v44 = vsel %vm2901_vm15, %v2903_v61, %v2899_v21  ;;  %v4583_v2 = vpop.eup %4582  ;;  %v2825_v32 = vand.u32 2147483647, %v6266_v56  ;;  %4586 = vrcp.f32 %v6299_v0 }
 0x23f   : > { %v2905_v10 = vmul.f32 %v2904_v44, %v2687_v15  ;;  %v2819_v26 = vmul.f32 %v4579_v48, %v2818_v24  ;;  %v2908_v7 = vsub.f32 1.0, %v2907_v22  ;;  %vm2912_vm9 = vweird.f32 %v4581_v43  ;;  %v4585_v56 = vpop.eup %4584 }
 0x240   : > { %v6296_v63 = vsel %vm3238_vm3, %v6171_v41, %v3010_v25  ;;  %v2631_v6 = vadd.f32 2.0, %v4583_v2  ;;  %v2682_v16 = vmul.f32 %v6249_v29, %v6204_v42  ;;  %vm2826_vm10 = vcmp.eq.f32.partialorder %v2825_v32, 8.507059e+37 }
 0x241   : > { %v3476_v20 = vpack.c.bf16 %v6296_v63, %v6296_v63  ;;  %v6304_v23 = vsel %vm3231_vm4, %v6174_v30, %v2905_v10  ;;  %v6316_v30 = vadd.f32 %v6006_v11, %v2484_v31  ;;  %v2820_v53 = vadd.f32 %v4579_v48, %v2819_v26 }
 0x242   : > { %v3469_v41 = vpack.c.bf16 %v6304_v23, %v6304_v23  ;;  %v2909_v60 = vmul.f32 %v4581_v43, %v2908_v7  ;;  %v2688_v34 = vmul.f32 %v6252_v47, %v6214_v54  ;;  %vm2911_vm11 = vweird.f32 %v6273_v45 }
 0x243   : > { %3509 = vst.msk [vmem:[%s6076_s20 + $0x44] sm:$0xf] %vm3491_vm1, %v3476_v20  ;;  %v2824_v8 = vsel %vm2823_vm8, %v4579_v48, %v2820_v53  ;;  %v6327_v19 = vmul.f32 %v4583_v2, %v2631_v6  ;;  %vm2913_vm12 = vmor %vm2911_vm11, %vm2912_vm9  ;;  %v2918_v17 = vor.u32 1.1754944e-38, %v2917_v18  ;;  %v2638_v27 = vadd.f32 2.0, %v4585_v56  ;;  %v2469_v2 = vpop.f32.mrf.mxu1 }
 0x244   : > { %3502 = vst.msk [vmem:[%s6076_s20 + $0x28] sm:$0xf] %vm3491_vm1, %v3469_v41  ;;  %v2829_v35 = vsel %vm2826_vm10, %v2828_v37, %v2824_v8  ;;  %v2910_v33 = vadd.f32 %v4581_v43, %v2909_v60  ;;  %4588 = vpow2.f32 %v2573_v50  ;;  %v4587_v28 = vpop.eup %4586  ;;  %vm2916_vm13 = vcmp.eq.f32.partialorder %v2915_v3, 8.507059e+37 }
 0x245   : > { %v2830_v15 = vmul.f32 %v2829_v35, %v2682_v16  ;;  %v6330_v29 = vadd.f32 2.0, %v6327_v19  ;;  %v2536_v47 = vmin.f32 %v6316_v30, 20.0  ;;  %vm3232_vm14 = vcmp.gt.f32.partialorder %v6214_v54, 20.0 }
 0x246   : > { %v2914_v49 = vsel %vm2913_vm12, %v4581_v43, %v2910_v33  ;;  %v3102_v14 = vmul.f32 %v4587_v28, %v6299_v0  ;;  %v6343_v43 = vmul.f32 %v4585_v56, %v2638_v27  ;;  %v6352_v62 = vadd.f32 %v6006_v11, %v2452_v5 }
 0x247   : > { %v3258_v45 = vsel %vm3226_vm5, %v6204_v42, %v2830_v15  ;;  %v2919_v46 = vsel %vm2916_vm13, %v2918_v17, %v2914_v49  ;;  %4590 = vrcp.f32 %v6330_v29  ;;  %v2587_v44 = vmul.f32 1.442695, %v2536_v47 }
 0x248   : > { %v3295_v59 = vsel %vm3285_vm0, %v3258_v45, 0.0  ;;  %v3362_v61 = vmul.f32 %v3258_v45, %v3258_v45  ;;  %v3464_v48 = vpack.c.bf16 %v3258_v45, %v3258_v45  ;;  %v2920_v55 = vmul.f32 %v2919_v46, %v2688_v34 }
 0x249   : > { %v6340_v21 = vadd.f32 %v3295_v59, %v6255_v4  ;;  %v3103_v36 = vsub.f32 1.0, %v3102_v14  ;;  %v3110_v22 = vand.u32 2147483647, %v6299_v0  ;;  %v3112_v24 = vand.u32 2147483648, %v6299_v0 }
 0x24a   : > { %v3398_v42 = vsel %vm3285_vm0, %v3362_v61, 0.0  ;;  %3497 = vst.msk [vmem:[%s6076_s20 + $0x14] sm:$0xf] %vm3491_vm1, %v3464_v48  ;;  %v6349_v25 = vsel %vm3232_vm14, %v6214_v54, %v2920_v55  ;;  %v4589_v10 = vpop.eup %4588  ;;  %vm3107_vm15 = vweird.f32 %v4587_v28  ;;  %v6363_v54 = vsel %vm3285_vm0, %v6141_v58, 0.0 }
 0x24b   : > { %v6355_v4 = vadd.f32 %v3398_v42, %v6269_v51  ;;  %v3470_v57 = vpack.c.bf16 %v6349_v25, %v6349_v25  ;;  %v3104_v31 = vmul.f32 %v4587_v28, %v3103_v36  ;;  %v3365_v20 = vmul.f32 %v6141_v58, %v6141_v58 }
 0x24c   : > { %v6370_v51 = vadd.f32 2.0, %v6343_v43  ;;  %v2625_v9 = vadd.f32 2.0, %v4589_v10  ;;  %vm3106_vm2 = vweird.f32 %v6299_v0  ;;  %4592 = vpow2.f32 %v2587_v44  ;;  %v2454_v0 = vpop.f32.mrf.mxu0 }
 0x24d   : > { %3503 = vst.msk [vmem:[%s6076_s20 + $0x2c] sm:$0xf] %vm3491_vm1, %v3470_v57  ;;  %v3105_v41 = vadd.f32 %v4587_v28, %v3104_v31  ;;  %v2523_v26 = vmin.f32 %v6352_v62, 20.0  ;;  %v4591_v32 = vpop.eup %4590  ;;  %v2701_v7 = vmul.f32 %v6285_v52, %v6220_v13  ;;  %vm3108_vm3 = vmor %vm3106_vm2, %vm3107_vm15  ;;  %vm3111_vm4 = vcmp.eq.f32.partialorder %v3110_v22, 8.507059e+37 }
 0x24e   : > { %v3113_v58 = vor.u32 1.1754944e-38, %v3112_v24  ;;  %4594 = vrcp.f32 %v6370_v51  ;;  %v3012_v37 = vmul.f32 %v4591_v32, %v6330_v29  ;;  %v6378_v3 = vmul.f32 %v4589_v10, %v2625_v9 }
 0x24f   : > { %v3109_v53 = vsel %vm3108_vm3, %v4587_v28, %v3105_v41  ;;  %v6381_v18 = vadd.f32 %v6006_v11, %v2469_v2  ;;  %v6384_v60 = vsel %vm3285_vm0, %v3365_v20, 0.0  ;;  %v3020_v52 = vand.u32 2147483647, %v6330_v29 }
 0x250   : > { %v3114_v6 = vsel %vm3111_vm4, %v3113_v58, %v3109_v53  ;;  %v2561_v50 = vmul.f32 1.442695, %v2523_v26  ;;  %v3013_v16 = vsub.f32 1.0, %v3012_v37  ;;  %v3022_v8 = vand.u32 2147483648, %v6330_v29 }
 0x251   : > { %v3115_v56 = vmul.f32 %v3114_v6, %v2701_v7  ;;  %v6389_v34 = vadd.f32 2.0, %v6378_v3  ;;  %vm3245_vm5 = vcmp.gt.f32.partialorder %v6220_v13, 20.0  ;;  %vm3017_vm6 = vweird.f32 %v4591_v32 }
 0x252   : > { %4596 = vpow2.f32 %v2561_v50  ;;  %v6393_v35 = vadd.f32 %v6006_v11, %v2454_v0  ;;  %v4593_v33 = vpop.eup %4592  ;;  %v3014_v17 = vmul.f32 %v4591_v32, %v3013_v16  ;;  %v2530_v27 = vmin.f32 %v6381_v18, 20.0 }
 0x253   : > { %v6396_v15 = vsel %vm3245_vm5, %v6220_v13, %v3115_v56  ;;  %4598 = vrcp.f32 %v6389_v34  ;;  %v6402_v49 = vsel %vm3285_vm0, %v6184_v12, 0.0  ;;  %v3366_v47 = vmul.f32 %v6184_v12, %v6184_v12  ;;  %v2487_v56 = vpop.f32.mrf.mxu2 }
 0x254   : > { %v4595_v28 = vpop.eup %4594  ;;  %v3483_v11 = vpack.c.bf16 %v6396_v15, %v6396_v15  ;;  %vm3016_vm7 = vweird.f32 %v6330_v29  ;;  %v3015_v13 = vadd.f32 %v4591_v32, %v3014_v17  ;;  %vm3021_vm8 = vcmp.eq.f32.partialorder %v3020_v52, 8.507059e+37 }
 0x255   : > { %v3023_v5 = vor.u32 1.1754944e-38, %v3022_v8  ;;  %v3117_v45 = vmul.f32 %v4595_v28, %v6370_v51  ;;  %v2695_v46 = vmul.f32 %v6327_v19, %v6244_v1  ;;  %vm3018_vm9 = vmor %vm3016_vm7, %vm3017_vm6  ;;  %v3125_v14 = vand.u32 2147483647, %v6370_v51 }
 0x256   : > { %3516 = vst.msk [vmem:[%s6076_s20 + $0x60] sm:$0xf] %vm3491_vm1, %v3483_v11  ;;  %v2632_v12 = vadd.f32 2.0, %v4593_v33  ;;  %v2524_v59 = vmin.f32 %v6393_v35, 20.0  ;;  %v3019_v61 = vsel %vm3018_vm9, %v4591_v32, %v3015_v13  ;;  %v3127_v29 = vand.u32 2147483648, %v6370_v51 }
 0x257   : > { %v3118_v48 = vsub.f32 1.0, %v3117_v45  ;;  %v2575_v55 = vmul.f32 1.442695, %v2530_v27  ;;  %v3024_v42 = vsel %vm3021_vm8, %v3023_v5, %v3019_v61  ;;  %vm3122_vm10 = vweird.f32 %v4595_v28 }
 0x258   : > { %v4597_v36 = vpop.eup %4596  ;;  %v6418_v44 = vmul.f32 %v4593_v33, %v2632_v12  ;;  %v2563_v10 = vmul.f32 1.442695, %v2524_v59  ;;  %v3025_v19 = vmul.f32 %v3024_v42, %v2695_v46  ;;  %vm3239_vm11 = vcmp.gt.f32.partialorder %v6244_v1, 20.0 }
 0x259   : > { %v4599_v57 = vpop.eup %4598  ;;  %v3119_v22 = vmul.f32 %v4595_v28, %v3118_v48  ;;  %v2619_v24 = vadd.f32 2.0, %v4597_v36  ;;  %4600 = vpow2.f32 %v2575_v55  ;;  %v2702_v31 = vmul.f32 %v6343_v43, %v6278_v40 }
 0x25a   : > { %v2922_v20 = vmul.f32 %v4599_v57, %v6389_v34  ;;  %v6425_v9 = vadd.f32 2.0, %v6418_v44  ;;  %v6428_v2 = vsel %vm3239_vm11, %v6244_v1, %v3025_v19  ;;  %vm3121_vm12 = vweird.f32 %v6370_v51 }
 0x25b   : > { %v3120_v41 = vadd.f32 %v4595_v28, %v3119_v22  ;;  %v6431_v26 = vmul.f32 %v4597_v36, %v2619_v24  ;;  %v3477_v32 = vpack.c.bf16 %v6428_v2, %v6428_v2  ;;  %vm3123_vm13 = vmor %vm3121_vm12, %vm3122_vm10  ;;  %v3128_v43 = vor.u32 1.1754944e-38, %v3127_v29 }
 0x25c   : > { %v2923_v7 = vsub.f32 1.0, %v2922_v20  ;;  %4602 = vpow2.f32 %v2563_v10  ;;  %vm3126_vm14 = vcmp.eq.f32.partialorder %v3125_v14, 8.507059e+37  ;;  %v2932_v53 = vand.u32 2147483648, %v6389_v34 }
 0x25d   : > { %v3124_v58 = vsel %vm3123_vm13, %v4595_v28, %v3120_v41  ;;  %4604 = vrcp.f32 %v6425_v9  ;;  %3510 = vst.msk [vmem:[%s6076_s20 + $0x48] sm:$0xf] %vm3491_vm1, %v3477_v32  ;;  %vm2927_vm15 = vweird.f32 %v4599_v57  ;;  %v2930_v37 = vand.u32 2147483647, %v6389_v34 }
 0x25e   : > { %v3129_v1 = vsel %vm3126_vm14, %v3128_v43, %v3124_v58  ;;  %v2924_v51 = vmul.f32 %v4599_v57, %v2923_v7  ;;  %v6442_v6 = vsel %vm3285_vm0, %v3366_v47, 0.0  ;;  %vm3246_vm2 = vcmp.gt.f32.partialorder %v6278_v40, 20.0 }
 0x25f   : > { %v4601_v0 = vpop.eup %4600  ;;  %v3130_v52 = vmul.f32 %v3129_v1, %v2702_v31  ;;  %v6446_v50 = vadd.f32 2.0, %v6431_v26  ;;  %v3367_v16 = vmul.f32 %v6304_v23, %v6304_v23  ;;  %vm2926_vm3 = vweird.f32 %v6389_v34  ;;  %v6462_v34 = vld [vmem:[%s6996_s4] ss:$0 sm:$0xff]  ;;  %v2502_v31 = vpop.f32.mrf.mxu3 }
 0x260   : > { %v2925_v8 = vadd.f32 %v4599_v57, %v2924_v51  ;;  %v2626_v33 = vadd.f32 2.0, %v4601_v0  ;;  %v2689_v27 = vmul.f32 %v6378_v3, %v6288_v39  ;;  %vm2928_vm4 = vmor %vm2926_vm3, %vm2927_vm15  ;;  %v2933_v28 = vor.u32 1.1754944e-38, %v2932_v53 }
 0x261   : > { %v6452_v17 = vsel %vm3246_vm2, %v6278_v40, %v3130_v52  ;;  %4606 = vrcp.f32 %v6446_v50  ;;  %vm2931_vm5 = vcmp.eq.f32.partialorder %v2930_v37, 8.507059e+37  ;;  %v6465_v40 = vadd.f32 %v6462_v34, %v2487_v56 }
 0x262   : > { %v4603_v47 = vpop.eup %4602  ;;  %v3484_v11 = vpack.c.bf16 %v6452_v17, %v6452_v17  ;;  %v2929_v13 = vsel %vm2928_vm4, %v4599_v57, %v2925_v8  ;;  %v6469_v5 = vmul.f32 %v6223_v38, %v6223_v38  ;;  %vm3233_vm6 = vcmp.gt.f32.partialorder %v6288_v39, 20.0 }
 0x263   : > { %v4605_v3 = vpop.eup %4604  ;;  %v2934_v45 = vsel %vm2931_vm5, %v2933_v28, %v2929_v13  ;;  %v6472_v46 = vmul.f32 %v4601_v0, %v2626_v33  ;;  %v6476_v14 = vmul.f32 %v6296_v63, %v6296_v63  ;;  %v6480_v12 = vsel %vm3285_vm0, %v6304_v23, 0.0  ;;  %v2489_v28 = vpop.f32.mrf.mxu2 }
 0x264   : > { %3517 = vst.msk [vmem:[%s6076_s20 + $0x64] sm:$0xf] %vm3491_vm1, %v3484_v11  ;;  %v2935_v59 = vmul.f32 %v2934_v45, %v2689_v27  ;;  %v3027_v61 = vmul.f32 %v4605_v3, %v6425_v9  ;;  %v3035_v48 = vand.u32 2147483647, %v6425_v9  ;;  %v3037_v29 = vand.u32 2147483648, %v6425_v9 }
 0x265   : > { %v6488_v55 = vadd.f32 2.0, %v6472_v46  ;;  %v2620_v36 = vadd.f32 2.0, %v4603_v47  ;;  %v6491_v42 = vsel %vm3285_vm0, %v3367_v16, 0.0  ;;  %v2537_v57 = vmin.f32 %v6465_v40, 20.0 }
 0x266   : > { %v6494_v23 = vsel %vm3233_vm6, %v6288_v39, %v2935_v59  ;;  %v3028_v10 = vsub.f32 1.0, %v3027_v61  ;;  %v3368_v22 = vmul.f32 %v6349_v25, %v6349_v25  ;;  %vm3240_vm7 = vcmp.gt.f32.partialorder %v6316_v30, 20.0 }
 0x267   : > { %v4607_v19 = vpop.eup %4606  ;;  %v3471_v24 = vpack.c.bf16 %v6494_v23, %v6494_v23  ;;  %4608 = vrcp.f32 %v6488_v55  ;;  %v2696_v20 = vmul.f32 %v6418_v44, %v6316_v30  ;;  %vm3032_vm8 = vweird.f32 %v4605_v3 }
 0x268   : > { %v3029_v39 = vmul.f32 %v4605_v3, %v3028_v10  ;;  %v2832_v41 = vmul.f32 %v4607_v19, %v6446_v50  ;;  %vm3031_vm9 = vweird.f32 %v6425_v9  ;;  %vm6509_vm10 = vcmp.eq.f32.partialorder %v3035_v48, 8.507059e+37 }
 0x269   : > { %3504 = vst.msk [vmem:[%s6076_s20 + $0x30] sm:$0xf] %vm3491_vm1, %v3471_v24  ;;  %v3038_v43 = vor.u32 1.1754944e-38, %v3037_v29  ;;  %v6513_v7 = vmul.f32 %v4603_v47, %v2620_v36  ;;  %v2589_v1 = vmul.f32 1.442695, %v2537_v57  ;;  %v6516_v44 = vadd.f32 %v6462_v34, %v2502_v31  ;;  %vm3033_vm11 = vmor %vm3031_vm9, %vm3032_vm8 }
 0x26a   : > { %v3030_v58 = vadd.f32 %v4605_v3, %v3029_v39  ;;  %v2833_v53 = vsub.f32 1.0, %v2832_v41  ;;  %vm2837_vm12 = vweird.f32 %v4607_v19  ;;  %v2840_v51 = vand.u32 2147483647, %v6446_v50 }
 0x26b   : > { %v2842_v37 = vand.u32 2147483648, %v6446_v50  ;;  %v6521_v9 = vadd.f32 2.0, %v6513_v7  ;;  %4610 = vpow2.f32 %v2589_v1  ;;  %v2543_v56 = vmin.f32 %v6516_v44, 20.0  ;;  %v2472_v1 = vpop.f32.mrf.mxu1 }
 0x26c   : > { %v3034_v0 = vsel %vm3033_vm11, %v4605_v3, %v3030_v58  ;;  %v2834_v52 = vmul.f32 %v4607_v19, %v2833_v53  ;;  %v6526_v8 = vsel %vm3285_vm0, %v6349_v25, 0.0  ;;  %v6529_v33 = vsel %vm3285_vm0, %v3368_v22, 0.0 }
 0x26d   : > { %v4609_v16 = vpop.eup %4608  ;;  %v3039_v27 = vsel %vm6509_vm10, %v3038_v43, %v3034_v0  ;;  %4612 = vrcp.f32 %v6521_v9  ;;  %vm2836_vm13 = vweird.f32 %v6446_v50  ;;  %v2683_v3 = vmul.f32 %v6431_v26, %v6352_v62 }
 0x26e   : > { %v3040_v47 = vmul.f32 %v3039_v27, %v2696_v20  ;;  %v2835_v11 = vadd.f32 %v4607_v19, %v2834_v52  ;;  %v2937_v13 = vmul.f32 %v4609_v16, %v6488_v55  ;;  %vm2838_vm14 = vmor %vm2836_vm13, %vm2837_vm12  ;;  %vm2841_vm15 = vcmp.eq.f32.partialorder %v2840_v51, 8.507059e+37 }
 0x26f   : > { %v2843_v25 = vor.u32 1.1754944e-38, %v2842_v37  ;;  %v2601_v45 = vmul.f32 1.442695, %v2543_v56  ;;  %v6545_v50 = vadd.f32 %v6462_v34, %v2489_v28  ;;  %v2945_v36 = vand.u32 2147483647, %v6488_v55 }
 0x270   : > { %v6542_v59 = vsel %vm3240_vm7, %v6316_v30, %v3040_v47  ;;  %v2839_v61 = vsel %vm2838_vm14, %v4607_v19, %v2835_v11  ;;  %v2938_v48 = vsub.f32 1.0, %v2937_v13  ;;  %v2947_v10 = vand.u32 2147483648, %v6488_v55 }
 0x271   : > { %v3478_v29 = vpack.c.bf16 %v6542_v59, %v6542_v59  ;;  %v2844_v26 = vsel %vm2841_vm15, %v2843_v25, %v2839_v61  ;;  %v4611_v57 = vpop.eup %4610  ;;  %vm2942_vm2 = vweird.f32 %v4609_v16  ;;  %4614 = vpow2.f32 %v2601_v45  ;;  %v2504_v45 = vpop.f32.mrf.mxu3 }
 0x272   : > { %v2845_v22 = vmul.f32 %v2844_v26, %v2683_v3  ;;  %v2939_v24 = vmul.f32 %v4609_v16, %v2938_v48  ;;  %vm3227_vm3 = vcmp.gt.f32.partialorder %v6352_v62, 20.0  ;;  %vm3234_vm4 = vcmp.gt.f32.partialorder %v6381_v18, 20.0 }
 0x273   : > { %v4613_v30 = vpop.eup %4612  ;;  %3511 = vst.msk [vmem:[%s6076_s20 + $0x4c] sm:$0xf] %vm3491_vm1, %v3478_v29  ;;  %v2633_v19 = vadd.f32 2.0, %v4611_v57  ;;  %v2538_v31 = vmin.f32 %v6545_v50, 20.0  ;;  %vm2941_vm5 = vweird.f32 %v6488_v55  ;;  %v2690_v43 = vmul.f32 %v6472_v46, %v6381_v18 }
 0x274   : > { %v3259_v20 = vsel %vm3227_vm3, %v6352_v62, %v2845_v22  ;;  %v2940_v39 = vadd.f32 %v4609_v16, %v2939_v24  ;;  %v2847_v41 = vmul.f32 %v4613_v30, %v6521_v9  ;;  %vm2943_vm6 = vmor %vm2941_vm5, %vm2942_vm2  ;;  %v2948_v58 = vor.u32 1.1754944e-38, %v2947_v10 }
 0x275   : > { %v3465_v32 = vpack.c.bf16 %v3259_v20, %v3259_v20  ;;  %v2665_v53 = vmul.f32 %v4611_v57, %v2633_v19  ;;  %vm2946_vm7 = vcmp.eq.f32.partialorder %v2945_v36, 8.507059e+37  ;;  %v2591_v0 = vmul.f32 1.442695, %v2538_v31 }
 0x276   : > { %v2944_v51 = vsel %vm2943_vm6, %v4609_v16, %v2940_v39  ;;  %v2848_v37 = vsub.f32 1.0, %v2847_v41  ;;  %v2855_v52 = vand.u32 2147483647, %v6521_v9  ;;  %v2857_v55 = vand.u32 2147483648, %v6521_v9 }
 0x277   : > { %3498 = vst.msk [vmem:[%s6076_s20 + $0x18] sm:$0xf] %vm3491_vm1, %v3465_v32  ;;  %v2949_v62 = vsel %vm2946_vm7, %v2948_v58, %v2944_v51  ;;  %vm3228_vm8 = vcmp.gt.f32.partialorder %v6393_v35, 20.0  ;;  %v6566_v56 = vadd.f32 2.0, %v2665_v53  ;;  %v4615_v46 = vpop.eup %4614  ;;  %vm2852_vm9 = vweird.f32 %v4613_v30  ;;  %v2474_v58 = vpop.f32.mrf.mxu1 }
 0x278   : > { %v2950_v27 = vmul.f32 %v2949_v62, %v2690_v43  ;;  %v2849_v28 = vmul.f32 %v4613_v30, %v2848_v37  ;;  %4616 = vpow2.f32 %v2591_v0  ;;  %v3369_v16 = vmul.f32 %v6494_v23, %v6494_v23 }
 0x279   : > { %v3363_v47 = vmul.f32 %v3259_v20, %v3259_v20  ;;  %vm2851_vm10 = vweird.f32 %v6521_v9  ;;  %4618 = vrcp.f32 %v6566_v56  ;;  %v2639_v3 = vadd.f32 2.0, %v4615_v46 }
 0x27a   : > { %v3266_v11 = vsel %vm3234_vm4, %v6381_v18, %v2950_v27  ;;  %v2850_v13 = vadd.f32 %v4613_v30, %v2849_v28  ;;  %v6576_v25 = vadd.f32 %v6462_v34, %v2472_v1  ;;  %v3297_v61 = vsel %vm3285_vm0, %v3259_v20, 0.0  ;;  %vm2853_vm11 = vmor %vm2851_vm10, %vm2852_vm9 }
 0x27b   : > { %v3472_v48 = vpack.c.bf16 %v3266_v11, %v3266_v11  ;;  %v2684_v29 = vmul.f32 %v6513_v7, %v6393_v35  ;;  %v2858_v9 = vor.u32 1.1754944e-38, %v2857_v55  ;;  %vm2856_vm12 = vcmp.eq.f32.partialorder %v2855_v52, 8.507059e+37 }
 0x27c   : > { %v2854_v26 = vsel %vm2853_vm11, %v4613_v30, %v2850_v13  ;;  %v6581_v36 = vmul.f32 %v4615_v46, %v2639_v3  ;;  %v2531_v18 = vmin.f32 %v6576_v25, 20.0  ;;  %v6586_v10 = vsel %vm3285_vm0, %v6494_v23, 0.0 }
 0x27d   : > { %v3400_v57 = vsel %vm3285_vm0, %v3363_v47, 0.0  ;;  %3505 = vst.msk [vmem:[%s6076_s20 + $0x34] sm:$0xf] %vm3491_vm1, %v3472_v48  ;;  %v2859_v22 = vsel %vm2856_vm12, %v2858_v9, %v2854_v26  ;;  %v6592_v24 = vadd.f32 %v6462_v34, %v2504_v45  ;;  %v6595_v30 = vsel %vm3285_vm0, %v3369_v16, 0.0 }
 0x27e   : > { %v4617_v7 = vpop.eup %4616  ;;  %v3298_v19 = vadd.f32 %v3297_v61, %v6340_v21  ;;  %v2860_v31 = vmul.f32 %v2859_v22, %v2684_v29  ;;  %v6599_v20 = vadd.f32 2.0, %v6581_v36  ;;  %v2697_v39 = vmul.f32 %v2665_v53, %v6465_v40 }
 0x27f   : > { %v4619_v23 = vpop.eup %4618  ;;  %v2634_v41 = vadd.f32 2.0, %v4617_v7  ;;  %v2577_v32 = vmul.f32 1.442695, %v2531_v18  ;;  %v2544_v43 = vmin.f32 %v6592_v24, 20.0  ;;  %v3401_v1 = vadd.f32 %v3400_v57, %v6355_v4 }
 0x280   : > { %v3260_v51 = vsel %vm3228_vm8, %v6393_v35, %v2860_v31  ;;  %v3042_v21 = vmul.f32 %v4619_v23, %v6566_v56  ;;  %4620 = vrcp.f32 %v6599_v20  ;;  %v3050_v62 = vand.u32 2147483647, %v6566_v56 }
 0x281   : > { %v3299_v37 = vsel %vm3285_vm0, %v3260_v51, 0.0  ;;  %v3364_v0 = vmul.f32 %v3260_v51, %v3260_v51  ;;  %v3466_v53 = vpack.c.bf16 %v3260_v51, %v3260_v51  ;;  %v3052_v46 = vand.u32 2147483648, %v6566_v56 }
 0x282   : > { %v3300_v52 = vadd.f32 %v3299_v37, %v3298_v19  ;;  %v3043_v55 = vsub.f32 1.0, %v3042_v21  ;;  %v6613_v4 = vadd.f32 %v6462_v34, %v2474_v58  ;;  %vm3241_vm13 = vcmp.gt.f32.partialorder %v6465_v40, 20.0 }
 0x283   : > { %v3402_v27 = vsel %vm3285_vm0, %v3364_v0, 0.0  ;;  %3499 = vst.msk [vmem:[%s6076_s20 + $0x1c] sm:$0xf] %vm3491_vm1, %v3466_v53  ;;  %v6619_v35 = vmul.f32 %v4617_v7, %v2634_v41  ;;  %4622 = vpow2.f32 %v2577_v32  ;;  %v2603_v28 = vmul.f32 1.442695, %v2544_v43 }
 0x284   : > { %v3302_v16 = vadd.f32 %v6363_v54, %v3300_v52  ;;  %v3403_v47 = vadd.f32 %v3402_v27, %v3401_v1  ;;  %v3044_v13 = vmul.f32 %v4619_v23, %v3043_v55  ;;  %vm3047_vm14 = vweird.f32 %v4619_v23  ;;  %v2507_v27 = vpop.f32.mrf.mxu3 }
 0x285   : > { %v3311_v3 = vsel %vm3285_vm0, %v3266_v11, 0.0  ;;  %vm3046_vm15 = vweird.f32 %v6566_v56  ;;  %v6625_v45 = vadd.f32 2.0, %v6619_v35  ;;  %4624 = vpow2.f32 %v2603_v28 }
 0x286   : > { %v4621_v61 = vpop.eup %4620  ;;  %v3304_v48 = vadd.f32 %v6402_v49, %v3302_v16  ;;  %v3405_v29 = vadd.f32 %v6384_v60, %v3403_v47  ;;  %v3045_v9 = vadd.f32 %v4619_v23, %v3044_v13  ;;  %v2532_v26 = vmin.f32 %v6613_v4, 20.0  ;;  %vm3048_vm2 = vmor %vm3046_vm15, %vm3047_vm14 }
 0x287   : > { %v3370_v54 = vmul.f32 %v3266_v11, %v3266_v11  ;;  %v3053_v18 = vor.u32 1.1754944e-38, %v3052_v46  ;;  %v3132_v57 = vmul.f32 %v4621_v61, %v6599_v20  ;;  %4626 = vrcp.f32 %v6625_v45 }
 0x288   : > { %v3306_v56 = vadd.f32 %v6480_v12, %v3304_v48  ;;  %v3407_v22 = vadd.f32 %v6442_v6, %v3405_v29  ;;  %v3049_v7 = vsel %vm3048_vm2, %v4619_v23, %v3045_v9  ;;  %vm3051_vm3 = vcmp.eq.f32.partialorder %v3050_v62, 8.507059e+37 }
 0x289   : > { %v4623_v19 = vpop.eup %4622  ;;  %v3054_v49 = vsel %vm3051_vm3, %v3053_v18, %v3049_v7  ;;  %v3133_v31 = vsub.f32 1.0, %v3132_v57  ;;  %v3140_v60 = vand.u32 2147483647, %v6599_v20  ;;  %v2579_v41 = vmul.f32 1.442695, %v2532_v26 }
 0x28a   : > { %v3409_v11 = vadd.f32 %v6491_v42, %v3407_v22  ;;  %v3055_v32 = vmul.f32 %v3054_v49, %v2697_v39  ;;  %v3142_v43 = vand.u32 2147483648, %v6599_v20  ;;  %vm3247_vm4 = vcmp.gt.f32.partialorder %v6516_v44, 20.0 }
 0x28b   : > { %v2627_v58 = vadd.f32 2.0, %v4623_v19  ;;  %v4625_v1 = vpop.eup %4624  ;;  %v3134_v12 = vmul.f32 %v4621_v61, %v3133_v31  ;;  %vm3137_vm5 = vweird.f32 %v4621_v61  ;;  %v3308_v6 = vadd.f32 %v6526_v8, %v3306_v56 }
 0x28c   : > { %4628 = vpow2.f32 %v2579_v41  ;;  %v3414_v23 = vsel %vm3285_vm0, %v3370_v54, 0.0  ;;  %v6643_v51 = vsel %vm3241_vm13, %v6465_v40, %v3055_v32  ;;  %v3411_v39 = vadd.f32 %v6529_v33, %v3409_v11 }
 0x28d   : > { %v6645_v42 = vmul.f32 %v4623_v19, %v2627_v58  ;;  %v4627_v21 = vpop.eup %4626  ;;  %v3479_v37 = vpack.c.bf16 %v6643_v51, %v6643_v51  ;;  %v2703_v8 = vmul.f32 %v6581_v36, %v6516_v44  ;;  %v3135_v0 = vadd.f32 %v4621_v61, %v3134_v12  ;;  %v2492_v36 = vpop.f32.mrf.mxu2 }
 0x28e   : > { %vm3136_vm6 = vweird.f32 %v6599_v20  ;;  %v3143_v53 = vor.u32 1.1754944e-38, %v3142_v43  ;;  %v3057_v62 = vmul.f32 %v4627_v21, %v6625_v45  ;;  %v2640_v52 = vadd.f32 2.0, %v4625_v1 }
 0x28f   : > { %vm3138_vm7 = vmor %vm3136_vm6, %vm3137_vm5  ;;  %v6655_v40 = vadd.f32 2.0, %v6645_v42  ;;  %3512 = vst.msk [vmem:[%s6076_s20 + $0x50] sm:$0xf] %vm3491_vm1, %v3479_v37  ;;  %vm3141_vm8 = vcmp.eq.f32.partialorder %v3140_v60, 8.507059e+37  ;;  %v3310_v55 = vadd.f32 %v6586_v10, %v3308_v6  ;;  %v3413_v46 = vadd.f32 %v6595_v30, %v3411_v39  ;;  %v2509_v6 = vpop.f32.mrf.mxu3 }
 0x290   : > { %v3139_v33 = vsel %vm3138_vm7, %v4621_v61, %v3135_v0  ;;  %v3058_v20 = vsub.f32 1.0, %v3057_v62  ;;  %v3065_v16 = vand.u32 2147483647, %v6625_v45  ;;  %vm3062_vm9 = vweird.f32 %v4627_v21 }
 0x291   : > { %v3144_v28 = vsel %vm3141_vm8, %v3143_v53, %v3139_v33  ;;  %4630 = vrcp.f32 %v6655_v40  ;;  %v3067_v48 = vand.u32 2147483648, %v6625_v45  ;;  %v6664_v29 = vadd.f32 %v3311_v3, %v3310_v55 }
 0x292   : > { %v4629_v47 = vpop.eup %4628  ;;  %v3145_v13 = vmul.f32 %v3144_v28, %v2703_v8  ;;  %v3059_v61 = vmul.f32 %v4627_v21, %v3058_v20  ;;  %v6666_v9 = vadd.f32 %v3414_v23, %v3413_v46  ;;  %v6668_v10 = vmul.f32 %v4625_v1, %v2640_v52 }
 0x293   : > { %v2628_v30 = vadd.f32 2.0, %v4629_v47  ;;  %v6672_v26 = vsel %vm3285_vm0, %v6223_v38, 0.0  ;;  %v6676_v54 = vsel %vm3285_vm0, %v6469_v5, 0.0  ;;  %v6680_v18 = vsel %vm3285_vm0, %v6296_v63, 0.0 }
 0x294   : > { %v6685_v3 = vsel %vm3247_vm4, %v6516_v44, %v3145_v13  ;;  %v3381_v57 = vmul.f32 %v6396_v15, %v6396_v15  ;;  %v3060_v56 = vadd.f32 %v4627_v21, %v3059_v61  ;;  %vm3061_vm10 = vweird.f32 %v6625_v45 }
 0x295   : > { %v3485_v38 = vpack.c.bf16 %v6685_v3, %v6685_v3  ;;  %vm3063_vm11 = vmor %vm3061_vm10, %vm3062_vm9  ;;  %v3068_v5 = vor.u32 1.1754944e-38, %v3067_v48  ;;  %v6694_v63 = vadd.f32 2.0, %v6668_v10  ;;  %v6696_v22 = vmul.f32 %v4629_v47, %v2628_v30  ;;  %v2494_v12 = vpop.f32.mrf.mxu2 }
 0x296   : > { %v6699_v44 = vadd.f32 %v6462_v34, %v2492_v36  ;;  %v6703_v19 = vsel %vm3285_vm0, %v6476_v14, 0.0  ;;  %v2698_v45 = vmul.f32 %v6619_v35, %v6545_v50  ;;  %v3064_v49 = vsel %vm3063_vm11, %v4627_v21, %v3060_v56 }
 0x297   : > { %v4631_v7 = vpop.eup %4630  ;;  %3518 = vst.msk [vmem:[%s6076_s20 + $0x68] sm:$0xf] %vm3491_vm1, %v3485_v38  ;;  %vm3066_vm12 = vcmp.eq.f32.partialorder %v3065_v16, 8.507059e+37  ;;  %v3375_v31 = vmul.f32 %v6428_v2, %v6428_v2  ;;  %4632 = vrcp.f32 %v6694_v63  ;;  %v6715_v11 = vsel %vm3285_vm0, %v6396_v15, 0.0 }
 0x298   : > { %v3069_v60 = vsel %vm3066_vm12, %v3068_v5, %v3064_v49  ;;  %v2952_v41 = vmul.f32 %v4631_v7, %v6655_v40  ;;  %v6718_v14 = vsel %vm3285_vm0, %v3381_v57, 0.0  ;;  %vm3242_vm13 = vcmp.gt.f32.partialorder %v6545_v50, 20.0  ;;  %v2512_v49 = vpop.f32.mrf.mxu3 }
 0x299   : > { %v3070_v32 = vmul.f32 %v3069_v60, %v2698_v45  ;;  %v6722_v43 = vadd.f32 2.0, %v6696_v22  ;;  %v2539_v58 = vmin.f32 %v6699_v44, 20.0  ;;  %v6726_v1 = vadd.f32 %v6462_v34, %v2507_v27 }
 0x29a   : > { %v2953_v35 = vsub.f32 1.0, %v2952_v41  ;;  %v6730_v15 = vsel %vm3285_vm0, %v6428_v2, 0.0  ;;  %v2960_v39 = vand.u32 2147483647, %v6655_v40  ;;  %v2962_v21 = vand.u32 2147483648, %v6655_v40 }
 0x29b   : > { %v6733_v23 = vsel %vm3242_vm13, %v6545_v50, %v3070_v32  ;;  %v6738_v37 = vsel %vm3285_vm0, %v3375_v31, 0.0  ;;  %vm2957_vm14 = vweird.f32 %v4631_v7  ;;  %v6744_v53 = vmul.f32 %v6452_v17, %v6452_v17 }
 0x29c   : > { %v3480_v8 = vpack.c.bf16 %v6733_v23, %v6733_v23  ;;  %v2954_v0 = vmul.f32 %v4631_v7, %v2953_v35  ;;  %v6748_v2 = vmul.f32 %v6542_v59, %v6542_v59  ;;  %4634 = vrcp.f32 %v6722_v43 }
 0x29d   : > { %v6752_v50 = vadd.f32 %v6462_v34, %v2494_v12  ;;  %v4633_v62 = vpop.eup %4632  ;;  %vm2956_vm15 = vweird.f32 %v6655_v40  ;;  %v2593_v33 = vmul.f32 1.442695, %v2539_v58  ;;  %v2545_v55 = vmin.f32 %v6726_v1, 20.0 }
 0x29e   : > { %3513 = vst.msk [vmem:[%s6076_s20 + $0x54] sm:$0xf] %vm3491_vm1, %v3480_v8  ;;  %v2955_v52 = vadd.f32 %v4631_v7, %v2954_v0  ;;  %v2691_v46 = vmul.f32 %v6645_v42, %v6576_v25  ;;  %vm2958_vm2 = vmor %vm2956_vm15, %vm2957_vm14  ;;  %vm2961_vm3 = vcmp.eq.f32.partialorder %v2960_v39, 8.507059e+37  ;;  %v2963_v36 = vor.u32 1.1754944e-38, %v2962_v21 }
 0x29f   : > { %v3147_v27 = vmul.f32 %v4633_v62, %v6694_v63  ;;  %v3155_v20 = vand.u32 2147483647, %v6694_v63  ;;  %4636 = vpow2.f32 %v2593_v33  ;;  %v2605_v16 = vmul.f32 1.442695, %v2545_v55 }
 0x2a0   : > { %v2959_v28 = vsel %vm2958_vm2, %v4631_v7, %v2955_v52  ;;  %v3157_v40 = vand.u32 2147483648, %v6694_v63  ;;  %v2540_v48 = vmin.f32 %v6752_v50, 20.0  ;;  %vm3235_vm4 = vcmp.gt.f32.partialorder %v6576_v25, 20.0 }
 0x2a1   : > { %v2964_v47 = vsel %vm2961_vm3, %v2963_v36, %v2959_v28  ;;  %v3148_v13 = vsub.f32 1.0, %v3147_v27  ;;  %4638 = vpow2.f32 %v2605_v16  ;;  %v6766_v42 = vadd.f32 %v6462_v34, %v2509_v6 }
 0x2a2   : > { %v2965_v61 = vmul.f32 %v2964_v47, %v2691_v46  ;;  %v4635_v30 = vpop.eup %4634  ;;  %v2704_v57 = vmul.f32 %v6668_v10, %v6592_v24  ;;  %vm3152_vm5 = vweird.f32 %v4633_v62  ;;  %v2595_v56 = vmul.f32 1.442695, %v2540_v48 }
 0x2a3   : > { %v3149_v38 = vmul.f32 %v4633_v62, %v3148_v13  ;;  %vm3151_vm6 = vweird.f32 %v6694_v63  ;;  %v2967_v7 = vmul.f32 %v4635_v30, %v6722_v43  ;;  %v2546_v45 = vmin.f32 %v6766_v42, 20.0 }
 0x2a4   : > { %v3267_v5 = vsel %vm3235_vm4, %v6576_v25, %v2965_v61  ;;  %vm3156_vm7 = vcmp.eq.f32.partialorder %v3155_v20, 8.507059e+37  ;;  %v3158_v41 = vor.u32 1.1754944e-38, %v3157_v40  ;;  %vm3153_vm8 = vmor %vm3151_vm6, %vm3152_vm5  ;;  %v2977_v35 = vand.u32 2147483648, %v6722_v43 }
 0x2a5   : > { %v3473_v31 = vpack.c.bf16 %v3267_v5, %v3267_v5  ;;  %v3150_v60 = vadd.f32 %v4633_v62, %v3149_v38  ;;  %v4637_v32 = vpop.eup %4636  ;;  %v2968_v10 = vsub.f32 1.0, %v2967_v7  ;;  %4640 = vpow2.f32 %v2595_v56 }
 0x2a6   : > { %v2607_v58 = vmul.f32 1.442695, %v2546_v45  ;;  %v2975_v63 = vand.u32 2147483647, %v6722_v43  ;;  %v2635_v12 = vadd.f32 2.0, %v4637_v32  ;;  %v6779_v6 = vadd.f32 %v6462_v34, %v2512_v49 }
 0x2a7   : > { %3506 = vst.msk [vmem:[%s6076_s20 + $0x38] sm:$0xf] %vm3491_vm1, %v3473_v31  ;;  %v3154_v25 = vsel %vm3153_vm8, %v4633_v62, %v3150_v60  ;;  %v4639_v39 = vpop.eup %4638  ;;  %v2969_v8 = vmul.f32 %v4635_v30, %v2968_v10  ;;  %vm2972_vm9 = vweird.f32 %v4635_v30  ;;  %vm3248_vm10 = vcmp.gt.f32.partialorder %v6592_v24, 20.0  ;;  %v2514_v31 = vpop.f32.mrf.mxu3 }
 0x2a8   : > { %v3159_v21 = vsel %vm3156_vm7, %v3158_v41, %v3154_v25  ;;  %4642 = vpow2.f32 %v2607_v58  ;;  %v2667_v52 = vmul.f32 %v4637_v32, %v2635_v12  ;;  %v2641_v33 = vadd.f32 2.0, %v4639_v39 }
 0x2a9   : > { %v3160_v0 = vmul.f32 %v3159_v21, %v2704_v57  ;;  %v2692_v55 = vmul.f32 %v6696_v22, %v6613_v4  ;;  %v2970_v62 = vadd.f32 %v4635_v30, %v2969_v8  ;;  %vm2971_vm11 = vweird.f32 %v6722_v43 }
 0x2aa   : > { %v2978_v46 = vor.u32 1.1754944e-38, %v2977_v35  ;;  %v3371_v36 = vmul.f32 %v3267_v5, %v3267_v5  ;;  %vm2973_vm12 = vmor %vm2971_vm11, %vm2972_vm9  ;;  %v6788_v28 = vadd.f32 2.0, %v2667_v52  ;;  %v6790_v20 = vmul.f32 %v4639_v39, %v2641_v33 }
 0x2ab   : > { %v6786_v27 = vsel %vm3248_vm10, %v6592_v24, %v3160_v0  ;;  %v4641_v16 = vpop.eup %4640  ;;  %v2974_v13 = vsel %vm2973_vm12, %v4635_v30, %v2970_v62  ;;  %vm2976_vm13 = vcmp.eq.f32.partialorder %v2975_v63, 8.507059e+37  ;;  %v2547_v22 = vmin.f32 %v6779_v6, 20.0 }
 0x2ac   : > { %v3486_v47 = vpack.c.bf16 %v6786_v27, %v6786_v27  ;;  %v3323_v43 = vsel %vm3285_vm0, %v6542_v59, 0.0  ;;  %v3313_v24 = vsel %vm3285_vm0, %v3267_v5, 0.0  ;;  %v2979_v40 = vsel %vm2976_vm13, %v2978_v46, %v2974_v13 }
 0x2ad   : > { %4644 = vrcp.f32 %v6788_v28  ;;  %v6801_v61 = vsel %vm3285_vm0, %v6748_v2, 0.0  ;;  %v6805_v57 = vsel %vm3285_vm0, %v6643_v51, 0.0  ;;  %v3377_v30 = vmul.f32 %v6643_v51, %v6643_v51 }
 0x2ae   : > { %v4643_v48 = vpop.eup %4642  ;;  %3519 = vst.msk [vmem:[%s6076_s20 + $0x6c] sm:$0xf] %vm3491_vm1, %v3486_v47  ;;  %v2980_v59 = vmul.f32 %v2979_v40, %v2692_v55  ;;  %v3416_v38 = vsel %vm3285_vm0, %v3371_v36, 0.0  ;;  %vm3236_vm14 = vcmp.gt.f32.partialorder %v6613_v4, 20.0  ;;  %v6814_v56 = vadd.f32 2.0, %v6790_v20 }
 0x2af   : > { %v2636_v5 = vadd.f32 2.0, %v4641_v16  ;;  %v3314_v2 = vadd.f32 %v3313_v24, %v6664_v29  ;;  %v2642_v45 = vadd.f32 2.0, %v4643_v48  ;;  %v2609_v49 = vmul.f32 1.442695, %v2547_v22 }
 0x2b0   : > { %v3268_v7 = vsel %vm3236_vm14, %v6613_v4, %v2980_v59  ;;  %4646 = vrcp.f32 %v6814_v56  ;;  %v6821_v32 = vsel %vm3285_vm0, %v3377_v30, 0.0  ;;  %v6825_v10 = vmul.f32 %v6685_v3, %v6685_v3 }
 0x2b1   : > { %v3315_v51 = vsel %vm3285_vm0, %v3268_v7, 0.0  ;;  %v3372_v60 = vmul.f32 %v3268_v7, %v3268_v7  ;;  %v3474_v41 = vpack.c.bf16 %v3268_v7, %v3268_v7  ;;  %v3417_v29 = vadd.f32 %v3416_v38, %v6666_v9 }
 0x2b2   : > { %v3316_v35 = vadd.f32 %v3315_v51, %v3314_v2  ;;  %v6830_v58 = vsel %vm3285_vm0, %v6733_v23, 0.0  ;;  %v2668_v63 = vmul.f32 %v4641_v16, %v2636_v5  ;;  %v6836_v12 = vadd.f32 %v6462_v34, %v2514_v31 }
 0x2b3   : > { %v4645_v4 = vpop.eup %4644  ;;  %v3418_v25 = vsel %vm3285_vm0, %v3372_v60, 0.0  ;;  %3507 = vst.msk [vmem:[%s6076_s20 + $0x3c] sm:$0xf] %vm3491_vm1, %v3474_v41  ;;  %4648 = vpow2.f32 %v2609_v49  ;;  %v3080_v9 = vand.u32 2147483647, %v6788_v28  ;;  %v3082_v0 = vand.u32 2147483648, %v6788_v28 }
 0x2b4   : > { %v3318_v39 = vadd.f32 %v6672_v26, %v3316_v35  ;;  %v3419_v21 = vadd.f32 %v3418_v25, %v3417_v29  ;;  %v3072_v8 = vmul.f32 %v4645_v4, %v6788_v28  ;;  %v6842_v33 = vadd.f32 2.0, %v2668_v63 }
 0x2b5   : > { %v2674_v55 = vmul.f32 %v4643_v48, %v2642_v45  ;;  %v3378_v62 = vmul.f32 %v6733_v23, %v6733_v23  ;;  %v2699_v16 = vmul.f32 %v2667_v52, %v6699_v44  ;;  %vm3077_vm15 = vweird.f32 %v4645_v4 }
 0x2b6   : > { %v3320_v46 = vadd.f32 %v6680_v18, %v3318_v39  ;;  %v3421_v34 = vadd.f32 %v6676_v54, %v3419_v21  ;;  %v3073_v36 = vsub.f32 1.0, %v3072_v8  ;;  %v4647_v26 = vpop.eup %4646  ;;  %vm3243_vm2 = vcmp.gt.f32.partialorder %v6699_v44, 20.0 }
 0x2b7   : > { %4650 = vrcp.f32 %v6842_v33  ;;  %v2548_v47 = vmin.f32 %v6836_v12, 20.0  ;;  %v3162_v18 = vmul.f32 %v4647_v26, %v6814_v56  ;;  %vm3076_vm3 = vweird.f32 %v6788_v28 }
 0x2b8   : > { %v3322_v13 = vadd.f32 %v6730_v15, %v3320_v46  ;;  %v3423_v22 = vadd.f32 %v6703_v19, %v3421_v34  ;;  %v3074_v23 = vmul.f32 %v4645_v4, %v3073_v36  ;;  %vm6856_vm4 = vcmp.eq.f32.partialorder %v3080_v9, 8.507059e+37  ;;  %vm3078_vm5 = vmor %vm3076_vm3, %vm3077_vm15 }
 0x2b9   : > { %v3083_v52 = vor.u32 1.1754944e-38, %v3082_v0  ;;  %v6860_v24 = vadd.f32 2.0, %v2674_v55  ;;  %v4649_v40 = vpop.eup %4648  ;;  %v3163_v15 = vsub.f32 1.0, %v3162_v18  ;;  %v3170_v19 = vand.u32 2147483647, %v6814_v56 }
 0x2ba   : > { %v3425_v48 = vadd.f32 %v6738_v37, %v3423_v22  ;;  %v3075_v30 = vadd.f32 %v4645_v4, %v3074_v23  ;;  %v3324_v59 = vadd.f32 %v3323_v43, %v3322_v13  ;;  %v3172_v38 = vand.u32 2147483648, %v6814_v56 }
 0x2bb   : > { %4652 = vrcp.f32 %v6860_v24  ;;  %v2611_v28 = vmul.f32 1.442695, %v2548_v47  ;;  %v3164_v7 = vmul.f32 %v4647_v26, %v3163_v15  ;;  %vm3167_vm6 = vweird.f32 %v4647_v26 }
 0x2bc   : > { %v3079_v5 = vsel %vm3078_vm5, %v4645_v4, %v3075_v30  ;;  %v3427_v2 = vadd.f32 %v6801_v61, %v3425_v48  ;;  %v3430_v37 = vsel %vm3285_vm0, %v3378_v62, 0.0  ;;  %vm3249_vm7 = vcmp.gt.f32.partialorder %v6726_v1, 20.0 }
 0x2bd   : > { %v4651_v45 = vpop.eup %4650  ;;  %v3084_v43 = vsel %vm6856_vm4, %v3083_v52, %v3079_v5  ;;  %v2643_v49 = vadd.f32 2.0, %v4649_v40  ;;  %v2705_v51 = vmul.f32 %v6790_v20, %v6726_v1  ;;  %v3165_v60 = vadd.f32 %v4647_v26, %v3164_v7 }
 0x2be   : > { %v3085_v31 = vmul.f32 %v3084_v43, %v2699_v16  ;;  %vm3166_vm8 = vweird.f32 %v6814_v56  ;;  %v3173_v61 = vor.u32 1.1754944e-38, %v3172_v38  ;;  %v3087_v41 = vmul.f32 %v4651_v45, %v6842_v33 }
 0x2bf   : > { %vm3168_vm9 = vmor %vm3166_vm8, %vm3167_vm6  ;;  %v6876_v29 = vmul.f32 %v4649_v40, %v2643_v49  ;;  %4654 = vpow2.f32 %v2611_v28  ;;  %vm3171_vm10 = vcmp.eq.f32.partialorder %v3170_v19, 8.507059e+37  ;;  %v2700_v25 = vmul.f32 %v2668_v63, %v6752_v50 }
 0x2c0   : > { %v3275_v35 = vsel %vm3243_vm2, %v6699_v44, %v3085_v31  ;;  %v3169_v4 = vsel %vm3168_vm9, %v4647_v26, %v3165_v60  ;;  %vm3091_vm11 = vweird.f32 %v6842_v33  ;;  %v2706_v56 = vmul.f32 %v2674_v55, %v6766_v42 }
 0x2c1   : > { %v4653_v20 = vpop.eup %4652  ;;  %v3481_v39 = vpack.c.bf16 %v3275_v35, %v3275_v35  ;;  %v3174_v21 = vsel %vm3171_vm10, %v3173_v61, %v3169_v4  ;;  %v3326_v8 = vadd.f32 %v6805_v57, %v3324_v59  ;;  %v3088_v0 = vsub.f32 1.0, %v3087_v41 }
 0x2c2   : > { %v3175_v9 = vmul.f32 %v3174_v21, %v2705_v51  ;;  %v3177_v62 = vmul.f32 %v4653_v20, %v6860_v24  ;;  %v3429_v46 = vadd.f32 %v6821_v32, %v3427_v2  ;;  %v3095_v44 = vand.u32 2147483647, %v6842_v33 }
 0x2c3   : > { %3514 = vst.msk [vmem:[%s6076_s20 + $0x58] sm:$0xf] %vm3491_vm1, %v3481_v39  ;;  %v3097_v63 = vand.u32 2147483648, %v6842_v33  ;;  %vm3244_vm12 = vcmp.gt.f32.partialorder %v6752_v50, 20.0  ;;  %v6893_v34 = vadd.f32 2.0, %v6876_v29  ;;  %v3089_v55 = vmul.f32 %v4651_v45, %v3088_v0 }
 0x2c4   : > { %v6898_v57 = vsel %vm3249_vm7, %v6726_v1, %v3175_v9  ;;  %vm3092_vm13 = vweird.f32 %v4651_v45  ;;  %v3178_v32 = vsub.f32 1.0, %v3177_v62  ;;  %v3185_v16 = vand.u32 2147483647, %v6860_v24 }
 0x2c5   : > { %v4655_v36 = vpop.eup %4654  ;;  %v3487_v26 = vpack.c.bf16 %v6898_v57, %v6898_v57  ;;  %v3187_v47 = vand.u32 2147483648, %v6860_v24  ;;  %4656 = vrcp.f32 %v6893_v34  ;;  %v3328_v13 = vadd.f32 %v6830_v58, %v3326_v8  ;;  %vm3093_vm15 = vmor %vm3091_vm11, %vm3092_vm13 }
 0x2c6   : > { %v3090_v22 = vadd.f32 %v4651_v45, %v3089_v55  ;;  %v3179_v23 = vmul.f32 %v4653_v20, %v3178_v32  ;;  %vm3182_vm14 = vweird.f32 %v4653_v20  ;;  %v3379_v1 = vmul.f32 %v3275_v35, %v3275_v35 }
 0x2c7   : > { %3520 = vst.msk [vmem:[%s6076_s20 + $0x70] sm:$0xf] %vm3491_vm1, %v3487_v26  ;;  %vm3096_vm2 = vcmp.eq.f32.partialorder %v3095_v44, 8.507059e+37  ;;  %v3098_v18 = vor.u32 1.1754944e-38, %v3097_v63  ;;  %v2644_v54 = vadd.f32 2.0, %v4655_v36  ;;  %v3431_v52 = vadd.f32 %v3430_v37, %v3429_v46 }
 0x2c8   : > { %v3094_v40 = vsel %vm3093_vm15, %v4651_v45, %v3090_v22  ;;  %v3180_v48 = vadd.f32 %v4653_v20, %v3179_v23  ;;  %vm3181_vm3 = vweird.f32 %v6860_v24  ;;  %v3329_v30 = vsel %vm3285_vm0, %v3275_v35, 0.0 }
 0x2c9   : > { %v3099_v58 = vsel %vm3096_vm2, %v3098_v18, %v3094_v40  ;;  %vm3183_vm4 = vmor %vm3181_vm3, %vm3182_vm14  ;;  %v3188_v59 = vor.u32 1.1754944e-38, %v3187_v47  ;;  %v6912_v15 = vmul.f32 %v4655_v36, %v2644_v54  ;;  %v3330_v19 = vadd.f32 %v3329_v30, %v3328_v13 }
 0x2ca   : > { %v3100_v38 = vmul.f32 %v3099_v58, %v2700_v25  ;;  %v3184_v28 = vsel %vm3183_vm4, %v4653_v20, %v3180_v48  ;;  %vm3186_vm5 = vcmp.eq.f32.partialorder %v3185_v16, 8.507059e+37  ;;  %v3432_v5 = vsel %vm3285_vm0, %v3379_v1, 0.0 }
 0x2cb   : > { %v4657_v33 = vpop.eup %4656  ;;  %v3189_v2 = vsel %vm3186_vm5, %v3188_v59, %v3184_v28  ;;  %vm3250_vm6 = vcmp.gt.f32.partialorder %v6766_v42, 20.0  ;;  %v6917_v24 = vadd.f32 2.0, %v6912_v15  ;;  %v3433_v7 = vadd.f32 %v3432_v5, %v3431_v52 }
 0x2cc   : > { %v3276_v45 = vsel %vm3244_vm12, %v6752_v50, %v3100_v38  ;;  %v3190_v37 = vmul.f32 %v3189_v2, %v2706_v56  ;;  %v3192_v43 = vmul.f32 %v4657_v33, %v6893_v34  ;;  %v3335_v60 = vsel %vm3285_vm0, %v6452_v17, 0.0 }
 0x2cd   : > { %v3331_v49 = vsel %vm3285_vm0, %v3276_v45, 0.0  ;;  %v3380_v31 = vmul.f32 %v3276_v45, %v3276_v45  ;;  %v3482_v51 = vpack.c.bf16 %v3276_v45, %v3276_v45  ;;  %4658 = vrcp.f32 %v6917_v24 }
 0x2ce   : > { %v3332_v61 = vadd.f32 %v3331_v49, %v3330_v19  ;;  %v3282_v41 = vsel %vm3250_vm6, %v6766_v42, %v3190_v37  ;;  %v3193_v35 = vsub.f32 1.0, %v3192_v43  ;;  %v3200_v25 = vand.u32 2147483647, %v6893_v34 }
 0x2cf   : > { %v3434_v4 = vsel %vm3285_vm0, %v3380_v31, 0.0  ;;  %3515 = vst.msk [vmem:[%s6076_s20 + $0x5c] sm:$0xf] %vm3491_vm1, %v3482_v51  ;;  %v3488_v50 = vpack.c.bf16 %v3282_v41, %v3282_v41  ;;  %v3202_v20 = vand.u32 2147483648, %v6893_v34  ;;  %vm3197_vm7 = vweird.f32 %v4657_v33 }
 0x2d0   : > { %v3334_v39 = vadd.f32 %v6715_v11, %v3332_v61  ;;  %v3435_v21 = vadd.f32 %v3434_v4, %v3433_v7  ;;  %v3194_v56 = vmul.f32 %v4657_v33, %v3193_v35  ;;  %v3438_v17 = vsel %vm3285_vm0, %v6744_v53, 0.0 }
 0x2d1   : > { %v3337_v42 = vsel %vm3285_vm0, %v6685_v3, 0.0  ;;  %v3440_v8 = vsel %vm3285_vm0, %v6825_v10, 0.0  ;;  %v3384_v9 = vmul.f32 %v6786_v27, %v6786_v27  ;;  %3521 = vst.msk [vmem:[%s6076_s20 + $0x74] sm:$0xf] %vm3491_vm1, %v3488_v50  ;;  %vm3196_vm8 = vweird.f32 %v6893_v34 }
 0x2d2   : > { %v3336_v0 = vadd.f32 %v3335_v60, %v3334_v39  ;;  %v3437_v11 = vadd.f32 %v6718_v14, %v3435_v21  ;;  %v3195_v62 = vadd.f32 %v4657_v33, %v3194_v56  ;;  %v2707_v53 = vmul.f32 %v6876_v29, %v6779_v6  ;;  %vm3198_vm9 = vmor %vm3196_vm8, %vm3197_vm7 }
 0x2d3   : > { %v4659_v46 = vpop.eup %4658  ;;  %vm3201_vm10 = vcmp.eq.f32.partialorder %v3200_v25, 8.507059e+37  ;;  %v3203_v3 = vor.u32 1.1754944e-38, %v3202_v20  ;;  %vm3251_vm11 = vcmp.gt.f32.partialorder %v6779_v6, 20.0  ;;  %v3339_v14 = vsel %vm3285_vm0, %v6786_v27, 0.0 }
 0x2d4   : > { %v3439_v10 = vadd.f32 %v3438_v17, %v3437_v11  ;;  %v3338_v44 = vadd.f32 %v3337_v42, %v3336_v0  ;;  %v3199_v63 = vsel %vm3198_vm9, %v4657_v33, %v3195_v62  ;;  %v3207_v55 = vmul.f32 %v4659_v46, %v6917_v24 }
 0x2d5   : > { %v3442_v32 = vsel %vm3285_vm0, %v3384_v9, 0.0  ;;  %v3385_v34 = vmul.f32 %v6898_v57, %v6898_v57  ;;  %v3204_v36 = vsel %vm3201_vm10, %v3203_v3, %v3199_v63  ;;  %v3341_v13 = vsel %vm3285_vm0, %v6898_v57, 0.0 }
 0x2d6   : > { %v3340_v29 = vadd.f32 %v3339_v14, %v3338_v44  ;;  %v3441_v26 = vadd.f32 %v3440_v8, %v3439_v10  ;;  %v3205_v16 = vmul.f32 %v3204_v36, %v2707_v53  ;;  %v3208_v47 = vsub.f32 1.0, %v3207_v55 }
 0x2d7   : > { %vm3212_vm12 = vweird.f32 %v4659_v46  ;;  %v3215_v22 = vand.u32 2147483647, %v6917_v24  ;;  %v3217_v23 = vand.u32 2147483648, %v6917_v24  ;;  %v3444_v52 = vsel %vm3285_vm0, %v3385_v34, 0.0 }
 0x2d8   : > { %v3342_v27 = vadd.f32 %v3341_v13, %v3340_v29  ;;  %v3443_v1 = vadd.f32 %v3442_v32, %v3441_v26  ;;  %v3283_v18 = vsel %vm3251_vm11, %v6779_v6, %v3205_v16  ;;  %v3209_v54 = vmul.f32 %v4659_v46, %v3208_v47 }
 0x2d9   : > { %v3386_v40 = vmul.f32 %v3282_v41, %v3282_v41  ;;  %v3489_v48 = vpack.c.bf16 %v3283_v18, %v3283_v18  ;;  %vm3211_vm13 = vweird.f32 %v6917_v24  ;;  %v3343_v57 = vsel %vm3285_vm0, %v3282_v41, 0.0 }
 0x2da   : > { %v3445_v30 = vadd.f32 %v3444_v52, %v3443_v1  ;;  %v3210_v58 = vadd.f32 %v4659_v46, %v3209_v54  ;;  %v3387_v59 = vmul.f32 %v3283_v18, %v3283_v18  ;;  %vm3213_vm14 = vmor %vm3211_vm13, %vm3212_vm12  ;;  %v3218_v19 = vor.u32 1.1754944e-38, %v3217_v23 }
 0x2db   : > { %3522 = vst.msk [vmem:[%s6076_s20 + $0x78] sm:$0xf] %vm3491_vm1, %v3489_v48  ;;  %v3344_v38 = vadd.f32 %v3343_v57, %v3342_v27  ;;  %v2708_v6 = vmul.f32 %v6912_v15, %v6836_v12  ;;  %vm3216_vm15 = vcmp.eq.f32.partialorder %v3215_v22, 8.507059e+37  ;;  %v3446_v33 = vsel %vm3285_vm0, %v3386_v40, 0.0 }
 0x2dc   : > { %v3214_v28 = vsel %vm3213_vm14, %v4659_v46, %v3210_v58  ;;  %v3345_v5 = vsel %vm3285_vm0, %v3283_v18, 0.0  ;;  %v3447_v24 = vadd.f32 %v3446_v33, %v3445_v30  ;;  %v3448_v45 = vsel %vm3285_vm0, %v3387_v59, 0.0 }
 0x2dd   : > { %v3219_v2 = vsel %vm3216_vm15, %v3218_v19, %v3214_v28  ;;  %vm3252_vm2 = vcmp.gt.f32.partialorder %v6836_v12, 20.0  ;;  %v3346_v37 = vadd.f32 %v3345_v5, %v3344_v38  ;;  %vm3355_vm3 = vcmask 57344  }
 0x2de   : > { %v3220_v7 = vmul.f32 %v3219_v2, %v2708_v6  ;;  %v3449_v51 = vadd.f32 %v3448_v45, %v3447_v24 }
 0x2e0   : > { %v3284_v43 = vsel %vm3252_vm2, %v6836_v12, %v3220_v7 }
 0x2e1   : > { %v3347_v15 = vsel %vm3285_vm0, %v3284_v43, 0.0  ;;  %v3388_v49 = vmul.f32 %v3284_v43, %v3284_v43  ;;  %v3490_v31 = vpack.c.bf16 %v3284_v43, %v3284_v43 }
 0x2e2   : > { %v3348_v60 = vadd.f32 %v3347_v15, %v3346_v37 }
 0x2e3   : > { %v3450_v61 = vsel %vm3285_vm0, %v3388_v49, 0.0  ;;  %3523 = vst.msk [vmem:[%s6076_s20 + $0x7c] sm:$0xf] %vm3491_vm1, %v3490_v31 }
 0x2e4   : > { %v3349_v41 = vrot.slane %v3348_v60, 4  ;;  %v3451_v35 = vadd.f32 %v3450_v61, %v3449_v51 }
 0x2e6   : > { %v3350_v4 = vadd.f32 %v3349_v41, %v3348_v60  ;;  %v3452_v50 = vrot.slane %v3451_v35, 4 }
 0x2e8   : > { %v3351_v25 = vrot.slane %v3350_v4, 2  ;;  %v3453_v20 = vadd.f32 %v3452_v50, %v3451_v35 }
 0x2ea   : > { %v3352_v39 = vadd.f32 %v3351_v25, %v3350_v4  ;;  %v3454_v21 = vrot.slane %v3453_v20, 2 }
 0x2ec   : > { %v3353_v12 = vrot.slane %v3352_v39, 1  ;;  %v3455_v56 = vadd.f32 %v3454_v21, %v3453_v20 }
 0x2ee   : > { %v3354_v17 = vadd.f32 %v3353_v12, %v3352_v39  ;;  %v3456_v42 = vrot.slane %v3455_v56, 1 }
 0x2f0   : > { %3356 = vst.msk [vmem:[%s488_s25] sm:$0x1] %vm3355_vm3, %v3354_v17  ;;  %v3457_v8 = vadd.f32 %v3456_v42, %v3455_v56 }
 0x2f2   : > { %3458 = vst.msk [vmem:[%s488_s25 + $0x1] sm:$0x1] %vm3355_vm3, %v3457_v8 }
 0x2f3 PF: > { %s19_s27 = sadd.s32 1, %s4683_s27   ;;  %s7050_s26 = smov %s4679_s2 }
 0x2f4   : > { %p16_p5 = scmp.ge.s32.totalorder %s19_s27, 4   ;;  %s7051_s2 = smov %s7053_s28 }
 0x2f6   :  { %18 = sbr.rel (!%p16_p5) target bundleno = 2 (0x2), region = 99 }

// kernel: unet_up_block.6
= control target key start
LH: loop header
LB: loop body
LE: loop exit
PB: predicated region body
PF: predicated region fallthrough
CT: control target
= control target key end

     0   :  { %s4718_s26 = smov 0   ;;  %s4720_s2 = smov 0   ;;  %s6967_s0 = inlined_call_operand.vmem [shape: bf16[2,16,16,8], index: 0, kind: input, shape index: {}, may-alias: {0,1,2}]   ;;  %s6968_s1 = inlined_call_operand.vmem [shape: bf16[2,16,16,8], index: 1, kind: input, shape index: {}, may-alias: {0,1,2}]   ;;  %s6969_s2 = inlined_call_operand.vmem [shape: bf16[2,16,16,8], index: 2, kind: input, shape index: {}, may-alias: {0,1,2}]   ;;  %s6970_s3 = inlined_call_operand.vmem [shape: bf16[72,8], index: 3, kind: input, shape index: {}]   ;;  %s6971_s4 = inlined_call_operand.vmem [shape: f32[1,8], index: 4, kind: input, shape index: {}]   ;;  %s6972_s5 = inlined_call_operand.vmem [shape: f32[1,8], index: 5, kind: input, shape index: {}]   ;;  %s6973_s6 = inlined_call_operand.vmem [shape: f32[1,8], index: 6, kind: input, shape index: {}]   ;;  %s6974_s7 = inlined_call_operand.vmem [shape: bf16[2,16,16,8], index: 7, kind: output, shape index: {0}]   ;;  %s6975_s8 = inlined_call_operand.vmem [shape: f32[2,2,8], index: 8, kind: output, shape index: {1}]  }
   0x1   :  { %s4722_s27 = smov 0  }
   0x2 LB: > { %s31_s28 = sadd.s32 1, %s4658_s2  ;;  %p3688_p0 = scmp.ge.s32.totalorder %s4662_s27, 1  ;;  %s4662_s27 = sphi %s4722_s27, %s19_s27   ;;  %s4658_s2 = sphi %s4720_s2, %s7026_s2   ;;  %s4654_s26 = sphi %s4718_s26, %s7025_s26  }
   0x3   : > { %p33_p1 = scmp.ge.s32.totalorder %s31_s28, 2  ;;  %p353_p2 = scmp.lt.s32.totalorder %s4662_s27, 3 }
   0x5   : > { %s7028_s28 = smov (%p33_p1, %s31_s28), 0  ;;  %p354_p3 = pnand %p3688_p0, %p353_p2 }
   0x7   : > { %357 = sbr.rel (%p354_p3) target bundleno = 756 (0x2f4), region = 48 }
   0xc   : > { %vm550_vm0 = vcmask 64512   ;;  %p429_p4 = scmp.lt.s32.totalorder %s4654_s26, 1  ;;  %v4664_v0 = vmov 0.0   ;;  %v4757_v1 = vld [vmem:[%s6972_s5] ss:$0 sm:$0xff]  ;;  %s4665_s15 = smov 8  }
   0xd   : > { %551 = vst.msk [vmem:[#allocation2 + $0x1] sm:$0xff] %vm550_vm0, %v4664_v0  ;;  %v4765_v5 = vld [vmem:[%s6973_s6] ss:$0 sm:$0xff]  ;;  %vm493_vm1 = vcmask 57344   ;;  %s4666_s16 = smov 16   ;;  %s4667_s17 = smov 24  }
   0xe   : > { %552 = vst.msk [vmem:[#allocation2 + $0x9] sm:$0xff] %vm550_vm0, %v4664_v0  ;;  %s7030_s26 = smov (!%p429_p4, %s4654_s26), 1  ;;  %s4668_s18 = smov 32   ;;  %vm2078_vm2 = vcmask 130048   ;;  %vm2111_vm3 = vcmask 195584   ;;  %vm2144_vm4 = vcmask 261120  }
   0xf   : > { %570 = vst.msk [vmem:[#allocation2 + $0x199] sm:$0xff] %vm550_vm0, %v4664_v0  ;;  %s3732_s29 = sshll.u32 %s7030_s26, 7  ;;  %s4669_s19 = smov 40   ;;  %vm2414_vm5 = vcmask 1043456   ;;  %vm2177_vm6 = vcmask 326656   ;;  %vm2210_vm7 = vcmask 392192  }
  0x10   : > { %571 = vst.msk [vmem:[#allocation2 + $0x1a1] sm:$0xff] %vm550_vm0, %v4664_v0  ;;  %s4752_s10 = scalar_lea.vmem %s6967_s0, %s3732_s29  ;;  %s4670_s20 = smov 48   ;;  %vm2243_vm8 = vcmask 457728   ;;  %vm2276_vm9 = vcmask 523264   ;;  %vm2365_vm10 = vcmask 588800  }
  0x11   : > { %v3807_v2 = vld [vmem:[%s4752_s10 + $0x18] sm:$0xff]   ;;  %v3805_v3 = vld [vmem:[%s4752_s10 + $0x8] sm:$0xff]   ;;  %v3742_v4 = vld [vmem:[%s4752_s10] sm:$0xff]   ;;  %512 = vst.msk [vmem:[#allocation2 + $0x11] sm:$0x1] %vm493_vm1, %v4664_v0  ;;  %s4671_s21 = smov 56  }
  0x12   : > { %v3755_v6 = vunpack.c.l.bf16 %v3807_v2  ;;  %v3756_v7 = vunpack.c.h.bf16 %v3807_v2  ;;  %v3747_v8 = vunpack.c.l.bf16 %v3805_v3  ;;  %v3748_v9 = vunpack.c.h.bf16 %v3805_v3  ;;  %v3808_v10 = vld [vmem:[%s4752_s10 + $0x20] sm:$0xff]   ;;  %v3806_v24 = vld [vmem:[%s4752_s10 + $0x10] sm:$0xff]   ;;  %v3809_v25 = vld [vmem:[%s4752_s10 + $0x28] sm:$0xff]   ;;  %494 = vst.msk [vmem:[#allocation2] sm:$0x1] %vm493_vm1, %v4664_v0  ;;  %s4672_s22 = smov 64  }
  0x13   : > { %v3743_v12 = vunpack.c.l.bf16 %v3742_v4  ;;  %v3744_v13 = vunpack.c.h.bf16 %v3742_v4  ;;  %v3759_v14 = vunpack.c.l.bf16 %v3808_v10  ;;  %v3760_v15 = vunpack.c.h.bf16 %v3808_v10  ;;  %v3811_v30 = vld [vmem:[%s4752_s10 + $0x38] sm:$0xff]   ;;  %v3810_v31 = vld [vmem:[%s4752_s10 + $0x30] sm:$0xff]   ;;  %v3812_v50 = vld [vmem:[%s4752_s10 + $0x40] sm:$0xff]   ;;  %495 = vst.msk [vmem:[#allocation2 + $0x18] sm:$0x1] %vm493_vm1, %v4664_v0 }
  0x14   : > { %v765_v11 = vld [vmem:[#allocation2 + $0x1] sm:$0xff]  ;;  %v642_v17 = vmul.f32 %v4757_v1, %v3755_v6  ;;  %v643_v18 = vmul.f32 %v4757_v1, %v3756_v7  ;;  %v638_v19 = vmul.f32 %v4757_v1, %v3747_v8  ;;  %v639_v20 = vmul.f32 %v4757_v1, %v3748_v9  ;;  %v3814_v51 = vld [vmem:[%s4752_s10 + $0x50] sm:$0xff]   ;;  %v3815_v4 = vld [vmem:[%s4752_s10 + $0x58] sm:$0xff]   ;;  %496 = vst.msk [vmem:[#allocation2 + $0x30] sm:$0x1] %vm493_vm1, %v4664_v0 }
  0x15   : > { %v766_v16 = vld [vmem:[#allocation2 + $0x9] sm:$0xff]  ;;  %v636_v22 = vmul.f32 %v4757_v1, %v3743_v12  ;;  %v637_v23 = vmul.f32 %v4757_v1, %v3744_v13  ;;  %v644_v29 = vmul.f32 %v4757_v1, %v3759_v14  ;;  %v645_v34 = vmul.f32 %v4757_v1, %v3760_v15  ;;  %497 = vst.msk [vmem:[#allocation2 + $0x48] sm:$0x1] %vm493_vm1, %v4664_v0 }
  0x16   : > { %v3868_v21 = vpack.i.bf16 %v766_v16, %v765_v11  ;;  %v674_v26 = vadd.f32 %v4765_v5, %v642_v17  ;;  %v675_v27 = vadd.f32 %v4765_v5, %v643_v18  ;;  %v670_v28 = vadd.f32 %v4765_v5, %v638_v19  ;;  %v3813_v57 = vld [vmem:[%s4752_s10 + $0x48] sm:$0xff]   ;;  %498 = vst.msk [vmem:[#allocation2 + $0x60] sm:$0x1] %vm493_vm1, %v4664_v0 }
  0x17   : > { %v671_v32 = vadd.f32 %v4765_v5, %v639_v20  ;;  %v668_v33 = vadd.f32 %v4765_v5, %v636_v22  ;;  %v3751_v35 = vunpack.c.l.bf16 %v3806_v24  ;;  %v3752_v36 = vunpack.c.h.bf16 %v3806_v24  ;;  %v3817_v15 = vld [vmem:[%s4752_s10 + $0x68] sm:$0xff]   ;;  %499 = vst.msk [vmem:[#allocation2 + $0x78] sm:$0x1] %vm493_vm1, %v4664_v0 }
  0x18   : > { %3869 = vrot.lane.b32.xlu0 %v3868_v21, %s4665_s15  ;;  %707 = vst.msk [vmem:[#allocation2 + $0x61] sm:$0xff] %vm550_vm0, %v674_v26  ;;  %v3763_v37 = vunpack.c.l.bf16 %v3809_v25  ;;  %v3764_v38 = vunpack.c.h.bf16 %v3809_v25  ;;  %v669_v39 = vadd.f32 %v4765_v5, %v637_v23  ;;  %v3771_v40 = vunpack.c.l.bf16 %v3811_v30  ;;  %v3816_v25 = vld [vmem:[%s4752_s10 + $0x60] sm:$0xff]  }
  0x19   : > { %708 = vst.msk [vmem:[#allocation2 + $0x69] sm:$0xff] %vm550_vm0, %v675_v27  ;;  %v3772_v41 = vunpack.c.h.bf16 %v3811_v30  ;;  %v3767_v42 = vunpack.c.l.bf16 %v3810_v31  ;;  %v676_v43 = vadd.f32 %v4765_v5, %v644_v29  ;;  %v640_v44 = vmul.f32 %v4757_v1, %v3751_v35  ;;  %v3818_v35 = vld [vmem:[%s4752_s10 + $0x70] sm:$0xff]  }
  0x1a   : > { %703 = vst.msk [vmem:[#allocation2 + $0x31] sm:$0xff] %vm550_vm0, %v670_v28  ;;  %v641_v45 = vmul.f32 %v4757_v1, %v3752_v36  ;;  %v646_v46 = vmul.f32 %v4757_v1, %v3763_v37  ;;  %v677_v47 = vadd.f32 %v4765_v5, %v645_v34  ;;  %v647_v48 = vmul.f32 %v4757_v1, %v3764_v38 }
  0x1b   : > { %704 = vst.msk [vmem:[#allocation2 + $0x39] sm:$0xff] %vm550_vm0, %v671_v32  ;;  %v3768_v49 = vunpack.c.h.bf16 %v3810_v31  ;;  %v672_v52 = vadd.f32 %v4765_v5, %v640_v44  ;;  %v650_v53 = vmul.f32 %v4757_v1, %v3771_v40  ;;  %v651_v55 = vmul.f32 %v4757_v1, %v3772_v41 }
  0x1c   : > { %701 = vst.msk [vmem:[#allocation2 + $0x19] sm:$0xff] %vm550_vm0, %v668_v33  ;;  %v673_v54 = vadd.f32 %v4765_v5, %v641_v45  ;;  %v648_v56 = vmul.f32 %v4757_v1, %v3767_v42  ;;  %v678_v58 = vadd.f32 %v4765_v5, %v646_v46  ;;  %v3775_v59 = vunpack.c.l.bf16 %v3812_v50 }
  0x1d   : > { %702 = vst.msk [vmem:[#allocation2 + $0x21] sm:$0xff] %vm550_vm0, %v669_v39  ;;  %v3776_v60 = vunpack.c.h.bf16 %v3812_v50  ;;  %v3783_v61 = vunpack.c.l.bf16 %v3814_v51  ;;  %v679_v63 = vadd.f32 %v4765_v5, %v647_v48  ;;  %v649_v2 = vmul.f32 %v4757_v1, %v3768_v49 }
  0x1e   : > { %709 = vst.msk [vmem:[#allocation2 + $0x79] sm:$0xff] %vm550_vm0, %v676_v43  ;;  %v3784_v3 = vunpack.c.h.bf16 %v3814_v51  ;;  %v682_v7 = vadd.f32 %v4765_v5, %v650_v53  ;;  %v652_v8 = vmul.f32 %v4757_v1, %v3775_v59  ;;  %v3779_v9 = vunpack.c.l.bf16 %v3813_v57 }
  0x1f   : > { %v773_v62 = vld [vmem:[#allocation2 + $0x61] sm:$0xff]  ;;  %710 = vst.msk [vmem:[#allocation2 + $0x81] sm:$0xff] %vm550_vm0, %v677_v47  ;;  %v683_v12 = vadd.f32 %v4765_v5, %v651_v55  ;;  %v653_v13 = vmul.f32 %v4757_v1, %v3776_v60  ;;  %v3780_v14 = vunpack.c.h.bf16 %v3813_v57  ;;  %v680_v17 = vadd.f32 %v4765_v5, %v648_v56 }
  0x20   : > { %v774_v6 = vld [vmem:[#allocation2 + $0x69] sm:$0xff]  ;;  %705 = vst.msk [vmem:[#allocation2 + $0x49] sm:$0xff] %vm550_vm0, %v672_v52  ;;  %v656_v18 = vmul.f32 %v4757_v1, %v3783_v61  ;;  %v3787_v19 = vunpack.c.l.bf16 %v3815_v4  ;;  %v681_v22 = vadd.f32 %v4765_v5, %v649_v2  ;;  %v657_v23 = vmul.f32 %v4757_v1, %v3784_v3 }
  0x21   : > { %v4816_v10 = vpack.i.bf16 %v774_v6, %v773_v62  ;;  %v769_v11 = vld [vmem:[#allocation2 + $0x31] sm:$0xff]  ;;  %706 = vst.msk [vmem:[#allocation2 + $0x51] sm:$0xff] %vm550_vm0, %v673_v54  ;;  %v3788_v24 = vunpack.c.h.bf16 %v3815_v4  ;;  %v684_v27 = vadd.f32 %v4765_v5, %v652_v8  ;;  %v654_v28 = vmul.f32 %v4757_v1, %v3779_v9 }
  0x22   : > { %v770_v16 = vld [vmem:[#allocation2 + $0x39] sm:$0xff]  ;;  %711 = vst.msk [vmem:[#allocation2 + $0x91] sm:$0xff] %vm550_vm0, %v678_v58  ;;  %v3795_v29 = vunpack.c.l.bf16 %v3817_v15  ;;  %v685_v32 = vadd.f32 %v4765_v5, %v653_v13  ;;  %v655_v33 = vmul.f32 %v4757_v1, %v3780_v14  ;;  %v3796_v34 = vunpack.c.h.bf16 %v3817_v15 }
  0x23   : > { %3889 = vrot.lane.b32.xlu2 %v4816_v10, %s4665_s15  ;;  %v4827_v20 = vpack.i.bf16 %v770_v16, %v769_v11  ;;  %v767_v21 = vld [vmem:[#allocation2 + $0x19] sm:$0xff]  ;;  %712 = vst.msk [vmem:[#allocation2 + $0x99] sm:$0xff] %vm550_vm0, %v679_v63  ;;  %v688_v37 = vadd.f32 %v4765_v5, %v656_v18  ;;  %v658_v38 = vmul.f32 %v4757_v1, %v3787_v19  ;;  %v3791_v39 = vunpack.c.l.bf16 %v3816_v25 }
  0x24   : > { %v768_v26 = vld [vmem:[#allocation2 + $0x21] sm:$0xff]  ;;  %715 = vst.msk [vmem:[#allocation2 + $0xc1] sm:$0xff] %vm550_vm0, %v682_v7  ;;  %v689_v42 = vadd.f32 %v4765_v5, %v657_v23  ;;  %v659_v43 = vmul.f32 %v4757_v1, %v3788_v24  ;;  %v3792_v44 = vunpack.c.h.bf16 %v3816_v25  ;;  %v686_v46 = vadd.f32 %v4765_v5, %v654_v28 }
  0x25   : > { %3879 = vrot.lane.b32.xlu1 %v4827_v20, %s4665_s15  ;;  %v4838_v30 = vpack.i.bf16 %v768_v26, %v767_v21  ;;  %v775_v31 = vld [vmem:[#allocation2 + $0x79] sm:$0xff]  ;;  %716 = vst.msk [vmem:[#allocation2 + $0xc9] sm:$0xff] %vm550_vm0, %v683_v12  ;;  %v662_v47 = vmul.f32 %v4757_v1, %v3795_v29  ;;  %v3799_v48 = vunpack.c.l.bf16 %v3818_v35  ;;  %v687_v51 = vadd.f32 %v4765_v5, %v655_v33 }
  0x26   : > { %v776_v36 = vld [vmem:[#allocation2 + $0x81] sm:$0xff]  ;;  %713 = vst.msk [vmem:[#allocation2 + $0xa9] sm:$0xff] %vm550_vm0, %v680_v17  ;;  %v663_v52 = vmul.f32 %v4757_v1, %v3796_v34  ;;  %v3800_v53 = vunpack.c.h.bf16 %v3818_v35  ;;  %v690_v55 = vadd.f32 %v4765_v5, %v658_v38  ;;  %v660_v56 = vmul.f32 %v4757_v1, %v3791_v39  ;;  %v798_v38 = vld [vmem:[#allocation2 + $0xa] sm:$0xff] }
  0x27   : > { %3874 = vrot.lane.b32.xlu0 %v4838_v30, %s4665_s15  ;;  %v4849_v40 = vpack.i.bf16 %v776_v36, %v775_v31  ;;  %v771_v41 = vld [vmem:[#allocation2 + $0x49] sm:$0xff]  ;;  %714 = vst.msk [vmem:[#allocation2 + $0xb1] sm:$0xff] %vm550_vm0, %v681_v22  ;;  %v691_v58 = vadd.f32 %v4765_v5, %v659_v43  ;;  %v661_v59 = vmul.f32 %v4757_v1, %v3792_v44 }
  0x28   : > { %v772_v45 = vld [vmem:[#allocation2 + $0x51] sm:$0xff]  ;;  %717 = vst.msk [vmem:[#allocation2 + $0xd9] sm:$0xff] %vm550_vm0, %v684_v27  ;;  %v694_v62 = vadd.f32 %v4765_v5, %v662_v47  ;;  %v664_v63 = vmul.f32 %v4757_v1, %v3799_v48  ;;  %v695_v2 = vadd.f32 %v4765_v5, %v663_v52  ;;  %v665_v3 = vmul.f32 %v4757_v1, %v3800_v53  ;;  %v807_v53 = vld [vmem:[#allocation2 + $0x7a] sm:$0xff] }
  0x29   : > { %v4857_v49 = vpack.i.bf16 %v772_v45, %v771_v41  ;;  %v777_v50 = vld [vmem:[#allocation2 + $0x91] sm:$0xff]  ;;  %718 = vst.msk [vmem:[#allocation2 + $0xe1] sm:$0xff] %vm550_vm0, %v685_v32  ;;  %v692_v7 = vadd.f32 %v4765_v5, %v660_v56  ;;  %v693_v9 = vadd.f32 %v4765_v5, %v661_v59  ;;  %v799_v41 = vld [vmem:[#allocation2 + $0x1a] sm:$0xff] }
  0x2a   : > { %v778_v54 = vld [vmem:[#allocation2 + $0x99] sm:$0xff]  ;;  %721 = vst.msk [vmem:[#allocation2 + $0x109] sm:$0xff] %vm550_vm0, %v688_v37  ;;  %v696_v13 = vadd.f32 %v4765_v5, %v664_v63  ;;  %v697_v15 = vadd.f32 %v4765_v5, %v665_v3  ;;  %v797_v37 = vld [vmem:[#allocation2 + $0x2] sm:$0xff]  ;;  %v803_v44 = vld [vmem:[#allocation2 + $0x4a] sm:$0xff] }
  0x2b   : > { %3894 = vrot.lane.b32.xlu2 %v4849_v40, %s4665_s15  ;;  %v4867_v57 = vpack.i.bf16 %v778_v54, %v777_v50  ;;  %722 = vst.msk [vmem:[#allocation2 + $0x111] sm:$0xff] %vm550_vm0, %v689_v42  ;;  %v781_v60 = vld [vmem:[#allocation2 + $0xc1] sm:$0xff]  ;;  %v3948_v39 = vpack.i.bf16 %v798_v38, %v797_v37  ;;  %v801_v42 = vld [vmem:[#allocation2 + $0x32] sm:$0xff] }
  0x2c   : > { %v782_v61 = vld [vmem:[#allocation2 + $0xc9] sm:$0xff]  ;;  %719 = vst.msk [vmem:[#allocation2 + $0xf1] sm:$0xff] %vm550_vm0, %v686_v46  ;;  %v3819_v38 = vld [vmem:[%s4752_s10 + $0x78] sm:$0xff]  }
  0x2d   : > { %3884 = vrot.lane.b32.xlu1 %v4857_v49, %s4665_s15  ;;  %720 = vst.msk [vmem:[#allocation2 + $0xf9] sm:$0xff] %vm550_vm0, %v687_v51  ;;  %v779_v4 = vld [vmem:[#allocation2 + $0xa9] sm:$0xff]  ;;  %v4884_v8 = vpack.i.bf16 %v782_v61, %v781_v60 }
  0x2e   : > { %v780_v6 = vld [vmem:[#allocation2 + $0xb1] sm:$0xff]  ;;  %723 = vst.msk [vmem:[#allocation2 + $0x121] sm:$0xff] %vm550_vm0, %v690_v55  ;;  %v805_v51 = vld [vmem:[#allocation2 + $0x62] sm:$0xff] }
  0x2f   : > { %3899 = vrot.lane.b32.xlu0 %v4867_v57, %s4665_s15  ;;  %724 = vst.msk [vmem:[#allocation2 + $0x129] sm:$0xff] %vm550_vm0, %v691_v58  ;;  %v783_v11 = vld [vmem:[#allocation2 + $0xd9] sm:$0xff]  ;;  %v4890_v14 = vpack.i.bf16 %v780_v6, %v779_v4  ;;  %v811_v61 = vld [vmem:[#allocation2 + $0xaa] sm:$0xff]  ;;  %v813_v63 = vld [vmem:[#allocation2 + $0xc2] sm:$0xff] }
  0x30   : > { %v784_v12 = vld [vmem:[#allocation2 + $0xe1] sm:$0xff]  ;;  %727 = vst.msk [vmem:[#allocation2 + $0x151] sm:$0xff] %vm550_vm0, %v694_v62  ;;  %v809_v55 = vld [vmem:[#allocation2 + $0x92] sm:$0xff] }
  0x31   : > { %728 = vst.msk [vmem:[#allocation2 + $0x159] sm:$0xff] %vm550_vm0, %v695_v2  ;;  %v4897_v16 = vpack.i.bf16 %v784_v12, %v783_v11  ;;  %v787_v17 = vld [vmem:[#allocation2 + $0x109] sm:$0xff]  ;;  %v815_v3 = vld [vmem:[#allocation2 + $0xda] sm:$0xff] }
  0x32   : > { %725 = vst.msk [vmem:[#allocation2 + $0x139] sm:$0xff] %vm550_vm0, %v692_v7  ;;  %v788_v18 = vld [vmem:[#allocation2 + $0x111] sm:$0xff] }
  0x33   : > { %3909 = vrot.lane.b32.xlu2 %v4884_v8, %s4665_s15  ;;  %726 = vst.msk [vmem:[#allocation2 + $0x141] sm:$0xff] %vm550_vm0, %v693_v9  ;;  %v785_v19 = vld [vmem:[#allocation2 + $0xf1] sm:$0xff]  ;;  %v4908_v22 = vpack.i.bf16 %v788_v18, %v787_v17 }
  0x34   : > { %729 = vst.msk [vmem:[#allocation2 + $0x169] sm:$0xff] %vm550_vm0, %v696_v13  ;;  %v786_v21 = vld [vmem:[#allocation2 + $0xf9] sm:$0xff]  ;;  %v819_v12 = vld [vmem:[#allocation2 + $0x10a] sm:$0xff] }
  0x35   : > { %3904 = vrot.lane.b32.xlu1 %v4890_v14, %s4665_s15  ;;  %730 = vst.msk [vmem:[#allocation2 + $0x171] sm:$0xff] %vm550_vm0, %v697_v15  ;;  %v789_v23 = vld [vmem:[#allocation2 + $0x121] sm:$0xff]  ;;  %v4914_v25 = vpack.i.bf16 %v786_v21, %v785_v19  ;;  %v817_v9 = vld [vmem:[#allocation2 + $0xf2] sm:$0xff] }
  0x36   : > { %v790_v24 = vld [vmem:[#allocation2 + $0x129] sm:$0xff]  ;;  %500 = vst.msk [vmem:[#allocation2 + $0x90] sm:$0x1] %vm493_vm1, %v4664_v0 }
  0x37   : > { %3914 = vrot.lane.b32.xlu0 %v4897_v16, %s4665_s15  ;;  %v4922_v26 = vpack.i.bf16 %v790_v24, %v789_v23  ;;  %v793_v27 = vld [vmem:[#allocation2 + $0x151] sm:$0xff]  ;;  %501 = vst.msk [vmem:[#allocation2 + $0xa8] sm:$0x1] %vm493_vm1, %v4664_v0  ;;  %v821_v15 = vld [vmem:[#allocation2 + $0x122] sm:$0xff] }
  0x38   : > { %v794_v28 = vld [vmem:[#allocation2 + $0x159] sm:$0xff]  ;;  %502 = vst.msk [vmem:[#allocation2 + $0xc0] sm:$0x1] %vm493_vm1, %v4664_v0 }
  0x39   : > { %v791_v29 = vld [vmem:[#allocation2 + $0x139] sm:$0xff]  ;;  %v4936_v32 = vpack.i.bf16 %v794_v28, %v793_v27  ;;  %503 = vst.msk [vmem:[#allocation2 + $0xd8] sm:$0x1] %vm493_vm1, %v4664_v0 }
  0x3a   : > { %v792_v31 = vld [vmem:[#allocation2 + $0x141] sm:$0xff]  ;;  %504 = vst.msk [vmem:[#allocation2 + $0xf0] sm:$0x1] %vm493_vm1, %v4664_v0  ;;  %v825_v27 = vld [vmem:[#allocation2 + $0x152] sm:$0xff] }
  0x3b   : > { %3924 = vrot.lane.b32.xlu2 %v4908_v22, %s4665_s15  ;;  %v795_v33 = vld [vmem:[#allocation2 + $0x169] sm:$0xff]  ;;  %v4942_v35 = vpack.i.bf16 %v792_v31, %v791_v29  ;;  %505 = vst.msk [vmem:[#allocation2 + $0x108] sm:$0x1] %vm493_vm1, %v4664_v0  ;;  %v823_v23 = vld [vmem:[#allocation2 + $0x13a] sm:$0xff] }
  0x3c   : > { %v796_v34 = vld [vmem:[#allocation2 + $0x171] sm:$0xff]  ;;  %506 = vst.msk [vmem:[#allocation2 + $0x120] sm:$0x1] %vm493_vm1, %v4664_v0 }
  0x3d   : > { %3919 = vrot.lane.b32.xlu1 %v4914_v25, %s4665_s15  ;;  %v4950_v36 = vpack.i.bf16 %v796_v34, %v795_v33  ;;  %507 = vst.msk [vmem:[#allocation2 + $0x138] sm:$0x1] %vm493_vm1, %v4664_v0  ;;  %v827_v29 = vld [vmem:[#allocation2 + $0x16a] sm:$0xff] }
  0x3e   : > { %508 = vst.msk [vmem:[#allocation2 + $0x150] sm:$0x1] %vm493_vm1, %v4664_v0 }
  0x3f   : > { %3929 = vrot.lane.b32.xlu0 %v4922_v26, %s4665_s15  ;;  %509 = vst.msk [vmem:[#allocation2 + $0x168] sm:$0x1] %vm493_vm1, %v4664_v0 }
  0x40   : > { %510 = vst.msk [vmem:[#allocation2 + $0x180] sm:$0x1] %vm493_vm1, %v4664_v0 }
  0x41   : > { %511 = vst.msk [vmem:[#allocation2 + $0x198] sm:$0x1] %vm493_vm1, %v4664_v0 }
  0x42   : > { %513 = vst.msk [vmem:[#allocation2 + $0x29] sm:$0x1] %vm493_vm1, %v4664_v0 }
  0x43   : > { %3939 = vrot.lane.b32.xlu2 %v4936_v32, %s4665_s15  ;;  %514 = vst.msk [vmem:[#allocation2 + $0x41] sm:$0x1] %vm493_vm1, %v4664_v0 }
  0x44   : > { %515 = vst.msk [vmem:[#allocation2 + $0x59] sm:$0x1] %vm493_vm1, %v4664_v0 }
  0x45   : > { %3934 = vrot.lane.b32.xlu1 %v4942_v35, %s4665_s15  ;;  %516 = vst.msk [vmem:[#allocation2 + $0x71] sm:$0x1] %vm493_vm1, %v4664_v0 }
  0x46   : > { %517 = vst.msk [vmem:[#allocation2 + $0x89] sm:$0x1] %vm493_vm1, %v4664_v0 }
  0x47   : > { %3944 = vrot.lane.b32.xlu0 %v4950_v36, %s4665_s15  ;;  %518 = vst.msk [vmem:[#allocation2 + $0xa1] sm:$0x1] %vm493_vm1, %v4664_v0 }
  0x48   : > { %519 = vst.msk [vmem:[#allocation2 + $0xb9] sm:$0x1] %vm493_vm1, %v4664_v0 }
  0x49   : > { %520 = vst.msk [vmem:[#allocation2 + $0xd1] sm:$0x1] %vm493_vm1, %v4664_v0  ;;  %v800_v43 = vld [vmem:[#allocation2 + $0x22] sm:$0xff] }
  0x4a   : > { %521 = vst.msk [vmem:[#allocation2 + $0xe9] sm:$0x1] %vm493_vm1, %v4664_v0  ;;  %v4987_v45 = vpack.i.bf16 %v800_v43, %v799_v41  ;;  %v802_v46 = vld [vmem:[#allocation2 + $0x3a] sm:$0xff]  ;;  %v3804_v43 = vunpack.c.h.bf16 %v3819_v38 }
  0x4b   : > { %522 = vst.msk [vmem:[#allocation2 + $0x101] sm:$0x1] %vm493_vm1, %v4664_v0  ;;  %v4991_v47 = vpack.i.bf16 %v802_v46, %v801_v42  ;;  %v804_v48 = vld [vmem:[#allocation2 + $0x52] sm:$0xff]  ;;  %v5050_v41 = vld [vmem:[#allocation2 + $0x20] sm:$0xff]  ;;  %v3803_v42 = vunpack.c.l.bf16 %v3819_v38 }
  0x4c   : > { %523 = vst.msk [vmem:[#allocation2 + $0x119] sm:$0x1] %vm493_vm1, %v4664_v0  ;;  %3954 = vrot.lane.b32.xlu2 %v4987_v45, %s4666_s16  ;;  %v4997_v50 = vpack.i.bf16 %v804_v48, %v803_v44  ;;  %v806_v52 = vld [vmem:[#allocation2 + $0x6a] sm:$0xff]  ;;  %v5055_v46 = vld [vmem:[#allocation2 + $0x38] sm:$0xff] }
  0x4d   : > { %3949 = vrot.lane.b32.xlu1 %v3948_v39, %s4666_s16  ;;  %524 = vst.msk [vmem:[#allocation2 + $0x131] sm:$0x1] %vm493_vm1, %v4664_v0  ;;  %v808_v54 = vld [vmem:[#allocation2 + $0x82] sm:$0xff]  ;;  %v5011_v58 = vpack.i.bf16 %v806_v52, %v805_v51  ;;  %v5048_v39 = vld [vmem:[#allocation2 + $0x18] sm:$0xff]  ;;  %v5053_v44 = vld [vmem:[#allocation2 + $0x30] sm:$0xff]  ;;  %v666_v52 = vmul.f32 %v4757_v1, %v3803_v42 }
  0x4e   : > { %525 = vst.msk [vmem:[#allocation2 + $0x149] sm:$0x1] %vm493_vm1, %v4664_v0  ;;  %v810_v56 = vld [vmem:[#allocation2 + $0x9a] sm:$0xff]  ;;  %v5015_v59 = vpack.i.bf16 %v808_v54, %v807_v53  ;;  %v5057_v48 = vld [vmem:[#allocation2 + $0x48] sm:$0xff]  ;;  %v5059_v51 = vld [vmem:[#allocation2 + $0x50] sm:$0xff]  ;;  %v667_v53 = vmul.f32 %v4757_v1, %v3804_v43  ;;  %v4028_v54 = vpack.i.bf16 %v5050_v41, %v5048_v39 }
  0x4f   : > { %3959 = vrot.lane.b32.xlu0 %v4991_v47, %s4666_s16  ;;  %526 = vst.msk [vmem:[#allocation2 + $0x161] sm:$0x1] %vm493_vm1, %v4664_v0  ;;  %v5019_v60 = vpack.i.bf16 %v810_v56, %v809_v55  ;;  %v812_v62 = vld [vmem:[#allocation2 + $0xb2] sm:$0xff]  ;;  %v5067_v55 = vpack.i.bf16 %v5055_v46, %v5053_v44  ;;  %v698_v56 = vadd.f32 %v4765_v5, %v666_v52  ;;  %v835_v1 = vld [vmem:[#allocation2 + $0x60] sm:$0xff] }
  0x50   : > { %527 = vst.msk [vmem:[#allocation2 + $0x179] sm:$0x1] %vm493_vm1, %v4664_v0  ;;  %v814_v2 = vld [vmem:[#allocation2 + $0xca] sm:$0xff]  ;;  %v5027_v6 = vpack.i.bf16 %v812_v62, %v811_v61  ;;  %v699_v61 = vadd.f32 %v4765_v5, %v667_v53  ;;  %v5073_v62 = vpack.i.bf16 %v5059_v51, %v5057_v48  ;;  %v837_v5 = vld [vmem:[#allocation2 + $0x78] sm:$0xff] }
  0x51   : > { %528 = vst.msk [vmem:[#allocation2 + $0x191] sm:$0x1] %vm493_vm1, %v4664_v0  ;;  %v816_v4 = vld [vmem:[#allocation2 + $0xe2] sm:$0xff] }
  0x52   : > { %529 = vst.msk [vmem:[#allocation2 + $0x1a9] sm:$0x1] %vm493_vm1, %v4664_v0  ;;  %v5029_v0 = vpack.i.bf16 %v814_v2, %v813_v63  ;;  %v5031_v7 = vpack.i.bf16 %v816_v4, %v815_v3  ;;  %v818_v11 = vld [vmem:[#allocation2 + $0xfa] sm:$0xff]  ;;  %v836_v63 = vld [vmem:[#allocation2 + $0x68] sm:$0xff] }
  0x53   : > { %6989 = vst [vmem:[#allocation3_spill] sm:$0xff] %v5019_v60  ;;  %v820_v13 = vld [vmem:[#allocation2 + $0x112] sm:$0xff]  ;;  %v5039_v18 = vpack.i.bf16 %v818_v11, %v817_v9  ;;  %v838_v2 = vld [vmem:[#allocation2 + $0x80] sm:$0xff] }
  0x54   : > { %3969 = vrot.lane.b32.xlu2 %v5011_v58, %s4666_s16  ;;  %6990 = vst [vmem:[#allocation4_spill] sm:$0xff] %v5027_v6  ;;  %v822_v17 = vld [vmem:[#allocation2 + $0x12a] sm:$0xff]  ;;  %v4003_v19 = vpack.i.bf16 %v820_v13, %v819_v12  ;;  %v5084_v12 = vld [vmem:[#allocation2 + $0x98] sm:$0xff]  ;;  %v5086_v13 = vpack.i.bf16 %v836_v63, %v835_v1 }
  0x55   : > { %3964 = vrot.lane.b32.xlu1 %v4997_v50, %s4666_s16  ;;  %6991 = vst [vmem:[#allocation5_spill] sm:$0xff] %v5029_v0  ;;  %v4008_v21 = vpack.i.bf16 %v822_v17, %v821_v15  ;;  %v824_v24 = vld [vmem:[#allocation2 + $0x142] sm:$0xff]  ;;  %v5082_v11 = vld [vmem:[#allocation2 + $0x90] sm:$0xff]  ;;  %v4048_v15 = vpack.i.bf16 %v838_v2, %v837_v5 }
  0x56   : > { %6992 = vst [vmem:[#allocation6_spill] sm:$0xff] %v5031_v7  ;;  %v826_v28 = vld [vmem:[#allocation2 + $0x15a] sm:$0xff]  ;;  %v4013_v33 = vpack.i.bf16 %v824_v24, %v823_v23  ;;  %v5101_v23 = vld [vmem:[#allocation2 + $0xa8] sm:$0xff]  ;;  %v5103_v24 = vld [vmem:[#allocation2 + $0xb0] sm:$0xff] }
  0x57   : > { %3974 = vrot.lane.b32.xlu0 %v5015_v59, %s4666_s16  ;;  %6993 = vst [vmem:[#allocation7_spill] sm:$0xff] %v5039_v18  ;;  %v828_v31 = vld [vmem:[#allocation2 + $0x172] sm:$0xff]  ;;  %v4018_v34 = vpack.i.bf16 %v826_v28, %v825_v27  ;;  %v843_v27 = vld [vmem:[#allocation2 + $0xc0] sm:$0xff]  ;;  %v844_v28 = vld [vmem:[#allocation2 + $0xc8] sm:$0xff]  ;;  %v5113_v38 = vpack.i.bf16 %v5103_v24, %v5101_v23 }
  0x58   : > { %v4023_v37 = vpack.i.bf16 %v828_v31, %v827_v29  ;;  %6994 = vst [vmem:[#allocation8_spill] sm:$0xff] %v5067_v55  ;;  %v4063_v42 = vpack.i.bf16 %v844_v28, %v843_v27 }
  0x59   : > { %6995 = vst [vmem:[#allocation9_spill] sm:$0xff] %v5073_v62 }
  0x5a   : > { %731 = vst.msk [vmem:[#allocation2 + $0x181] sm:$0xff] %vm550_vm0, %v698_v56  ;;  %v5128_v56 = vld [vmem:[#allocation2 + $0xf8] sm:$0xff] }
  0x5b   : > { %732 = vst.msk [vmem:[#allocation2 + $0x189] sm:$0xff] %vm550_vm0, %v699_v61  ;;  %v849_v61 = vld [vmem:[#allocation2 + $0x108] sm:$0xff] }
  0x5c   : > { %3984 = vrot.lane.b32.xlu2 %v5027_v6, %s4666_s16  ;;  %6996 = vst [vmem:[#allocation10_spill] sm:$0xff] %v5086_v13 }
  0x5d   : > { %3979 = vrot.lane.b32.xlu1 %v5019_v60, %s4666_s16  ;;  %6998 = vst [vmem:[#allocation12_spill] sm:$0xff] %v5113_v38 }
  0x5f   : > { %3989 = vrot.lane.b32.xlu0 %v5029_v0, %s4666_s16 }
  0x64   : > { %3999 = vrot.lane.b32.xlu2 %v5039_v18, %s4666_s16  ;;  %v5162_v18 = vld [vmem:[#allocation2 + $0x170] sm:$0xff] }
  0x65   : > { %3994 = vrot.lane.b32.xlu1 %v5031_v7, %s4666_s16 }
  0x67   : > { %4004 = vrot.lane.b32.xlu0 %v4003_v19, %s4666_s16 }
  0x6c   : > { %4014 = vrot.lane.b32.xlu2 %v4013_v33, %s4666_s16 }
  0x6d   : > { %4009 = vrot.lane.b32.xlu1 %v4008_v21, %s4666_s16  ;;  %v5096_v21 = vpack.i.bf16 %v5084_v12, %v5082_v11 }
  0x6f   : > { %4019 = vrot.lane.b32.xlu0 %v4018_v34, %s4666_s16  ;;  %6997 = vst [vmem:[#allocation11_spill] sm:$0xff] %v5096_v21  ;;  %v5107_v34 = vld [vmem:[#allocation2 + $0xd8] sm:$0xff] }
  0x74   : > { %4029 = vrot.lane.b32.xlu2 %v4028_v54, %s4667_s17  ;;  %v5126_v54 = vld [vmem:[#allocation2 + $0xf0] sm:$0xff] }
  0x75   : > { %4024 = vrot.lane.b32.xlu1 %v4023_v37, %s4666_s16  ;;  %v5109_v37 = vld [vmem:[#allocation2 + $0xe0] sm:$0xff] }
  0x76   : > { %v4068_v53 = vpack.i.bf16 %v5109_v37, %v5107_v34 }
  0x77   : > { %4034 = vrot.lane.b32.xlu0 %v5067_v55, %s4667_s17 }
  0x7c   : > { %4044 = vrot.lane.b32.xlu2 %v5086_v13, %s4667_s17  ;;  %v856_v13 = vld [vmem:[#allocation2 + $0x158] sm:$0xff] }
  0x7d   : > { %4039 = vrot.lane.b32.xlu1 %v5073_v62, %s4667_s17  ;;  %v3890_v3 = vpop.permute.xlu2 %3889 }
  0x7e   : > { %v3892_v4 = vunpack.i.h.bf16 %v3890_v3  ;;  %v3891_v9 = vunpack.i.l.bf16 %v3890_v3  ;;  %v5131_v3 = vld [vmem:[#allocation2 + $0x120] sm:$0xff] }
  0x7f   : > { %4049 = vrot.lane.b32.xlu0 %v4048_v15, %s4667_s17 }
  0x80   : > { %v5089_v17 = vsel %vm550_vm0, %v835_v1, %v3891_v9  ;;  %v5092_v19 = vsel %vm550_vm0, %v836_v63, %v3892_v4  ;;  %v850_v1 = vld [vmem:[#allocation2 + $0x110] sm:$0xff]  ;;  %v5133_v4 = vld [vmem:[#allocation2 + $0x128] sm:$0xff]  ;;  %v5137_v9 = vpack.i.bf16 %v5128_v56, %v5126_v54 }
  0x82   : > { %6999 = vst [vmem:[#allocation13_spill] sm:$0xff] %v5137_v9 }
  0x84   : > { %4059 = vrot.lane.b32.xlu2 %v5113_v38, %s4667_s17  ;;  %v855_v38 = vld [vmem:[#allocation2 + $0x150] sm:$0xff] }
  0x85   : > { %4054 = vrot.lane.b32.xlu1 %v5096_v21, %s4667_s17  ;;  %v3895_v29 = vpop.permute.xlu2 %3894  ;;  %v5166_v21 = vpack.i.bf16 %v856_v13, %v855_v38 }
  0x86   : > { %v3897_v31 = vunpack.i.h.bf16 %v3895_v29  ;;  %v3896_v33 = vunpack.i.l.bf16 %v3895_v29  ;;  %v5141_v29 = vpack.i.bf16 %v850_v1, %v849_v61 }
  0x87   : > { %4064 = vrot.lane.b32.xlu0 %v4063_v42, %s4667_s17  ;;  %v4083_v42 = vpack.i.bf16 %v5133_v4, %v5131_v3 }
  0x88   : > { %v5116_v43 = vsel %vm550_vm0, %v838_v2, %v3897_v31  ;;  %v5119_v52 = vsel %vm550_vm0, %v837_v5, %v3896_v33  ;;  %7000 = vst [vmem:[#allocation14_spill] sm:$0xff] %v5141_v29 }
  0x8a   : > { %v5139_v15 = vpop.permute.xlu0 %3869 }
  0x8c   : > { %4074 = vrot.lane.b32.xlu2 %v5137_v9, %s4667_s17 }
  0x8d   : > { %4069 = vrot.lane.b32.xlu1 %v4068_v53, %s4667_s17  ;;  %v3910_v63 = vpop.permute.xlu2 %3909  ;;  %v5153_v53 = vld [vmem:[#allocation2 + $0x138] sm:$0xff] }
  0x8e   : > { %v3912_v2 = vunpack.i.h.bf16 %v3910_v63  ;;  %v3911_v5 = vunpack.i.l.bf16 %v3910_v63  ;;  %v5157_v63 = vld [vmem:[#allocation2 + $0x140] sm:$0xff] }
  0x8f   : > { %4079 = vrot.lane.b32.xlu0 %v5141_v29, %s4667_s17  ;;  %v4088_v9 = vpack.i.bf16 %v5157_v63, %v5153_v53 }
  0x90   : > { %v5144_v31 = vsel %vm550_vm0, %v844_v28, %v3912_v2  ;;  %v5147_v33 = vsel %vm550_vm0, %v843_v27, %v3911_v5  ;;  %v5160_v5 = vld [vmem:[#allocation2 + $0x168] sm:$0xff] }
  0x94   : > { %4089 = vrot.lane.b32.xlu2 %v4088_v9, %s4667_s17 }
  0x95   : > { %4084 = vrot.lane.b32.xlu1 %v4083_v42, %s4667_s17  ;;  %v3925_v28 = vpop.permute.xlu2 %3924 }
  0x96   : > { %v3927_v27 = vunpack.i.h.bf16 %v3925_v28  ;;  %v3926_v2 = vunpack.i.l.bf16 %v3925_v28  ;;  %v4098_v28 = vpack.i.bf16 %v5162_v18, %v5160_v5 }
  0x97   : > { %v3880_v62 = vpop.permute.xlu1 %3879  ;;  %4094 = vrot.lane.b32.xlu0 %v5166_v21, %s4667_s17 }
  0x98   : > { %v5169_v29 = vsel %vm550_vm0, %v850_v1, %v3927_v27  ;;  %v5172_v55 = vsel %vm550_vm0, %v849_v61, %v3926_v2  ;;  %v3882_v42 = vunpack.i.h.bf16 %v3880_v62  ;;  %v3881_v7 = vunpack.i.l.bf16 %v3880_v62  ;;  %v859_v61 = vld [vmem:[#allocation2 + $0x180] sm:$0xff]  ;;  %v860_v1 = vld [vmem:[#allocation2 + $0x188] sm:$0xff] }
  0x99   : > { %7001 = vst [vmem:[#allocation15_spill] sm:$0xff] %v5169_v29  ;;  %v3875_v0 = vpop.permute.xlu0 %3874 }
  0x9a   : > { %7002 = vst [vmem:[#allocation16_spill] sm:$0xff] %v5172_v55  ;;  %v5178_v6 = vsel %vm550_vm0, %v5053_v44, %v3881_v7  ;;  %v5182_v60 = vsel %vm550_vm0, %v5055_v46, %v3882_v42  ;;  %v4103_v55 = vpack.i.bf16 %v860_v1, %v859_v61 }
  0x9c   : > { %4104 = vrot.lane.b32.xlu2 %v4103_v55, %s4667_s17  ;;  %v3877_v55 = vunpack.i.h.bf16 %v3875_v0 }
  0x9d   : > { %4099 = vrot.lane.b32.xlu1 %v4098_v28, %s4667_s17  ;;  %v3940_v62 = vpop.permute.xlu2 %3939 }
  0x9e   : > { %v3942_v27 = vunpack.i.h.bf16 %v3940_v62  ;;  %v3941_v2 = vunpack.i.l.bf16 %v3940_v62 }
  0x9f   : > { %v5188_v29 = vpop.permute.xlu1 %3884  ;;  %4109 = vrot.lane.b32.xlu0 %v4838_v30, %s4668_s18 }
  0xa0   : > { %v5191_v7 = vsel %vm550_vm0, %v856_v13, %v3942_v27  ;;  %v5194_v44 = vsel %vm550_vm0, %v855_v38, %v3941_v2  ;;  %v3876_v27 = vunpack.i.l.bf16 %v3875_v0 }
  0xa1   : > { %v3900_v46 = vpop.permute.xlu0 %3899 }
  0xa2   : > { %v3902_v9 = vunpack.i.h.bf16 %v3900_v46  ;;  %v3901_v42 = vunpack.i.l.bf16 %v3900_v46 }
  0xa4   : > { %v5201_v28 = vsel %vm550_vm0, %v5084_v12, %v3902_v9  ;;  %v5205_v13 = vsel %vm550_vm0, %v5082_v11, %v3901_v42  ;;  %4119 = vrot.lane.b32.xlu2 %v4857_v49, %s4668_s18  ;;  %v2048_v49 = vsel %vm550_vm0, %v5048_v39, %v3876_v27 }
  0xa5   : > { %4114 = vrot.lane.b32.xlu1 %v4827_v20, %s4668_s18 }
  0xa6   : > { %v3955_v20 = vpop.permute.xlu2 %3954 }
  0xa7   : > { %v3905_v38 = vpop.permute.xlu1 %3904  ;;  %4124 = vrot.lane.b32.xlu0 %v4816_v10, %s4668_s18  ;;  %v3957_v0 = vunpack.i.h.bf16 %v3955_v20  ;;  %v3956_v12 = vunpack.i.l.bf16 %v3955_v20  ;;  %v2049_v10 = vsel %vm550_vm0, %v5050_v41, %v3877_v55 }
  0xa8   : > { %v3907_v27 = vunpack.i.h.bf16 %v3905_v38  ;;  %v3906_v20 = vunpack.i.l.bf16 %v3905_v38  ;;  %v734_v38 = vld [vmem:[#allocation2 + $0x8] sm:$0xff] }
  0xa9   : > { %v3915_v61 = vpop.permute.xlu0 %3914 }
  0xaa   : > { %v3917_v1 = vunpack.i.h.bf16 %v3915_v61  ;;  %v3916_v62 = vunpack.i.l.bf16 %v3915_v61 }
  0xac   : > { %v5215_v30 = vsel %vm550_vm0, %v5109_v37, %v3917_v1  ;;  %v5219_v11 = vsel %vm550_vm0, %v5107_v34, %v3916_v62  ;;  %v5228_v37 = vsel %vm2078_vm2, %v2048_v49, %v3956_v12  ;;  %v5231_v34 = vsel %vm2078_vm2, %v2049_v10, %v3957_v0  ;;  %4134 = vrot.lane.b32.xlu2 %v4867_v57, %s4668_s18 }
  0xad   : > { %4129 = vrot.lane.b32.xlu1 %v4849_v40, %s4668_s18  ;;  %v3871_v0 = vunpack.i.l.bf16 %v5139_v15  ;;  %v2060_v10 = vsel %vm550_vm0, %v5101_v23, %v3906_v20 }
  0xae   : > { %v3970_v41 = vpop.permute.xlu2 %3969 }
  0xaf   : > { %v3920_v2 = vpop.permute.xlu1 %3919  ;;  %4139 = vrot.lane.b32.xlu0 %v4890_v14, %s4668_s18  ;;  %v3972_v61 = vunpack.i.h.bf16 %v3970_v41  ;;  %v3971_v1 = vunpack.i.l.bf16 %v3970_v41 }
  0xb0   : > { %v3922_v23 = vunpack.i.h.bf16 %v3920_v2 }
  0xb1   : > { %v3930_v46 = vpop.permute.xlu0 %3929  ;;  %v5251_v57 = vsel %vm2078_vm2, %v5092_v19, %v3972_v61  ;;  %v5255_v14 = vsel %vm2078_vm2, %v5089_v17, %v3971_v1  ;;  %v3872_v17 = vunpack.i.h.bf16 %v5139_v15  ;;  %v3921_v1 = vunpack.i.l.bf16 %v3920_v2 }
  0xb2   : > { %v3932_v9 = vunpack.i.h.bf16 %v3930_v46  ;;  %v3931_v42 = vunpack.i.l.bf16 %v3930_v46 }
  0xb3   : > { %v2047_v41 = vsel %vm550_vm0, %v734_v38, %v3872_v17 }
  0xb4   : > { %v5239_v40 = vsel %vm550_vm0, %v5133_v4, %v3932_v9  ;;  %v5243_v39 = vsel %vm550_vm0, %v5131_v3, %v3931_v42  ;;  %4149 = vrot.lane.b32.xlu2 %v4897_v16, %s4668_s18  ;;  %v733_v16 = vld [vmem:[#allocation2] sm:$0xff] }
  0xb5   : > { %4144 = vrot.lane.b32.xlu1 %v4884_v8, %s4668_s18 }
  0xb6   : > { %v3985_v12 = vpop.permute.xlu2 %3984 }
  0xb7   : > { %v5247_v62 = vpop.permute.xlu1 %3934  ;;  %4154 = vrot.lane.b32.xlu0 %v4914_v25, %s4668_s18  ;;  %v3987_v49 = vunpack.i.h.bf16 %v3985_v12  ;;  %v3986_v25 = vunpack.i.l.bf16 %v3985_v12 }
  0xb9   : > { %v3945_v4 = vpop.permute.xlu0 %3944  ;;  %v5281_v15 = vsel %vm2078_vm2, %v2060_v10, %v3986_v25 }
  0xba   : > { %v3947_v55 = vunpack.i.h.bf16 %v3945_v4  ;;  %v3946_v3 = vunpack.i.l.bf16 %v3945_v4  ;;  %v891_v4 = vld [vmem:[#allocation2 + $0x181] sm:$0xff] }
  0xbc   : > { %v5263_v8 = vsel %vm550_vm0, %v5162_v18, %v3947_v55  ;;  %v5267_v19 = vsel %vm550_vm0, %v5160_v5, %v3946_v3  ;;  %v2061_v18 = vsel %vm550_vm0, %v5103_v24, %v3907_v27  ;;  %4164 = vrot.lane.b32.xlu2 %v4922_v26, %s4668_s18  ;;  %v892_v55 = vld [vmem:[#allocation2 + $0x189] sm:$0xff]  ;;  %v3887_v3 = vunpack.i.h.bf16 %v5188_v29 }
  0xbd   : > { %4159 = vrot.lane.b32.xlu1 %v4908_v22, %s4668_s18  ;;  %v5278_v46 = vsel %vm2078_vm2, %v2061_v18, %v3987_v49  ;;  %v2046_v22 = vsel %vm550_vm0, %v733_v16, %v3871_v0  ;;  %v3886_v27 = vunpack.i.l.bf16 %v5188_v29  ;;  %v4183_v2 = vpack.i.bf16 %v892_v55, %v891_v4 }
  0xbe   : > { %v4000_v20 = vpop.permute.xlu2 %3999  ;;  %v2067_v26 = vsel %vm550_vm0, %v5128_v56, %v3922_v23  ;;  %v2066_v16 = vsel %vm550_vm0, %v5126_v54, %v3921_v1  ;;  %v2053_v10 = vsel %vm550_vm0, %v5059_v51, %v3887_v3 }
  0xbf   : > { %v3950_v5 = vpop.permute.xlu1 %3949  ;;  %4169 = vrot.lane.b32.xlu0 %v4942_v35, %s4668_s18  ;;  %v4002_v17 = vunpack.i.h.bf16 %v4000_v20  ;;  %v4001_v0 = vunpack.i.l.bf16 %v4000_v20  ;;  %v2052_v56 = vsel %vm550_vm0, %v5057_v48, %v3886_v27 }
  0xc0   : > { %v3952_v9 = vunpack.i.h.bf16 %v3950_v5  ;;  %v3951_v42 = vunpack.i.l.bf16 %v3950_v5 }
  0xc1   : > { %v3960_v12 = vpop.permute.xlu0 %3959  ;;  %v5304_v25 = vsel %vm2078_vm2, %v2067_v26, %v4002_v17  ;;  %v5307_v29 = vsel %vm2078_vm2, %v2066_v16, %v4001_v0 }
  0xc2   : > { %v5286_v61 = vsel %vm2078_vm2, %v2047_v41, %v3952_v9  ;;  %v5289_v24 = vsel %vm2078_vm2, %v2046_v22, %v3951_v42  ;;  %v3962_v38 = vunpack.i.h.bf16 %v3960_v12  ;;  %v3961_v35 = vunpack.i.l.bf16 %v3960_v12 }
  0xc3   : > { %v3937_v22 = vunpack.i.h.bf16 %v5247_v62  ;;  %v3936_v41 = vunpack.i.l.bf16 %v5247_v62 }
  0xc4   : > { %v5315_v54 = vsel %vm2078_vm2, %v5182_v60, %v3962_v38  ;;  %v5319_v5 = vsel %vm2078_vm2, %v5178_v6, %v3961_v35  ;;  %4179 = vrot.lane.b32.xlu2 %v4950_v36, %s4668_s18 }
  0xc5   : > { %4174 = vrot.lane.b32.xlu1 %v4936_v32, %s4668_s18  ;;  %v2073_v23 = vsel %vm550_vm0, %v5157_v63, %v3937_v22  ;;  %v2072_v1 = vsel %vm550_vm0, %v5153_v53, %v3936_v41 }
  0xc6   : > { %v4015_v48 = vpop.permute.xlu2 %4014 }
  0xc7   : > { %v3965_v49 = vpop.permute.xlu1 %3964  ;;  %4184 = vrot.lane.b32.xlu0 %v4183_v2, %s4668_s18  ;;  %v4017_v60 = vunpack.i.h.bf16 %v4015_v48  ;;  %v4016_v6 = vunpack.i.l.bf16 %v4015_v48  ;;  %s6051_s18 = scalar_lea.vmem %s6974_s7, %s3732_s29 }
  0xc8   : > { %v3967_v32 = vunpack.i.h.bf16 %v3965_v49  ;;  %v3966_v18 = vunpack.i.l.bf16 %v3965_v49 }
  0xc9   : > { %v3975_v51 = vpop.permute.xlu0 %3974  ;;  %v5335_v36 = vsel %vm2078_vm2, %v2073_v23, %v4017_v60  ;;  %v5338_v3 = vsel %vm2078_vm2, %v2072_v1, %v4016_v6  ;;  %v7005_v6 = vld [vmem:[#allocation15_spill] sm:$0xff]  ;;  %v7006_v23 = vld [vmem:[#allocation16_spill] sm:$0xff] }
  0xca   : > { %v2085_v9 = vsel %vm2078_vm2, %v2052_v56, %v3966_v18  ;;  %v2086_v42 = vsel %vm2078_vm2, %v2053_v10, %v3967_v32  ;;  %v3977_v62 = vunpack.i.h.bf16 %v3975_v51  ;;  %v3976_v4 = vunpack.i.l.bf16 %v3975_v51 }
  0xcc   : > { %v5342_v20 = vsel %vm2078_vm2, %v5116_v43, %v3977_v62  ;;  %v5346_v63 = vsel %vm2078_vm2, %v5119_v52, %v3976_v4  ;;  %4194 = vrot.lane.b32.xlu2 %v4991_v47, %s4669_s19  ;;  %v7007_v4 = vld [vmem:[#allocation5_spill] sm:$0xff] }
  0xcd   : > { %4189 = vrot.lane.b32.xlu1 %v4987_v45, %s4669_s19 }
  0xce   : > { %v4030_v0 = vpop.permute.xlu2 %4029 }
  0xcf   : > { %v3980_v55 = vpop.permute.xlu1 %3979  ;;  %4199 = vrot.lane.b32.xlu0 %v4997_v50, %s4669_s19  ;;  %v4032_v43 = vunpack.i.h.bf16 %v4030_v0  ;;  %v4031_v52 = vunpack.i.l.bf16 %v4030_v0  ;;  %v7009_v0 = vld [vmem:[#allocation8_spill] sm:$0xff] }
  0xd0   : > { %v3982_v27 = vunpack.i.h.bf16 %v3980_v55  ;;  %v3981_v45 = vunpack.i.l.bf16 %v3980_v55  ;;  %v958_v55 = vld [vmem:[#allocation2 + $0x31] sm:$0xff] }
  0xd1   : > { %v3990_v12 = vpop.permute.xlu0 %3989  ;;  %v5364_v16 = vsel %vm2111_vm3, %v5289_v24, %v4031_v52  ;;  %v7003_v24 = vld [vmem:[#allocation3_spill] sm:$0xff] }
  0xd2   : > { %v2091_v53 = vsel %vm2078_vm2, %v5205_v13, %v3981_v45  ;;  %v2092_v17 = vsel %vm2078_vm2, %v5201_v28, %v3982_v27  ;;  %v3992_v2 = vunpack.i.h.bf16 %v3990_v12  ;;  %v3991_v26 = vunpack.i.l.bf16 %v3990_v12  ;;  %v959_v27 = vld [vmem:[#allocation2 + $0x39] sm:$0xff] }
  0xd3   : > { %v5360_v28 = vsel %vm2111_vm3, %v5286_v61, %v4032_v43 }
  0xd4   : > { %v5368_v49 = vsel %vm2078_vm2, %v5144_v31, %v3992_v2  ;;  %4209 = vrot.lane.b32.xlu2 %v5015_v59, %s4669_s19  ;;  %v7004_v31 = vld [vmem:[#allocation4_spill] sm:$0xff] }
  0xd5   : > { %4204 = vrot.lane.b32.xlu1 %v5011_v58, %s4669_s19  ;;  %v5372_v58 = vsel %vm2078_vm2, %v5147_v33, %v3991_v26  ;;  %v4238_v26 = vpack.i.bf16 %v959_v27, %v958_v55 }
  0xd6   : > { %v4045_v18 = vpop.permute.xlu2 %4044 }
  0xd7   : > { %v3995_v13 = vpop.permute.xlu1 %3994  ;;  %4214 = vrot.lane.b32.xlu0 %v7003_v24, %s4669_s19  ;;  %v4047_v10 = vunpack.i.h.bf16 %v4045_v18  ;;  %v4046_v56 = vunpack.i.l.bf16 %v4045_v18 }
  0xd8   : > { %v3997_v38 = vunpack.i.h.bf16 %v3995_v13  ;;  %v3996_v35 = vunpack.i.l.bf16 %v3995_v13 }
  0xd9   : > { %v4005_v33 = vpop.permute.xlu0 %4004 }
  0xda   : > { %v2097_v32 = vsel %vm2078_vm2, %v5219_v11, %v3996_v35  ;;  %v2098_v61 = vsel %vm2078_vm2, %v5215_v30, %v3997_v38  ;;  %v4007_v22 = vunpack.i.h.bf16 %v4005_v33  ;;  %v4006_v41 = vunpack.i.l.bf16 %v4005_v33 }
  0xdb   : > { %v5385_v11 = vsel %vm2111_vm3, %v2086_v42, %v4047_v10  ;;  %v5388_v30 = vsel %vm2111_vm3, %v2085_v9, %v4046_v56  ;;  %v7008_v9 = vld [vmem:[#allocation6_spill] sm:$0xff] }
  0xdc   : > { %v5392_v51 = vsel %vm2078_vm2, %v7005_v6, %v4007_v22  ;;  %v5396_v1 = vsel %vm2078_vm2, %v7006_v23, %v4006_v41  ;;  %4224 = vrot.lane.b32.xlu2 %v7007_v4, %s4669_s19  ;;  %v7010_v22 = vld [vmem:[#allocation9_spill] sm:$0xff] }
  0xdd   : > { %4219 = vrot.lane.b32.xlu1 %v7004_v31, %s4669_s19 }
  0xde   : > { %v4060_v45 = vpop.permute.xlu2 %4059 }
  0xdf   : > { %v4010_v48 = vpop.permute.xlu1 %4009  ;;  %4229 = vrot.lane.b32.xlu0 %v7008_v9, %s4669_s19  ;;  %v4062_v43 = vunpack.i.h.bf16 %v4060_v45  ;;  %v4061_v52 = vunpack.i.l.bf16 %v4060_v45 }
  0xe0   : > { %v4012_v59 = vunpack.i.h.bf16 %v4010_v48  ;;  %v4011_v60 = vunpack.i.l.bf16 %v4010_v48 }
  0xe1   : > { %v4020_v12 = vpop.permute.xlu0 %4019  ;;  %v5409_v13 = vsel %vm2111_vm3, %v2091_v53, %v4061_v52  ;;  %v5412_v38 = vsel %vm2111_vm3, %v2092_v17, %v4062_v43  ;;  %v960_v17 = vld [vmem:[#allocation2 + $0x49] sm:$0xff] }
  0xe2   : > { %v2103_v62 = vsel %vm2078_vm2, %v5243_v39, %v4011_v60  ;;  %v2104_v42 = vsel %vm2078_vm2, %v5239_v40, %v4012_v59  ;;  %v4022_v39 = vunpack.i.h.bf16 %v4020_v12  ;;  %v4021_v2 = vunpack.i.l.bf16 %v4020_v12  ;;  %v967_v59 = vld [vmem:[#allocation2 + $0x99] sm:$0xff] }
  0xe4   : > { %v5416_v31 = vsel %vm2078_vm2, %v5191_v7, %v4022_v39  ;;  %v5420_v10 = vsel %vm2078_vm2, %v5194_v44, %v4021_v2  ;;  %4239 = vrot.lane.b32.xlu2 %v4238_v26, %s4671_s21  ;;  %v961_v7 = vld [vmem:[#allocation2 + $0x51] sm:$0xff] }
  0xe5   : > { %4234 = vrot.lane.b32.xlu1 %v7009_v0, %s4670_s20  ;;  %v4258_v6 = vpack.i.bf16 %v961_v7, %v960_v17 }
  0xe6   : > { %v4075_v33 = vpop.permute.xlu2 %4074 }
  0xe7   : > { %v4025_v40 = vpop.permute.xlu1 %4024  ;;  %4244 = vrot.lane.b32.xlu0 %v4991_v47, %s4672_s22  ;;  %v4077_v44 = vunpack.i.h.bf16 %v4075_v33  ;;  %v4076_v41 = vunpack.i.l.bf16 %v4075_v33 }
  0xe8   : > { %v4027_v35 = vunpack.i.h.bf16 %v4025_v40  ;;  %v4026_v18 = vunpack.i.l.bf16 %v4025_v40 }
  0xe9   : > { %v4035_v48 = vpop.permute.xlu0 %4034  ;;  %v5432_v4 = vsel %vm2111_vm3, %v2097_v32, %v4076_v41  ;;  %v5435_v47 = vsel %vm2111_vm3, %v2098_v61, %v4077_v44  ;;  %v7011_v61 = vld [vmem:[#allocation11_spill] sm:$0xff] }
  0xea   : > { %v2109_v56 = vsel %vm2078_vm2, %v5267_v19, %v4026_v18  ;;  %v2110_v53 = vsel %vm2078_vm2, %v5263_v8, %v4027_v35  ;;  %v966_v19 = vld [vmem:[#allocation2 + $0x91] sm:$0xff]  ;;  %v4037_v60 = vunpack.i.h.bf16 %v4035_v48  ;;  %v4036_v8 = vunpack.i.l.bf16 %v4035_v48 }
  0xeb   : > { %v4263_v0 = vpack.i.bf16 %v967_v59, %v966_v19  ;;  %vm3479_vm2 = vcmask 60416  }
  0xec   : > { %v5439_v27 = vsel %vm2111_vm3, %v5228_v37, %v4036_v8  ;;  %v5443_v45 = vsel %vm2111_vm3, %v5231_v34, %v4037_v60  ;;  %4254 = vrot.lane.b32.xlu2 %v7011_v61, %s4670_s20 }
  0xed   : > { %4249 = vrot.lane.b32.xlu1 %v7010_v22, %s4670_s20 }
  0xee   : > { %v4090_v52 = vpop.permute.xlu2 %4089 }
  0xef   : > { %v4040_v23 = vpop.permute.xlu1 %4039  ;;  %4259 = vrot.lane.b32.xlu0 %v4258_v6, %s4671_s21  ;;  %v4092_v37 = vunpack.i.h.bf16 %v4090_v52  ;;  %v4091_v12 = vunpack.i.l.bf16 %v4090_v52  ;;  %v968_v52 = vld [vmem:[#allocation2 + $0xa9] sm:$0xff] }
  0xf0   : > { %v4042_v9 = vunpack.i.h.bf16 %v4040_v23  ;;  %v4041_v55 = vunpack.i.l.bf16 %v4040_v23 }
  0xf1   : > { %v4050_v39 = vpop.permute.xlu0 %4049  ;;  %v5454_v40 = vsel %vm2111_vm3, %v2103_v62, %v4091_v12 }
  0xf2   : > { %v2116_v43 = vsel %vm2111_vm3, %v5319_v5, %v4041_v55  ;;  %v2117_v32 = vsel %vm2111_vm3, %v5315_v54, %v4042_v9  ;;  %v4052_v34 = vunpack.i.h.bf16 %v4050_v39  ;;  %v4051_v2 = vunpack.i.l.bf16 %v4050_v39  ;;  %v962_v9 = vld [vmem:[#allocation2 + $0x61] sm:$0xff] }
  0xf3   : > { %v5457_v5 = vsel %vm2111_vm3, %v2104_v42, %v4092_v37  ;;  %v975_v42 = vld [vmem:[#allocation2 + $0xf9] sm:$0xff]  ;;  %v969_v37 = vld [vmem:[#allocation2 + $0xb1] sm:$0xff] }
  0xf4   : > { %v5461_v18 = vsel %vm2111_vm3, %v5251_v57, %v4052_v34  ;;  %v5465_v17 = vsel %vm2111_vm3, %v5255_v14, %v4051_v2  ;;  %4269 = vrot.lane.b32.xlu2 %v4997_v50, %s4672_s22  ;;  %v974_v57 = vld [vmem:[#allocation2 + $0xf1] sm:$0xff]  ;;  %v7012_v14 = vld [vmem:[#allocation13_spill] sm:$0xff] }
  0xf5   : > { %4264 = vrot.lane.b32.xlu1 %v4263_v0, %s4671_s21  ;;  %v4283_v19 = vpack.i.bf16 %v975_v42, %v974_v57 }
  0xf6   : > { %v4105_v33 = vpop.permute.xlu2 %4104 }
  0xf7   : > { %v4055_v26 = vpop.permute.xlu1 %4054  ;;  %4274 = vrot.lane.b32.xlu0 %v7003_v24, %s4672_s22  ;;  %v4107_v22 = vunpack.i.h.bf16 %v4105_v33  ;;  %v4106_v44 = vunpack.i.l.bf16 %v4105_v33  ;;  %v4308_v33 = vpack.i.bf16 %v969_v37, %v968_v52 }
  0xf8   : > { %v4057_v54 = vunpack.i.h.bf16 %v4055_v26  ;;  %v4056_v35 = vunpack.i.l.bf16 %v4055_v26 }
  0xf9   : > { %v5482_v59 = vsel %vm2111_vm3, %v2109_v56, %v4106_v44  ;;  %v5485_v50 = vsel %vm2111_vm3, %v2110_v53, %v4107_v22  ;;  %v7013_v53 = vld [vmem:[#allocation7_spill] sm:$0xff]  ;;  %v994_v22 = vld [vmem:[#allocation2 + $0x62] sm:$0xff] }
  0xfa   : > { %v5469_v7 = vsel %vm2111_vm3, %v5346_v63, %v4056_v35  ;;  %v5473_v62 = vsel %vm2111_vm3, %v5342_v20, %v4057_v54  ;;  %v4065_v63 = vpop.permute.xlu0 %4064  ;;  %v1000_v44 = vld [vmem:[#allocation2 + $0xaa] sm:$0xff] }
  0xfb   : > { %v4067_v41 = vunpack.i.h.bf16 %v4065_v63  ;;  %v4066_v48 = vunpack.i.l.bf16 %v4065_v63  ;;  %v1001_v63 = vld [vmem:[#allocation2 + $0xb2] sm:$0xff] }
  0xfc   : > { %4284 = vrot.lane.b32.xlu2 %v4283_v19, %s4671_s21  ;;  %v911_v19 = vld [vmem:[#allocation2 + $0xf2] sm:$0xff] }
  0xfd   : > { %4279 = vrot.lane.b32.xlu1 %v7012_v14, %s4670_s20  ;;  %v5489_v8 = vsel %vm2111_vm3, %v5278_v46, %v4067_v41  ;;  %v5493_v6 = vsel %vm2111_vm3, %v5281_v15, %v4066_v48  ;;  %v963_v46 = vld [vmem:[#allocation2 + $0x69] sm:$0xff] }
  0xfe   : > { %v4120_v55 = vpop.permute.xlu2 %4119  ;;  %v7014_v15 = vld [vmem:[#allocation10_spill] sm:$0xff]  ;;  %v4303_v39 = vpack.i.bf16 %v963_v46, %v962_v9 }
  0xff   : > { %v4070_v20 = vpop.permute.xlu1 %4069  ;;  %4289 = vrot.lane.b32.xlu0 %v7013_v53, %s4672_s22  ;;  %v4122_v0 = vunpack.i.h.bf16 %v4120_v55  ;;  %v4121_v61 = vunpack.i.l.bf16 %v4120_v55  ;;  %v4318_v53 = vpack.i.bf16 %v1001_v63, %v1000_v44 }
 0x100   : > { %v4072_v24 = vunpack.i.h.bf16 %v4070_v20  ;;  %v4071_v60 = vunpack.i.l.bf16 %v4070_v20  ;;  %v912_v20 = vld [vmem:[#allocation2 + $0xfa] sm:$0xff] }
 0x101   : > { %v5509_v2 = vsel %vm2144_vm4, %v2116_v43, %v4121_v61  ;;  %v5512_v26 = vsel %vm2144_vm4, %v2117_v32, %v4122_v0  ;;  %v7015_v32 = vld [vmem:[#allocation12_spill] sm:$0xff]  ;;  %v4323_v52 = vpack.i.bf16 %v912_v20, %v911_v19  ;;  %v1008_v20 = vld [vmem:[#allocation2 + $0x10a] sm:$0xff] }
 0x102   : > { %v5497_v23 = vsel %vm2111_vm3, %v5372_v58, %v4071_v60  ;;  %v5501_v56 = vsel %vm2111_vm3, %v5368_v49, %v4072_v24  ;;  %v4080_v58 = vpop.permute.xlu0 %4079 }
 0x103   : > { %v4082_v12 = vunpack.i.h.bf16 %v4080_v58  ;;  %v4081_v49 = vunpack.i.l.bf16 %v4080_v58 }
 0x104   : > { %4299 = vrot.lane.b32.xlu2 %v7015_v32, %s4670_s20 }
 0x105   : > { %4294 = vrot.lane.b32.xlu1 %v7014_v15, %s4670_s20  ;;  %v5516_v57 = vsel %vm2111_vm3, %v5304_v25, %v4082_v12  ;;  %v5520_v42 = vsel %vm2111_vm3, %v5307_v29, %v4081_v49  ;;  %v995_v25 = vld [vmem:[#allocation2 + $0x6a] sm:$0xff] }
 0x106   : > { %v4135_v29 = vpop.permute.xlu2 %4134  ;;  %v4313_v60 = vpack.i.bf16 %v995_v25, %v994_v22 }
 0x107   : > { %v4085_v34 = vpop.permute.xlu1 %4084  ;;  %4304 = vrot.lane.b32.xlu0 %v4303_v39, %s4671_s21  ;;  %v4137_v41 = vunpack.i.h.bf16 %v4135_v29  ;;  %v4136_v48 = vunpack.i.l.bf16 %v4135_v29  ;;  %v7016_v29 = vld [vmem:[#allocation14_spill] sm:$0xff] }
 0x108   : > { %v4087_v54 = vunpack.i.h.bf16 %v4085_v34  ;;  %v4086_v35 = vunpack.i.l.bf16 %v4085_v34 }
 0x109   : > { %v5536_v46 = vsel %vm2144_vm4, %v5469_v7, %v4136_v48  ;;  %v5540_v55 = vsel %vm2144_vm4, %v5473_v62, %v4137_v41  ;;  %v917_v62 = vld [vmem:[#allocation2 + $0x13a] sm:$0xff]  ;;  %v982_v41 = vld [vmem:[#allocation2 + $0x151] sm:$0xff] }
 0x10a   : > { %v5524_v14 = vsel %vm2111_vm3, %v5396_v1, %v4086_v35  ;;  %v5528_v43 = vsel %vm2111_vm3, %v5392_v51, %v4087_v54  ;;  %v4095_v1 = vpop.permute.xlu0 %4094  ;;  %v983_v48 = vld [vmem:[#allocation2 + $0x159] sm:$0xff] }
 0x10b   : > { %v4097_v24 = vunpack.i.h.bf16 %v4095_v1  ;;  %v4096_v51 = vunpack.i.l.bf16 %v4095_v1 }
 0x10c   : > { %4314 = vrot.lane.b32.xlu2 %v4313_v60, %s4672_s22 }
 0x10d   : > { %4309 = vrot.lane.b32.xlu1 %v4308_v33, %s4671_s21  ;;  %v5544_v61 = vsel %vm2111_vm3, %v5335_v36, %v4097_v24  ;;  %v5548_v58 = vsel %vm2111_vm3, %v5338_v3, %v4096_v51  ;;  %v918_v36 = vld [vmem:[#allocation2 + $0x142] sm:$0xff] }
 0x10e   : > { %v4150_v12 = vpop.permute.xlu2 %4149 }
 0x10f   : > { %v4100_v9 = vpop.permute.xlu1 %4099  ;;  %4319 = vrot.lane.b32.xlu0 %v4318_v53, %s4672_s22  ;;  %v4152_v3 = vunpack.i.h.bf16 %v4150_v12  ;;  %v4151_v49 = vunpack.i.l.bf16 %v4150_v12  ;;  %v4348_v53 = vpack.i.bf16 %v983_v48, %v982_v41 }
 0x110   : > { %v4102_v15 = vunpack.i.h.bf16 %v4100_v9  ;;  %v4101_v0 = vunpack.i.l.bf16 %v4100_v9 }
 0x111   : > { %v5569_v33 = vsel %vm2144_vm4, %v5501_v56, %v4152_v3  ;;  %v976_v56 = vld [vmem:[#allocation2 + $0x109] sm:$0xff]  ;;  %v1014_v3 = vld [vmem:[#allocation2 + $0x152] sm:$0xff] }
 0x112   : > { %v5552_v37 = vsel %vm2111_vm3, %v5420_v10, %v4101_v0  ;;  %v5556_v7 = vsel %vm2111_vm3, %v5416_v31, %v4102_v15  ;;  %v4110_v39 = vpop.permute.xlu0 %4109  ;;  %v5561_v10 = vpack.i.bf16 %v918_v36, %v917_v62  ;;  %v5565_v31 = vsel %vm2144_vm4, %v5497_v23, %v4151_v49  ;;  %v932_v49 = vld [vmem:[#allocation2 + $0x78] sm:$0xff] }
 0x113   : > { %v4112_v34 = vunpack.i.h.bf16 %v4110_v39  ;;  %v4111_v54 = vunpack.i.l.bf16 %v4110_v39  ;;  %v933_v39 = vld [vmem:[#allocation2 + $0x80] sm:$0xff] }
 0x114   : > { %4329 = vrot.lane.b32.xlu2 %v5561_v10, %s4669_s19 }
 0x115   : > { %4324 = vrot.lane.b32.xlu1 %v4323_v52, %s4669_s19  ;;  %v5573_v25 = vsel %vm2144_vm4, %v5360_v28, %v4112_v34  ;;  %v5577_v44 = vsel %vm2144_vm4, %v5364_v16, %v4111_v54  ;;  %v977_v28 = vld [vmem:[#allocation2 + $0x111] sm:$0xff] }
 0x116   : > { %v4165_v16 = vpop.permute.xlu2 %4164  ;;  %v4343_v60 = vpack.i.bf16 %v977_v28, %v976_v56 }
 0x117   : > { %v4115_v35 = vpop.permute.xlu1 %4114  ;;  %4334 = vrot.lane.b32.xlu0 %v7016_v29, %s4670_s20  ;;  %v4166_v1 = vunpack.i.l.bf16 %v4165_v16  ;;  %v4363_v29 = vpack.i.bf16 %v933_v39, %v932_v49 }
 0x118   : > { %v4117_v32 = vunpack.i.h.bf16 %v4115_v35  ;;  %v4116_v22 = vunpack.i.l.bf16 %v4115_v35  ;;  %v938_v35 = vld [vmem:[#allocation2 + $0xc0] sm:$0xff] }
 0x119   : > { %v5595_v15 = vsel %vm2144_vm4, %v5524_v14, %v4166_v1 }
 0x11a   : > { %v5581_v63 = vsel %vm2144_vm4, %v5439_v27, %v4116_v22  ;;  %v5585_v23 = vsel %vm2144_vm4, %v5443_v45, %v4117_v32  ;;  %v4167_v27 = vunpack.i.h.bf16 %v4165_v16  ;;  %v4125_v19 = vpop.permute.xlu0 %4124  ;;  %v1009_v45 = vld [vmem:[#allocation2 + $0x112] sm:$0xff]  ;;  %v939_v32 = vld [vmem:[#allocation2 + $0xc8] sm:$0xff] }
 0x11b   : > { %v4127_v24 = vunpack.i.h.bf16 %v4125_v19  ;;  %v4126_v51 = vunpack.i.l.bf16 %v4125_v19  ;;  %v5609_v12 = vpack.i.bf16 %v1009_v45, %v1008_v20  ;;  %v4368_v20 = vpack.i.bf16 %v939_v32, %v938_v35 }
 0x11c   : > { %v5599_v0 = vsel %vm2144_vm4, %v5528_v43, %v4167_v27  ;;  %4344 = vrot.lane.b32.xlu2 %v4343_v60, %s4671_s21  ;;  %v996_v60 = vld [vmem:[#allocation2 + $0x7a] sm:$0xff] }
 0x11d   : > { %4339 = vrot.lane.b32.xlu1 %v5166_v21, %s4670_s20  ;;  %v5603_v62 = vsel %vm2144_vm4, %v5385_v11, %v4127_v24  ;;  %v5607_v36 = vsel %vm2144_vm4, %v5388_v30, %v4126_v51  ;;  %v1015_v11 = vld [vmem:[#allocation2 + $0x15a] sm:$0xff]  ;;  %v971_v51 = vld [vmem:[#allocation2 + $0xc9] sm:$0xff] }
 0x11e   : > { %v4180_v30 = vpop.permute.xlu2 %4179  ;;  %v5623_v56 = vpack.i.bf16 %v1015_v11, %v1014_v3  ;;  %v970_v24 = vld [vmem:[#allocation2 + $0xc1] sm:$0xff] }
 0x11f   : > { %v4130_v9 = vpop.permute.xlu1 %4129  ;;  %4349 = vrot.lane.b32.xlu0 %v4348_v53, %s4671_s21  ;;  %v4182_v34 = vunpack.i.h.bf16 %v4180_v30  ;;  %v4181_v54 = vunpack.i.l.bf16 %v4180_v30  ;;  %v4378_v49 = vpack.i.bf16 %v971_v51, %v970_v24 }
 0x120   : > { %v4132_v52 = vunpack.i.h.bf16 %v4130_v9  ;;  %v4131_v21 = vunpack.i.l.bf16 %v4130_v9 }
 0x121   : > { %v5627_v41 = vsel %vm2144_vm4, %v5552_v37, %v4181_v54  ;;  %v5631_v48 = vsel %vm2144_vm4, %v5556_v7, %v4182_v34  ;;  %v964_v7 = vld [vmem:[#allocation2 + $0x79] sm:$0xff] }
 0x122   : > { %v5613_v14 = vsel %vm2144_vm4, %v5465_v17, %v4131_v21  ;;  %v5617_v43 = vsel %vm2144_vm4, %v5461_v18, %v4132_v52  ;;  %v4140_v17 = vpop.permute.xlu0 %4139 }
 0x123   : > { %v4142_v22 = vunpack.i.h.bf16 %v4140_v17  ;;  %v4141_v18 = vunpack.i.l.bf16 %v4140_v17 }
 0x124   : > { %4359 = vrot.lane.b32.xlu2 %v5623_v56, %s4672_s22 }
 0x125   : > { %4354 = vrot.lane.b32.xlu1 %v5609_v12, %s4672_s22  ;;  %v5635_v1 = vsel %vm2144_vm4, %v5409_v13, %v4141_v18  ;;  %v5639_v19 = vsel %vm2144_vm4, %v5412_v38, %v4142_v22  ;;  %v965_v13 = vld [vmem:[#allocation2 + $0x81] sm:$0xff] }
 0x126   : > { %v5652_v38 = vpop.permute.xlu2 %4194  ;;  %v4373_v3 = vpack.i.bf16 %v965_v13, %v964_v7 }
 0x127   : > { %v4145_v28 = vpop.permute.xlu1 %4144  ;;  %4364 = vrot.lane.b32.xlu0 %v4363_v29, %s4670_s20  ;;  %v1003_v29 = vld [vmem:[#allocation2 + $0xca] sm:$0xff] }
 0x128   : > { %v4147_v16 = vunpack.i.h.bf16 %v4145_v28  ;;  %v4146_v27 = vunpack.i.l.bf16 %v4145_v28 }
 0x12a   : > { %v5643_v45 = vsel %vm2144_vm4, %v5493_v6, %v4146_v27  ;;  %v5647_v37 = vsel %vm2144_vm4, %v5489_v8, %v4147_v16  ;;  %v997_v6 = vld [vmem:[#allocation2 + $0x82] sm:$0xff]  ;;  %v4155_v53 = vpop.permute.xlu0 %4154 }
 0x12b   : > { %v2333_v8 = vld [vmem:[%s6970_s3 + $0x20] sm:$0xf]  ;;  %v4157_v52 = vunpack.i.h.bf16 %v4155_v53  ;;  %v4156_v21 = vunpack.i.l.bf16 %v4155_v53  ;;  %v4383_v34 = vpack.i.bf16 %v997_v6, %v996_v60  ;;  %v3739_v60 = vld [vmem:[%s6970_s3 + $0x10] sm:$0xff] }
 0x12c   : > { %v2355_v9 = vunpack.c.l.b16 %v2333_v8  ;;  %4374 = vrot.lane.b32.xlu2 %v4373_v3, %s4671_s21 }
 0x12d   : > { %4369 = vrot.lane.b32.xlu1 %v4368_v20, %s4670_s20  ;;  %v5660_v54 = vsel %vm2144_vm4, %v5432_v4, %v4156_v21  ;;  %v5664_v17 = vsel %vm2144_vm4, %v5435_v47, %v4157_v52  ;;  %v1002_v4 = vld [vmem:[#allocation2 + $0xc2] sm:$0xff] }
 0x12e   : > { %v2360_v35 = vpack.c.b16 %v2355_v9, %v2355_v9  ;;  %v5676_v47 = vpop.permute.xlu2 %4209  ;;  %v4388_v27 = vpack.i.bf16 %v1003_v29, %v1002_v4  ;;  %v953_v9 = vld [vmem:[#allocation2 + $0x170] sm:$0xff]  ;;  %v3737_v4 = vld [vmem:[%s6970_s3] sm:$0xff] }
 0x12f   : > { %v4160_v11 = vpop.permute.xlu1 %4159  ;;  %4379 = vrot.lane.b32.xlu0 %v4378_v49, %s4671_s21  ;;  %v979_v49 = vld [vmem:[#allocation2 + $0x129] sm:$0xff] }
 0x130   : > { %v4162_v39 = vunpack.i.h.bf16 %v4160_v11  ;;  %v4161_v30 = vunpack.i.l.bf16 %v4160_v11  ;;  %v2416_v18 = vsel %vm2414_vm5, %v2360_v35, 0  ;;  %v978_v11 = vld [vmem:[#allocation2 + $0x121] sm:$0xff] }
 0x131   : > { %2421 = vmatpush.bf16.msra.mxu0 %v2416_v18  ;;  %3820 = vmatpush.bf16.msra.mxu1 %v2416_v18 }
 0x132   : > { %v5668_v32 = vsel %vm2144_vm4, %v5520_v42, %v4161_v30  ;;  %v5672_v22 = vsel %vm2144_vm4, %v5516_v57, %v4162_v39  ;;  %v3740_v42 = vld [vmem:[%s6970_s3 + $0x18] sm:$0xff]  ;;  %v4170_v28 = vpop.permute.xlu0 %4169  ;;  %3821 = vmatpush.bf16.msra.mxu2 %v2416_v18  ;;  %3822 = vmatpush.bf16.msra.mxu3 %v2416_v18 }
 0x133   : > { %v4172_v57 = vunpack.i.h.bf16 %v4170_v28  ;;  %v4171_v16 = vunpack.i.l.bf16 %v4170_v28  ;;  %v985_v28 = vld [vmem:[#allocation2 + $0x171] sm:$0xff] }
 0x134   : > { %4389 = vrot.lane.b32.xlu2 %v4388_v27, %s4672_s22  ;;  %v1016_v27 = vld [vmem:[#allocation2 + $0x16a] sm:$0xff] }
 0x135   : > { %4384 = vrot.lane.b32.xlu1 %v4383_v34, %s4672_s22  ;;  %2422 = vmatpush.bf16.msra.mxu0 %v3740_v42  ;;  %v5684_v24 = vsel %vm2144_vm4, %v5454_v40, %v4171_v16  ;;  %v5688_v51 = vsel %vm2144_vm4, %v5457_v5, %v4172_v57  ;;  %v946_v40 = vld [vmem:[#allocation2 + $0x120] sm:$0xff]  ;;  %v947_v5 = vld [vmem:[#allocation2 + $0x128] sm:$0xff] }
 0x136   : > { %3823 = vmatpush.bf16.msra.mxu1 %v3740_v42  ;;  %3824 = vmatpush.bf16.msra.mxu2 %v3740_v42  ;;  %v4225_v53 = vpop.permute.xlu2 %4224  ;;  %v4403_v30 = vpack.i.bf16 %v947_v5, %v946_v40  ;;  %v1011_v16 = vld [vmem:[#allocation2 + $0x12a] sm:$0xff] }
 0x137   : > { %v4175_v20 = vpop.permute.xlu1 %4174  ;;  %3825 = vmatpush.bf16.msra.mxu3 %v3740_v42  ;;  %4394 = vrot.lane.b32.xlu0 %v5609_v12, %s4669_s19  ;;  %v4227_v52 = vunpack.i.h.bf16 %v4225_v53  ;;  %v4226_v21 = vunpack.i.l.bf16 %v4225_v53 }
 0x138   : > { %v4177_v7 = vunpack.i.h.bf16 %v4175_v20  ;;  %v4176_v13 = vunpack.i.l.bf16 %v4175_v20  ;;  %v1017_v20 = vld [vmem:[#allocation2 + $0x172] sm:$0xff] }
 0x139   : > { %2423 = vmatpush.bf16.msra.mxu0 %v3739_v60  ;;  %v5717_v35 = vsel %vm2177_vm6, %v5647_v37, %v4227_v52  ;;  %v984_v37 = vld [vmem:[#allocation2 + $0x169] sm:$0xff]  ;;  %v4428_v53 = vpack.i.bf16 %v1017_v20, %v1016_v27  ;;  %v941_v52 = vld [vmem:[#allocation2 + $0xe0] sm:$0xff] }
 0x13a   : > { %v5695_v6 = vsel %vm2144_vm4, %v5548_v58, %v4176_v13  ;;  %v5699_v8 = vsel %vm2144_vm4, %v5544_v61, %v4177_v7  ;;  %v952_v58 = vld [vmem:[#allocation2 + $0x168] sm:$0xff]  ;;  %3826 = vmatpush.bf16.msra.mxu1 %v3739_v60  ;;  %v4185_v3 = vpop.permute.xlu0 %4184  ;;  %3827 = vmatpush.bf16.msra.mxu2 %v3739_v60  ;;  %v4418_v7 = vpack.i.bf16 %v985_v28, %v984_v37 }
 0x13b   : > { %v3738_v61 = vld [vmem:[%s6970_s3 + $0x8] sm:$0xff]  ;;  %3828 = vmatpush.bf16.msra.mxu3 %v3739_v60  ;;  %v4187_v12 = vunpack.i.h.bf16 %v4185_v3  ;;  %v4186_v39 = vunpack.i.l.bf16 %v4185_v3  ;;  %v4408_v18 = vpack.i.bf16 %v953_v9, %v952_v58  ;;  %v972_v3 = vld [vmem:[#allocation2 + $0xd9] sm:$0xff] }
 0x13c   : > { %4404 = vrot.lane.b32.xlu2 %v4403_v30, %s4670_s20 }
 0x13d   : > { %4399 = vrot.lane.b32.xlu1 %v5623_v56, %s4669_s19  ;;  %v5713_v56 = vsel %vm2177_vm6, %v5643_v45, %v4226_v21  ;;  %2424 = vmatpush.bf16.msra.mxu0 %v3738_v61  ;;  %v5724_v29 = vsel %vm2144_vm4, %v5482_v59, %v4186_v39  ;;  %v5728_v42 = vsel %vm2144_vm4, %v5485_v50, %v4187_v12  ;;  %v1010_v59 = vld [vmem:[#allocation2 + $0x122] sm:$0xff] }
 0x13e   : > { %v4413_v45 = vpack.i.bf16 %v979_v49, %v978_v11  ;;  %3829 = vmatpush.bf16.msra.mxu1 %v3738_v61  ;;  %3830 = vmatpush.bf16.msra.mxu2 %v3738_v61  ;;  %v5732_v57 = vpop.permute.xlu2 %4239  ;;  %v4423_v60 = vpack.i.bf16 %v1011_v16, %v1010_v59  ;;  %v973_v11 = vld [vmem:[#allocation2 + $0xe1] sm:$0xff] }
 0x13f   : > { %v5709_v34 = vpop.permute.xlu1 %4189  ;;  %3831 = vmatpush.bf16.msra.mxu3 %v3738_v61  ;;  %4409 = vrot.lane.b32.xlu0 %v4408_v18, %s4670_s20  ;;  %v940_v61 = vld [vmem:[#allocation2 + $0xd8] sm:$0xff]  ;;  %v1005_v12 = vld [vmem:[#allocation2 + $0xe2] sm:$0xff] }
 0x140   : > { %v4433_v39 = vpack.i.bf16 %v941_v52, %v940_v61  ;;  %v4192_v16 = vunpack.i.h.bf16 %v5709_v34  ;;  %v4191_v27 = vunpack.i.l.bf16 %v5709_v34 }
 0x141   : > { %2425 = vmatpush.bf16.msra.mxu0 %v3737_v4 }
 0x142   : > { %3832 = vmatpush.bf16.msra.mxu1 %v3737_v4  ;;  %v5735_v50 = vpop.permute.xlu0 %4199  ;;  %3833 = vmatpush.bf16.msra.mxu2 %v3737_v4  ;;  %v2178_v61 = vsel %vm2177_vm6, %v5577_v44, %v4191_v27  ;;  %v2179_v52 = vsel %vm2177_vm6, %v5573_v25, %v4192_v16  ;;  %v980_v25 = vld [vmem:[#allocation2 + $0x139] sm:$0xff]  ;;  %v981_v44 = vld [vmem:[#allocation2 + $0x141] sm:$0xff] }
 0x143   : > { %3834 = vmatpush.bf16.msra.mxu3 %v3737_v4 }
 0x144   : > { %4419 = vrot.lane.b32.xlu2 %v4418_v7, %s4671_s21  ;;  %v949_v7 = vld [vmem:[#allocation2 + $0x140] sm:$0xff] }
 0x145   : > { %4414 = vrot.lane.b32.xlu1 %v4413_v45, %s4671_s21 }
 0x146   : > { %v5747_v21 = vpop.permute.xlu2 %4254 }
 0x147   : > { %v4205_v13 = vpop.permute.xlu1 %4204  ;;  %4424 = vrot.lane.b32.xlu0 %v4423_v60, %s4672_s22 }
 0x148   : > { %v4207_v40 = vunpack.i.h.bf16 %v4205_v13  ;;  %v4206_v5 = vunpack.i.l.bf16 %v4205_v13 }
 0x14a   : > { %v5739_v58 = vsel %vm2177_vm6, %v5607_v36, %v4206_v5  ;;  %v5743_v9 = vsel %vm2177_vm6, %v5603_v62, %v4207_v40  ;;  %v5750_v49 = vpop.permute.xlu0 %4214  ;;  %v1004_v36 = vld [vmem:[#allocation2 + $0xda] sm:$0xff]  ;;  %v4438_v62 = vpack.i.bf16 %v973_v11, %v972_v3  ;;  %v4242_v3 = vunpack.i.h.bf16 %v5732_v57 }
 0x14b   : > { %v4443_v45 = vpack.i.bf16 %v1005_v12, %v1004_v36  ;;  %v4241_v11 = vunpack.i.l.bf16 %v5732_v57  ;;  %v954_v12 = vld [vmem:[#allocation2 + $0x180] sm:$0xff] }
 0x14c   : > { %4434 = vrot.lane.b32.xlu2 %v4433_v39, %s4670_s20  ;;  %v955_v39 = vld [vmem:[#allocation2 + $0x188] sm:$0xff] }
 0x14d   : > { %4429 = vrot.lane.b32.xlu1 %v4428_v53, %s4672_s22 }
 0x14e   : > { %v5762_v59 = vpop.permute.xlu2 %4269 }
 0x14f   : > { %v4220_v30 = vpop.permute.xlu1 %4219  ;;  %4439 = vrot.lane.b32.xlu0 %v4438_v62, %s4671_s21 }
 0x150   : > { %v4222_v18 = vunpack.i.h.bf16 %v4220_v30  ;;  %v4221_v4 = vunpack.i.l.bf16 %v4220_v30 }
 0x152   : > { %v5754_v37 = vsel %vm2177_vm6, %v5635_v1, %v4221_v4  ;;  %v5758_v28 = vsel %vm2177_vm6, %v5639_v19, %v4222_v18  ;;  %v5767_v20 = vpop.permute.xlu0 %4229  ;;  %v948_v1 = vld [vmem:[#allocation2 + $0x138] sm:$0xff]  ;;  %v986_v18 = vld [vmem:[#allocation2 + $0x181] sm:$0xff]  ;;  %v987_v4 = vld [vmem:[#allocation2 + $0x189] sm:$0xff] }
 0x153   : > { %v4458_v5 = vpack.i.bf16 %v949_v7, %v948_v1  ;;  %v4197_v1 = vunpack.i.h.bf16 %v5652_v38  ;;  %v4196_v7 = vunpack.i.l.bf16 %v5652_v38 }
 0x154   : > { %4449 = vrot.lane.b32.xlu2 %v4423_v60, %s4669_s19 }
 0x155   : > { %4444 = vrot.lane.b32.xlu1 %v4443_v45, %s4672_s22  ;;  %v2181_v38 = vsel %vm2177_vm6, %v5585_v23, %v4197_v1  ;;  %v4212_v23 = vunpack.i.h.bf16 %v5676_v47 }
 0x156   : > { %v5779_v30 = vpop.permute.xlu2 %4284 }
 0x157   : > { %v4235_v13 = vpop.permute.xlu1 %4234  ;;  %4454 = vrot.lane.b32.xlu0 %v4428_v53, %s4669_s19  ;;  %v4463_v53 = vpack.i.bf16 %v955_v39, %v954_v12  ;;  %v1019_v12 = vld [vmem:[#allocation2 + $0x18a] sm:$0xff]  ;;  %v4272_v39 = vunpack.i.h.bf16 %v5762_v59 }
 0x158   : > { %v4237_v40 = vunpack.i.h.bf16 %v4235_v13  ;;  %v4236_v19 = vunpack.i.l.bf16 %v4235_v13  ;;  %v4468_v13 = vpack.i.bf16 %v981_v44, %v980_v25  ;;  %v4271_v25 = vunpack.i.l.bf16 %v5762_v59 }
 0x15a   : > { %v2211_v34 = vsel %vm2210_vm7, %v2178_v61, %v4236_v19  ;;  %v2212_v36 = vsel %vm2210_vm7, %v2179_v52, %v4237_v40  ;;  %v4245_v62 = vpop.permute.xlu0 %4244 }
 0x15b   : > { %v2244_v57 = vsel %vm2243_vm8, %v2211_v34, %v4241_v11  ;;  %v2245_v60 = vsel %vm2243_vm8, %v2212_v36, %v4242_v3  ;;  %v4247_v45 = vunpack.i.h.bf16 %v4245_v62  ;;  %v4246_v16 = vunpack.i.l.bf16 %v4245_v62  ;;  %v1018_v36 = vld [vmem:[#allocation2 + $0x182] sm:$0xff] }
 0x15c   : > { %4464 = vrot.lane.b32.xlu2 %v4463_v53, %s4670_s20  ;;  %v2180_v11 = vsel %vm2177_vm6, %v5581_v63, %v4196_v7 }
 0x15d   : > { %4459 = vrot.lane.b32.xlu1 %v4458_v5, %s4670_s20  ;;  %v2277_v40 = vsel %vm2276_vm9, %v2244_v57, %v4246_v16  ;;  %v2278_v19 = vsel %vm2276_vm9, %v2245_v60, %v4247_v45  ;;  %v4473_v5 = vpack.i.bf16 %v987_v4, %v986_v18  ;;  %v4211_v4 = vunpack.i.l.bf16 %v5676_v47 }
 0x15e   : > { %v2309_v3 = vpack.c.bf16 %v2278_v19, %v2277_v40  ;;  %v5795_v34 = vpop.permute.xlu2 %4299  ;;  %v4483_v45 = vpack.i.bf16 %v1019_v12, %v1018_v36  ;;  %v4257_v16 = vunpack.i.h.bf16 %v5747_v21  ;;  %v989_v36 = vld [vmem:[#allocation2 + $0x1a1] sm:$0xff] }
 0x15f   : > { %v4250_v27 = vpop.permute.xlu1 %4249  ;;  %4469 = vrot.lane.b32.xlu0 %v4468_v13, %s4671_s21  ;;  %v2186_v47 = vsel %vm2177_vm6, %v5613_v14, %v4211_v4  ;;  %v4232_v14 = vunpack.i.h.bf16 %v5767_v20 }
 0x160   : > { %v4252_v61 = vunpack.i.h.bf16 %v4250_v27  ;;  %v4251_v52 = vunpack.i.l.bf16 %v4250_v27  ;;  %3714 = vmatmul.msk.bf16.vlgmr.msra.gmra.mxu0 %vm2365_vm10, %v2309_v3  ;;  %v4256_v27 = vunpack.i.l.bf16 %v5747_v21  ;;  %v2187_v21 = vsel %vm2177_vm6, %v5617_v43, %v4212_v23 }
 0x161   : > { %v2220_v3 = vsel %vm2210_vm7, %v2187_v21, %v4257_v16 }
 0x162   : > { %v2213_v44 = vsel %vm2210_vm7, %v2180_v11, %v4251_v52  ;;  %v2214_v62 = vsel %vm2210_vm7, %v2181_v38, %v4252_v61  ;;  %v4260_v57 = vpop.permute.xlu0 %4259  ;;  %v957_v61 = vld [vmem:[#allocation2 + $0x1a0] sm:$0xff]  ;;  %v2219_v52 = vsel %vm2210_vm7, %v2186_v47, %v4256_v27  ;;  %v4231_v11 = vunpack.i.l.bf16 %v5767_v20 }
 0x163   : > { %v4262_v60 = vunpack.i.h.bf16 %v4260_v57  ;;  %v4261_v63 = vunpack.i.l.bf16 %v4260_v57 }
 0x164   : > { %4479 = vrot.lane.b32.xlu2 %v5561_v10, %s4672_s22  ;;  %v988_v10 = vld [vmem:[#allocation2 + $0x199] sm:$0xff] }
 0x165   : > { %4474 = vrot.lane.b32.xlu1 %v4473_v5, %s4671_s21  ;;  %v2246_v53 = vsel %vm2243_vm8, %v2213_v44, %v4261_v63  ;;  %v2247_v59 = vsel %vm2243_vm8, %v2214_v62, %v4262_v60  ;;  %v956_v5 = vld [vmem:[#allocation2 + $0x198] sm:$0xff]  ;;  %v1021_v44 = vld [vmem:[#allocation2 + $0x1a2] sm:$0xff]  ;;  %v4498_v4 = vpack.i.bf16 %v989_v36, %v988_v10 }
 0x166   : > { %v2279_v13 = vsel %vm2276_vm9, %v2246_v53, %v4271_v25  ;;  %v2280_v40 = vsel %vm2276_vm9, %v2247_v59, %v4272_v39  ;;  %v5820_v38 = vpop.permute.xlu2 %4314  ;;  %v1020_v25 = vld [vmem:[#allocation2 + $0x19a] sm:$0xff]  ;;  %v4493_v63 = vpack.i.bf16 %v957_v61, %v956_v5  ;;  %v2195_v53 = vsel %vm2177_vm6, %v5569_v33, %v4232_v14 }
 0x167   : > { %v4265_v18 = vpop.permute.xlu1 %4264  ;;  %v2310_v19 = vpack.c.bf16 %v2280_v40, %v2279_v13  ;;  %4484 = vrot.lane.b32.xlu0 %v4483_v45, %s4672_s22  ;;  %v4503_v27 = vpack.i.bf16 %v1021_v44, %v1020_v25  ;;  %v4287_v59 = vunpack.i.h.bf16 %v5779_v30  ;;  %v4317_v25 = vunpack.i.h.bf16 %v5820_v38 }
 0x168   : > { %v4267_v1 = vunpack.i.h.bf16 %v4265_v18  ;;  %v4266_v7 = vunpack.i.l.bf16 %v4265_v18 }
 0x16a   : > { %v2252_v43 = vsel %vm2243_vm8, %v2219_v52, %v4266_v7  ;;  %v2253_v12 = vsel %vm2243_vm8, %v2220_v3, %v4267_v1  ;;  %v4275_v39 = vpop.permute.xlu0 %4274  ;;  %v4286_v1 = vunpack.i.l.bf16 %v5779_v30  ;;  %v4202_v52 = vunpack.i.h.bf16 %v5735_v50 }
 0x16b   : > { %v4277_v62 = vunpack.i.h.bf16 %v4275_v39  ;;  %v4276_v57 = vunpack.i.l.bf16 %v4275_v39  ;;  %v4201_v3 = vunpack.i.l.bf16 %v5735_v50  ;;  %v4316_v50 = vunpack.i.l.bf16 %v5820_v38 }
 0x16c   : > { %4494 = vrot.lane.b32.xlu2 %v4493_v63, %s4670_s20  ;;  %s3697_s20 = sshll.u32 %s7030_s26, 1 }
 0x16d   : > { %4489 = vrot.lane.b32.xlu1 %v4483_v45, %s4669_s19  ;;  %v2194_v45 = vsel %vm2177_vm6, %v5565_v31, %v4231_v11  ;;  %v2285_v16 = vsel %vm2276_vm9, %v2252_v43, %v4276_v57  ;;  %v2286_v20 = vsel %vm2276_vm9, %v2253_v12, %v4277_v62  ;;  %v2182_v43 = vsel %vm2177_vm6, %v5509_v2, %v4201_v3  ;;  %s488_s23 = scalar_lea.vmem %s6975_s8, %s3697_s20 }
 0x16e   : > { %v2313_v7 = vpack.c.bf16 %v2286_v20, %v2285_v16  ;;  %v5839_v31 = vpop.permute.xlu2 %4329  ;;  %v2183_v12 = vsel %vm2177_vm6, %v5512_v26, %v4202_v52  ;;  %v4216_v2 = vunpack.i.l.bf16 %v5750_v49  ;;  %v4302_v26 = vunpack.i.h.bf16 %v5795_v34 }
 0x16f   : > { %v4280_v60 = vpop.permute.xlu1 %4279  ;;  %4499 = vrot.lane.b32.xlu0 %v4498_v4, %s4671_s21  ;;  %v4301_v4 = vunpack.i.l.bf16 %v5795_v34 }
 0x170   : > { %v4282_v18 = vunpack.i.h.bf16 %v4280_v60  ;;  %v4281_v23 = vunpack.i.l.bf16 %v4280_v60  ;;  %3718 = vmatmul.msk.bf16.vlgmr.msra.gmra.mxu1 %vm2365_vm10, %v2313_v7  ;;  %3715 = vmatmul.msk.bf16.gmra.mxu0 %vm2365_vm10, %v2310_v19 }
 0x172   : > { %v2227_v13 = vsel %vm2210_vm7, %v2194_v45, %v4281_v23  ;;  %v2228_v40 = vsel %vm2210_vm7, %v2195_v53, %v4282_v18  ;;  %v4290_v33 = vpop.permute.xlu0 %4289  ;;  %v4217_v23 = vunpack.i.h.bf16 %v5750_v49 }
 0x173   : > { %v2260_v30 = vsel %vm2243_vm8, %v2227_v13, %v4286_v1  ;;  %v2261_v47 = vsel %vm2243_vm8, %v2228_v40, %v4287_v59  ;;  %v4292_v21 = vunpack.i.h.bf16 %v4290_v33  ;;  %v4291_v5 = vunpack.i.l.bf16 %v4290_v33 }
 0x174   : > { %v2188_v1 = vsel %vm2177_vm6, %v5536_v46, %v4216_v2  ;;  %v2189_v49 = vsel %vm2177_vm6, %v5540_v55, %v4217_v23 }
 0x175   : > { %4504 = vrot.lane.b32.xlu1 %v4503_v27, %s4672_s22  ;;  %v2293_v11 = vsel %vm2276_vm9, %v2260_v30, %v4291_v5  ;;  %v2294_v10 = vsel %vm2276_vm9, %v2261_v47, %v4292_v21  ;;  %v2221_v7 = vsel %vm2210_vm7, %v2188_v1, %v4301_v4  ;;  %v2222_v34 = vsel %vm2210_vm7, %v2189_v49, %v4302_v26 }
 0x176   : > { %v2317_v14 = vpack.c.bf16 %v2294_v10, %v2293_v11  ;;  %v5854_v39 = vpop.permute.xlu2 %4344 }
 0x177   : > { %v4295_v61 = vpop.permute.xlu1 %4294 }
 0x178   : > { %v4297_v36 = vunpack.i.h.bf16 %v4295_v61  ;;  %v4296_v19 = vunpack.i.l.bf16 %v4295_v61  ;;  %3722 = vmatmul.msk.bf16.vlgmr.msra.gmra.mxu2 %vm2365_vm10, %v2317_v14  ;;  %v4331_v14 = vunpack.i.l.bf16 %v5839_v31 }
 0x17a   : > { %v2215_v44 = vsel %vm2210_vm7, %v2182_v43, %v4296_v19  ;;  %v2216_v62 = vsel %vm2210_vm7, %v2183_v12, %v4297_v36  ;;  %v4305_v57 = vpop.permute.xlu0 %4304  ;;  %v4332_v19 = vunpack.i.h.bf16 %v5839_v31  ;;  %v4346_v31 = vunpack.i.l.bf16 %v5854_v39 }
 0x17b   : > { %v4307_v60 = vunpack.i.h.bf16 %v4305_v57  ;;  %v4306_v63 = vunpack.i.l.bf16 %v4305_v57  ;;  %v2202_v57 = vsel %vm2177_vm6, %v5684_v24, %v4331_v14 }
 0x17d   : > { %v2248_v45 = vsel %vm2243_vm8, %v2215_v44, %v4306_v63  ;;  %v2249_v38 = vsel %vm2243_vm8, %v2216_v62, %v4307_v60  ;;  %v2203_v60 = vsel %vm2177_vm6, %v5688_v51, %v4332_v19  ;;  %v4347_v63 = vunpack.i.h.bf16 %v5854_v39 }
 0x17e   : > { %v2281_v27 = vsel %vm2276_vm9, %v2248_v45, %v4316_v50  ;;  %v2282_v53 = vsel %vm2276_vm9, %v2249_v38, %v4317_v25  ;;  %v4360_v13 = vpop.permute.xlu2 %4359 }
 0x17f   : > { %v4310_v18 = vpop.permute.xlu1 %4309  ;;  %v2311_v59 = vpack.c.bf16 %v2282_v53, %v2281_v27  ;;  %v4361_v23 = vunpack.i.l.bf16 %v4360_v13 }
 0x180   : > { %v4312_v16 = vunpack.i.h.bf16 %v4310_v18  ;;  %v4311_v20 = vunpack.i.l.bf16 %v4310_v18  ;;  %v4362_v18 = vunpack.i.h.bf16 %v4360_v13 }
 0x181   : > { %3716 = vmatmul.msk.bf16.gmra.mxu0 %vm2365_vm10, %v2311_v59 }
 0x182   : > { %v2254_v40 = vsel %vm2243_vm8, %v2221_v7, %v4311_v20  ;;  %v2255_v33 = vsel %vm2243_vm8, %v2222_v34, %v4312_v16  ;;  %v4320_v30 = vpop.permute.xlu0 %4319 }
 0x183   : > { %v4322_v47 = vunpack.i.h.bf16 %v4320_v30  ;;  %v4321_v21 = vunpack.i.l.bf16 %v4320_v30 }
 0x185   : > { %v2287_v46 = vsel %vm2276_vm9, %v2254_v40, %v4321_v21  ;;  %v2288_v61 = vsel %vm2276_vm9, %v2255_v33, %v4322_v47 }
 0x186   : > { %v2314_v55 = vpack.c.bf16 %v2288_v61, %v2287_v46  ;;  %v5880_v10 = vpop.permute.xlu2 %4374 }
 0x187   : > { %v4325_v5 = vpop.permute.xlu1 %4324 }
 0x188   : > { %3719 = vmatmul.msk.bf16.gmra.mxu1 %vm2365_vm10, %v2314_v55  ;;  %v4327_v3 = vunpack.i.h.bf16 %v4325_v5  ;;  %v4326_v11 = vunpack.i.l.bf16 %v4325_v5  ;;  %v4377_v55 = vunpack.i.h.bf16 %v5880_v10 }
 0x18a   : > { %v4335_v52 = vpop.permute.xlu0 %4334  ;;  %v2196_v44 = vsel %vm2177_vm6, %v5660_v54, %v4326_v11  ;;  %v2197_v62 = vsel %vm2177_vm6, %v5664_v17, %v4327_v3 }
 0x18b   : > { %v4337_v43 = vunpack.i.h.bf16 %v4335_v52  ;;  %v4336_v12 = vunpack.i.l.bf16 %v4335_v52  ;;  %v4376_v52 = vunpack.i.l.bf16 %v5880_v10 }
 0x18d   : > { %v2229_v2 = vsel %vm2210_vm7, %v2196_v44, %v4336_v12  ;;  %v2230_v26 = vsel %vm2210_vm7, %v2197_v62, %v4337_v43 }
 0x18e   : > { %v4390_v20 = vpop.permute.xlu2 %4389  ;;  %v2262_v53 = vsel %vm2243_vm8, %v2229_v2, %v4346_v31  ;;  %v2263_v59 = vsel %vm2243_vm8, %v2230_v26, %v4347_v63 }
 0x18f   : > { %v4340_v36 = vpop.permute.xlu1 %4339  ;;  %v4392_v3 = vunpack.i.h.bf16 %v4390_v20  ;;  %v4391_v11 = vunpack.i.l.bf16 %v4390_v20 }
 0x190   : > { %v4342_v25 = vunpack.i.h.bf16 %v4340_v36  ;;  %v4341_v50 = vunpack.i.l.bf16 %v4340_v36 }
 0x192   : > { %v2235_v54 = vsel %vm2210_vm7, %v2202_v57, %v4341_v50  ;;  %v2236_v17 = vsel %vm2210_vm7, %v2203_v60, %v4342_v25  ;;  %v4350_v4 = vpop.permute.xlu0 %4349 }
 0x193   : > { %v4352_v45 = vunpack.i.h.bf16 %v4350_v4  ;;  %v4351_v24 = vunpack.i.l.bf16 %v4350_v4 }
 0x195   : > { %v2268_v27 = vsel %vm2243_vm8, %v2235_v54, %v4351_v24  ;;  %v2269_v39 = vsel %vm2243_vm8, %v2236_v17, %v4352_v45 }
 0x196   : > { %v2301_v1 = vsel %vm2276_vm9, %v2268_v27, %v4361_v23  ;;  %v2302_v49 = vsel %vm2276_vm9, %v2269_v39, %v4362_v18  ;;  %v4405_v61 = vpop.permute.xlu2 %4404 }
 0x197   : > { %v4355_v38 = vpop.permute.xlu1 %4354  ;;  %v2321_v13 = vpack.c.bf16 %v2302_v49, %v2301_v1  ;;  %v4407_v20 = vunpack.i.h.bf16 %v4405_v61  ;;  %v4406_v27 = vunpack.i.l.bf16 %v4405_v61 }
 0x198   : > { %v4357_v16 = vunpack.i.h.bf16 %v4355_v38  ;;  %v4356_v51 = vunpack.i.l.bf16 %v4355_v38 }
 0x199   : > { %3726 = vmatmul.msk.bf16.vlgmr.msra.gmra.mxu3 %vm2365_vm10, %v2321_v13 }
 0x19a   : > { %v2295_v7 = vsel %vm2276_vm9, %v2262_v53, %v4356_v51  ;;  %v2296_v34 = vsel %vm2276_vm9, %v2263_v59, %v4357_v16  ;;  %v4365_v33 = vpop.permute.xlu0 %4364 }
 0x19b   : > { %v2318_v40 = vpack.c.bf16 %v2296_v34, %v2295_v7  ;;  %v4367_v47 = vunpack.i.h.bf16 %v4365_v33  ;;  %v4366_v21 = vunpack.i.l.bf16 %v4365_v33 }
 0x19d   : > { %3723 = vmatmul.msk.bf16.gmra.mxu2 %vm2365_vm10, %v2318_v40  ;;  %v2217_v36 = vsel %vm2210_vm7, %v5739_v58, %v4366_v21  ;;  %v2218_v19 = vsel %vm2210_vm7, %v5743_v9, %v4367_v47 }
 0x19e   : > { %v2250_v58 = vsel %vm2243_vm8, %v2217_v36, %v4376_v52  ;;  %v2251_v9 = vsel %vm2243_vm8, %v2218_v19, %v4377_v55  ;;  %v4420_v2 = vpop.permute.xlu2 %4419 }
 0x19f   : > { %v4370_v30 = vpop.permute.xlu1 %4369  ;;  %v4422_v40 = vunpack.i.h.bf16 %v4420_v2  ;;  %v4421_v33 = vunpack.i.l.bf16 %v4420_v2 }
 0x1a0   : > { %v4372_v5 = vunpack.i.h.bf16 %v4370_v30  ;;  %v4371_v46 = vunpack.i.l.bf16 %v4370_v30 }
 0x1a2   : > { %v2223_v14 = vsel %vm2210_vm7, %v5754_v37, %v4371_v46  ;;  %v2224_v43 = vsel %vm2210_vm7, %v5758_v28, %v4372_v5  ;;  %v4380_v12 = vpop.permute.xlu0 %4379 }
 0x1a3   : > { %v4382_v25 = vunpack.i.h.bf16 %v4380_v12  ;;  %v4381_v50 = vunpack.i.l.bf16 %v4380_v12 }
 0x1a5   : > { %v2256_v57 = vsel %vm2243_vm8, %v2223_v14, %v4381_v50  ;;  %v2257_v60 = vsel %vm2243_vm8, %v2224_v43, %v4382_v25 }
 0x1a6   : > { %v2289_v63 = vsel %vm2276_vm9, %v2256_v57, %v4391_v11  ;;  %v2290_v37 = vsel %vm2276_vm9, %v2257_v60, %v4392_v3  ;;  %v4435_v24 = vpop.permute.xlu2 %4434 }
 0x1a7   : > { %v4385_v44 = vpop.permute.xlu1 %4384  ;;  %v2315_v18 = vpack.c.bf16 %v2290_v37, %v2289_v63 }
 0x1a8   : > { %v4387_v62 = vunpack.i.h.bf16 %v4385_v44  ;;  %v4386_v10 = vunpack.i.l.bf16 %v4385_v44  ;;  %v4437_v44 = vunpack.i.h.bf16 %v4435_v24 }
 0x1a9   : > { %3720 = vmatmul.msk.bf16.gmra.mxu1 %vm2365_vm10, %v2315_v18 }
 0x1aa   : > { %v2283_v28 = vsel %vm2276_vm9, %v2250_v58, %v4386_v10  ;;  %v2284_v31 = vsel %vm2276_vm9, %v2251_v9, %v4387_v62  ;;  %v4395_v26 = vpop.permute.xlu0 %4394  ;;  %v4436_v62 = vunpack.i.l.bf16 %v4435_v24  ;;  %v2226_v63 = vsel %vm2210_vm7, %v5717_v35, %v4437_v44 }
 0x1ab   : > { %v2312_v23 = vpack.c.bf16 %v2284_v31, %v2283_v28  ;;  %v4397_v17 = vunpack.i.h.bf16 %v4395_v26  ;;  %v4396_v4 = vunpack.i.l.bf16 %v4395_v26 }
 0x1ac   : > { %v2225_v9 = vsel %vm2210_vm7, %v5713_v56, %v4436_v62 }
 0x1ad   : > { %3717 = vmatmul.msk.bf16.gmra.mxu0 %vm2365_vm10, %v2312_v23  ;;  %v2198_v39 = vsel %vm2177_vm6, %v5668_v32, %v4396_v4  ;;  %v2199_v53 = vsel %vm2177_vm6, %v5672_v22, %v4397_v17 }
 0x1ae   : > { %v2231_v30 = vsel %vm2210_vm7, %v2198_v39, %v4406_v27  ;;  %v2232_v47 = vsel %vm2210_vm7, %v2199_v53, %v4407_v20  ;;  %v4450_v3 = vpop.permute.xlu2 %4449 }
 0x1af   : > { %v4400_v54 = vpop.permute.xlu1 %4399  ;;  %v4452_v56 = vunpack.i.h.bf16 %v4450_v3 }
 0x1b0   : > { %v4402_v38 = vunpack.i.h.bf16 %v4400_v54  ;;  %v4401_v16 = vunpack.i.l.bf16 %v4400_v54 }
 0x1b2   : > { %v4410_v45 = vpop.permute.xlu0 %4409  ;;  %v2204_v34 = vsel %vm2177_vm6, %v5695_v6, %v4401_v16  ;;  %v2205_v13 = vsel %vm2177_vm6, %v5699_v8, %v4402_v38 }
 0x1b3   : > { %v4412_v59 = vunpack.i.h.bf16 %v4410_v45  ;;  %v4411_v1 = vunpack.i.l.bf16 %v4410_v45  ;;  %v4451_v45 = vunpack.i.l.bf16 %v4450_v3 }
 0x1b5   : > { %v2237_v32 = vsel %vm2210_vm7, %v2204_v34, %v4411_v1  ;;  %v2238_v22 = vsel %vm2210_vm7, %v2205_v13, %v4412_v59  ;;  %v2200_v16 = vsel %vm2177_vm6, %v5595_v15, %v4451_v45 }
 0x1b6   : > { %v2270_v19 = vsel %vm2243_vm8, %v2237_v32, %v4421_v33  ;;  %v2271_v14 = vsel %vm2243_vm8, %v2238_v22, %v4422_v40  ;;  %v4465_v23 = vpop.permute.xlu2 %4464 }
 0x1b7   : > { %v4415_v51 = vpop.permute.xlu1 %4414  ;;  %v4467_v40 = vunpack.i.h.bf16 %v4465_v23  ;;  %v4466_v33 = vunpack.i.l.bf16 %v4465_v23 }
 0x1b8   : > { %v4417_v49 = vunpack.i.h.bf16 %v4415_v51  ;;  %v4416_v7 = vunpack.i.l.bf16 %v4415_v51  ;;  %v2201_v51 = vsel %vm2177_vm6, %v5599_v0, %v4452_v56 }
 0x1ba   : > { %v2264_v21 = vsel %vm2243_vm8, %v2231_v30, %v4416_v7  ;;  %v2265_v5 = vsel %vm2243_vm8, %v2232_v47, %v4417_v49  ;;  %v4425_v46 = vpop.permute.xlu0 %4424 }
 0x1bb   : > { %v4427_v61 = vunpack.i.h.bf16 %v4425_v46  ;;  %v4426_v6 = vunpack.i.l.bf16 %v4425_v46 }
 0x1bd   : > { %v2297_v11 = vsel %vm2276_vm9, %v2264_v21, %v4426_v6  ;;  %v2298_v36 = vsel %vm2276_vm9, %v2265_v5, %v4427_v61 }
 0x1be   : > { %v2319_v43 = vpack.c.bf16 %v2298_v36, %v2297_v11  ;;  %v4480_v38 = vpop.permute.xlu2 %4479 }
 0x1bf   : > { %v4430_v55 = vpop.permute.xlu1 %4429  ;;  %v4482_v1 = vunpack.i.h.bf16 %v4480_v38  ;;  %v4481_v49 = vunpack.i.l.bf16 %v4480_v38 }
 0x1c0   : > { %v4432_v52 = vunpack.i.h.bf16 %v4430_v55  ;;  %v4431_v8 = vunpack.i.l.bf16 %v4430_v55  ;;  %3724 = vmatmul.msk.bf16.gmra.mxu2 %vm2365_vm10, %v2319_v43 }
 0x1c2   : > { %v2303_v12 = vsel %vm2276_vm9, %v2270_v19, %v4431_v8  ;;  %v2304_v25 = vsel %vm2276_vm9, %v2271_v14, %v4432_v52  ;;  %v4440_v10 = vpop.permute.xlu0 %4439  ;;  %v5981_v52 = vld [vmem:[%s6971_s4] ss:$0 sm:$0xff] }
 0x1c3   : > { %v2322_v50 = vpack.c.bf16 %v2304_v25, %v2303_v12  ;;  %v4442_v57 = vunpack.i.h.bf16 %v4440_v10  ;;  %v4441_v60 = vunpack.i.l.bf16 %v4440_v10 }
 0x1c5   : > { %3727 = vmatmul.msk.bf16.gmra.mxu3 %vm2365_vm10, %v2322_v50  ;;  %v2258_v31 = vsel %vm2243_vm8, %v2225_v9, %v4441_v60  ;;  %v2259_v18 = vsel %vm2243_vm8, %v2226_v63, %v4442_v57 }
 0x1c6   : > { %v4495_v36 = vpop.permute.xlu2 %4494 }
 0x1c7   : > { %v4445_v58 = vpop.permute.xlu1 %4444  ;;  %v4497_v62 = vunpack.i.h.bf16 %v4495_v36  ;;  %v4496_v10 = vunpack.i.l.bf16 %v4495_v36 }
 0x1c8   : > { %v4447_v37 = vunpack.i.h.bf16 %v4445_v58  ;;  %v4446_v28 = vunpack.i.l.bf16 %v4445_v58 }
 0x1ca   : > { %v2291_v2 = vsel %vm2276_vm9, %v2258_v31, %v4446_v28  ;;  %v2292_v26 = vsel %vm2276_vm9, %v2259_v18, %v4447_v37  ;;  %v4455_v17 = vpop.permute.xlu0 %4454 }
 0x1cb   : > { %v2316_v54 = vpack.c.bf16 %v2292_v26, %v2291_v2  ;;  %v4457_v20 = vunpack.i.h.bf16 %v4455_v17  ;;  %v4456_v27 = vunpack.i.l.bf16 %v4455_v17 }
 0x1cd   : > { %3721 = vmatmul.msk.bf16.gmra.mxu1 %vm2365_vm10, %v2316_v54  ;;  %v2206_v15 = vsel %vm2177_vm6, %v5627_v41, %v4456_v27  ;;  %v2207_v0 = vsel %vm2177_vm6, %v5631_v48, %v4457_v20 }
 0x1ce   : > { %v2239_v61 = vsel %vm2210_vm7, %v2206_v15, %v4466_v33  ;;  %v2240_v6 = vsel %vm2210_vm7, %v2207_v0, %v4467_v40 }
 0x1cf   : > { %v4460_v4 = vpop.permute.xlu1 %4459 }
 0x1d0   : > { %v4462_v24 = vunpack.i.h.bf16 %v4460_v4  ;;  %v4461_v35 = vunpack.i.l.bf16 %v4460_v4 }
 0x1d2   : > { %v2233_v39 = vsel %vm2210_vm7, %v2200_v16, %v4461_v35  ;;  %v2234_v53 = vsel %vm2210_vm7, %v2201_v51, %v4462_v24  ;;  %v4470_v59 = vpop.permute.xlu0 %4469 }
 0x1d3   : > { %v4472_v7 = vunpack.i.h.bf16 %v4470_v59  ;;  %v4471_v34 = vunpack.i.l.bf16 %v4470_v59 }
 0x1d5   : > { %v2266_v30 = vsel %vm2243_vm8, %v2233_v39, %v4471_v34  ;;  %v2267_v47 = vsel %vm2243_vm8, %v2234_v53, %v4472_v7 }
 0x1d6   : > { %v2299_v21 = vsel %vm2276_vm9, %v2266_v30, %v4481_v49  ;;  %v2300_v5 = vsel %vm2276_vm9, %v2267_v47, %v4482_v1 }
 0x1d7   : > { %v4475_v13 = vpop.permute.xlu1 %4474  ;;  %v2320_v46 = vpack.c.bf16 %v2300_v5, %v2299_v21 }
 0x1d8   : > { %v4477_v32 = vunpack.i.h.bf16 %v4475_v13  ;;  %v4476_v22 = vunpack.i.l.bf16 %v4475_v13 }
 0x1d9   : > { %3725 = vmatmul.msk.bf16.gmra.mxu2 %vm2365_vm10, %v2320_v46 }
 0x1da   : > { %v2272_v41 = vsel %vm2243_vm8, %v2239_v61, %v4476_v22  ;;  %v2273_v48 = vsel %vm2243_vm8, %v2240_v6, %v4477_v32  ;;  %v4485_v55 = vpop.permute.xlu0 %4484 }
 0x1db   : > { %v4487_v8 = vunpack.i.h.bf16 %v4485_v55  ;;  %v4486_v3 = vunpack.i.l.bf16 %v4485_v55 }
 0x1dd   : > { %v2427_v43 = vpop.f32.mrf.mxu0  ;;  %v2305_v12 = vsel %vm2276_vm9, %v2272_v41, %v4486_v3  ;;  %v2306_v25 = vsel %vm2276_vm9, %v2273_v48, %v4487_v8 }
 0x1de   : > { %v5986_v50 = vadd.f32 %v5981_v52, %v2427_v43  ;;  %v2323_v44 = vpack.c.bf16 %v2306_v25, %v2305_v12 }
 0x1df   : > { %v4490_v11 = vpop.permute.xlu1 %4489 }
 0x1e0   : > { %v4492_v19 = vunpack.i.h.bf16 %v4490_v11  ;;  %v4491_v14 = vunpack.i.l.bf16 %v4490_v11  ;;  %v2507_v58 = vmin.f32 %v5986_v50, 20.0  ;;  %3728 = vmatmul.msk.bf16.gmra.mxu3 %vm2365_vm10, %v2323_v44  ;;  %vm3211_vm15 = vcmp.gt.f32.partialorder %v5986_v50, 20.0 }
 0x1e2   : > { %v2208_v57 = vsel %vm2177_vm6, %v5724_v29, %v4491_v14  ;;  %v2209_v60 = vsel %vm2177_vm6, %v5728_v42, %v4492_v19  ;;  %v2539_v9 = vmul.f32 1.442695, %v2507_v58  ;;  %v4500_v28 = vpop.permute.xlu0 %4499 }
 0x1e3   : > { %v2241_v63 = vsel %vm2210_vm7, %v2208_v57, %v4496_v10  ;;  %v2242_v37 = vsel %vm2210_vm7, %v2209_v60, %v4497_v62  ;;  %v4502_v31 = vunpack.i.h.bf16 %v4500_v28  ;;  %v4501_v18 = vunpack.i.l.bf16 %v4500_v28 }
 0x1e4   : > { %4511 = vpow2.f32 %v2539_v9 }
 0x1e5   : > { %v2274_v29 = vsel %vm2243_vm8, %v2241_v63, %v4501_v18  ;;  %v2275_v42 = vsel %vm2243_vm8, %v2242_v37, %v4502_v31  ;;  %v2429_v54 = vpop.f32.mrf.mxu0 }
 0x1e6   : > { %v5999_v17 = vadd.f32 %v5981_v52, %v2429_v54 }
 0x1e7   : > { %v4505_v23 = vpop.permute.xlu1 %4504 }
 0x1e8   : > { %v4507_v2 = vunpack.i.h.bf16 %v4505_v23  ;;  %v4506_v26 = vunpack.i.l.bf16 %v4505_v23  ;;  %v2508_v24 = vmin.f32 %v5999_v17, 20.0  ;;  %vm3212_vm3 = vcmp.gt.f32.partialorder %v5999_v17, 20.0 }
 0x1ea   : > { %v2307_v4 = vsel %vm2276_vm9, %v2274_v29, %v4506_v26  ;;  %v2308_v56 = vsel %vm2276_vm9, %v2275_v42, %v4507_v2  ;;  %v4512_v35 = vpop.eup %4511  ;;  %v2541_v38 = vmul.f32 1.442695, %v2508_v24 }
 0x1eb   : > { %v2324_v45 = vpack.c.bf16 %v2308_v56, %v2307_v4  ;;  %v2603_v16 = vadd.f32 2.0, %v4512_v35 }
 0x1ec   : > { %4513 = vpow2.f32 %v2541_v38 }
 0x1ed   : > { %v2635_v51 = vmul.f32 %v4512_v35, %v2603_v16  ;;  %v2447_v20 = vpop.f32.mrf.mxu1  ;;  %v2432_v39 = vpop.f32.mrf.mxu0 }
 0x1ee   : > { %v6005_v27 = vadd.f32 %v5981_v52, %v2447_v20  ;;  %v6008_v59 = vadd.f32 %v5981_v52, %v2432_v39 }
 0x1ef   : > { %v2699_v53 = vadd.f32 2.0, %v2635_v51  ;;  %v2667_v10 = vmul.f32 %v2635_v51, %v5986_v50 }
 0x1f0   : > { %v2515_v1 = vmin.f32 %v6005_v27, 20.0  ;;  %3729 = vmatmul.msk.bf16.gmra.mxu3 %vm2365_vm10, %v2324_v45  ;;  %v2509_v34 = vmin.f32 %v6008_v59, 20.0  ;;  %vm3219_vm10 = vcmp.gt.f32.partialorder %v6005_v27, 20.0 }
 0x1f1   : > { %4515 = vrcp.f32 %v2699_v53  ;;  %v2740_v48 = vand.u32 2147483647, %v2699_v53  ;;  %v2742_v55 = vand.u32 2147483648, %v2699_v53  ;;  %vm2736_vm12 = vweird.f32 %v2699_v53 }
 0x1f2   : > { %v4514_v49 = vpop.eup %4513  ;;  %v2555_v7 = vmul.f32 1.442695, %v2515_v1  ;;  %v2543_v40 = vmul.f32 1.442695, %v2509_v34 }
 0x1f3   : > { %v2604_v13 = vadd.f32 2.0, %v4514_v49  ;;  %v2743_v57 = vor.u32 1.1754944e-38, %v2742_v55  ;;  %vm2741_vm14 = vcmp.eq.f32.partialorder %v2740_v48, 8.507059e+37 }
 0x1f4   : > { %4517 = vpow2.f32 %v2555_v7 }
 0x1f5   : > { %v6013_v33 = vmul.f32 %v4514_v49, %v2604_v13  ;;  %v2449_v15 = vpop.f32.mrf.mxu1  ;;  %4519 = vpow2.f32 %v2543_v40  ;;  %v2434_v30 = vpop.f32.mrf.mxu0 }
 0x1f6   : > { %v6016_v0 = vadd.f32 %v5981_v52, %v2449_v15  ;;  %v6022_v22 = vadd.f32 %v5981_v52, %v2434_v30 }
 0x1f7   : > { %v4516_v47 = vpop.eup %4515  ;;  %v6019_v32 = vadd.f32 2.0, %v6013_v33  ;;  %v2668_v51 = vmul.f32 %v6013_v33, %v5999_v17 }
 0x1f8   : > { %v2732_v21 = vmul.f32 %v4516_v47, %v2699_v53  ;;  %v2516_v5 = vmin.f32 %v6016_v0, 20.0  ;;  %v2510_v41 = vmin.f32 %v6022_v22, 20.0  ;;  %vm2737_vm11 = vweird.f32 %v4516_v47 }
 0x1f9   : > { %4521 = vrcp.f32 %v6019_v32  ;;  %vm2738_vm13 = vmor %vm2736_vm12, %vm2737_vm11  ;;  %v2755_v2 = vand.u32 2147483647, %v6019_v32  ;;  %v2757_v29 = vand.u32 2147483648, %v6019_v32  ;;  %vm2751_vm5 = vweird.f32 %v6019_v32 }
 0x1fa   : > { %v4518_v46 = vpop.eup %4517  ;;  %v2733_v61 = vsub.f32 1.0, %v2732_v21  ;;  %v2557_v6 = vmul.f32 1.442695, %v2516_v5  ;;  %v2545_v19 = vmul.f32 1.442695, %v2510_v41 }
 0x1fb   : > { %v2611_v8 = vadd.f32 2.0, %v4518_v46  ;;  %v2467_v3 = vpop.f32.mrf.mxu2  ;;  %v4520_v11 = vpop.eup %4519  ;;  %vm2756_vm6 = vcmp.eq.f32.partialorder %v2755_v2, 8.507059e+37  ;;  %v2758_v39 = vor.u32 1.1754944e-38, %v2757_v29 }
 0x1fc   : > { %v2734_v36 = vmul.f32 %v4516_v47, %v2733_v61  ;;  %4523 = vpow2.f32 %v2557_v6  ;;  %v6028_v14 = vadd.f32 %v5981_v52, %v2467_v3  ;;  %v2605_v12 = vadd.f32 2.0, %v4520_v11 }
 0x1fd   : > { %v2643_v43 = vmul.f32 %v4518_v46, %v2611_v8  ;;  %4525 = vpow2.f32 %v2545_v19 }
 0x1fe   : > { %v2735_v25 = vadd.f32 %v4516_v47, %v2734_v36  ;;  %v2523_v44 = vmin.f32 %v6028_v14, 20.0  ;;  %v6035_v58 = vmul.f32 %v4520_v11, %v2605_v12  ;;  %v2437_v26 = vpop.f32.mrf.mxu0 }
 0x1ff   : > { %v4522_v62 = vpop.eup %4521  ;;  %v6033_v60 = vadd.f32 2.0, %v2643_v43  ;;  %v6058_v16 = vadd.f32 %v5981_v52, %v2437_v26  ;;  %v2675_v53 = vmul.f32 %v2643_v43, %v6005_v27 }
 0x200   : > { %v2739_v9 = vsel %vm2738_vm13, %v4516_v47, %v2735_v25  ;;  %v2747_v63 = vmul.f32 %v4522_v62, %v6019_v32  ;;  %v2571_v37 = vmul.f32 1.442695, %v2523_v44  ;;  %v6044_v42 = vadd.f32 2.0, %v6035_v58 }
 0x201   : > { %v2744_v28 = vsel %vm2741_vm14, %v2743_v57, %v2739_v9  ;;  %4527 = vrcp.f32 %v6033_v60  ;;  %vm2752_vm4 = vweird.f32 %v4522_v62  ;;  %v2860_v24 = vand.u32 2147483647, %v6033_v60 }
 0x202   : > { %v4524_v31 = vpop.eup %4523  ;;  %v2745_v18 = vmul.f32 %v2744_v28, %v2667_v10  ;;  %v2748_v23 = vsub.f32 1.0, %v2747_v63  ;;  %4529 = vpow2.f32 %v2571_v37  ;;  %v2862_v38 = vand.u32 2147483648, %v6033_v60  ;;  %vm2753_vm7 = vmor %vm2751_vm5, %vm2752_vm4 }
 0x203   : > { %v2612_v54 = vadd.f32 2.0, %v4524_v31  ;;  %v4526_v4 = vpop.eup %4525  ;;  %4531 = vrcp.f32 %v6044_v42  ;;  %vm2856_vm8 = vweird.f32 %v6033_v60  ;;  %vm6070_vm9 = vcmp.eq.f32.partialorder %v2860_v24, 8.507059e+37 }
 0x204   : > { %v3243_v56 = vsel %vm3211_vm15, %v5986_v50, %v2745_v18  ;;  %v2749_v45 = vmul.f32 %v4522_v62, %v2748_v23  ;;  %v2606_v49 = vadd.f32 2.0, %v4526_v4  ;;  %v2863_v15 = vor.u32 1.1754944e-38, %v2862_v38 }
 0x205   : > { %v3447_v35 = vpack.c.bf16 %v3243_v56, %v3243_v56  ;;  %v6066_v1 = vmul.f32 %v4524_v31, %v2612_v54  ;;  %v2511_v47 = vmin.f32 %v6058_v16, 20.0  ;;  %v3275_v32 = vsel %vm550_vm0, %v3243_v56, 0.0 }
 0x206   : > { %v2750_v20 = vadd.f32 %v4522_v62, %v2749_v45  ;;  %v3345_v21 = vmul.f32 %v3243_v56, %v3243_v56  ;;  %v2770_v6 = vand.u32 2147483647, %v6044_v42  ;;  %v2638_v41 = vmul.f32 %v4526_v4, %v2606_v49 }
 0x207   : > { %v4528_v50 = vpop.eup %4527  ;;  %3480 = vst.msk [vmem:[%s6051_s18] sm:$0xf] %vm3479_vm2, %v3447_v35  ;;  %v6075_v30 = vadd.f32 2.0, %v6066_v1  ;;  %v2772_v43 = vand.u32 2147483648, %v6044_v42  ;;  %vm3213_vm13 = vcmp.gt.f32.partialorder %v6008_v59, 20.0  ;;  %v2669_v23 = vmul.f32 %v6035_v58, %v6008_v59 }
 0x208   : > { %v2754_v7 = vsel %vm2753_vm7, %v4522_v62, %v2750_v20  ;;  %v2852_v34 = vmul.f32 %v4528_v50, %v6033_v60  ;;  %v4530_v40 = vpop.eup %4529  ;;  %vm2857_vm11 = vweird.f32 %v4528_v50  ;;  %v2547_v62 = vmul.f32 1.442695, %v2511_v47 }
 0x209   : > { %v2759_v33 = vsel %vm2756_vm6, %v2758_v39, %v2754_v7  ;;  %v4532_v61 = vpop.eup %4531  ;;  %4533 = vrcp.f32 %v6075_v30  ;;  %v2619_v48 = vadd.f32 2.0, %v4530_v40  ;;  %v3377_v10 = vsel %vm550_vm0, %v3345_v21, 0.0  ;;  %vm2858_vm12 = vmor %vm2856_vm8, %vm2857_vm11 }
 0x20a   : > { %v2760_v5 = vmul.f32 %v2759_v33, %v2668_v51  ;;  %v2853_v46 = vsub.f32 1.0, %v2852_v34  ;;  %v2762_v3 = vmul.f32 %v4532_v61, %v6044_v42  ;;  %vm2767_vm14 = vweird.f32 %v4532_v61 }
 0x20b   : > { %v6097_v9 = vmul.f32 %v4530_v40, %v2619_v48  ;;  %vm2766_vm15 = vweird.f32 %v6044_v42  ;;  %v2773_v29 = vor.u32 1.1754944e-38, %v2772_v43  ;;  %v2875_v54 = vand.u32 2147483647, %v6075_v30  ;;  %v2469_v40 = vpop.f32.mrf.mxu2 }
 0x20c   : > { %v3244_v55 = vsel %vm3212_vm3, %v5999_v17, %v2760_v5  ;;  %v2854_v8 = vmul.f32 %v4528_v50, %v2853_v46  ;;  %v2763_v44 = vsub.f32 1.0, %v2762_v3  ;;  %v6095_v17 = vadd.f32 2.0, %v2638_v41  ;;  %vm2768_vm3 = vmor %vm2766_vm15, %vm2767_vm14 }
 0x20d   : > { %v3276_v11 = vsel %vm550_vm0, %v3244_v55, 0.0  ;;  %v3346_v36 = vmul.f32 %v3244_v55, %v3244_v55  ;;  %v3448_v19 = vpack.c.bf16 %v3244_v55, %v3244_v55  ;;  %v2877_v4 = vand.u32 2147483648, %v6075_v30 }
 0x20e   : > { %v3277_v12 = vadd.f32 %v3276_v11, %v3275_v32  ;;  %v2855_v25 = vadd.f32 %v4528_v50, %v2854_v8  ;;  %v2764_v28 = vmul.f32 %v4532_v61, %v2763_v44  ;;  %4535 = vrcp.f32 %v6095_v17  ;;  %v2452_v32 = vpop.f32.mrf.mxu1 }
 0x20f   : > { %v3378_v57 = vsel %vm550_vm0, %v3346_v36, 0.0  ;;  %3481 = vst.msk [vmem:[%s6051_s18 + $0x4] sm:$0xf] %vm3479_vm2, %v3448_v19  ;;  %v4534_v31 = vpop.eup %4533  ;;  %4537 = vpow2.f32 %v2547_v62  ;;  %v6109_v56 = vadd.f32 2.0, %v6097_v9  ;;  %vm2771_vm4 = vcmp.eq.f32.partialorder %v2770_v6, 8.507059e+37 }
 0x210   : > { %v3379_v63 = vadd.f32 %v3378_v57, %v3377_v10  ;;  %v2859_v37 = vsel %vm2858_vm12, %v4528_v50, %v2855_v25  ;;  %v2765_v2 = vadd.f32 %v4532_v61, %v2764_v28  ;;  %v2867_v26 = vmul.f32 %v4534_v31, %v6075_v30 }
 0x211   : > { %v2864_v18 = vsel %vm6070_vm9, %v2863_v15, %v2859_v37  ;;  %v2676_v38 = vmul.f32 %v6066_v1, %v6016_v0  ;;  %vm3220_vm5 = vcmp.gt.f32.partialorder %v6016_v0, 20.0  ;;  %vm2872_vm6 = vweird.f32 %v4534_v31 }
 0x212   : > { %v2865_v60 = vmul.f32 %v2864_v18, %v2675_v53  ;;  %v2769_v42 = vsel %vm2768_vm3, %v4532_v61, %v2765_v2  ;;  %v2868_v45 = vsub.f32 1.0, %v2867_v26  ;;  %4539 = vrcp.f32 %v6109_v56 }
 0x213   : > { %v2774_v35 = vsel %vm2771_vm4, %v2773_v29, %v2769_v42  ;;  %vm2871_vm7 = vweird.f32 %v6075_v30  ;;  %vm6125_vm8 = vcmp.eq.f32.partialorder %v2875_v54, 8.507059e+37  ;;  %v2878_v39 = vor.u32 1.1754944e-38, %v2877_v4 }
 0x214   : > { %v6114_v58 = vsel %vm3219_vm10, %v6005_v27, %v2865_v60  ;;  %v2775_v51 = vmul.f32 %v2774_v35, %v2669_v23  ;;  %v2869_v20 = vmul.f32 %v4534_v31, %v2868_v45  ;;  %v4536_v50 = vpop.eup %4535  ;;  %v2670_v53 = vmul.f32 %v2638_v41, %v6022_v22  ;;  %vm2873_vm9 = vmor %vm2871_vm7, %vm2872_vm6  ;;  %v2439_v60 = vpop.f32.mrf.mxu0 }
 0x215   : > { %v3455_v24 = vpack.c.bf16 %v6114_v58, %v6114_v58  ;;  %v4538_v1 = vpop.eup %4537  ;;  %v2777_v34 = vmul.f32 %v4536_v50, %v6095_v17  ;;  %v2785_v13 = vand.u32 2147483647, %v6095_v17  ;;  %v2787_v47 = vand.u32 2147483648, %v6095_v17 }
 0x216   : > { %v3245_v49 = vsel %vm3213_vm13, %v6008_v59, %v2775_v51  ;;  %v2870_v7 = vadd.f32 %v4534_v31, %v2869_v20  ;;  %vm2782_vm10 = vweird.f32 %v4536_v50  ;;  %v2607_v6 = vadd.f32 2.0, %v4538_v1  ;;  %v2454_v45 = vpop.f32.mrf.mxu1 }
 0x217   : > { %3488 = vst.msk [vmem:[%s6051_s18 + $0x20] sm:$0xf] %vm3479_vm2, %v3455_v24  ;;  %v3278_v33 = vsel %vm550_vm0, %v3245_v49, 0.0  ;;  %v3347_v15 = vmul.f32 %v3245_v49, %v3245_v49  ;;  %v3449_v30 = vpack.c.bf16 %v3245_v49, %v3245_v49  ;;  %v2778_v46 = vsub.f32 1.0, %v2777_v34 }
 0x218   : > { %v3279_v21 = vadd.f32 %v3278_v33, %v3277_v12  ;;  %v2874_v5 = vsel %vm2873_vm9, %v4534_v31, %v2870_v7  ;;  %v6144_v41 = vadd.f32 %v5981_v52, %v2469_v40  ;;  %v4540_v48 = vpop.eup %4539  ;;  %v6147_v11 = vadd.f32 %v5981_v52, %v2452_v32 }
 0x219   : > { %v3380_v59 = vsel %vm550_vm0, %v3347_v15, 0.0  ;;  %3482 = vst.msk [vmem:[%s6051_s18 + $0x8] sm:$0xf] %vm3479_vm2, %v3449_v30  ;;  %v2879_v61 = vsel %vm6125_vm8, %v2878_v39, %v2874_v5  ;;  %v2779_v3 = vmul.f32 %v4536_v50, %v2778_v46  ;;  %vm2781_vm11 = vweird.f32 %v6095_v17 }
 0x21a   : > { %v3381_v55 = vadd.f32 %v3380_v59, %v3379_v63  ;;  %v2880_v8 = vmul.f32 %v2879_v61, %v2676_v38  ;;  %v2972_v36 = vmul.f32 %v4540_v48, %v6109_v56  ;;  %v6151_v19 = vmul.f32 %v4538_v1, %v2607_v6  ;;  %vm2783_vm13 = vmor %vm2781_vm11, %vm2782_vm10 }
 0x21b   : > { %v2524_v43 = vmin.f32 %v6144_v41, 20.0  ;;  %v2780_v25 = vadd.f32 %v4536_v50, %v2779_v3  ;;  %vm2786_vm12 = vcmp.eq.f32.partialorder %v2785_v13, 8.507059e+37  ;;  %v2517_v44 = vmin.f32 %v6147_v11, 20.0 }
 0x21c   : > { %v6157_v12 = vsel %vm3220_vm5, %v6016_v0, %v2880_v8  ;;  %v2788_v10 = vor.u32 1.1754944e-38, %v2787_v47  ;;  %v2973_v57 = vsub.f32 1.0, %v2972_v36  ;;  %v2980_v17 = vand.u32 2147483647, %v6109_v56  ;;  %v2487_v51 = vpop.f32.mrf.mxu3 }
 0x21d   : > { %v3456_v62 = vpack.c.bf16 %v6157_v12, %v6157_v12  ;;  %v2784_v63 = vsel %vm2783_vm13, %v4536_v50, %v2780_v25  ;;  %v2982_v37 = vand.u32 2147483648, %v6109_v56  ;;  %v6166_v28 = vadd.f32 2.0, %v6151_v19 }
 0x21e   : > { %v2573_v0 = vmul.f32 1.442695, %v2524_v43  ;;  %v2789_v31 = vsel %vm2786_vm12, %v2788_v10, %v2784_v63  ;;  %v2974_v18 = vmul.f32 %v4540_v48, %v2973_v57  ;;  %vm2977_vm14 = vweird.f32 %v4540_v48 }
 0x21f   : > { %3489 = vst.msk [vmem:[%s6051_s18 + $0x24] sm:$0xf] %vm3479_vm2, %v3456_v62  ;;  %v2559_v23 = vmul.f32 1.442695, %v2517_v44  ;;  %v2790_v2 = vmul.f32 %v2789_v31, %v2670_v53  ;;  %vm3214_vm15 = vcmp.gt.f32.partialorder %v6022_v22, 20.0  ;;  %v2683_v26 = vmul.f32 %v6097_v9, %v6028_v14 }
 0x220   : > { %4541 = vrcp.f32 %v6166_v28  ;;  %v2975_v29 = vadd.f32 %v4540_v48, %v2974_v18  ;;  %vm2976_vm3 = vweird.f32 %v6109_v56  ;;  %vm2981_vm4 = vcmp.eq.f32.partialorder %v2980_v17, 8.507059e+37  ;;  %v2472_v25 = vpop.f32.mrf.mxu2 }
 0x221   : > { %4543 = vpow2.f32 %v2573_v0  ;;  %v3246_v54 = vsel %vm3214_vm15, %v6022_v22, %v2790_v2  ;;  %vm2978_vm5 = vmor %vm2976_vm3, %vm2977_vm14  ;;  %v2983_v4 = vor.u32 1.1754944e-38, %v2982_v37  ;;  %v6177_v42 = vadd.f32 %v5981_v52, %v2439_v60 }
 0x222   : > { %4545 = vpow2.f32 %v2559_v23  ;;  %v3280_v24 = vsel %vm550_vm0, %v3246_v54, 0.0  ;;  %v3348_v9 = vmul.f32 %v3246_v54, %v3246_v54  ;;  %v3450_v35 = vpack.c.bf16 %v3246_v54, %v3246_v54 }
 0x223   : > { %v2979_v38 = vsel %vm2978_vm5, %v4540_v48, %v2975_v29  ;;  %v6180_v20 = vadd.f32 %v3280_v24, %v3279_v21  ;;  %v2512_v50 = vmin.f32 %v6177_v42, 20.0  ;;  %v6187_v39 = vadd.f32 %v5981_v52, %v2454_v45 }
 0x224   : > { %v2984_v56 = vsel %vm2981_vm4, %v2983_v4, %v2979_v38  ;;  %v3382_v22 = vsel %vm550_vm0, %v3348_v9, 0.0  ;;  %3483 = vst.msk [vmem:[%s6051_s18 + $0xc] sm:$0xf] %vm3479_vm2, %v3450_v35  ;;  %vm3227_vm6 = vcmp.gt.f32.partialorder %v6028_v14, 20.0  ;;  %v6193_v7 = vadd.f32 %v5981_v52, %v2487_v51  ;;  %v2489_v9 = vpop.f32.mrf.mxu3 }
 0x225   : > { %v2985_v27 = vmul.f32 %v2984_v56, %v2683_v26  ;;  %v6189_v1 = vadd.f32 %v3382_v22, %v3381_v55  ;;  %v2549_v49 = vmul.f32 1.442695, %v2512_v50  ;;  %v2518_v33 = vmin.f32 %v6187_v39, 20.0 }
 0x226   : > { %v4542_v53 = vpop.eup %4541  ;;  %v2800_v46 = vand.u32 2147483647, %v6166_v28  ;;  %v2531_v61 = vmin.f32 %v6193_v7, 20.0  ;;  %vm2796_vm8 = vweird.f32 %v6166_v28  ;;  %v2671_v62 = vmul.f32 %v6151_v19, %v6058_v16 }
 0x227   : > { %v4544_v34 = vpop.eup %4543  ;;  %v6196_v13 = vsel %vm3227_vm6, %v6028_v14, %v2985_v27  ;;  %v2792_v40 = vmul.f32 %v4542_v53, %v6166_v28  ;;  %4547 = vpow2.f32 %v2549_v49  ;;  %v2561_v5 = vmul.f32 1.442695, %v2518_v33 }
 0x228   : > { %v4546_v15 = vpop.eup %4545  ;;  %v3463_v30 = vpack.c.bf16 %v6196_v13, %v6196_v13  ;;  %v2620_v47 = vadd.f32 2.0, %v4544_v34  ;;  %v2802_v14 = vand.u32 2147483648, %v6166_v28  ;;  %vm2797_vm7 = vweird.f32 %v4542_v53 }
 0x229   : > { %v2793_v32 = vsub.f32 1.0, %v2792_v40  ;;  %v2613_v21 = vadd.f32 2.0, %v4546_v15  ;;  %4549 = vpow2.f32 %v2561_v5  ;;  %vm2798_vm9 = vmor %vm2796_vm8, %vm2797_vm7  ;;  %v2587_v43 = vmul.f32 1.442695, %v2531_v61 }
 0x22a   : > { %3496 = vst.msk [vmem:[%s6051_s18 + $0x40] sm:$0xf] %vm3479_vm2, %v3463_v30  ;;  %v2652_v59 = vmul.f32 %v4544_v34, %v2620_v47  ;;  %v2803_v36 = vor.u32 1.1754944e-38, %v2802_v14  ;;  %vm2801_vm10 = vcmp.eq.f32.partialorder %v2800_v46, 8.507059e+37  ;;  %v6217_v28 = vadd.f32 %v5981_v52, %v2472_v25 }
 0x22b   : > { %v2794_v6 = vmul.f32 %v4542_v53, %v2793_v32  ;;  %v2645_v48 = vmul.f32 %v4546_v15, %v2613_v21  ;;  %vm3215_vm11 = vcmp.gt.f32.partialorder %v6058_v16, 20.0  ;;  %v6251_v40 = vadd.f32 %v5981_v52, %v2489_v9  ;;  %v2457_v21 = vpop.f32.mrf.mxu1 }
 0x22c   : > { %v6207_v55 = vadd.f32 2.0, %v2652_v59  ;;  %v2684_v19 = vmul.f32 %v2652_v59, %v6144_v41  ;;  %vm3228_vm7 = vcmp.gt.f32.partialorder %v6144_v41, 20.0  ;;  %vm3221_vm8 = vcmp.gt.f32.partialorder %v6147_v11, 20.0 }
 0x22d   : > { %v2795_v8 = vadd.f32 %v4542_v53, %v2794_v6  ;;  %v6210_v3 = vadd.f32 2.0, %v2645_v48  ;;  %v4548_v44 = vpop.eup %4547  ;;  %v2677_v15 = vmul.f32 %v2645_v48, %v6147_v11  ;;  %v2532_v14 = vmin.f32 %v6251_v40, 20.0 }
 0x22e   : > { %4551 = vrcp.f32 %v6207_v55  ;;  %v2608_v37 = vadd.f32 2.0, %v4548_v44  ;;  %v2995_v24 = vand.u32 2147483647, %v6207_v55  ;;  %v2997_v38 = vand.u32 2147483648, %v6207_v55 }
 0x22f   : > { %v2799_v10 = vsel %vm2798_vm9, %v4542_v53, %v2795_v8  ;;  %4553 = vrcp.f32 %v6210_v3  ;;  %v4550_v17 = vpop.eup %4549  ;;  %v2890_v22 = vand.u32 2147483647, %v6210_v3  ;;  %v2892_v34 = vand.u32 2147483648, %v6210_v3 }
 0x230   : > { %v2804_v57 = vsel %vm2801_vm10, %v2803_v36, %v2799_v10  ;;  %v2614_v0 = vadd.f32 2.0, %v4550_v17  ;;  %4555 = vpow2.f32 %v2587_v43  ;;  %v6222_v18 = vmul.f32 %v4548_v44, %v2608_v37 }
 0x231   : > { %v2805_v63 = vmul.f32 %v2804_v57, %v2671_v62  ;;  %vm2991_vm13 = vweird.f32 %v6207_v55  ;;  %vm2996_vm15 = vcmp.eq.f32.partialorder %v2995_v24, 8.507059e+37  ;;  %vm2886_vm3 = vweird.f32 %v6210_v3 }
 0x232   : > { %v6225_v29 = vmul.f32 %v4550_v17, %v2614_v0  ;;  %v6239_v56 = vadd.f32 2.0, %v6222_v18  ;;  %v2998_v5 = vor.u32 1.1754944e-38, %v2997_v38  ;;  %vm2891_vm5 = vcmp.eq.f32.partialorder %v2890_v22, 8.507059e+37 }
 0x233   : > { %v3247_v31 = vsel %vm3215_vm11, %v6058_v16, %v2805_v63  ;;  %v2525_v16 = vmin.f32 %v6217_v28, 20.0  ;;  %v2893_v61 = vor.u32 1.1754944e-38, %v2892_v34  ;;  %v2589_v36 = vmul.f32 1.442695, %v2532_v14 }
 0x234   : > { %v4552_v23 = vpop.eup %4551  ;;  %v3282_v60 = vsel %vm550_vm0, %v3247_v31, 0.0  ;;  %v3349_v2 = vmul.f32 %v3247_v31, %v3247_v31  ;;  %v3451_v26 = vpack.c.bf16 %v3247_v31, %v3247_v31  ;;  %v6246_v27 = vadd.f32 2.0, %v6225_v29  ;;  %v2474_v31 = vpop.f32.mrf.mxu2 }
 0x235   : > { %v4554_v54 = vpop.eup %4553  ;;  %v6228_v4 = vadd.f32 %v3282_v60, %v6180_v20  ;;  %v2987_v45 = vmul.f32 %v4552_v23, %v6207_v55  ;;  %4557 = vrcp.f32 %v6239_v56  ;;  %vm2992_vm12 = vweird.f32 %v4552_v23 }
 0x236   : > { %v3384_v35 = vsel %vm550_vm0, %v3349_v2, 0.0  ;;  %3484 = vst.msk [vmem:[%s6051_s18 + $0x10] sm:$0xf] %vm3479_vm2, %v3451_v26  ;;  %v2882_v51 = vmul.f32 %v4554_v54, %v6210_v3  ;;  %v4556_v53 = vpop.eup %4555  ;;  %4559 = vrcp.f32 %v6246_v27  ;;  %vm2887_vm14 = vweird.f32 %v4554_v54  ;;  %vm2993_vm4 = vmor %vm2991_vm13, %vm2992_vm12 }
 0x237   : > { %v6242_v20 = vadd.f32 %v3384_v35, %v6189_v1  ;;  %v2988_v50 = vsub.f32 1.0, %v2987_v45  ;;  %v2575_v1 = vmul.f32 1.442695, %v2525_v16  ;;  %v2627_v32 = vadd.f32 2.0, %v4556_v53  ;;  %vm2888_vm6 = vmor %vm2886_vm3, %vm2887_vm14 }
 0x238   : > { %v2883_v49 = vsub.f32 1.0, %v2882_v51  ;;  %v6261_v3 = vadd.f32 %v5981_v52, %v2457_v21  ;;  %v2817_v57 = vand.u32 2147483648, %v6239_v56  ;;  %vm3216_vm9 = vcmp.gt.f32.partialorder %v6177_v42, 20.0 }
 0x239   : > { %v2989_v33 = vmul.f32 %v4552_v23, %v2988_v50  ;;  %v6258_v6 = vmul.f32 %v4556_v53, %v2627_v32  ;;  %4561 = vpow2.f32 %v2575_v1  ;;  %vm2811_vm11 = vweird.f32 %v6239_v56 }
 0x23a   : > { %v2884_v30 = vmul.f32 %v4554_v54, %v2883_v49  ;;  %4563 = vpow2.f32 %v2589_v36  ;;  %v2519_v60 = vmin.f32 %v6261_v3, 20.0  ;;  %v2818_v16 = vor.u32 1.1754944e-38, %v2817_v57 }
 0x23b   : > { %v2990_v47 = vadd.f32 %v4552_v23, %v2989_v33  ;;  %v4558_v48 = vpop.eup %4557  ;;  %v6272_v0 = vadd.f32 2.0, %v6258_v6  ;;  %v2905_v9 = vand.u32 2147483647, %v6246_v27  ;;  %v2907_v35 = vand.u32 2147483648, %v6246_v27 }
 0x23c   : > { %v2885_v46 = vadd.f32 %v4554_v54, %v2884_v30  ;;  %v4560_v43 = vpop.eup %4559  ;;  %v2807_v62 = vmul.f32 %v4558_v48, %v6239_v56  ;;  %vm2812_vm10 = vweird.f32 %v4558_v48  ;;  %v2563_v50 = vmul.f32 1.442695, %v2519_v60 }
 0x23d   : > { %v2994_v59 = vsel %vm2993_vm4, %v4552_v23, %v2990_v47  ;;  %v2897_v17 = vmul.f32 %v4560_v43, %v6246_v27  ;;  %4565 = vrcp.f32 %v6272_v0  ;;  %vm2813_vm12 = vmor %vm2811_vm11, %vm2812_vm10  ;;  %vm2902_vm13 = vweird.f32 %v4560_v43 }
 0x23e   : > { %v2999_v55 = vsel %vm2996_vm15, %v2998_v5, %v2994_v59  ;;  %v2889_v8 = vsel %vm2888_vm6, %v4554_v54, %v2885_v46  ;;  %v2808_v37 = vsub.f32 1.0, %v2807_v62  ;;  %v2815_v54 = vand.u32 2147483647, %v6239_v56  ;;  %v2442_v5 = vpop.f32.mrf.mxu0 }
 0x23f   : > { %v3000_v25 = vmul.f32 %v2999_v55, %v2684_v19  ;;  %v2894_v44 = vsel %vm2891_vm5, %v2893_v61, %v2889_v8  ;;  %v4562_v2 = vpop.eup %4561  ;;  %v2898_v45 = vsub.f32 1.0, %v2897_v17  ;;  %v2672_v22 = vmul.f32 %v6222_v18, %v6177_v42 }
 0x240   : > { %v2895_v10 = vmul.f32 %v2894_v44, %v2677_v15  ;;  %v2809_v26 = vmul.f32 %v4558_v48, %v2808_v37  ;;  %v2621_v51 = vadd.f32 2.0, %v4562_v2  ;;  %v4564_v56 = vpop.eup %4563  ;;  %vm2816_vm14 = vcmp.eq.f32.partialorder %v2815_v54, 8.507059e+37 }
 0x241   : > { %v6269_v63 = vsel %vm3228_vm7, %v6144_v41, %v3000_v25  ;;  %v2899_v38 = vmul.f32 %v4560_v43, %v2898_v45  ;;  %v2678_v49 = vmul.f32 %v6225_v29, %v6187_v39  ;;  %vm2901_vm15 = vweird.f32 %v6246_v27 }
 0x242   : > { %v3464_v19 = vpack.c.bf16 %v6269_v63, %v6269_v63  ;;  %v6277_v23 = vsel %vm3221_vm8, %v6147_v11, %v2895_v10  ;;  %v6289_v11 = vadd.f32 %v5981_v52, %v2474_v31  ;;  %v2810_v24 = vadd.f32 %v4558_v48, %v2809_v26  ;;  %vm2903_vm3 = vmor %vm2901_vm15, %vm2902_vm13 }
 0x243   : > { %v3457_v41 = vpack.c.bf16 %v6277_v23, %v6277_v23  ;;  %v2900_v33 = vadd.f32 %v4560_v43, %v2899_v38  ;;  %v6300_v1 = vmul.f32 %v4562_v2, %v2621_v51  ;;  %v2908_v30 = vor.u32 1.1754944e-38, %v2907_v35  ;;  %v4566_v32 = vpop.eup %4565  ;;  %v2459_v2 = vpop.f32.mrf.mxu1 }
 0x244   : > { %3497 = vst.msk [vmem:[%s6051_s18 + $0x44] sm:$0xf] %vm3479_vm2, %v3464_v19  ;;  %v2814_v53 = vsel %vm2813_vm12, %v4558_v48, %v2810_v24  ;;  %v2628_v47 = vadd.f32 2.0, %v4564_v56  ;;  %4567 = vpow2.f32 %v2563_v50  ;;  %vm2906_vm4 = vcmp.eq.f32.partialorder %v2905_v9, 8.507059e+37 }
 0x245   : > { %3490 = vst.msk [vmem:[%s6051_s18 + $0x28] sm:$0xf] %vm3479_vm2, %v3457_v41  ;;  %v2819_v34 = vsel %vm2816_vm14, %v2818_v16, %v2814_v53  ;;  %v2904_v21 = vsel %vm2903_vm3, %v4560_v43, %v2900_v33  ;;  %v6303_v18 = vadd.f32 2.0, %v6300_v1  ;;  %v2526_v29 = vmin.f32 %v6289_v11, 20.0 }
 0x246   : > { %v2820_v15 = vmul.f32 %v2819_v34, %v2672_v22  ;;  %v2909_v46 = vsel %vm2906_vm4, %v2908_v30, %v2904_v21  ;;  %vm3222_vm5 = vcmp.gt.f32.partialorder %v6187_v39, 20.0  ;;  %v3092_v14 = vmul.f32 %v4566_v32, %v6272_v0 }
 0x247   : > { %v2910_v55 = vmul.f32 %v2909_v46, %v2678_v49  ;;  %4569 = vrcp.f32 %v6303_v18  ;;  %v6316_v43 = vmul.f32 %v4564_v56, %v2628_v47  ;;  %v2577_v44 = vmul.f32 1.442695, %v2526_v29 }
 0x248   : > { %v3248_v27 = vsel %vm3216_vm9, %v6177_v42, %v2820_v15  ;;  %v3093_v36 = vsub.f32 1.0, %v3092_v14  ;;  %v6325_v62 = vadd.f32 %v5981_v52, %v2442_v5  ;;  %v3100_v17 = vand.u32 2147483647, %v6272_v0 }
 0x249   : > { %v3284_v59 = vsel %vm550_vm0, %v3248_v27, 0.0  ;;  %v3350_v61 = vmul.f32 %v3248_v27, %v3248_v27  ;;  %v3452_v48 = vpack.c.bf16 %v3248_v27, %v3248_v27  ;;  %v6322_v25 = vsel %vm3222_vm5, %v6187_v39, %v2910_v55 }
 0x24a   : > { %v6313_v8 = vadd.f32 %v3284_v59, %v6228_v4  ;;  %v4568_v10 = vpop.eup %4567  ;;  %v3458_v57 = vpack.c.bf16 %v6322_v25, %v6322_v25  ;;  %v3102_v37 = vand.u32 2147483648, %v6272_v0  ;;  %v3094_v31 = vmul.f32 %v4566_v32, %v3093_v36 }
 0x24b   : > { %v3386_v42 = vsel %vm550_vm0, %v3350_v61, 0.0  ;;  %3485 = vst.msk [vmem:[%s6051_s18 + $0x14] sm:$0xf] %vm3479_vm2, %v3452_v48  ;;  %vm3097_vm6 = vweird.f32 %v4566_v32  ;;  %v6336_v39 = vsel %vm550_vm0, %v6114_v58, 0.0  ;;  %v3353_v19 = vmul.f32 %v6114_v58, %v6114_v58 }
 0x24c   : > { %v6328_v4 = vadd.f32 %v3386_v42, %v6242_v20  ;;  %3491 = vst.msk [vmem:[%s6051_s18 + $0x2c] sm:$0xf] %vm3479_vm2, %v3458_v57  ;;  %v6343_v20 = vadd.f32 2.0, %v6316_v43  ;;  %v2615_v60 = vadd.f32 2.0, %v4568_v10  ;;  %v3095_v41 = vadd.f32 %v4566_v32, %v3094_v31 }
 0x24d   : > { %vm3096_vm7 = vweird.f32 %v6272_v0  ;;  %4571 = vpow2.f32 %v2577_v44  ;;  %v2513_v26 = vmin.f32 %v6325_v62, 20.0  ;;  %v4570_v54 = vpop.eup %4569  ;;  %v2691_v45 = vmul.f32 %v6258_v6, %v6193_v7  ;;  %v2444_v0 = vpop.f32.mrf.mxu0 }
 0x24e   : > { %vm3098_vm8 = vmor %vm3096_vm7, %vm3097_vm6  ;;  %vm3101_vm9 = vcmp.eq.f32.partialorder %v3100_v17, 8.507059e+37  ;;  %v3103_v58 = vor.u32 1.1754944e-38, %v3102_v37  ;;  %4573 = vrcp.f32 %v6343_v20  ;;  %v3002_v16 = vmul.f32 %v4570_v54, %v6303_v18 }
 0x24f   : > { %v3099_v24 = vsel %vm3098_vm8, %v4566_v32, %v3095_v41  ;;  %v6351_v9 = vmul.f32 %v4568_v10, %v2615_v60  ;;  %v6354_v35 = vadd.f32 %v5981_v52, %v2459_v2  ;;  %v6357_v38 = vsel %vm550_vm0, %v3353_v19, 0.0 }
 0x250   : > { %v3104_v51 = vsel %vm3101_vm9, %v3103_v58, %v3099_v24  ;;  %v3010_v6 = vand.u32 2147483647, %v6303_v18  ;;  %v2551_v50 = vmul.f32 1.442695, %v2513_v26  ;;  %v3003_v22 = vsub.f32 1.0, %v3002_v16 }
 0x251   : > { %v3105_v56 = vmul.f32 %v3104_v51, %v2691_v45  ;;  %v3012_v53 = vand.u32 2147483648, %v6303_v18  ;;  %v6362_v49 = vadd.f32 2.0, %v6351_v9  ;;  %vm3235_vm10 = vcmp.gt.f32.partialorder %v6193_v7, 20.0 }
 0x252   : > { %vm3007_vm11 = vweird.f32 %v4570_v54  ;;  %4575 = vpow2.f32 %v2551_v50  ;;  %v6366_v34 = vadd.f32 %v5981_v52, %v2444_v0  ;;  %v3004_v30 = vmul.f32 %v4570_v54, %v3003_v22 }
 0x253   : > { %v4572_v33 = vpop.eup %4571  ;;  %v6369_v15 = vsel %vm3235_vm10, %v6193_v7, %v3105_v56  ;;  %4577 = vrcp.f32 %v6362_v49  ;;  %v2520_v47 = vmin.f32 %v6354_v35, 20.0  ;;  %v6375_v21 = vsel %vm550_vm0, %v6157_v12, 0.0  ;;  %v2477_v56 = vpop.f32.mrf.mxu2 }
 0x254   : > { %v4574_v32 = vpop.eup %4573  ;;  %v3354_v29 = vmul.f32 %v6157_v12, %v6157_v12  ;;  %v3471_v52 = vpack.c.bf16 %v6369_v15, %v6369_v15  ;;  %vm3006_vm12 = vweird.f32 %v6303_v18  ;;  %v3005_v7 = vadd.f32 %v4570_v54, %v3004_v30 }
 0x255   : > { %vm3011_vm13 = vcmp.eq.f32.partialorder %v3010_v6, 8.507059e+37  ;;  %v3013_v5 = vor.u32 1.1754944e-38, %v3012_v53  ;;  %v3107_v27 = vmul.f32 %v4574_v32, %v6343_v20  ;;  %v2685_v46 = vmul.f32 %v6300_v1, %v6217_v28  ;;  %vm3008_vm14 = vmor %vm3006_vm12, %vm3007_vm11 }
 0x256   : > { %3504 = vst.msk [vmem:[%s6051_s18 + $0x60] sm:$0xf] %vm3479_vm2, %v3471_v52  ;;  %v3115_v14 = vand.u32 2147483647, %v6343_v20  ;;  %v2622_v12 = vadd.f32 2.0, %v4572_v33  ;;  %v2514_v59 = vmin.f32 %v6366_v34, 20.0  ;;  %v3009_v61 = vsel %vm3008_vm14, %v4570_v54, %v3005_v7 }
 0x257   : > { %v3108_v48 = vsub.f32 1.0, %v3107_v27  ;;  %v3117_v18 = vand.u32 2147483648, %v6343_v20  ;;  %v2565_v55 = vmul.f32 1.442695, %v2520_v47  ;;  %v3014_v42 = vsel %vm3011_vm13, %v3013_v5, %v3009_v61 }
 0x258   : > { %v4576_v36 = vpop.eup %4575  ;;  %vm3112_vm15 = vweird.f32 %v4574_v32  ;;  %v6391_v44 = vmul.f32 %v4572_v33, %v2622_v12  ;;  %v2553_v10 = vmul.f32 1.442695, %v2514_v59  ;;  %v3015_v1 = vmul.f32 %v3014_v42, %v2685_v46 }
 0x259   : > { %v4578_v57 = vpop.eup %4577  ;;  %v3109_v17 = vmul.f32 %v4574_v32, %v3108_v48  ;;  %v2609_v37 = vadd.f32 2.0, %v4576_v36  ;;  %4579 = vpow2.f32 %v2565_v55  ;;  %vm3229_vm3 = vcmp.gt.f32.partialorder %v6217_v28, 20.0 }
 0x25a   : > { %v2692_v31 = vmul.f32 %v6316_v43, %v6251_v40  ;;  %v2912_v19 = vmul.f32 %v4578_v57, %v6362_v49  ;;  %v6398_v60 = vadd.f32 2.0, %v6391_v44  ;;  %v6401_v2 = vsel %vm3229_vm3, %v6217_v28, %v3015_v1 }
 0x25b   : > { %v3110_v41 = vadd.f32 %v4574_v32, %v3109_v17  ;;  %vm3111_vm4 = vweird.f32 %v6343_v20  ;;  %v6404_v26 = vmul.f32 %v4576_v36, %v2609_v37  ;;  %v3465_v54 = vpack.c.bf16 %v6401_v2, %v6401_v2 }
 0x25c   : > { %vm3113_vm5 = vmor %vm3111_vm4, %vm3112_vm15  ;;  %v3118_v43 = vor.u32 1.1754944e-38, %v3117_v18  ;;  %v2913_v45 = vsub.f32 1.0, %v2912_v19  ;;  %4581 = vpow2.f32 %v2553_v10  ;;  %vm3116_vm6 = vcmp.eq.f32.partialorder %v3115_v14, 8.507059e+37 }
 0x25d   : > { %v3114_v58 = vsel %vm3113_vm5, %v4574_v32, %v3110_v41  ;;  %v2922_v24 = vand.u32 2147483648, %v6362_v49  ;;  %4583 = vrcp.f32 %v6398_v60  ;;  %3498 = vst.msk [vmem:[%s6051_s18 + $0x48] sm:$0xf] %vm3479_vm2, %v3465_v54  ;;  %vm2917_vm7 = vweird.f32 %v4578_v57 }
 0x25e   : > { %v3119_v28 = vsel %vm3116_vm6, %v3118_v43, %v3114_v58  ;;  %v2914_v20 = vmul.f32 %v4578_v57, %v2913_v45  ;;  %v2920_v16 = vand.u32 2147483647, %v6362_v49  ;;  %v6415_v51 = vsel %vm550_vm0, %v3354_v29, 0.0 }
 0x25f   : > { %v4580_v0 = vpop.eup %4579  ;;  %v3120_v6 = vmul.f32 %v3119_v28, %v2692_v31  ;;  %vm3236_vm8 = vcmp.gt.f32.partialorder %v6251_v40, 20.0  ;;  %v6419_v50 = vadd.f32 2.0, %v6404_v26  ;;  %v3355_v22 = vmul.f32 %v6277_v23, %v6277_v23  ;;  %v2492_v31 = vpop.f32.mrf.mxu3 }
 0x260   : > { %v2915_v53 = vadd.f32 %v4578_v57, %v2914_v20  ;;  %vm2916_vm9 = vweird.f32 %v6362_v49  ;;  %v2616_v33 = vadd.f32 2.0, %v4580_v0  ;;  %v2679_v47 = vmul.f32 %v6351_v9, %v6261_v3  ;;  %v6435_v49 = vld [vmem:[%s6971_s4] ss:$0 sm:$0xff] }
 0x261   : > { %v6425_v30 = vsel %vm3236_vm8, %v6251_v40, %v3120_v6  ;;  %vm2918_vm10 = vmor %vm2916_vm9, %vm2917_vm7  ;;  %v2923_v32 = vor.u32 1.1754944e-38, %v2922_v24  ;;  %4585 = vrcp.f32 %v6419_v50  ;;  %vm2921_vm11 = vcmp.eq.f32.partialorder %v2920_v16, 8.507059e+37 }
 0x262   : > { %v4582_v29 = vpop.eup %4581  ;;  %v3472_v52 = vpack.c.bf16 %v6425_v30, %v6425_v30  ;;  %v2919_v7 = vsel %vm2918_vm10, %v4578_v57, %v2915_v53  ;;  %v6438_v40 = vadd.f32 %v6435_v49, %v2477_v56  ;;  %v6442_v5 = vmul.f32 %v6196_v13, %v6196_v13 }
 0x263   : > { %v4584_v9 = vpop.eup %4583  ;;  %v2924_v27 = vsel %vm2921_vm11, %v2923_v32, %v2919_v7  ;;  %vm3223_vm12 = vcmp.gt.f32.partialorder %v6261_v3, 20.0  ;;  %v6445_v46 = vmul.f32 %v4580_v0, %v2616_v33  ;;  %v6449_v14 = vmul.f32 %v6269_v63, %v6269_v63  ;;  %v2479_v32 = vpop.f32.mrf.mxu2 }
 0x264   : > { %v6453_v12 = vsel %vm550_vm0, %v6277_v23, 0.0  ;;  %3505 = vst.msk [vmem:[%s6051_s18 + $0x64] sm:$0xf] %vm3479_vm2, %v3472_v52  ;;  %v2925_v59 = vmul.f32 %v2924_v27, %v2679_v47  ;;  %v3017_v61 = vmul.f32 %v4584_v9, %v6398_v60  ;;  %v3025_v48 = vand.u32 2147483647, %v6398_v60 }
 0x265   : > { %v3027_v18 = vand.u32 2147483648, %v6398_v60  ;;  %v6461_v55 = vadd.f32 2.0, %v6445_v46  ;;  %v2610_v36 = vadd.f32 2.0, %v4582_v29  ;;  %v6464_v42 = vsel %vm550_vm0, %v3355_v22, 0.0 }
 0x266   : > { %v6467_v23 = vsel %vm3223_vm12, %v6261_v3, %v2925_v59  ;;  %v3018_v10 = vsub.f32 1.0, %v3017_v61  ;;  %v2527_v57 = vmin.f32 %v6438_v40, 20.0  ;;  %v3356_v17 = vmul.f32 %v6322_v25, %v6322_v25 }
 0x267   : > { %v4586_v1 = vpop.eup %4585  ;;  %v3459_v37 = vpack.c.bf16 %v6467_v23, %v6467_v23  ;;  %vm3230_vm13 = vcmp.gt.f32.partialorder %v6289_v11, 20.0  ;;  %4587 = vrcp.f32 %v6461_v55  ;;  %v2686_v19 = vmul.f32 %v6391_v44, %v6289_v11 }
 0x268   : > { %v3019_v3 = vmul.f32 %v4584_v9, %v3018_v10  ;;  %vm3022_vm14 = vweird.f32 %v4584_v9  ;;  %v2822_v41 = vmul.f32 %v4586_v1, %v6419_v50  ;;  %vm3021_vm15 = vweird.f32 %v6398_v60 }
 0x269   : > { %3492 = vst.msk [vmem:[%s6051_s18 + $0x30] sm:$0xf] %vm3479_vm2, %v3459_v37  ;;  %vm6482_vm3 = vcmp.eq.f32.partialorder %v3025_v48, 8.507059e+37  ;;  %v3028_v43 = vor.u32 1.1754944e-38, %v3027_v18  ;;  %v6486_v45 = vmul.f32 %v4582_v29, %v2610_v36  ;;  %v2579_v28 = vmul.f32 1.442695, %v2527_v57  ;;  %vm3023_vm4 = vmor %vm3021_vm15, %vm3022_vm14 }
 0x26a   : > { %v3020_v58 = vadd.f32 %v4584_v9, %v3019_v3  ;;  %v2823_v24 = vsub.f32 1.0, %v2822_v41  ;;  %v6489_v44 = vadd.f32 %v6435_v49, %v2492_v31  ;;  %vm2827_vm5 = vweird.f32 %v4586_v1 }
 0x26b   : > { %v2830_v20 = vand.u32 2147483647, %v6419_v50  ;;  %v2832_v16 = vand.u32 2147483648, %v6419_v50  ;;  %v6494_v60 = vadd.f32 2.0, %v6486_v45  ;;  %4589 = vpow2.f32 %v2579_v28  ;;  %v2462_v28 = vpop.f32.mrf.mxu1 }
 0x26c   : > { %v3024_v0 = vsel %vm3023_vm4, %v4584_v9, %v3020_v58  ;;  %v2824_v6 = vmul.f32 %v4586_v1, %v2823_v24  ;;  %v2533_v56 = vmin.f32 %v6489_v44, 20.0  ;;  %v6499_v53 = vsel %vm550_vm0, %v6322_v25, 0.0 }
 0x26d   : > { %v4588_v22 = vpop.eup %4587  ;;  %v6502_v33 = vsel %vm550_vm0, %v3356_v17, 0.0  ;;  %v3029_v47 = vsel %vm6482_vm3, %v3028_v43, %v3024_v0  ;;  %4591 = vrcp.f32 %v6494_v60  ;;  %vm2826_vm6 = vweird.f32 %v6419_v50 }
 0x26e   : > { %v3030_v29 = vmul.f32 %v3029_v47, %v2686_v19  ;;  %v2825_v52 = vadd.f32 %v4586_v1, %v2824_v6  ;;  %v2927_v7 = vmul.f32 %v4588_v22, %v6461_v55  ;;  %v2673_v9 = vmul.f32 %v6404_v26, %v6325_v62  ;;  %vm2828_vm7 = vmor %vm2826_vm6, %vm2827_vm5 }
 0x26f   : > { %vm2831_vm8 = vcmp.eq.f32.partialorder %v2830_v20, 8.507059e+37  ;;  %v2833_v25 = vor.u32 1.1754944e-38, %v2832_v16  ;;  %v2591_v27 = vmul.f32 1.442695, %v2533_v56  ;;  %v6518_v50 = vadd.f32 %v6435_v49, %v2479_v32 }
 0x270   : > { %v6515_v59 = vsel %vm3230_vm13, %v6289_v11, %v3030_v29  ;;  %v2829_v61 = vsel %vm2828_vm7, %v4586_v1, %v2825_v52  ;;  %v2928_v48 = vsub.f32 1.0, %v2927_v7  ;;  %v2935_v36 = vand.u32 2147483647, %v6461_v55 }
 0x271   : > { %v3466_v18 = vpack.c.bf16 %v6515_v59, %v6515_v59  ;;  %v2834_v26 = vsel %vm2831_vm8, %v2833_v25, %v2829_v61  ;;  %v2937_v10 = vand.u32 2147483648, %v6461_v55  ;;  %v4590_v57 = vpop.eup %4589  ;;  %vm2932_vm9 = vweird.f32 %v4588_v22 }
 0x272   : > { %v2835_v17 = vmul.f32 %v2834_v26, %v2673_v9  ;;  %v2929_v37 = vmul.f32 %v4588_v22, %v2928_v48  ;;  %4593 = vpow2.f32 %v2591_v27  ;;  %vm3217_vm10 = vcmp.gt.f32.partialorder %v6325_v62, 20.0  ;;  %v2494_v27 = vpop.f32.mrf.mxu3 }
 0x273   : > { %v4592_v11 = vpop.eup %4591  ;;  %3499 = vst.msk [vmem:[%s6051_s18 + $0x4c] sm:$0xf] %vm3479_vm2, %v3466_v18  ;;  %vm3224_vm11 = vcmp.gt.f32.partialorder %v6354_v35, 20.0  ;;  %v2623_v1 = vadd.f32 2.0, %v4590_v57  ;;  %v2528_v31 = vmin.f32 %v6518_v50, 20.0  ;;  %vm2931_vm12 = vweird.f32 %v6461_v55 }
 0x274   : > { %v3249_v19 = vsel %vm3217_vm10, %v6325_v62, %v2835_v17  ;;  %v2930_v3 = vadd.f32 %v4588_v22, %v2929_v37  ;;  %v2837_v41 = vmul.f32 %v4592_v11, %v6494_v60  ;;  %v2680_v43 = vmul.f32 %v6445_v46, %v6354_v35  ;;  %vm2933_vm13 = vmor %vm2931_vm12, %vm2932_vm9 }
 0x275   : > { %v3453_v54 = vpack.c.bf16 %v3249_v19, %v3249_v19  ;;  %v2938_v58 = vor.u32 1.1754944e-38, %v2937_v10  ;;  %v2655_v24 = vmul.f32 %v4590_v57, %v2623_v1  ;;  %vm2936_vm14 = vcmp.eq.f32.partialorder %v2935_v36, 8.507059e+37 }
 0x276   : > { %v2934_v20 = vsel %vm2933_vm13, %v4588_v22, %v2930_v3  ;;  %v2838_v16 = vsub.f32 1.0, %v2837_v41  ;;  %v2581_v0 = vmul.f32 1.442695, %v2528_v31  ;;  %v2845_v6 = vand.u32 2147483647, %v6494_v60 }
 0x277   : > { %3486 = vst.msk [vmem:[%s6051_s18 + $0x18] sm:$0xf] %vm3479_vm2, %v3453_v54  ;;  %v2939_v62 = vsel %vm2936_vm14, %v2938_v58, %v2934_v20  ;;  %v2847_v55 = vand.u32 2147483648, %v6494_v60  ;;  %vm3218_vm15 = vcmp.gt.f32.partialorder %v6366_v34, 20.0  ;;  %v6539_v56 = vadd.f32 2.0, %v2655_v24  ;;  %v2464_v58 = vpop.f32.mrf.mxu1 }
 0x278   : > { %v4594_v46 = vpop.eup %4593  ;;  %v2940_v47 = vmul.f32 %v2939_v62, %v2680_v43  ;;  %v2839_v32 = vmul.f32 %v4592_v11, %v2838_v16  ;;  %vm2842_vm3 = vweird.f32 %v4592_v11  ;;  %4595 = vpow2.f32 %v2581_v0 }
 0x279   : > { %v3357_v22 = vmul.f32 %v6467_v23, %v6467_v23  ;;  %v3351_v29 = vmul.f32 %v3249_v19, %v3249_v19  ;;  %vm2841_vm4 = vweird.f32 %v6494_v60  ;;  %4597 = vrcp.f32 %v6539_v56 }
 0x27a   : > { %v3256_v52 = vsel %vm3224_vm11, %v6354_v35, %v2940_v47  ;;  %v2840_v7 = vadd.f32 %v4592_v11, %v2839_v32  ;;  %v2629_v9 = vadd.f32 2.0, %v4594_v46  ;;  %v6549_v25 = vadd.f32 %v6435_v49, %v2462_v28  ;;  %vm2843_vm5 = vmor %vm2841_vm4, %vm2842_vm3 }
 0x27b   : > { %v3286_v61 = vsel %vm550_vm0, %v3249_v19, 0.0  ;;  %v3460_v48 = vpack.c.bf16 %v3256_v52, %v3256_v52  ;;  %v2674_v18 = vmul.f32 %v6486_v45, %v6366_v34  ;;  %v2848_v60 = vor.u32 1.1754944e-38, %v2847_v55 }
 0x27c   : > { %v2844_v26 = vsel %vm2843_vm5, %v4592_v11, %v2840_v7  ;;  %vm2846_vm6 = vcmp.eq.f32.partialorder %v2845_v6, 8.507059e+37  ;;  %v6554_v36 = vmul.f32 %v4594_v46, %v2629_v9  ;;  %v2521_v35 = vmin.f32 %v6549_v25, 20.0 }
 0x27d   : > { %v6559_v10 = vsel %vm550_vm0, %v6467_v23, 0.0  ;;  %v3388_v57 = vsel %vm550_vm0, %v3351_v29, 0.0  ;;  %3493 = vst.msk [vmem:[%s6051_s18 + $0x34] sm:$0xf] %vm3479_vm2, %v3460_v48  ;;  %v2849_v17 = vsel %vm2846_vm6, %v2848_v60, %v2844_v26  ;;  %v6565_v37 = vadd.f32 %v6435_v49, %v2494_v27 }
 0x27e   : > { %v4596_v45 = vpop.eup %4595  ;;  %v6568_v11 = vsel %vm550_vm0, %v3357_v22, 0.0  ;;  %v3287_v1 = vadd.f32 %v3286_v61, %v6313_v8  ;;  %v2850_v31 = vmul.f32 %v2849_v17, %v2674_v18  ;;  %v6572_v19 = vadd.f32 2.0, %v6554_v36 }
 0x27f   : > { %v4598_v23 = vpop.eup %4597  ;;  %v2687_v3 = vmul.f32 %v2655_v24, %v6438_v40  ;;  %v2624_v41 = vadd.f32 2.0, %v4596_v45  ;;  %v2567_v54 = vmul.f32 1.442695, %v2521_v35  ;;  %v2534_v43 = vmin.f32 %v6565_v37, 20.0 }
 0x280   : > { %v3389_v28 = vadd.f32 %v3388_v57, %v6328_v4  ;;  %v3250_v20 = vsel %vm3218_vm15, %v6366_v34, %v2850_v31  ;;  %v3032_v8 = vmul.f32 %v4598_v23, %v6539_v56  ;;  %4599 = vrcp.f32 %v6572_v19 }
 0x281   : > { %v3288_v16 = vsel %vm550_vm0, %v3250_v20, 0.0  ;;  %v3352_v0 = vmul.f32 %v3250_v20, %v3250_v20  ;;  %v3454_v24 = vpack.c.bf16 %v3250_v20, %v3250_v20  ;;  %v3040_v62 = vand.u32 2147483647, %v6539_v56 }
 0x282   : > { %v3289_v6 = vadd.f32 %v3288_v16, %v3287_v1  ;;  %v3033_v55 = vsub.f32 1.0, %v3032_v8  ;;  %v3042_v46 = vand.u32 2147483648, %v6539_v56  ;;  %v6586_v4 = vadd.f32 %v6435_v49, %v2464_v58 }
 0x283   : > { %v3390_v47 = vsel %vm550_vm0, %v3352_v0, 0.0  ;;  %3487 = vst.msk [vmem:[%s6051_s18 + $0x1c] sm:$0xf] %vm3479_vm2, %v3454_v24  ;;  %vm3231_vm7 = vcmp.gt.f32.partialorder %v6438_v40, 20.0  ;;  %v6592_v34 = vmul.f32 %v4596_v45, %v2624_v41  ;;  %4601 = vpow2.f32 %v2567_v54 }
 0x284   : > { %v2593_v32 = vmul.f32 1.442695, %v2534_v43  ;;  %v3291_v22 = vadd.f32 %v6336_v39, %v3289_v6  ;;  %v3391_v29 = vadd.f32 %v3390_v47, %v3389_v28  ;;  %v3034_v7 = vmul.f32 %v4598_v23, %v3033_v55  ;;  %v2497_v47 = vpop.f32.mrf.mxu3 }
 0x285   : > { %vm3037_vm8 = vweird.f32 %v4598_v23  ;;  %v3300_v9 = vsel %vm550_vm0, %v3256_v52, 0.0  ;;  %vm3036_vm9 = vweird.f32 %v6539_v56  ;;  %v6598_v27 = vadd.f32 2.0, %v6592_v34 }
 0x286   : > { %4603 = vpow2.f32 %v2593_v32  ;;  %v4600_v61 = vpop.eup %4599  ;;  %v3293_v48 = vadd.f32 %v6375_v21, %v3291_v22  ;;  %v3393_v18 = vadd.f32 %v6357_v38, %v3391_v29  ;;  %v3035_v60 = vadd.f32 %v4598_v23, %v3034_v7  ;;  %vm3038_vm10 = vmor %vm3036_vm9, %vm3037_vm8 }
 0x287   : > { %v2522_v26 = vmin.f32 %v6586_v4, 20.0  ;;  %v3358_v39 = vmul.f32 %v3256_v52, %v3256_v52  ;;  %v3043_v35 = vor.u32 1.1754944e-38, %v3042_v46  ;;  %v3122_v57 = vmul.f32 %v4600_v61, %v6572_v19 }
 0x288   : > { %4605 = vrcp.f32 %v6598_v27  ;;  %v3295_v56 = vadd.f32 %v6453_v12, %v3293_v48  ;;  %v3395_v17 = vadd.f32 %v6415_v51, %v3393_v18  ;;  %v3039_v45 = vsel %vm3038_vm10, %v4598_v23, %v3035_v60 }
 0x289   : > { %vm3041_vm11 = vcmp.eq.f32.partialorder %v3040_v62, 8.507059e+37  ;;  %v4602_v1 = vpop.eup %4601  ;;  %v3123_v31 = vsub.f32 1.0, %v3122_v57  ;;  %v3130_v38 = vand.u32 2147483647, %v6572_v19  ;;  %v2569_v41 = vmul.f32 1.442695, %v2522_v26 }
 0x28a   : > { %v3044_v21 = vsel %vm3041_vm11, %v3043_v35, %v3039_v45  ;;  %v3397_v52 = vadd.f32 %v6464_v42, %v3395_v17  ;;  %v3132_v43 = vand.u32 2147483648, %v6572_v19  ;;  %vm3237_vm12 = vcmp.gt.f32.partialorder %v6489_v44, 20.0 }
 0x28b   : > { %v3045_v54 = vmul.f32 %v3044_v21, %v2687_v3  ;;  %v2617_v58 = vadd.f32 2.0, %v4602_v1  ;;  %v3124_v12 = vmul.f32 %v4600_v61, %v3123_v31  ;;  %vm3127_vm13 = vweird.f32 %v4600_v61 }
 0x28c   : > { %v4604_v28 = vpop.eup %4603  ;;  %v3297_v51 = vadd.f32 %v6499_v53, %v3295_v56  ;;  %4607 = vpow2.f32 %v2569_v41  ;;  %v3402_v23 = vsel %vm550_vm0, %v3358_v39, 0.0  ;;  %v3399_v3 = vadd.f32 %v6502_v33, %v3397_v52 }
 0x28d   : > { %v6616_v20 = vsel %vm3231_vm7, %v6438_v40, %v3045_v54  ;;  %v6618_v42 = vmul.f32 %v4602_v1, %v2617_v58  ;;  %v2693_v53 = vmul.f32 %v6554_v36, %v6489_v44  ;;  %v3125_v0 = vadd.f32 %v4600_v61, %v3124_v12  ;;  %v2482_v36 = vpop.f32.mrf.mxu2 }
 0x28e   : > { %v4606_v8 = vpop.eup %4605  ;;  %v3467_v16 = vpack.c.bf16 %v6616_v20, %v6616_v20  ;;  %vm3126_vm14 = vweird.f32 %v6572_v19  ;;  %v3133_v24 = vor.u32 1.1754944e-38, %v3132_v43  ;;  %v2630_v6 = vadd.f32 2.0, %v4604_v28 }
 0x28f   : > { %vm3128_vm15 = vmor %vm3126_vm14, %vm3127_vm13  ;;  %v3047_v62 = vmul.f32 %v4606_v8, %v6598_v27  ;;  %v6628_v40 = vadd.f32 2.0, %v6618_v42  ;;  %vm3131_vm3 = vcmp.eq.f32.partialorder %v3130_v38, 8.507059e+37  ;;  %v3299_v55 = vadd.f32 %v6559_v10, %v3297_v51  ;;  %v2499_v51 = vpop.f32.mrf.mxu3 }
 0x290   : > { %3500 = vst.msk [vmem:[%s6051_s18 + $0x50] sm:$0xf] %vm3479_vm2, %v3467_v16  ;;  %v3129_v33 = vsel %vm3128_vm15, %v4600_v61, %v3125_v0  ;;  %v3401_v46 = vadd.f32 %v6568_v11, %v3399_v3  ;;  %v3055_v22 = vand.u32 2147483647, %v6598_v27  ;;  %vm3052_vm4 = vweird.f32 %v4606_v8 }
 0x291   : > { %v3134_v32 = vsel %vm3131_vm3, %v3133_v24, %v3129_v33  ;;  %v3048_v19 = vsub.f32 1.0, %v3047_v62  ;;  %4609 = vrcp.f32 %v6628_v40  ;;  %v3057_v48 = vand.u32 2147483648, %v6598_v27 }
 0x292   : > { %v4608_v29 = vpop.eup %4607  ;;  %v3135_v7 = vmul.f32 %v3134_v32, %v2693_v53  ;;  %v6637_v18 = vadd.f32 %v3300_v9, %v3299_v55  ;;  %v6639_v60 = vadd.f32 %v3402_v23, %v3401_v46  ;;  %v6641_v10 = vmul.f32 %v4604_v28, %v2630_v6 }
 0x293   : > { %v3049_v61 = vmul.f32 %v4606_v8, %v3048_v19  ;;  %v2618_v11 = vadd.f32 2.0, %v4608_v29  ;;  %v6645_v26 = vsel %vm550_vm0, %v6196_v13, 0.0  ;;  %v6649_v39 = vsel %vm550_vm0, %v6442_v5, 0.0 }
 0x294   : > { %v6653_v35 = vsel %vm550_vm0, %v6269_v63, 0.0  ;;  %v6658_v9 = vsel %vm3237_vm12, %v6489_v44, %v3135_v7  ;;  %v3369_v57 = vmul.f32 %v6369_v15, %v6369_v15  ;;  %vm3051_vm5 = vweird.f32 %v6598_v27 }
 0x295   : > { %v3473_v13 = vpack.c.bf16 %v6658_v9, %v6658_v9  ;;  %v3050_v56 = vadd.f32 %v4606_v8, %v3049_v61  ;;  %vm3053_vm6 = vmor %vm3051_vm5, %vm3052_vm4  ;;  %v3058_v5 = vor.u32 1.1754944e-38, %v3057_v48  ;;  %v6667_v63 = vadd.f32 2.0, %v6641_v10  ;;  %v2484_v12 = vpop.f32.mrf.mxu2 }
 0x296   : > { %v6669_v17 = vmul.f32 %v4608_v29, %v2618_v11  ;;  %v6672_v44 = vadd.f32 %v6435_v49, %v2482_v36  ;;  %v6676_v1 = vsel %vm550_vm0, %v6449_v14, 0.0  ;;  %v2688_v27 = vmul.f32 %v6592_v34, %v6518_v50 }
 0x297   : > { %v4610_v45 = vpop.eup %4609  ;;  %3506 = vst.msk [vmem:[%s6051_s18 + $0x68] sm:$0xf] %vm3479_vm2, %v3473_v13  ;;  %v3054_v21 = vsel %vm3053_vm6, %v4606_v8, %v3050_v56  ;;  %vm3056_vm7 = vcmp.eq.f32.partialorder %v3055_v22, 8.507059e+37  ;;  %v3363_v31 = vmul.f32 %v6401_v2, %v6401_v2  ;;  %4611 = vrcp.f32 %v6667_v63 }
 0x298   : > { %v3059_v38 = vsel %vm3056_vm7, %v3058_v5, %v3054_v21  ;;  %v2942_v41 = vmul.f32 %v4610_v45, %v6628_v40  ;;  %v6688_v52 = vsel %vm550_vm0, %v6369_v15, 0.0  ;;  %v6691_v14 = vsel %vm550_vm0, %v3369_v57, 0.0  ;;  %v2502_v21 = vpop.f32.mrf.mxu3 }
 0x299   : > { %v3060_v54 = vmul.f32 %v3059_v38, %v2688_v27  ;;  %vm3232_vm8 = vcmp.gt.f32.partialorder %v6518_v50, 20.0  ;;  %v6695_v43 = vadd.f32 2.0, %v6669_v17  ;;  %v2529_v58 = vmin.f32 %v6672_v44, 20.0 }
 0x29a   : > { %v2943_v34 = vsub.f32 1.0, %v2942_v41  ;;  %v6699_v28 = vadd.f32 %v6435_v49, %v2497_v47  ;;  %v6703_v15 = vsel %vm550_vm0, %v6401_v2, 0.0  ;;  %v2950_v3 = vand.u32 2147483647, %v6628_v40 }
 0x29b   : > { %v6706_v23 = vsel %vm3232_vm8, %v6518_v50, %v3060_v54  ;;  %v2952_v8 = vand.u32 2147483648, %v6628_v40  ;;  %v6711_v16 = vsel %vm550_vm0, %v3363_v31, 0.0  ;;  %vm2947_vm9 = vweird.f32 %v4610_v45 }
 0x29c   : > { %v3468_v53 = vpack.c.bf16 %v6706_v23, %v6706_v23  ;;  %v2944_v0 = vmul.f32 %v4610_v45, %v2943_v34  ;;  %v6717_v24 = vmul.f32 %v6425_v30, %v6425_v30  ;;  %v6721_v2 = vmul.f32 %v6515_v59, %v6515_v59 }
 0x29d   : > { %4613 = vrcp.f32 %v6695_v43  ;;  %v6725_v50 = vadd.f32 %v6435_v49, %v2484_v12  ;;  %v4612_v62 = vpop.eup %4611  ;;  %vm2946_vm10 = vweird.f32 %v6628_v40  ;;  %v2583_v33 = vmul.f32 1.442695, %v2529_v58 }
 0x29e   : > { %3501 = vst.msk [vmem:[%s6051_s18 + $0x54] sm:$0xf] %vm3479_vm2, %v3468_v53  ;;  %v2945_v6 = vadd.f32 %v4610_v45, %v2944_v0  ;;  %v2535_v55 = vmin.f32 %v6699_v28, 20.0  ;;  %v2681_v46 = vmul.f32 %v6618_v42, %v6549_v25  ;;  %vm2948_vm11 = vmor %vm2946_vm10, %vm2947_vm9  ;;  %vm2951_vm12 = vcmp.eq.f32.partialorder %v2950_v3, 8.507059e+37 }
 0x29f   : > { %v2953_v36 = vor.u32 1.1754944e-38, %v2952_v8  ;;  %v3137_v47 = vmul.f32 %v4612_v62, %v6667_v63  ;;  %v3145_v19 = vand.u32 2147483647, %v6667_v63  ;;  %4615 = vpow2.f32 %v2583_v33 }
 0x2a0   : > { %v2949_v32 = vsel %vm2948_vm11, %v4610_v45, %v2945_v6  ;;  %v2595_v22 = vmul.f32 1.442695, %v2535_v55  ;;  %v3147_v40 = vand.u32 2147483648, %v6667_v63  ;;  %v2530_v48 = vmin.f32 %v6725_v50, 20.0 }
 0x2a1   : > { %v2954_v29 = vsel %vm2951_vm12, %v2953_v36, %v2949_v32  ;;  %v3138_v7 = vsub.f32 1.0, %v3137_v47  ;;  %vm3225_vm13 = vcmp.gt.f32.partialorder %v6549_v25, 20.0  ;;  %v6739_v42 = vadd.f32 %v6435_v49, %v2499_v51 }
 0x2a2   : > { %v2955_v61 = vmul.f32 %v2954_v29, %v2681_v46  ;;  %4617 = vpow2.f32 %v2595_v22  ;;  %v2694_v57 = vmul.f32 %v6641_v10, %v6565_v37  ;;  %vm3142_vm14 = vweird.f32 %v4612_v62 }
 0x2a3   : > { %v4614_v11 = vpop.eup %4613  ;;  %v3139_v13 = vmul.f32 %v4612_v62, %v3138_v7  ;;  %v2585_v56 = vmul.f32 1.442695, %v2530_v48  ;;  %vm3141_vm15 = vweird.f32 %v6667_v63  ;;  %v2536_v27 = vmin.f32 %v6739_v42, 20.0 }
 0x2a4   : > { %v3257_v5 = vsel %vm3225_vm13, %v6549_v25, %v2955_v61  ;;  %v2957_v45 = vmul.f32 %v4614_v11, %v6695_v43  ;;  %vm3146_vm3 = vcmp.eq.f32.partialorder %v3145_v19, 8.507059e+37  ;;  %v3148_v41 = vor.u32 1.1754944e-38, %v3147_v40  ;;  %vm3143_vm4 = vmor %vm3141_vm15, %vm3142_vm14 }
 0x2a5   : > { %v3461_v31 = vpack.c.bf16 %v3257_v5, %v3257_v5  ;;  %v3140_v38 = vadd.f32 %v4612_v62, %v3139_v13  ;;  %v4616_v54 = vpop.eup %4615  ;;  %v2967_v34 = vand.u32 2147483648, %v6695_v43  ;;  %4619 = vpow2.f32 %v2585_v56 }
 0x2a6   : > { %v2958_v10 = vsub.f32 1.0, %v2957_v45  ;;  %v2597_v58 = vmul.f32 1.442695, %v2536_v27  ;;  %v2965_v63 = vand.u32 2147483647, %v6695_v43  ;;  %v2625_v12 = vadd.f32 2.0, %v4616_v54 }
 0x2a7   : > { %3494 = vst.msk [vmem:[%s6051_s18 + $0x38] sm:$0xf] %vm3479_vm2, %v3461_v31  ;;  %v3144_v25 = vsel %vm3143_vm4, %v4612_v62, %v3140_v38  ;;  %v6752_v51 = vadd.f32 %v6435_v49, %v2502_v21  ;;  %vm2962_vm5 = vweird.f32 %v4614_v11  ;;  %vm3238_vm6 = vcmp.gt.f32.partialorder %v6565_v37, 20.0  ;;  %v2504_v31 = vpop.f32.mrf.mxu3 }
 0x2a8   : > { %v4618_v3 = vpop.eup %4617  ;;  %v3149_v8 = vsel %vm3146_vm3, %v3148_v41, %v3144_v25  ;;  %v2959_v53 = vmul.f32 %v4614_v11, %v2958_v10  ;;  %4621 = vpow2.f32 %v2597_v58  ;;  %v2657_v6 = vmul.f32 %v4616_v54, %v2625_v12 }
 0x2a9   : > { %v3150_v0 = vmul.f32 %v3149_v8, %v2694_v57  ;;  %v2631_v33 = vadd.f32 2.0, %v4618_v3  ;;  %v2682_v55 = vmul.f32 %v6669_v17, %v6586_v4  ;;  %vm2961_vm7 = vweird.f32 %v6695_v43 }
 0x2aa   : > { %v2960_v62 = vadd.f32 %v4614_v11, %v2959_v53  ;;  %v2968_v46 = vor.u32 1.1754944e-38, %v2967_v34  ;;  %v3359_v36 = vmul.f32 %v3257_v5, %v3257_v5  ;;  %vm2963_vm8 = vmor %vm2961_vm7, %vm2962_vm5  ;;  %v6761_v32 = vadd.f32 2.0, %v2657_v6 }
 0x2ab   : > { %v6759_v47 = vsel %vm3238_vm6, %v6565_v37, %v3150_v0  ;;  %v6763_v19 = vmul.f32 %v4618_v3, %v2631_v33  ;;  %v4620_v22 = vpop.eup %4619  ;;  %vm2966_vm9 = vcmp.eq.f32.partialorder %v2965_v63, 8.507059e+37  ;;  %v2537_v17 = vmin.f32 %v6752_v51, 20.0 }
 0x2ac   : > { %v3474_v29 = vpack.c.bf16 %v6759_v47, %v6759_v47  ;;  %v2964_v7 = vsel %vm2963_vm8, %v4614_v11, %v2960_v62  ;;  %v3312_v43 = vsel %vm550_vm0, %v6515_v59, 0.0  ;;  %v3302_v37 = vsel %vm550_vm0, %v3257_v5, 0.0 }
 0x2ad   : > { %v2969_v40 = vsel %vm2966_vm9, %v2968_v46, %v2964_v7  ;;  %4623 = vrcp.f32 %v6761_v32  ;;  %v6774_v61 = vsel %vm550_vm0, %v6721_v2, 0.0  ;;  %v6778_v57 = vsel %vm550_vm0, %v6616_v20, 0.0 }
 0x2ae   : > { %v4622_v48 = vpop.eup %4621  ;;  %v3365_v11 = vmul.f32 %v6616_v20, %v6616_v20  ;;  %3507 = vst.msk [vmem:[%s6051_s18 + $0x6c] sm:$0xf] %vm3479_vm2, %v3474_v29  ;;  %v2970_v59 = vmul.f32 %v2969_v40, %v2682_v55  ;;  %v3404_v13 = vsel %vm550_vm0, %v3359_v36, 0.0  ;;  %vm3226_vm10 = vcmp.gt.f32.partialorder %v6586_v4, 20.0 }
 0x2af   : > { %v6787_v56 = vadd.f32 2.0, %v6763_v19  ;;  %v2626_v5 = vadd.f32 2.0, %v4620_v22  ;;  %v3303_v2 = vadd.f32 %v3302_v37, %v6637_v18  ;;  %v2632_v27 = vadd.f32 2.0, %v4622_v48 }
 0x2b0   : > { %v3258_v45 = vsel %vm3226_vm10, %v6586_v4, %v2970_v59  ;;  %v2599_v21 = vmul.f32 1.442695, %v2537_v17  ;;  %v6794_v54 = vsel %vm550_vm0, %v3365_v11, 0.0  ;;  %v6798_v10 = vmul.f32 %v6658_v9, %v6658_v9 }
 0x2b1   : > { %v3304_v20 = vsel %vm550_vm0, %v3258_v45, 0.0  ;;  %v3360_v38 = vmul.f32 %v3258_v45, %v3258_v45  ;;  %v3462_v41 = vpack.c.bf16 %v3258_v45, %v3258_v45  ;;  %4625 = vrcp.f32 %v6787_v56 }
 0x2b2   : > { %v3405_v18 = vadd.f32 %v3404_v13, %v6639_v60  ;;  %v3305_v34 = vadd.f32 %v3304_v20, %v3303_v2  ;;  %v6803_v58 = vsel %vm550_vm0, %v6706_v23, 0.0  ;;  %v2658_v63 = vmul.f32 %v4620_v22, %v2626_v5 }
 0x2b3   : > { %v4624_v4 = vpop.eup %4623  ;;  %v3406_v25 = vsel %vm550_vm0, %v3360_v38, 0.0  ;;  %3495 = vst.msk [vmem:[%s6051_s18 + $0x3c] sm:$0xf] %vm3479_vm2, %v3462_v41  ;;  %v6809_v12 = vadd.f32 %v6435_v49, %v2504_v31  ;;  %4627 = vpow2.f32 %v2599_v21  ;;  %v3070_v60 = vand.u32 2147483647, %v6761_v32 }
 0x2b4   : > { %v3307_v3 = vadd.f32 %v6645_v26, %v3305_v34  ;;  %v3407_v8 = vadd.f32 %v3406_v25, %v3405_v18  ;;  %v3062_v53 = vmul.f32 %v4624_v4, %v6761_v32  ;;  %v3072_v0 = vand.u32 2147483648, %v6761_v32 }
 0x2b5   : > { %v6815_v33 = vadd.f32 2.0, %v2658_v63  ;;  %v2664_v55 = vmul.f32 %v4622_v48, %v2632_v27  ;;  %v3366_v62 = vmul.f32 %v6706_v23, %v6706_v23  ;;  %v2689_v22 = vmul.f32 %v2657_v6, %v6672_v44 }
 0x2b6   : > { %v3309_v46 = vadd.f32 %v6653_v35, %v3307_v3  ;;  %v3409_v49 = vadd.f32 %v6649_v39, %v3407_v8  ;;  %v3063_v36 = vsub.f32 1.0, %v3062_v53  ;;  %vm3067_vm11 = vweird.f32 %v4624_v4 }
 0x2b7   : > { %v4626_v26 = vpop.eup %4625  ;;  %vm3233_vm12 = vcmp.gt.f32.partialorder %v6672_v44, 20.0  ;;  %4629 = vrcp.f32 %v6815_v33  ;;  %v2538_v29 = vmin.f32 %v6809_v12, 20.0  ;;  %vm3066_vm13 = vweird.f32 %v6761_v32 }
 0x2b8   : > { %v3311_v7 = vadd.f32 %v6703_v15, %v3309_v46  ;;  %v3411_v17 = vadd.f32 %v6676_v1, %v3409_v49  ;;  %v3064_v23 = vmul.f32 %v4624_v4, %v3063_v36  ;;  %v3152_v35 = vmul.f32 %v4626_v26, %v6787_v56  ;;  %vm3068_vm15 = vmor %vm3066_vm13, %vm3067_vm11 }
 0x2b9   : > { %vm6829_vm14 = vcmp.eq.f32.partialorder %v3070_v60, 8.507059e+37  ;;  %v3073_v6 = vor.u32 1.1754944e-38, %v3072_v0  ;;  %v6833_v37 = vadd.f32 2.0, %v2664_v55  ;;  %v4628_v40 = vpop.eup %4627  ;;  %v3160_v1 = vand.u32 2147483647, %v6787_v56 }
 0x2ba   : > { %v3413_v48 = vadd.f32 %v6711_v16, %v3411_v17  ;;  %v3065_v11 = vadd.f32 %v4624_v4, %v3064_v23  ;;  %v3313_v59 = vadd.f32 %v3312_v43, %v3311_v7  ;;  %v3153_v15 = vsub.f32 1.0, %v3152_v35 }
 0x2bb   : > { %v3162_v13 = vand.u32 2147483648, %v6787_v56  ;;  %4631 = vrcp.f32 %v6833_v37  ;;  %v2601_v32 = vmul.f32 1.442695, %v2538_v29  ;;  %vm3157_vm3 = vweird.f32 %v4626_v26 }
 0x2bc   : > { %v3069_v5 = vsel %vm3068_vm15, %v4624_v4, %v3065_v11  ;;  %v3415_v2 = vadd.f32 %v6774_v61, %v3413_v48  ;;  %v3154_v45 = vmul.f32 %v4626_v26, %v3153_v15  ;;  %v3418_v16 = vsel %vm550_vm0, %v3366_v62, 0.0 }
 0x2bd   : > { %v4630_v27 = vpop.eup %4629  ;;  %v3074_v43 = vsel %vm6829_vm14, %v3073_v6, %v3069_v5  ;;  %vm3239_vm4 = vcmp.gt.f32.partialorder %v6699_v28, 20.0  ;;  %v2633_v21 = vadd.f32 2.0, %v4628_v40  ;;  %v2695_v20 = vmul.f32 %v6763_v19, %v6699_v28 }
 0x2be   : > { %v3075_v31 = vmul.f32 %v3074_v43, %v2689_v22  ;;  %v3155_v38 = vadd.f32 %v4626_v26, %v3154_v45  ;;  %vm3156_vm5 = vweird.f32 %v6787_v56  ;;  %v3163_v61 = vor.u32 1.1754944e-38, %v3162_v13 }
 0x2bf   : > { %vm3158_vm6 = vmor %vm3156_vm5, %vm3157_vm3  ;;  %v3077_v41 = vmul.f32 %v4630_v27, %v6815_v33  ;;  %v6849_v18 = vmul.f32 %v4628_v40, %v2633_v21  ;;  %4633 = vpow2.f32 %v2601_v32  ;;  %vm3161_vm7 = vcmp.eq.f32.partialorder %v3160_v1, 8.507059e+37 }
 0x2c0   : > { %v3265_v34 = vsel %vm3233_vm12, %v6672_v44, %v3075_v31  ;;  %v3159_v4 = vsel %vm3158_vm6, %v4626_v26, %v3155_v38  ;;  %v2690_v25 = vmul.f32 %v2658_v63, %v6725_v50  ;;  %vm3081_vm8 = vweird.f32 %v6815_v33 }
 0x2c1   : > { %v4632_v19 = vpop.eup %4631  ;;  %v3469_v3 = vpack.c.bf16 %v3265_v34, %v3265_v34  ;;  %v3164_v8 = vsel %vm3161_vm7, %v3163_v61, %v3159_v4  ;;  %v2696_v56 = vmul.f32 %v2664_v55, %v6739_v42  ;;  %v3315_v53 = vadd.f32 %v6778_v57, %v3313_v59 }
 0x2c2   : > { %v3165_v60 = vmul.f32 %v3164_v8, %v2695_v20  ;;  %v3078_v0 = vsub.f32 1.0, %v3077_v41  ;;  %v3167_v62 = vmul.f32 %v4632_v19, %v6833_v37  ;;  %v3417_v46 = vadd.f32 %v6794_v54, %v3415_v2 }
 0x2c3   : > { %3502 = vst.msk [vmem:[%s6051_s18 + $0x58] sm:$0xf] %vm3479_vm2, %v3469_v3  ;;  %v3085_v44 = vand.u32 2147483647, %v6815_v33  ;;  %v3087_v63 = vand.u32 2147483648, %v6815_v33  ;;  %vm3234_vm9 = vcmp.gt.f32.partialorder %v6725_v50, 20.0  ;;  %vm3082_vm10 = vweird.f32 %v4630_v27 }
 0x2c4   : > { %v6866_v49 = vadd.f32 2.0, %v6849_v18  ;;  %v6871_v57 = vsel %vm3239_vm4, %v6699_v28, %v3165_v60  ;;  %v3079_v55 = vmul.f32 %v4630_v27, %v3078_v0  ;;  %v3168_v54 = vsub.f32 1.0, %v3167_v62  ;;  %vm3083_vm12 = vmor %vm3081_vm8, %vm3082_vm10 }
 0x2c5   : > { %v4634_v36 = vpop.eup %4633  ;;  %v3475_v26 = vpack.c.bf16 %v6871_v57, %v6871_v57  ;;  %v3175_v22 = vand.u32 2147483647, %v6833_v37  ;;  %v3177_v29 = vand.u32 2147483648, %v6833_v37  ;;  %v3317_v7 = vadd.f32 %v6803_v58, %v3315_v53 }
 0x2c6   : > { %4635 = vrcp.f32 %v6866_v49  ;;  %v3080_v17 = vadd.f32 %v4630_v27, %v3079_v55  ;;  %v3169_v23 = vmul.f32 %v4632_v19, %v3168_v54  ;;  %vm3172_vm11 = vweird.f32 %v4632_v19 }
 0x2c7   : > { %v3367_v28 = vmul.f32 %v3265_v34, %v3265_v34  ;;  %3508 = vst.msk [vmem:[%s6051_s18 + $0x70] sm:$0xf] %vm3479_vm2, %v3475_v26  ;;  %vm3086_vm13 = vcmp.eq.f32.partialorder %v3085_v44, 8.507059e+37  ;;  %v3088_v35 = vor.u32 1.1754944e-38, %v3087_v63  ;;  %v2634_v39 = vadd.f32 2.0, %v4634_v36 }
 0x2c8   : > { %v3419_v6 = vadd.f32 %v3418_v16, %v3417_v46  ;;  %v3084_v40 = vsel %vm3083_vm12, %v4630_v27, %v3080_v17  ;;  %v3170_v48 = vadd.f32 %v4632_v19, %v3169_v23  ;;  %vm3171_vm14 = vweird.f32 %v6833_v37 }
 0x2c9   : > { %v3318_v11 = vsel %vm550_vm0, %v3265_v34, 0.0  ;;  %v3089_v58 = vsel %vm3086_vm13, %v3088_v35, %v3084_v40  ;;  %vm3173_vm15 = vmor %vm3171_vm14, %vm3172_vm11  ;;  %v3178_v59 = vor.u32 1.1754944e-38, %v3177_v29  ;;  %v6885_v15 = vmul.f32 %v4634_v36, %v2634_v39 }
 0x2ca   : > { %v3319_v1 = vadd.f32 %v3318_v11, %v3317_v7  ;;  %v3090_v13 = vmul.f32 %v3089_v58, %v2690_v25  ;;  %v3174_v32 = vsel %vm3173_vm15, %v4632_v19, %v3170_v48  ;;  %vm3176_vm3 = vcmp.eq.f32.partialorder %v3175_v22, 8.507059e+37 }
 0x2cb   : > { %v3420_v5 = vsel %vm550_vm0, %v3367_v28, 0.0  ;;  %v3179_v2 = vsel %vm3176_vm3, %v3178_v59, %v3174_v32  ;;  %vm3240_vm4 = vcmp.gt.f32.partialorder %v6739_v42, 20.0  ;;  %v6890_v37 = vadd.f32 2.0, %v6885_v15 }
 0x2cc   : > { %v4636_v33 = vpop.eup %4635  ;;  %v3421_v45 = vadd.f32 %v3420_v5, %v3419_v6  ;;  %v3266_v27 = vsel %vm3234_vm9, %v6725_v50, %v3090_v13  ;;  %v3180_v16 = vmul.f32 %v3179_v2, %v2696_v56  ;;  %v3324_v38 = vsel %vm550_vm0, %v6425_v30, 0.0 }
 0x2cd   : > { %v3182_v43 = vmul.f32 %v4636_v33, %v6866_v49  ;;  %v3320_v21 = vsel %vm550_vm0, %v3266_v27, 0.0  ;;  %v3368_v31 = vmul.f32 %v3266_v27, %v3266_v27  ;;  %v3470_v20 = vpack.c.bf16 %v3266_v27, %v3266_v27 }
 0x2ce   : > { %4637 = vrcp.f32 %v6890_v37  ;;  %v3321_v61 = vadd.f32 %v3320_v21, %v3319_v1  ;;  %v3272_v41 = vsel %vm3240_vm4, %v6739_v42, %v3180_v16  ;;  %v3190_v25 = vand.u32 2147483647, %v6866_v49 }
 0x2cf   : > { %v3183_v34 = vsub.f32 1.0, %v3182_v43  ;;  %v3422_v4 = vsel %vm550_vm0, %v3368_v31, 0.0  ;;  %3503 = vst.msk [vmem:[%s6051_s18 + $0x5c] sm:$0xf] %vm3479_vm2, %v3470_v20  ;;  %v3476_v50 = vpack.c.bf16 %v3272_v41, %v3272_v41  ;;  %v3192_v19 = vand.u32 2147483648, %v6866_v49 }
 0x2d0   : > { %v3323_v3 = vadd.f32 %v6688_v52, %v3321_v61  ;;  %v3423_v8 = vadd.f32 %v3422_v4, %v3421_v45  ;;  %vm3187_vm5 = vweird.f32 %v4636_v33  ;;  %v3426_v30 = vsel %vm550_vm0, %v6717_v24, 0.0 }
 0x2d1   : > { %v3184_v56 = vmul.f32 %v4636_v33, %v3183_v34  ;;  %v3326_v42 = vsel %vm550_vm0, %v6658_v9, 0.0  ;;  %v3428_v53 = vsel %vm550_vm0, %v6798_v10, 0.0  ;;  %v3372_v60 = vmul.f32 %v6759_v47, %v6759_v47  ;;  %3509 = vst.msk [vmem:[%s6051_s18 + $0x74] sm:$0xf] %vm3479_vm2, %v3476_v50 }
 0x2d2   : > { %v3325_v0 = vadd.f32 %v3324_v38, %v3323_v3  ;;  %v3425_v52 = vadd.f32 %v6691_v14, %v3423_v8  ;;  %vm3186_vm6 = vweird.f32 %v6866_v49  ;;  %v2697_v24 = vmul.f32 %v6849_v18, %v6752_v51 }
 0x2d3   : > { %v3185_v62 = vadd.f32 %v4636_v33, %v3184_v56  ;;  %vm3188_vm7 = vmor %vm3186_vm6, %vm3187_vm5  ;;  %vm3191_vm8 = vcmp.eq.f32.partialorder %v3190_v25, 8.507059e+37  ;;  %v3193_v9 = vor.u32 1.1754944e-38, %v3192_v19  ;;  %vm3241_vm9 = vcmp.gt.f32.partialorder %v6752_v51, 20.0 }
 0x2d4   : > { %v4638_v46 = vpop.eup %4637  ;;  %v3427_v10 = vadd.f32 %v3426_v30, %v3425_v52  ;;  %v3327_v44 = vadd.f32 %v3326_v42, %v3325_v0  ;;  %v3328_v14 = vsel %vm550_vm0, %v6759_v47, 0.0  ;;  %v3430_v54 = vsel %vm550_vm0, %v3372_v60, 0.0 }
 0x2d5   : > { %v3189_v63 = vsel %vm3188_vm7, %v4636_v33, %v3185_v62  ;;  %v3197_v55 = vmul.f32 %v4638_v46, %v6890_v37  ;;  %v3373_v49 = vmul.f32 %v6871_v57, %v6871_v57  ;;  %v3330_v7 = vsel %vm550_vm0, %v6871_v57, 0.0 }
 0x2d6   : > { %v3194_v36 = vsel %vm3191_vm8, %v3193_v9, %v3189_v63  ;;  %v3329_v18 = vadd.f32 %v3328_v14, %v3327_v44  ;;  %v3429_v26 = vadd.f32 %v3428_v53, %v3427_v10  ;;  %vm3202_vm10 = vweird.f32 %v4638_v46 }
 0x2d7   : > { %v3195_v22 = vmul.f32 %v3194_v36, %v2697_v24  ;;  %v3198_v29 = vsub.f32 1.0, %v3197_v55  ;;  %v3205_v17 = vand.u32 2147483647, %v6890_v37  ;;  %v3207_v23 = vand.u32 2147483648, %v6890_v37 }
 0x2d8   : > { %v3331_v47 = vadd.f32 %v3330_v7, %v3329_v18  ;;  %v3431_v28 = vadd.f32 %v3430_v54, %v3429_v26  ;;  %v3432_v6 = vsel %vm550_vm0, %v3373_v49, 0.0  ;;  %v3374_v40 = vmul.f32 %v3272_v41, %v3272_v41 }
 0x2d9   : > { %v3273_v35 = vsel %vm3241_vm9, %v6752_v51, %v3195_v22  ;;  %v3199_v39 = vmul.f32 %v4638_v46, %v3198_v29  ;;  %vm3201_vm11 = vweird.f32 %v6890_v37  ;;  %v3332_v57 = vsel %vm550_vm0, %v3272_v41, 0.0 }
 0x2da   : > { %v3477_v48 = vpack.c.bf16 %v3273_v35, %v3273_v35  ;;  %v3433_v11 = vadd.f32 %v3432_v6, %v3431_v28  ;;  %v3375_v59 = vmul.f32 %v3273_v35, %v3273_v35  ;;  %vm3203_vm12 = vmor %vm3201_vm11, %vm3202_vm10  ;;  %v3208_v1 = vor.u32 1.1754944e-38, %v3207_v23 }
 0x2db   : > { %v3200_v58 = vadd.f32 %v4638_v46, %v3199_v39  ;;  %v3333_v13 = vadd.f32 %v3332_v57, %v3331_v47  ;;  %v2698_v51 = vmul.f32 %v6885_v15, %v6809_v12  ;;  %vm3206_vm13 = vcmp.eq.f32.partialorder %v3205_v17, 8.507059e+37 }
 0x2dc   : > { %3510 = vst.msk [vmem:[%s6051_s18 + $0x78] sm:$0xf] %vm3479_vm2, %v3477_v48  ;;  %v3434_v33 = vsel %vm550_vm0, %v3374_v40, 0.0  ;;  %v3334_v5 = vsel %vm550_vm0, %v3273_v35, 0.0  ;;  %v3436_v27 = vsel %vm550_vm0, %v3375_v59, 0.0  ;;  %vm3242_vm14 = vcmp.gt.f32.partialorder %v6809_v12, 20.0 }
 0x2dd   : > { %v3204_v32 = vsel %vm3203_vm12, %v4638_v46, %v3200_v58  ;;  %v3435_v37 = vadd.f32 %v3434_v33, %v3433_v11  ;;  %v3335_v16 = vadd.f32 %v3334_v5, %v3333_v13 }
 0x2de   : > { %v3209_v2 = vsel %vm3206_vm13, %v3208_v1, %v3204_v32 }
 0x2df   : > { %v3210_v45 = vmul.f32 %v3209_v2, %v2698_v51  ;;  %v3437_v20 = vadd.f32 %v3436_v27, %v3435_v37 }
 0x2e1   : > { %v3274_v43 = vsel %vm3242_vm14, %v6809_v12, %v3210_v45 }
 0x2e2   : > { %v3336_v15 = vsel %vm550_vm0, %v3274_v43, 0.0  ;;  %v3376_v21 = vmul.f32 %v3274_v43, %v3274_v43  ;;  %v3478_v31 = vpack.c.bf16 %v3274_v43, %v3274_v43 }
 0x2e3   : > { %v3337_v38 = vadd.f32 %v3336_v15, %v3335_v16 }
 0x2e4   : > { %v3438_v61 = vsel %vm550_vm0, %v3376_v21, 0.0  ;;  %3511 = vst.msk [vmem:[%s6051_s18 + $0x7c] sm:$0xf] %vm3479_vm2, %v3478_v31 }
 0x2e5   : > { %v3338_v41 = vrot.slane %v3337_v38, 4  ;;  %v3439_v34 = vadd.f32 %v3438_v61, %v3437_v20 }
 0x2e7   : > { %v3339_v4 = vadd.f32 %v3338_v41, %v3337_v38  ;;  %v3440_v50 = vrot.slane %v3439_v34, 4 }
 0x2e9   : > { %v3340_v25 = vrot.slane %v3339_v4, 2  ;;  %v3441_v19 = vadd.f32 %v3440_v50, %v3439_v34 }
 0x2eb   : > { %v3341_v3 = vadd.f32 %v3340_v25, %v3339_v4  ;;  %v3442_v8 = vrot.slane %v3441_v19, 2 }
 0x2ed   : > { %v3342_v12 = vrot.slane %v3341_v3, 1  ;;  %v3443_v56 = vadd.f32 %v3442_v8, %v3441_v19 }
 0x2ef   : > { %v3343_v30 = vadd.f32 %v3342_v12, %v3341_v3  ;;  %v3444_v42 = vrot.slane %v3443_v56, 1 }
 0x2f1   : > { %3344 = vst.msk [vmem:[%s488_s23] sm:$0x1] %vm493_vm1, %v3343_v30  ;;  %v3445_v53 = vadd.f32 %v3444_v42, %v3443_v56 }
 0x2f3   : > { %3446 = vst.msk [vmem:[%s488_s23 + $0x1] sm:$0x1] %vm493_vm1, %v3445_v53 }
 0x2f4 PF: > { %s19_s27 = sadd.s32 1, %s4662_s27   ;;  %s7025_s26 = smov %s4658_s2 }
 0x2f5   : > { %p16_p5 = scmp.ge.s32.totalorder %s19_s27, 4   ;;  %s7026_s2 = smov %s7028_s28 }
 0x2f7   :  { %18 = sbr.rel (!%p16_p5) target bundleno = 2 (0x2), region = 99 }

</bundles_post_ra>
